<compile_context>
chip_gen: v7x
topology: tpu7x:2x2x1
jax: 0.10.0
libtpu: 0.0.40
codegen_flags: <defaults>
</compile_context>

<pallas_src>
import functools

import jax
import jax.numpy as jnp
from jax.experimental import pallas as pl
from jax.experimental.pallas import tpu as pltpu

NGF = 64
C = NGF * 4          # 256
FLAT = C * 4 * 4     # 4096  (matches nn.Linear(4096, 3))
H = W = 16
HW = H * W           # 256


def _ftgan_atten_kernel(sf_ref, s1_ref, s2_ref, s3_ref,
                        w_ref, b_ref, noise_ref, out_ref):
    # --- Linear(4096, 3) on the K-mean, with the mean folded into the matmul:
    #     mean_k(sf_k) @ W^T == sf_flat(B, K*4096) @ tile(W^T / K, (K, 1))
    logits = jnp.dot(sf_ref[...].astype(jnp.float32), w_ref[...],
                     preferred_element_type=jnp.float32) + b_ref[...]   # (tb, 3)
    m = jnp.max(logits, axis=1, keepdims=True)
    e = jnp.exp(logits - m)
    weight = e / jnp.sum(e, axis=1, keepdims=True)                      # softmax(dim=1)

    # --- mean over K of the three pooled style vectors (tiny; f32 math) ---
    f1 = jnp.mean(s1_ref[...].astype(jnp.float32), axis=1)              # (tb, C)
    f2 = jnp.mean(s2_ref[...].astype(jnp.float32), axis=1)
    f3 = jnp.mean(s3_ref[...].astype(jnp.float32), axis=1)

    combined = (f1 * weight[:, 0:1]
                + f2 * weight[:, 1:2]
                + f3 * weight[:, 2:3])                                  # (tb, C)

    # --- NCHW-style broadcast over spatial + 0.02 * noise, lane dim = HW = 256 ---
    out_ref[...] = (combined[:, :, None]
                    + noise_ref[...].astype(jnp.float32) * 0.02).astype(out_ref.dtype)


@functools.partial(jax.jit, static_argnames=("B", "K"))
def ftgan_layer_atten(style_features, style_features_1, style_features_2,
                      style_features_3, fc_w, fc_b, noise_nchw, B, K):
    """style_features: (B*K, C, 4, 4); style_features_{1,2,3}: (B*K, C);
    fc_w: (3, 4096) torch convention; fc_b: (3,); noise_nchw: (B, C, 16, 16).
    Returns NCHW (B, C, 16, 16)."""
    # All reshapes below are free row-major reshapes (no transposes).
    sf = style_features.reshape(B, K * FLAT)
    s1 = style_features_1.reshape(B, K, C)
    s2 = style_features_2.reshape(B, K, C)
    s3 = style_features_3.reshape(B, K, C)
    # Tiny parameter prep: (3, 4096) -> (K*4096, 3) with the 1/K mean folded in.
    w_eff = jnp.tile(fc_w.T.astype(jnp.float32) / K, (K, 1))           # (K*FLAT, 3)
    b2 = fc_b.reshape(1, 3).astype(jnp.float32)
    noise = noise_nchw.reshape(B, C, HW)                               # NCHW-derived

    tb = min(B, 8)                         # batch tile; keeps VMEM per step small
    grid = (pl.cdiv(B, tb),)

    out = pl.pallas_call(
        _ftgan_atten_kernel,
        out_shape=jax.ShapeDtypeStruct((B, C, HW), noise.dtype),
        grid_spec=pltpu.PrefetchScalarGridSpec(
            num_scalar_prefetch=0,
            grid=grid,
            in_specs=[
                pl.BlockSpec((tb, K * FLAT), lambda i: (i, 0)),        # style slab
                pl.BlockSpec((tb, K, C), lambda i: (i, 0, 0)),         # s1
                pl.BlockSpec((tb, K, C), lambda i: (i, 0, 0)),         # s2
                pl.BlockSpec((tb, K, C), lambda i: (i, 0, 0)),         # s3
                pl.BlockSpec((K * FLAT, 3), lambda i: (0, 0)),         # fc weight (resident)
                pl.BlockSpec((1, 3), lambda i: (0, 0)),                # fc bias   (resident)
                pl.BlockSpec((tb, C, HW), lambda i: (i, 0, 0)),        # noise
            ],
            out_specs=pl.BlockSpec((tb, C, HW), lambda i: (i, 0, 0)),
        ),
        compiler_params=pltpu.CompilerParams(
            dimension_semantics=("parallel",)),
        input_output_aliases={6: 0},   # noise buffer reused as the output buffer
    )(sf, s1, s2, s3, w_eff, b2, noise)

    return out.reshape(B, C, H, W)     # free row-major reshape, no transpose


def _reference(style_features, s1, s2, s3, fc_w, fc_b, noise_nchw, B, K):
    sf = jnp.mean(style_features.reshape(B, K, C, 4, 4), axis=1).reshape(B, -1)
    logits = sf @ fc_w.T + fc_b
    weight = jax.nn.softmax(logits, axis=1)
    f1 = jnp.mean(s1.reshape(B, K, C), axis=1)
    f2 = jnp.mean(s2.reshape(B, K, C), axis=1)
    f3 = jnp.mean(s3.reshape(B, K, C), axis=1)
    comb = f1 * weight[:, 0:1] + f2 * weight[:, 1:2] + f3 * weight[:, 2:3]
    return comb.reshape(B, C, 1, 1) + noise_nchw * 0.02


if __name__ == "__main__":
    B, K = 2, 3
    key = jax.random.PRNGKey(0)
    k_sf, k1, k2, k3, kw, kb, kn = jax.random.split(key, 7)

    style_features = jax.random.normal(k_sf, (B * K, C, 4, 4), jnp.float32)
    style_features_1 = jax.random.normal(k1, (B * K, C), jnp.float32)
    style_features_2 = jax.random.normal(k2, (B * K, C), jnp.float32)
    style_features_3 = jax.random.normal(k3, (B * K, C), jnp.float32)

    # deterministic "fc" parameters (nn.Linear(4096, 3))
    fc_w = jax.random.normal(kw, (3, FLAT), jnp.float32) * (1.0 / jnp.sqrt(FLAT))
    fc_b = jax.random.normal(kb, (3,), jnp.float32) * 0.01

    noise_nchw = jax.random.normal(kn, (B, C, H, W), jnp.float32)

    out = ftgan_layer_atten(style_features, style_features_1, style_features_2,
                            style_features_3, fc_w, fc_b, noise_nchw, B, K)
    out = jax.block_until_ready(out)

    ref = _reference(style_features, style_features_1, style_features_2,
                     style_features_3, fc_w, fc_b, noise_nchw, B, K)
    assert out.shape == (B, C, H, W)
    assert jnp.allclose(out, ref, atol=1e-4, rtol=1e-4)
    print("KERNEL_OK")
</pallas_src>

<mosaic_0001>
module attributes {stable_mosaic.version = 11 : i64} {
  func.func @_ftgan_atten_kernel(%arg0: i32, %arg1: memref<2x12288xf32, #tpu.memory_space<vmem>>, %arg2: memref<2x3x256xf32, #tpu.memory_space<vmem>>, %arg3: memref<2x3x256xf32, #tpu.memory_space<vmem>>, %arg4: memref<2x3x256xf32, #tpu.memory_space<vmem>>, %arg5: memref<12288x3xf32, #tpu.memory_space<vmem>>, %arg6: memref<1x3xf32, #tpu.memory_space<vmem>>, %arg7: memref<2x256x256xf32, #tpu.memory_space<vmem>>, %arg8: memref<2x256x256xf32, #tpu.memory_space<vmem>>) attributes {dimension_semantics = [#tpu.dimension_semantics<parallel>], iteration_bounds = array<i64: 1>, scalar_prefetch = 0 : i64, scratch_operands = 0 : i64, tpu.core_type = #tpu.core_type<tc>, window_params = [{transform_indices = @transform_0, window_bounds = array<i64: 2, 12288>}, {transform_indices = @transform_1, window_bounds = array<i64: 2, 3, 256>}, {transform_indices = @transform_2, window_bounds = array<i64: 2, 3, 256>}, {transform_indices = @transform_3, window_bounds = array<i64: 2, 3, 256>}, {pipeline_mode = #tpu.pipeline_mode<synchronous>, transform_indices = @transform_4, window_bounds = array<i64: 12288, 3>}, {pipeline_mode = #tpu.pipeline_mode<synchronous>, transform_indices = @transform_5, window_bounds = array<i64: 1, 3>}, {transform_indices = @transform_6, window_bounds = array<i64: 2, 256, 256>}, {transform_indices = @transform_7, window_bounds = array<i64: 2, 256, 256>}]} {
    %c0 = arith.constant 0 : index
    %c0_0 = arith.constant 0 : index
    %0 = vector.load %arg1[%c0, %c0_0] : memref<2x12288xf32, #tpu.memory_space<vmem>>, vector<2x12288xf32>
    %c0_1 = arith.constant 0 : index
    %c0_2 = arith.constant 0 : index
    %1 = vector.load %arg5[%c0_1, %c0_2] : memref<12288x3xf32, #tpu.memory_space<vmem>>, vector<12288x3xf32>
    %cst = arith.constant dense<0.000000e+00> : vector<2x3xf32>
    %2 = tpu.matmul %0, %1, %cst {dimension_numbers = #tpu.dot_dimension_numbers<[1], [0], [0], [1], [0, 0, 1, 1], [], []>} : vector<2x12288xf32>, vector<12288x3xf32>, vector<2x3xf32> -> vector<2x3xf32>
    %c0_3 = arith.constant 0 : index
    %c0_4 = arith.constant 0 : index
    %3 = vector.load %arg6[%c0_3, %c0_4] : memref<1x3xf32, #tpu.memory_space<vmem>>, vector<1x3xf32>
    %4 = vector.broadcast %3 : vector<1x3xf32> to vector<2x3xf32>
    %5 = arith.addf %2, %4 : vector<2x3xf32>
    %cst_5 = arith.constant dense<0xFF800000> : vector<2xf32>
    %6 = vector.multi_reduction <maximumf>, %5, %cst_5 [1] : vector<2x3xf32> to vector<2xf32>
    %7 = vector.shape_cast %6 : vector<2xf32> to vector<2x1xf32>
    %8 = vector.broadcast %7 : vector<2x1xf32> to vector<2x3xf32>
    %9 = arith.subf %5, %8 : vector<2x3xf32>
    %10 = math.exp %9 : vector<2x3xf32>
    %cst_6 = arith.constant dense<0.000000e+00> : vector<2xf32>
    %11 = vector.multi_reduction <add>, %10, %cst_6 [1] : vector<2x3xf32> to vector<2xf32>
    %12 = vector.shape_cast %11 : vector<2xf32> to vector<2x1xf32>
    %13 = vector.broadcast %12 : vector<2x1xf32> to vector<2x3xf32>
    %14 = arith.divf %10, %13 : vector<2x3xf32>
    %c0_7 = arith.constant 0 : index
    %c0_8 = arith.constant 0 : index
    %c0_9 = arith.constant 0 : index
    %15 = vector.load %arg2[%c0_7, %c0_8, %c0_9] : memref<2x3x256xf32, #tpu.memory_space<vmem>>, vector<2x3x256xf32>
    %cst_10 = arith.constant dense<0.000000e+00> : vector<2x256xf32>
    %16 = vector.multi_reduction <add>, %15, %cst_10 [1] : vector<2x3x256xf32> to vector<2x256xf32>
    %cst_11 = arith.constant 3.000000e+00 : f32
    %17 = vector.broadcast %cst_11 : f32 to vector<2x256xf32>
    %18 = arith.divf %16, %17 : vector<2x256xf32>
    %c0_12 = arith.constant 0 : index
    %c0_13 = arith.constant 0 : index
    %c0_14 = arith.constant 0 : index
    %19 = vector.load %arg3[%c0_12, %c0_13, %c0_14] : memref<2x3x256xf32, #tpu.memory_space<vmem>>, vector<2x3x256xf32>
    %cst_15 = arith.constant dense<0.000000e+00> : vector<2x256xf32>
    %20 = vector.multi_reduction <add>, %19, %cst_15 [1] : vector<2x3x256xf32> to vector<2x256xf32>
    %cst_16 = arith.constant 3.000000e+00 : f32
    %21 = vector.broadcast %cst_16 : f32 to vector<2x256xf32>
    %22 = arith.divf %20, %21 : vector<2x256xf32>
    %c0_17 = arith.constant 0 : index
    %c0_18 = arith.constant 0 : index
    %c0_19 = arith.constant 0 : index
    %23 = vector.load %arg4[%c0_17, %c0_18, %c0_19] : memref<2x3x256xf32, #tpu.memory_space<vmem>>, vector<2x3x256xf32>
    %cst_20 = arith.constant dense<0.000000e+00> : vector<2x256xf32>
    %24 = vector.multi_reduction <add>, %23, %cst_20 [1] : vector<2x3x256xf32> to vector<2x256xf32>
    %cst_21 = arith.constant 3.000000e+00 : f32
    %25 = vector.broadcast %cst_21 : f32 to vector<2x256xf32>
    %26 = arith.divf %24, %25 : vector<2x256xf32>
    %27 = vector.extract_strided_slice %14 {offsets = [0, 0], sizes = [2, 1], strides = [1, 1]} : vector<2x3xf32> to vector<2x1xf32>
    %28 = vector.broadcast %27 : vector<2x1xf32> to vector<2x256xf32>
    %29 = arith.mulf %18, %28 : vector<2x256xf32>
    %30 = vector.extract_strided_slice %14 {offsets = [0, 1], sizes = [2, 1], strides = [1, 1]} : vector<2x3xf32> to vector<2x1xf32>
    %31 = vector.broadcast %30 : vector<2x1xf32> to vector<2x256xf32>
    %32 = arith.mulf %22, %31 : vector<2x256xf32>
    %33 = arith.addf %29, %32 : vector<2x256xf32>
    %34 = vector.extract_strided_slice %14 {offsets = [0, 2], sizes = [2, 1], strides = [1, 1]} : vector<2x3xf32> to vector<2x1xf32>
    %35 = vector.broadcast %34 : vector<2x1xf32> to vector<2x256xf32>
    %36 = arith.mulf %26, %35 : vector<2x256xf32>
    %37 = arith.addf %33, %36 : vector<2x256xf32>
    %38 = vector.shape_cast %37 : vector<2x256xf32> to vector<2x256x1xf32>
    %c0_22 = arith.constant 0 : index
    %c0_23 = arith.constant 0 : index
    %c0_24 = arith.constant 0 : index
    %39 = vector.load %arg7[%c0_22, %c0_23, %c0_24] : memref<2x256x256xf32, #tpu.memory_space<vmem>>, vector<2x256x256xf32>
    %cst_25 = arith.constant 2.000000e-02 : f32
    %40 = vector.broadcast %cst_25 : f32 to vector<2x256x256xf32>
    %41 = arith.mulf %39, %40 : vector<2x256x256xf32>
    %42 = vector.broadcast %38 : vector<2x256x1xf32> to vector<2x256x256xf32>
    %43 = arith.addf %42, %41 : vector<2x256x256xf32>
    %c0_26 = arith.constant 0 : index
    %c0_27 = arith.constant 0 : index
    %c0_28 = arith.constant 0 : index
    %44 = vector.load %arg8[%c0_26, %c0_27, %c0_28] : memref<2x256x256xf32, #tpu.memory_space<vmem>>, vector<2x256x256xf32>
    tpu.vector_store %arg8[%c0_26, %c0_27, %c0_28], %43 {strides = array<i32>} : memref<2x256x256xf32, #tpu.memory_space<vmem>>, vector<2x256x256xf32>,
    return
  }
  func.func @transform_0(%arg0: i32) -> (i32, i32) {
    %c0_i32 = arith.constant 0 : i32
    %c0_i32_0 = arith.constant 0 : i32
    return %arg0, %c0_i32 : i32, i32
  }
  func.func @transform_1(%arg0: i32) -> (i32, i32, i32) {
    %c0_i32 = arith.constant 0 : i32
    %c0_i32_0 = arith.constant 0 : i32
    %c0_i32_1 = arith.constant 0 : i32
    return %arg0, %c0_i32, %c0_i32_0 : i32, i32, i32
  }
  func.func @transform_2(%arg0: i32) -> (i32, i32, i32) {
    %c0_i32 = arith.constant 0 : i32
    %c0_i32_0 = arith.constant 0 : i32
    %c0_i32_1 = arith.constant 0 : i32
    return %arg0, %c0_i32, %c0_i32_0 : i32, i32, i32
  }
  func.func @transform_3(%arg0: i32) -> (i32, i32, i32) {
    %c0_i32 = arith.constant 0 : i32
    %c0_i32_0 = arith.constant 0 : i32
    %c0_i32_1 = arith.constant 0 : i32
    return %arg0, %c0_i32, %c0_i32_0 : i32, i32, i32
  }
  func.func @transform_4(%arg0: i32) -> (i32, i32) {
    %c0_i32 = arith.constant 0 : i32
    %c0_i32_0 = arith.constant 0 : i32
    %c0_i32_1 = arith.constant 0 : i32
    return %c0_i32, %c0_i32_0 : i32, i32
  }
  func.func @transform_5(%arg0: i32) -> (i32, i32) {
    %c0_i32 = arith.constant 0 : i32
    %c0_i32_0 = arith.constant 0 : i32
    %c0_i32_1 = arith.constant 0 : i32
    return %c0_i32, %c0_i32_0 : i32, i32
  }
  func.func @transform_6(%arg0: i32) -> (i32, i32, i32) {
    %c0_i32 = arith.constant 0 : i32
    %c0_i32_0 = arith.constant 0 : i32
    %c0_i32_1 = arith.constant 0 : i32
    return %arg0, %c0_i32, %c0_i32_0 : i32, i32, i32
  }
  func.func @transform_7(%arg0: i32) -> (i32, i32, i32) {
    %c0_i32 = arith.constant 0 : i32
    %c0_i32_0 = arith.constant 0 : i32
    %c0_i32_1 = arith.constant 0 : i32
    return %arg0, %c0_i32, %c0_i32_0 : i32, i32, i32
  }
}

</mosaic_0001>

<bundles_post_ra>
// kernel: ftgan_layer_atten.1
= control target key start
LH: loop header
LB: loop body
LE: loop exit
PB: predicated region body
PF: predicated region fallthrough
CT: control target
= control target key end

     0   :  { %v9696_v47 = vmov 1983009808   ;;  %v1621_v49 = vlaneseq  ;;  %vm5481_vm0 = vcmask 17408   ;;  %vm5501_vm1 = vcmask 1042432   ;;  %s15646_s4 = inlined_call_operand.vmem [shape: f32[12288,3], index: 4, kind: input, shape index: {}]   ;;  %s15647_s0 = inlined_call_operand.vmem [shape: f32[2,12288], index: 0, kind: input, shape index: {}]   ;;  %s15648_s5 = inlined_call_operand.vmem [shape: f32[1,3], index: 5, kind: input, shape index: {}]   ;;  %s15649_s1 = inlined_call_operand.vmem [shape: f32[2,3,256], index: 1, kind: input, shape index: {}]   ;;  %s15650_s2 = inlined_call_operand.vmem [shape: f32[2,3,256], index: 2, kind: input, shape index: {}]   ;;  %s15651_s3 = inlined_call_operand.vmem [shape: f32[2,3,256], index: 3, kind: input, shape index: {}]   ;;  %s15652_s6 = inlined_call_operand.vmem [shape: f32[2,256,256], index: 6, kind: input, shape index: {}, may-alias: {6,7}]   ;;  %s15653_s7 = inlined_call_operand.vmem [shape: f32[2,256,256], index: 7, kind: output, shape index: {}, may-alias: {6,7}]  }
   0x1   :  { %v66_v0 = vld [vmem:[%s15646_s4 + $0x80] sm:$0xff]  ;;  %v67_v1 = vld [vmem:[%s15646_s4 + $0x88] sm:$0xff]  ;;  %v68_v11 = vld [vmem:[%s15646_s4 + $0x90] sm:$0xff]  ;;  %v1619_v48 = vunpack.c.l.s4 %v9696_v47 }
   0x2   :  { %v50_v2 = vld [vmem:[%s15646_s4] sm:$0xff]  ;;  %v8119_v3 = vpack.c.bf16 %v67_v1, %v66_v0  ;;  %v51_v4 = vld [vmem:[%s15646_s4 + $0x8] sm:$0xff]  ;;  %v69_v13 = vld [vmem:[%s15646_s4 + $0x98] sm:$0xff]  ;;  %v9866_v0 = vshrl.u32 %v1621_v49, 7 }
   0x3   :  { %v98_v5 = vld [vmem:[%s15646_s4 + $0x180] sm:$0xff]  ;;  %v99_v6 = vld [vmem:[%s15646_s4 + $0x188] sm:$0xff]  ;;  %v8121_v7 = vpack.c.bf16 %v51_v4, %v50_v2  ;;  %v52_v14 = vld [vmem:[%s15646_s4 + $0x10] sm:$0xff]  ;;  %v8123_v16 = vpack.c.bf16 %v69_v13, %v68_v11  ;;  %v1620_v63 = vunpack.c.0.s8 %v1619_v48 }
   0x4   :  { %v8151_v8 = vpack.c.bf16 %v99_v6, %v98_v5  ;;  %v82_v9 = vld [vmem:[%s15646_s4 + $0x100] sm:$0xff]  ;;  %v83_v10 = vld [vmem:[%s15646_s4 + $0x108] sm:$0xff]  ;;  %8120 = vmatprep.subr.bf16.mxu0 %v8119_v3  ;;  %v53_v15 = vld [vmem:[%s15646_s4 + $0x18] sm:$0xff] }
   0x5   :  { %v8153_v12 = vpack.c.bf16 %v83_v10, %v82_v9  ;;  %8122 = vmatpush3.bf16.msra.mxu0 %v8121_v7  ;;  %v8125_v17 = vpack.c.bf16 %v53_v15, %v52_v14  ;;  %v100_v18 = vld [vmem:[%s15646_s4 + $0x190] sm:$0xff]  ;;  %v101_v19 = vld [vmem:[%s15646_s4 + $0x198] sm:$0xff]  ;;  %v70_v23 = vld [vmem:[%s15646_s4 + $0xa0] sm:$0xff]  ;;  %v9893_v13 = vsub.s32 %v1620_v63, %v9866_v0 }
   0x6   :  { %8152 = vmatprep.subr.bf16.mxu1 %v8151_v8  ;;  %v84_v20 = vld [vmem:[%s15646_s4 + $0x110] sm:$0xff]  ;;  %v8155_v21 = vpack.c.bf16 %v101_v19, %v100_v18  ;;  %v85_v22 = vld [vmem:[%s15646_s4 + $0x118] sm:$0xff]  ;;  %v71_v24 = vld [vmem:[%s15646_s4 + $0xa8] sm:$0xff]  ;;  %8124 = vmatprep.subr.bf16.mxu0 %v8123_v16 }
   0x7   :  { %8154 = vmatpush3.bf16.msra.mxu1 %v8153_v12  ;;  %v8157_v25 = vpack.c.bf16 %v85_v22, %v84_v20  ;;  %v8127_v26 = vpack.c.bf16 %v71_v24, %v70_v23  ;;  %v54_v27 = vld [vmem:[%s15646_s4 + $0x20] sm:$0xff]  ;;  %v55_v28 = vld [vmem:[%s15646_s4 + $0x28] sm:$0xff]  ;;  %v72_v35 = vld [vmem:[%s15646_s4 + $0xb0] sm:$0xff] }
   0x8   :  { %v102_v29 = vld [vmem:[%s15646_s4 + $0x1a0] sm:$0xff]  ;;  %8156 = vmatprep.subr.bf16.mxu1 %v8155_v21  ;;  %v103_v30 = vld [vmem:[%s15646_s4 + $0x1a8] sm:$0xff]  ;;  %v8129_v33 = vpack.c.bf16 %v55_v28, %v54_v27  ;;  %v73_v36 = vld [vmem:[%s15646_s4 + $0xb8] sm:$0xff] }
   0x9   :  { %v86_v31 = vld [vmem:[%s15646_s4 + $0x120] sm:$0xff]  ;;  %v87_v32 = vld [vmem:[%s15646_s4 + $0x128] sm:$0xff]  ;;  %8126 = vmatpush3.bf16.msra.mxu0 %v8125_v17  ;;  %v8159_v34 = vpack.c.bf16 %v103_v30, %v102_v29  ;;  %v56_v37 = vld [vmem:[%s15646_s4 + $0x30] sm:$0xff]  ;;  %v8131_v39 = vpack.c.bf16 %v73_v36, %v72_v35 }
   0xa   :  { %8128 = vmatprep.subr.bf16.mxu0 %v8127_v26  ;;  %v8161_v38 = vpack.c.bf16 %v87_v32, %v86_v31  ;;  %v57_v40 = vld [vmem:[%s15646_s4 + $0x38] sm:$0xff]  ;;  %v104_v41 = vld [vmem:[%s15646_s4 + $0x1b0] sm:$0xff]  ;;  %v74_v46 = vld [vmem:[%s15646_s4 + $0xc0] sm:$0xff] }
   0xb   :  { %8158 = vmatpush3.bf16.msra.mxu1 %v8157_v25  ;;  %v105_v42 = vld [vmem:[%s15646_s4 + $0x1b8] sm:$0xff]  ;;  %v88_v44 = vld [vmem:[%s15646_s4 + $0x130] sm:$0xff]  ;;  %v75_v50 = vld [vmem:[%s15646_s4 + $0xc8] sm:$0xff]  ;;  %v8133_v51 = vpack.c.bf16 %v57_v40, %v56_v37 }
   0xc   :  { %8160 = vmatprep.subr.bf16.mxu1 %v8159_v34  ;;  %v8163_v43 = vpack.c.bf16 %v105_v42, %v104_v41  ;;  %v89_v45 = vld [vmem:[%s15646_s4 + $0x138] sm:$0xff]  ;;  %v106_v52 = vld [vmem:[%s15646_s4 + $0x1c0] sm:$0xff]  ;;  %v107_v53 = vld [vmem:[%s15646_s4 + $0x1c8] sm:$0xff]  ;;  %v8135_v55 = vpack.c.bf16 %v75_v50, %v74_v46 }
   0xd   :  { %8130 = vmatpush3.bf16.msra.mxu0 %v8129_v33  ;;  %v8165_v54 = vpack.c.bf16 %v89_v45, %v88_v44  ;;  %v58_v56 = vld [vmem:[%s15646_s4 + $0x40] sm:$0xff]  ;;  %v59_v57 = vld [vmem:[%s15646_s4 + $0x48] sm:$0xff]  ;;  %v8167_v59 = vpack.c.bf16 %v107_v53, %v106_v52  ;;  %v76_v61 = vld [vmem:[%s15646_s4 + $0xd0] sm:$0xff] }
   0xe   :  { %8132 = vmatprep.subr.bf16.mxu0 %v8131_v39  ;;  %v90_v58 = vld [vmem:[%s15646_s4 + $0x140] sm:$0xff]  ;;  %v91_v60 = vld [vmem:[%s15646_s4 + $0x148] sm:$0xff]  ;;  %v77_v62 = vld [vmem:[%s15646_s4 + $0xd8] sm:$0xff]  ;;  %v8137_v3 = vpack.c.bf16 %v59_v57, %v58_v56 }
   0xf   :  { %8162 = vmatpush3.bf16.msra.mxu1 %v8161_v38  ;;  %v108_v1 = vld [vmem:[%s15646_s4 + $0x1d0] sm:$0xff]  ;;  %v109_v2 = vld [vmem:[%s15646_s4 + $0x1d8] sm:$0xff]  ;;  %v8169_v4 = vpack.c.bf16 %v91_v60, %v90_v58  ;;  %v8139_v5 = vpack.c.bf16 %v77_v62, %v76_v61  ;;  %v78_v11 = vld [vmem:[%s15646_s4 + $0xe0] sm:$0xff] }
  0x10   :  { %8164 = vmatprep.subr.bf16.mxu1 %v8163_v43  ;;  %v60_v6 = vld [vmem:[%s15646_s4 + $0x50] sm:$0xff]  ;;  %v61_v7 = vld [vmem:[%s15646_s4 + $0x58] sm:$0xff]  ;;  %v8171_v9 = vpack.c.bf16 %v109_v2, %v108_v1  ;;  %v79_v12 = vld [vmem:[%s15646_s4 + $0xe8] sm:$0xff] }
  0x11   :  { %8134 = vmatpush3.bf16.msra.mxu0 %v8133_v51  ;;  %v92_v8 = vld [vmem:[%s15646_s4 + $0x150] sm:$0xff]  ;;  %v93_v10 = vld [vmem:[%s15646_s4 + $0x158] sm:$0xff]  ;;  %v110_v14 = vld [vmem:[%s15646_s4 + $0x1e0] sm:$0xff]  ;;  %v8141_v16 = vpack.c.bf16 %v61_v7, %v60_v6  ;;  %v8143_v19 = vpack.c.bf16 %v79_v12, %v78_v11 }
  0x12   :  { %8136 = vmatprep.subr.bf16.mxu0 %v8135_v55  ;;  %v111_v15 = vld [vmem:[%s15646_s4 + $0x1e8] sm:$0xff]  ;;  %v62_v17 = vld [vmem:[%s15646_s4 + $0x60] sm:$0xff]  ;;  %v8173_v18 = vpack.c.bf16 %v93_v10, %v92_v8  ;;  %v80_v25 = vld [vmem:[%s15646_s4 + $0xf0] sm:$0xff] }
  0x13   :  { %8166 = vmatpush3.bf16.msra.mxu1 %v8165_v54  ;;  %v63_v20 = vld [vmem:[%s15646_s4 + $0x68] sm:$0xff]  ;;  %v94_v21 = vld [vmem:[%s15646_s4 + $0x160] sm:$0xff]  ;;  %v8175_v23 = vpack.c.bf16 %v111_v15, %v110_v14  ;;  %v81_v26 = vld [vmem:[%s15646_s4 + $0xf8] sm:$0xff] }
  0x14   :  { %8168 = vmatprep.subr.bf16.mxu1 %v8167_v59  ;;  %v26_v22 = vld [vmem:[%s15647_s0] sm:$0xff]  ;;  %v95_v24 = vld [vmem:[%s15646_s4 + $0x168] sm:$0xff]  ;;  %v112_v29 = vld [vmem:[%s15646_s4 + $0x1f0] sm:$0xff]  ;;  %v8145_v31 = vpack.c.bf16 %v63_v20, %v62_v17  ;;  %v8147_v35 = vpack.c.bf16 %v81_v26, %v80_v25 }
  0x15   :  { %8138 = vmatpush3.bf16.msra.mxu0 %v8137_v3  ;;  %v1624_v27 = vrot.slane %v26_v22, %v9893_v13  ;;  %v1617_v28 = vcombine.high %v26_v22, %v26_v22  ;;  %v113_v30 = vld [vmem:[%s15646_s4 + $0x1f8] sm:$0xff]  ;;  %v8177_v34 = vpack.c.bf16 %v95_v24, %v94_v21  ;;  %v64_v36 = vld [vmem:[%s15646_s4 + $0x70] sm:$0xff]  ;;  %v130_v41 = vld [vmem:[%s15646_s4 + $0x280] sm:$0xff] }
  0x16   :  { %8140 = vmatprep.subr.bf16.mxu0 %v8139_v5  ;;  %v65_v37 = vld [vmem:[%s15646_s4 + $0x78] sm:$0xff]  ;;  %v96_v38 = vld [vmem:[%s15646_s4 + $0x170] sm:$0xff]  ;;  %v8179_v39 = vpack.c.bf16 %v113_v30, %v112_v29  ;;  %v131_v42 = vld [vmem:[%s15646_s4 + $0x288] sm:$0xff] }
  0x17   :  { %8170 = vmatpush3.bf16.msra.mxu1 %v8169_v4  ;;  %v1632_v32 = vcombine.high %v1624_v27, %v1624_v27  ;;  %v1631_v33 = vrot.slane %v1617_v28, %v9893_v13  ;;  %v97_v40 = vld [vmem:[%s15646_s4 + $0x178] sm:$0xff]  ;;  %v162_v44 = vld [vmem:[%s15646_s4 + $0x380] sm:$0xff]  ;;  %v163_v45 = vld [vmem:[%s15646_s4 + $0x388] sm:$0xff]  ;;  %v8149_v46 = vpack.c.bf16 %v65_v37, %v64_v36  ;;  %v8183_v48 = vpack.c.bf16 %v131_v42, %v130_v41 }
  0x18   :  { %8172 = vmatprep.subr.bf16.mxu1 %v8171_v9  ;;  %v8181_v47 = vpack.c.bf16 %v97_v40, %v96_v38  ;;  %v114_v49 = vld [vmem:[%s15646_s4 + $0x200] sm:$0xff]  ;;  %v115_v50 = vld [vmem:[%s15646_s4 + $0x208] sm:$0xff]  ;;  %v8215_v52 = vpack.c.bf16 %v163_v45, %v162_v44  ;;  %v132_v54 = vld [vmem:[%s15646_s4 + $0x290] sm:$0xff] }
  0x19   :  { %8142 = vmatpush3.bf16.msra.mxu0 %v8141_v16  ;;  %2185 = vmatprep.mubr.f32.mxu0 %v1632_v32  ;;  %v1633_v43 = vcombine.high %v1631_v33, %v1631_v33  ;;  %v146_v51 = vld [vmem:[%s15646_s4 + $0x300] sm:$0xff]  ;;  %v147_v53 = vld [vmem:[%s15646_s4 + $0x308] sm:$0xff]  ;;  %v133_v55 = vld [vmem:[%s15646_s4 + $0x298] sm:$0xff]  ;;  %v8185_v58 = vpack.c.bf16 %v115_v50, %v114_v49 }
  0x1a   :  { %8144 = vmatprep.subr.bf16.mxu0 %v8143_v19  ;;  %v164_v56 = vld [vmem:[%s15646_s4 + $0x390] sm:$0xff]  ;;  %v165_v57 = vld [vmem:[%s15646_s4 + $0x398] sm:$0xff]  ;;  %v8217_v59 = vpack.c.bf16 %v147_v53, %v146_v51  ;;  %v8187_v60 = vpack.c.bf16 %v133_v55, %v132_v54  ;;  %v134_v3 = vld [vmem:[%s15646_s4 + $0x2a0] sm:$0xff] }
  0x1b   :  { %8174 = vmatpush3.bf16.msra.mxu1 %v8173_v18  ;;  %2255 = vmatprep.mubr.f32.mxu1 %v1633_v43  ;;  %v116_v61 = vld [vmem:[%s15646_s4 + $0x210] sm:$0xff]  ;;  %v117_v62 = vld [vmem:[%s15646_s4 + $0x218] sm:$0xff]  ;;  %v8219_v1 = vpack.c.bf16 %v165_v57, %v164_v56  ;;  %v135_v4 = vld [vmem:[%s15646_s4 + $0x2a8] sm:$0xff] }
  0x1c   :  { %8176 = vmatprep.subr.bf16.mxu1 %v8175_v23  ;;  %v148_v63 = vld [vmem:[%s15646_s4 + $0x310] sm:$0xff]  ;;  %v149_v2 = vld [vmem:[%s15646_s4 + $0x318] sm:$0xff]  ;;  %v166_v5 = vld [vmem:[%s15646_s4 + $0x3a0] sm:$0xff]  ;;  %v8189_v7 = vpack.c.bf16 %v117_v62, %v116_v61  ;;  %v8191_v9 = vpack.c.bf16 %v135_v4, %v134_v3 }
  0x1d   :  { %8146 = vmatpush3.bf16.msra.mxu0 %v8145_v31  ;;  %v167_v6 = vld [vmem:[%s15646_s4 + $0x3a8] sm:$0xff]  ;;  %v8221_v8 = vpack.c.bf16 %v149_v2, %v148_v63  ;;  %v118_v10 = vld [vmem:[%s15646_s4 + $0x220] sm:$0xff]  ;;  %v136_v16 = vld [vmem:[%s15646_s4 + $0x2b0] sm:$0xff] }
  0x1e   :  { %8148 = vmatprep.subr.bf16.mxu0 %v8147_v35  ;;  %v119_v11 = vld [vmem:[%s15646_s4 + $0x228] sm:$0xff]  ;;  %v150_v12 = vld [vmem:[%s15646_s4 + $0x320] sm:$0xff]  ;;  %v8223_v14 = vpack.c.bf16 %v167_v6, %v166_v5  ;;  %v137_v17 = vld [vmem:[%s15646_s4 + $0x2b8] sm:$0xff] }
  0x1f   :  { %8178 = vmatpush3.bf16.msra.mxu1 %v8177_v34  ;;  %v151_v15 = vld [vmem:[%s15646_s4 + $0x328] sm:$0xff]  ;;  %v168_v18 = vld [vmem:[%s15646_s4 + $0x3b0] sm:$0xff]  ;;  %v169_v19 = vld [vmem:[%s15646_s4 + $0x3b8] sm:$0xff]  ;;  %v8193_v20 = vpack.c.bf16 %v119_v11, %v118_v10  ;;  %v8195_v22 = vpack.c.bf16 %v137_v17, %v136_v16 }
  0x20   :  { %8180 = vmatprep.subr.bf16.mxu1 %v8179_v39  ;;  %v8225_v21 = vpack.c.bf16 %v151_v15, %v150_v12  ;;  %v120_v23 = vld [vmem:[%s15646_s4 + $0x230] sm:$0xff]  ;;  %v121_v24 = vld [vmem:[%s15646_s4 + $0x238] sm:$0xff]  ;;  %v8227_v26 = vpack.c.bf16 %v169_v19, %v168_v18  ;;  %v138_v28 = vld [vmem:[%s15646_s4 + $0x2c0] sm:$0xff] }
  0x21   :  { %8150 = vmatpush3.bf16.msra.mxu0 %v8149_v46  ;;  %v152_v25 = vld [vmem:[%s15646_s4 + $0x330] sm:$0xff]  ;;  %v139_v29 = vld [vmem:[%s15646_s4 + $0x2c8] sm:$0xff]  ;;  %v170_v30 = vld [vmem:[%s15646_s4 + $0x3c0] sm:$0xff] }
  0x22   :  { %8184 = vmatprep.subr.bf16.mxu0 %v8183_v48  ;;  %v171_v31 = vld [vmem:[%s15646_s4 + $0x3c8] sm:$0xff]  ;;  %v8199_v37 = vpack.c.bf16 %v139_v29, %v138_v28  ;;  %v122_v38 = vld [vmem:[%s15646_s4 + $0x240] sm:$0xff]  ;;  %v140_v43 = vld [vmem:[%s15646_s4 + $0x2d0] sm:$0xff] }
  0x23   :  { %8182 = vmatpush3.bf16.msra.mxu1 %v8181_v47  ;;  %v27_v32 = vld [vmem:[%s15647_s0 + $0x8] sm:$0xff]  ;;  %v154_v40 = vld [vmem:[%s15646_s4 + $0x340] sm:$0xff]  ;;  %v8231_v41 = vpack.c.bf16 %v171_v31, %v170_v30  ;;  %v141_v44 = vld [vmem:[%s15646_s4 + $0x2d8] sm:$0xff] }
  0x24   :  { %8216 = vmatprep.subr.bf16.mxu1 %v8215_v52  ;;  %2186 = vmatmul.mubr.f32.vlgmr.msra.gmra.mrb[0].mxu0 %v1624_v27  ;;  %v153_v27 = vld [vmem:[%s15646_s4 + $0x338] sm:$0xff]  ;;  %v10054_v34 = vrot.slane %v27_v32, %v9893_v13  ;;  %v1634_v35 = vcombine.high %v27_v32, %v27_v32  ;;  %v123_v39 = vld [vmem:[%s15646_s4 + $0x248] sm:$0xff]  ;;  %v172_v47 = vld [vmem:[%s15646_s4 + $0x3d0] sm:$0xff]  ;;  %v8203_v52 = vpack.c.bf16 %v141_v44, %v140_v43 }
  0x25   :  { %8186 = vmatpush3.bf16.msra.mxu0 %v8185_v58  ;;  %v8229_v36 = vpack.c.bf16 %v153_v27, %v152_v25  ;;  %v155_v42 = vld [vmem:[%s15646_s4 + $0x348] sm:$0xff]  ;;  %v173_v48 = vld [vmem:[%s15646_s4 + $0x3d8] sm:$0xff]  ;;  %v8201_v49 = vpack.c.bf16 %v123_v39, %v122_v38  ;;  %v124_v53 = vld [vmem:[%s15646_s4 + $0x250] sm:$0xff] }
  0x26   :  { %2256 = vmatmul.mubr.f32.vlgmr.msra.gmra.mrb[0].mxu1 %v1631_v33  ;;  %8188 = vmatprep.subr.bf16.mxu0 %v8187_v60  ;;  %v8197_v33 = vpack.c.bf16 %v121_v24, %v120_v23  ;;  %v1649_v45 = vcombine.high %v10054_v34, %v10054_v34  ;;  %v10077_v46 = vrot.slane %v1634_v35, %v9893_v13  ;;  %v125_v54 = vld [vmem:[%s15646_s4 + $0x258] sm:$0xff]  ;;  %v156_v55 = vld [vmem:[%s15646_s4 + $0x350] sm:$0xff]  ;;  %v142_v58 = vld [vmem:[%s15646_s4 + $0x2e0] sm:$0xff] }
  0x27   :  { %8218 = vmatpush3.bf16.msra.mxu1 %v8217_v59  ;;  %v8233_v51 = vpack.c.bf16 %v155_v42, %v154_v40  ;;  %v8235_v56 = vpack.c.bf16 %v173_v48, %v172_v47  ;;  %v157_v57 = vld [vmem:[%s15646_s4 + $0x358] sm:$0xff]  ;;  %v143_v59 = vld [vmem:[%s15646_s4 + $0x2e8] sm:$0xff]  ;;  %v174_v60 = vld [vmem:[%s15646_s4 + $0x3e0] sm:$0xff]  ;;  %v8205_v62 = vpack.c.bf16 %v125_v54, %v124_v53 }
  0x28   :  { %8220 = vmatprep.subr.bf16.mxu1 %v8219_v1  ;;  %2325 = vmatprep.mubr.f32.mxu0 %v1649_v45  ;;  %v1650_v50 = vcombine.high %v10077_v46, %v10077_v46  ;;  %v175_v61 = vld [vmem:[%s15646_s4 + $0x3e8] sm:$0xff]  ;;  %v8237_v63 = vpack.c.bf16 %v157_v57, %v156_v55  ;;  %v8207_v1 = vpack.c.bf16 %v143_v59, %v142_v58  ;;  %v126_v2 = vld [vmem:[%s15646_s4 + $0x260] sm:$0xff]  ;;  %v177_v10 = vld [vmem:[%s15646_s4 + $0x3f8] sm:$0xff] }
  0x29   :  { %8190 = vmatpush3.bf16.msra.mxu0 %v8189_v7  ;;  %v127_v3 = vld [vmem:[%s15646_s4 + $0x268] sm:$0xff]  ;;  %v158_v4 = vld [vmem:[%s15646_s4 + $0x360] sm:$0xff]  ;;  %v8239_v5 = vpack.c.bf16 %v175_v61, %v174_v60  ;;  %v144_v7 = vld [vmem:[%s15646_s4 + $0x2f0] sm:$0xff] }
  0x2a   :  { %8192 = vmatprep.subr.bf16.mxu0 %v8191_v9  ;;  %2395 = vmatprep.mubr.f32.mxu1 %v1650_v50  ;;  %v159_v6 = vld [vmem:[%s15646_s4 + $0x368] sm:$0xff]  ;;  %v176_v9 = vld [vmem:[%s15646_s4 + $0x3f0] sm:$0xff]  ;;  %v8209_v11 = vpack.c.bf16 %v127_v3, %v126_v2  ;;  %v129_v16 = vld [vmem:[%s15646_s4 + $0x278] sm:$0xff] }
  0x2b   :  { %8222 = vmatpush3.bf16.msra.mxu1 %v8221_v8  ;;  %v145_v8 = vld [vmem:[%s15646_s4 + $0x2f8] sm:$0xff]  ;;  %v8241_v12 = vpack.c.bf16 %v159_v6, %v158_v4  ;;  %v128_v15 = vld [vmem:[%s15646_s4 + $0x270] sm:$0xff]  ;;  %v8243_v18 = vpack.c.bf16 %v177_v10, %v176_v9  ;;  %v227_v23 = vld [vmem:[%s15646_s4 + $0x588] sm:$0xff] }
  0x2c   :  { %8224 = vmatprep.subr.bf16.mxu1 %v8223_v14  ;;  %v8211_v14 = vpack.c.bf16 %v145_v8, %v144_v7  ;;  %v160_v17 = vld [vmem:[%s15646_s4 + $0x370] sm:$0xff]  ;;  %v161_v19 = vld [vmem:[%s15646_s4 + $0x378] sm:$0xff]  ;;  %v8213_v24 = vpack.c.bf16 %v129_v16, %v128_v15  ;;  %v178_v25 = vld [vmem:[%s15646_s4 + $0x400] sm:$0xff] }
  0x2d   :  { %8194 = vmatpush3.bf16.msra.mxu0 %v8193_v20  ;;  %v194_v20 = vld [vmem:[%s15646_s4 + $0x480] sm:$0xff]  ;;  %v179_v28 = vld [vmem:[%s15646_s4 + $0x408] sm:$0xff]  ;;  %v196_v32 = vld [vmem:[%s15646_s4 + $0x490] sm:$0xff] }
  0x2e   :  { %8196 = vmatprep.subr.bf16.mxu0 %v8195_v22  ;;  %v226_v22 = vld [vmem:[%s15646_s4 + $0x580] sm:$0xff]  ;;  %v211_v30 = vld [vmem:[%s15646_s4 + $0x508] sm:$0xff]  ;;  %v228_v35 = vld [vmem:[%s15646_s4 + $0x590] sm:$0xff] }
  0x2f   :  { %8226 = vmatpush3.bf16.msra.mxu1 %v8225_v21  ;;  %v195_v21 = vld [vmem:[%s15646_s4 + $0x488] sm:$0xff]  ;;  %v210_v29 = vld [vmem:[%s15646_s4 + $0x500] sm:$0xff]  ;;  %v8279_v31 = vpack.c.bf16 %v227_v23, %v226_v22  ;;  %v28_v39 = vld [vmem:[%s15647_s0 + $0x10] sm:$0xff] }
  0x30   :  { %8228 = vmatprep.subr.bf16.mxu1 %v8227_v26  ;;  %v8245_v26 = vpack.c.bf16 %v161_v19, %v160_v17  ;;  %v8247_v27 = vpack.c.bf16 %v195_v21, %v194_v20  ;;  %v8281_v38 = vpack.c.bf16 %v211_v30, %v210_v29  ;;  %v181_v42 = vld [vmem:[%s15646_s4 + $0x418] sm:$0xff]  ;;  %v212_v43 = vld [vmem:[%s15646_s4 + $0x510] sm:$0xff]  ;;  %v10196_v44 = vrot.slane %v28_v39, %v9893_v13  ;;  %v199_v50 = vld [vmem:[%s15646_s4 + $0x4a8] sm:$0xff] }
  0x31   :  { %8198 = vmatpush3.bf16.msra.mxu0 %v8197_v33  ;;  %v197_v33 = vld [vmem:[%s15646_s4 + $0x498] sm:$0xff]  ;;  %v1651_v45 = vcombine.high %v28_v39, %v28_v39  ;;  %v182_v57 = vld [vmem:[%s15646_s4 + $0x420] sm:$0xff]  ;;  %v183_v58 = vld [vmem:[%s15646_s4 + $0x428] sm:$0xff] }
  0x32   :  { %8200 = vmatprep.subr.bf16.mxu0 %v8199_v37  ;;  %v8249_v37 = vpack.c.bf16 %v179_v28, %v178_v25  ;;  %v8251_v40 = vpack.c.bf16 %v197_v33, %v196_v32  ;;  %v213_v48 = vld [vmem:[%s15646_s4 + $0x518] sm:$0xff]  ;;  %v1666_v53 = vcombine.high %v10196_v44, %v10196_v44  ;;  %v214_v59 = vld [vmem:[%s15646_s4 + $0x520] sm:$0xff]  ;;  %v215_v61 = vld [vmem:[%s15646_s4 + $0x528] sm:$0xff]  ;;  %v8257_v3 = vpack.c.bf16 %v183_v58, %v182_v57 }
  0x33   :  { %8230 = vmatpush3.bf16.msra.mxu1 %v8229_v36  ;;  %v229_v36 = vld [vmem:[%s15646_s4 + $0x598] sm:$0xff]  ;;  %v10217_v54 = vrot.slane %v1651_v45, %v9893_v13  ;;  %v8289_v4 = vpack.c.bf16 %v215_v61, %v214_v59  ;;  %v184_v6 = vld [vmem:[%s15646_s4 + $0x430] sm:$0xff]  ;;  %v235_v15 = vld [vmem:[%s15646_s4 + $0x5c8] sm:$0xff] }
  0x34   :  { %8232 = vmatprep.subr.bf16.mxu1 %v8231_v41  ;;  %v180_v41 = vld [vmem:[%s15646_s4 + $0x410] sm:$0xff]  ;;  %v8283_v47 = vpack.c.bf16 %v229_v36, %v228_v35  ;;  %v233_v2 = vld [vmem:[%s15646_s4 + $0x5b8] sm:$0xff]  ;;  %v186_v19 = vld [vmem:[%s15646_s4 + $0x440] sm:$0xff] }
  0x35   :  { %8202 = vmatpush3.bf16.msra.mxu0 %v8201_v49  ;;  %v198_v49 = vld [vmem:[%s15646_s4 + $0x4a0] sm:$0xff]  ;;  %v8253_v55 = vpack.c.bf16 %v181_v42, %v180_v41  ;;  %v185_v7 = vld [vmem:[%s15646_s4 + $0x438] sm:$0xff]  ;;  %v216_v8 = vld [vmem:[%s15646_s4 + $0x530] sm:$0xff] }
  0x36   :  { %8204 = vmatprep.subr.bf16.mxu0 %v8203_v52  ;;  %v231_v52 = vld [vmem:[%s15646_s4 + $0x5a8] sm:$0xff]  ;;  %v217_v10 = vld [vmem:[%s15646_s4 + $0x538] sm:$0xff]  ;;  %v8261_v16 = vpack.c.bf16 %v185_v7, %v184_v6  ;;  %v218_v21 = vld [vmem:[%s15646_s4 + $0x540] sm:$0xff] }
  0x37   :  { %8234 = vmatpush3.bf16.msra.mxu1 %v8233_v51  ;;  %v230_v51 = vld [vmem:[%s15646_s4 + $0x5a0] sm:$0xff]  ;;  %v8293_v17 = vpack.c.bf16 %v217_v10, %v216_v8  ;;  %v187_v20 = vld [vmem:[%s15646_s4 + $0x448] sm:$0xff]  ;;  %v205_v25 = vld [vmem:[%s15646_s4 + $0x4d8] sm:$0xff] }
  0x38   :  { %8236 = vmatprep.subr.bf16.mxu1 %v8235_v56  ;;  %v8255_v56 = vpack.c.bf16 %v199_v50, %v198_v49  ;;  %v8287_v60 = vpack.c.bf16 %v231_v52, %v230_v51  ;;  %v219_v23 = vld [vmem:[%s15646_s4 + $0x548] sm:$0xff]  ;;  %v8265_v28 = vpack.c.bf16 %v187_v20, %v186_v19  ;;  %v189_v32 = vld [vmem:[%s15646_s4 + $0x458] sm:$0xff]  ;;  %v220_v33 = vld [vmem:[%s15646_s4 + $0x550] sm:$0xff] }
  0x39   :  { %8206 = vmatpush3.bf16.msra.mxu0 %v8205_v62  ;;  %v200_v62 = vld [vmem:[%s15646_s4 + $0x4b0] sm:$0xff]  ;;  %v8297_v29 = vpack.c.bf16 %v219_v23, %v218_v21  ;;  %v221_v36 = vld [vmem:[%s15646_s4 + $0x558] sm:$0xff]  ;;  %v238_v39 = vld [vmem:[%s15646_s4 + $0x5e0] sm:$0xff] }
  0x3a   :  { %8208 = vmatprep.subr.bf16.mxu0 %v8207_v1  ;;  %v232_v1 = vld [vmem:[%s15646_s4 + $0x5b0] sm:$0xff]  ;;  %v8301_v42 = vpack.c.bf16 %v221_v36, %v220_v33  ;;  %v190_v45 = vld [vmem:[%s15646_s4 + $0x460] sm:$0xff]  ;;  %v223_v50 = vld [vmem:[%s15646_s4 + $0x568] sm:$0xff] }
  0x3b   :  { %8238 = vmatpush3.bf16.msra.mxu1 %v8237_v63  ;;  %v201_v63 = vld [vmem:[%s15646_s4 + $0x4b8] sm:$0xff]  ;;  %v8291_v9 = vpack.c.bf16 %v233_v2, %v232_v1  ;;  %v208_v51 = vld [vmem:[%s15646_s4 + $0x4f0] sm:$0xff]  ;;  %v259_v1 = vld [vmem:[%s15646_s4 + $0x688] sm:$0xff] }
  0x3c   :  { %8240 = vmatprep.subr.bf16.mxu1 %v8239_v5  ;;  %v8259_v5 = vpack.c.bf16 %v201_v63, %v200_v62  ;;  %v209_v52 = vld [vmem:[%s15646_s4 + $0x4f8] sm:$0xff]  ;;  %v192_v59 = vld [vmem:[%s15646_s4 + $0x470] sm:$0xff]  ;;  %v258_v63 = vld [vmem:[%s15646_s4 + $0x680] sm:$0xff] }
  0x3d   :  { %8210 = vmatpush3.bf16.msra.mxu0 %v8209_v11  ;;  %v202_v11 = vld [vmem:[%s15646_s4 + $0x4c0] sm:$0xff]  ;;  %v8275_v58 = vpack.c.bf16 %v209_v52, %v208_v51  ;;  %v225_v62 = vld [vmem:[%s15646_s4 + $0x578] sm:$0xff]  ;;  %v8311_v7 = vpack.c.bf16 %v259_v1, %v258_v63  ;;  %v244_v23 = vld [vmem:[%s15646_s4 + $0x610] sm:$0xff] }
  0x3e   :  { %8212 = vmatprep.subr.bf16.mxu0 %v8211_v14  ;;  %v234_v14 = vld [vmem:[%s15646_s4 + $0x5c0] sm:$0xff]  ;;  %v249_v51 = vld [vmem:[%s15646_s4 + $0x638] sm:$0xff]  ;;  %v280_v52 = vld [vmem:[%s15646_s4 + $0x730] sm:$0xff] }
  0x3f   :  { %8242 = vmatpush3.bf16.msra.mxu1 %v8241_v12  ;;  %v203_v12 = vld [vmem:[%s15646_s4 + $0x4c8] sm:$0xff]  ;;  %v8295_v22 = vpack.c.bf16 %v235_v15, %v234_v14  ;;  %v290_v2 = vld [vmem:[%s15646_s4 + $0x780] sm:$0xff]  ;;  %v260_v14 = vld [vmem:[%s15646_s4 + $0x690] sm:$0xff] }
  0x40   :  { %8244 = vmatprep.subr.bf16.mxu1 %v8243_v18  ;;  %v8263_v18 = vpack.c.bf16 %v203_v12, %v202_v11  ;;  %v242_v8 = vld [vmem:[%s15646_s4 + $0x600] sm:$0xff]  ;;  %v275_v12 = vld [vmem:[%s15646_s4 + $0x708] sm:$0xff]  ;;  %v261_v15 = vld [vmem:[%s15646_s4 + $0x698] sm:$0xff] }
  0x41   :  { %8214 = vmatpush3.bf16.msra.mxu0 %v8213_v24  ;;  %v204_v24 = vld [vmem:[%s15646_s4 + $0x4d0] sm:$0xff]  ;;  %v274_v10 = vld [vmem:[%s15646_s4 + $0x700] sm:$0xff] }
  0x42   :  { %8248 = vmatprep.subr.bf16.mxu0 %v8247_v27  ;;  %v237_v27 = vld [vmem:[%s15646_s4 + $0x5d8] sm:$0xff]  ;;  %v8267_v30 = vpack.c.bf16 %v205_v25, %v204_v24  ;;  %v8345_v21 = vpack.c.bf16 %v275_v12, %v274_v10  ;;  %v276_v25 = vld [vmem:[%s15646_s4 + $0x710] sm:$0xff]  ;;  %v282_v63 = vld [vmem:[%s15646_s4 + $0x740] sm:$0xff] }
  0x43   :  { %8246 = vmatpush3.bf16.msra.mxu1 %v8245_v26  ;;  %v236_v26 = vld [vmem:[%s15646_s4 + $0x5d0] sm:$0xff]  ;;  %v245_v24 = vld [vmem:[%s15646_s4 + $0x618] sm:$0xff] }
  0x44   :  { %8280 = vmatprep.subr.bf16.mxu1 %v8279_v31  ;;  %2326 = vmatmul.mubr.f32.vlgmr.msra.gmra.mrb[2].mxu0 %v10054_v34  ;;  %v8285_v34 = vpack.c.bf16 %v213_v48, %v212_v43  ;;  %v188_v31 = vld [vmem:[%s15646_s4 + $0x450] sm:$0xff]  ;;  %v8299_v35 = vpack.c.bf16 %v237_v27, %v236_v26  ;;  %v222_v48 = vld [vmem:[%s15646_s4 + $0x560] sm:$0xff]  ;;  %v277_v27 = vld [vmem:[%s15646_s4 + $0x718] sm:$0xff] }
  0x45   :  { %8250 = vmatpush3.bf16.msra.mxu0 %v8249_v37  ;;  %2465 = vmatprep.mubr.f32.mxu0 %v1666_v53  ;;  %v206_v37 = vld [vmem:[%s15646_s4 + $0x4e0] sm:$0xff]  ;;  %v8269_v41 = vpack.c.bf16 %v189_v32, %v188_v31  ;;  %v240_v53 = vld [vmem:[%s15646_s4 + $0x5f0] sm:$0xff]  ;;  %v8305_v57 = vpack.c.bf16 %v223_v50, %v222_v48  ;;  %v295_v32 = vld [vmem:[%s15646_s4 + $0x7a8] sm:$0xff]  ;;  %v8349_v36 = vpack.c.bf16 %v277_v27, %v276_v25 }
  0x46   :  { %2396 = vmatmul.mubr.f32.vlgmr.msra.gmra.mrb[2].mxu1 %v10077_v46  ;;  %8252 = vmatprep.subr.bf16.mxu0 %v8251_v40  ;;  %v1667_v46 = vcombine.high %v10217_v54, %v10217_v54  ;;  %v239_v40 = vld [vmem:[%s15646_s4 + $0x5e8] sm:$0xff]  ;;  %v294_v31 = vld [vmem:[%s15646_s4 + $0x7a0] sm:$0xff]  ;;  %v248_v50 = vld [vmem:[%s15646_s4 + $0x630] sm:$0xff] }
  0x47   :  { %8282 = vmatpush3.bf16.msra.mxu1 %v8281_v38  ;;  %v207_v38 = vld [vmem:[%s15646_s4 + $0x4e8] sm:$0xff]  ;;  %v8303_v49 = vpack.c.bf16 %v239_v40, %v238_v39  ;;  %v278_v39 = vld [vmem:[%s15646_s4 + $0x720] sm:$0xff]  ;;  %v8351_v40 = vpack.c.bf16 %v295_v32, %v294_v31  ;;  %v252_v10 = vld [vmem:[%s15646_s4 + $0x650] sm:$0xff] }
  0x48   :  { %8284 = vmatprep.subr.bf16.mxu1 %v8283_v47  ;;  %2535 = vmatprep.mubr.f32.mxu1 %v1667_v46  ;;  %v8271_v43 = vpack.c.bf16 %v207_v38, %v206_v37  ;;  %v191_v47 = vld [vmem:[%s15646_s4 + $0x468] sm:$0xff]  ;;  %v193_v46 = vld [vmem:[%s15646_s4 + $0x478] sm:$0xff]  ;;  %v284_v12 = vld [vmem:[%s15646_s4 + $0x750] sm:$0xff] }
  0x49   :  { %8254 = vmatpush3.bf16.msra.mxu0 %v8253_v55  ;;  %v241_v55 = vld [vmem:[%s15646_s4 + $0x5f8] sm:$0xff]  ;;  %v247_v38 = vld [vmem:[%s15646_s4 + $0x628] sm:$0xff]  ;;  %v254_v25 = vld [vmem:[%s15646_s4 + $0x660] sm:$0xff] }
  0x4a   :  { %8256 = vmatprep.subr.bf16.mxu0 %v8255_v56  ;;  %v29_v56 = vld [vmem:[%s15647_s0 + $0x18] sm:$0xff]  ;;  %v8307_v61 = vpack.c.bf16 %v241_v55, %v240_v53  ;;  %v286_v27 = vld [vmem:[%s15646_s4 + $0x760] sm:$0xff]  ;;  %v304_v32 = vld [vmem:[%s15646_s4 + $0x7f0] sm:$0xff] }
  0x4b   :  { %8286 = vmatpush3.bf16.msra.mxu1 %v8285_v34  ;;  %v8273_v34 = vpack.c.bf16 %v191_v47, %v190_v45  ;;  %v297_v45 = vld [vmem:[%s15646_s4 + $0x7b8] sm:$0xff] }
  0x4c   :  { %8288 = vmatprep.subr.bf16.mxu1 %v8287_v60  ;;  %v224_v60 = vld [vmem:[%s15646_s4 + $0x570] sm:$0xff]  ;;  %v281_v55 = vld [vmem:[%s15646_s4 + $0x738] sm:$0xff] }
  0x4d   :  { %8258 = vmatpush3.bf16.msra.mxu0 %v8257_v3  ;;  %v291_v3 = vld [vmem:[%s15646_s4 + $0x788] sm:$0xff]  ;;  %v8309_v6 = vpack.c.bf16 %v225_v62, %v224_v60  ;;  %v273_v31 = vld [vmem:[%s15646_s4 + $0x6f8] sm:$0xff] }
  0x4e   :  { %8260 = vmatprep.subr.bf16.mxu0 %v8259_v5  ;;  %v8277_v5 = vpack.c.bf16 %v193_v46, %v192_v59  ;;  %v8343_v11 = vpack.c.bf16 %v291_v3, %v290_v2  ;;  %v8325_v59 = vpack.c.bf16 %v249_v51, %v248_v50  ;;  %v8357_v46 = vpack.c.bf16 %v281_v55, %v280_v52  ;;  %v251_v62 = vld [vmem:[%s15646_s4 + $0x648] sm:$0xff]  ;;  %v268_v3 = vld [vmem:[%s15646_s4 + $0x6d0] sm:$0xff]  ;;  %v306_v52 = vld [vmem:[%s15646_s4 + $0x800] sm:$0xff] }
  0x4f   :  { %8290 = vmatpush3.bf16.msra.mxu1 %v8289_v4  ;;  %v1668_v4 = vcombine.high %v29_v56, %v29_v56  ;;  %v283_v2 = vld [vmem:[%s15646_s4 + $0x748] sm:$0xff]  ;;  %v338_v55 = vld [vmem:[%s15646_s4 + $0x900] sm:$0xff] }
  0x50   :  { %8292 = vmatprep.subr.bf16.mxu1 %v8291_v9  ;;  %v243_v9 = vld [vmem:[%s15646_s4 + $0x608] sm:$0xff] }
  0x51   :  { %8262 = vmatpush3.bf16.msra.mxu0 %v8261_v16  ;;  %v10388_v16 = vrot.slane %v29_v56, %v9893_v13  ;;  %v10397_v19 = vrot.slane %v1668_v4, %v9893_v13  ;;  %v8313_v20 = vpack.c.bf16 %v243_v9, %v242_v8  ;;  %v267_v56 = vld [vmem:[%s15646_s4 + $0x6c8] sm:$0xff]  ;;  %v269_v4 = vld [vmem:[%s15646_s4 + $0x6d8] sm:$0xff]  ;;  %v8361_v8 = vpack.c.bf16 %v283_v2, %v282_v63  ;;  %v308_v2 = vld [vmem:[%s15646_s4 + $0x810] sm:$0xff] }
  0x52   :  { %8264 = vmatprep.subr.bf16.mxu0 %v8263_v18  ;;  %v293_v18 = vld [vmem:[%s15646_s4 + $0x798] sm:$0xff]  ;;  %v8331_v9 = vpack.c.bf16 %v269_v4, %v268_v3  ;;  %v340_v4 = vld [vmem:[%s15646_s4 + $0x910] sm:$0xff] }
  0x53   :  { %8294 = vmatpush3.bf16.msra.mxu1 %v8293_v17  ;;  %v292_v17 = vld [vmem:[%s15646_s4 + $0x790] sm:$0xff]  ;;  %v1684_v33 = vcombine.high %v10397_v19, %v10397_v19  ;;  %v309_v3 = vld [vmem:[%s15646_s4 + $0x818] sm:$0xff] }
  0x54   :  { %8296 = vmatprep.subr.bf16.mxu1 %v8295_v22  ;;  %v8315_v22 = vpack.c.bf16 %v261_v15, %v260_v14  ;;  %v8347_v26 = vpack.c.bf16 %v293_v18, %v292_v17  ;;  %v285_v15 = vld [vmem:[%s15646_s4 + $0x758] sm:$0xff]  ;;  %v270_v17 = vld [vmem:[%s15646_s4 + $0x6e0] sm:$0xff]  ;;  %v271_v18 = vld [vmem:[%s15646_s4 + $0x6e8] sm:$0xff] }
  0x55   :  { %8266 = vmatpush3.bf16.msra.mxu0 %v8265_v28  ;;  %v262_v28 = vld [vmem:[%s15646_s4 + $0x6a0] sm:$0xff] }
  0x56   :  { %8268 = vmatprep.subr.bf16.mxu0 %v8267_v30  ;;  %v1683_v30 = vcombine.high %v10388_v16, %v10388_v16 }
  0x57   :  { %8298 = vmatpush3.bf16.msra.mxu1 %v8297_v29  ;;  %v263_v29 = vld [vmem:[%s15646_s4 + $0x6a8] sm:$0xff] }
  0x58   :  { %8300 = vmatprep.subr.bf16.mxu1 %v8299_v35  ;;  %v8317_v35 = vpack.c.bf16 %v245_v24, %v244_v23  ;;  %v8319_v37 = vpack.c.bf16 %v263_v29, %v262_v28  ;;  %v8365_v23 = vpack.c.bf16 %v285_v15, %v284_v12  ;;  %v8335_v24 = vpack.c.bf16 %v271_v18, %v270_v17  ;;  %v287_v29 = vld [vmem:[%s15646_s4 + $0x768] sm:$0xff] }
  0x59   :  { %8270 = vmatpush3.bf16.msra.mxu0 %v8269_v41  ;;  %v264_v41 = vld [vmem:[%s15646_s4 + $0x6b0] sm:$0xff]  ;;  %v311_v18 = vld [vmem:[%s15646_s4 + $0x828] sm:$0xff] }
  0x5a   :  { %8272 = vmatprep.subr.bf16.mxu0 %v8271_v43  ;;  %v296_v43 = vld [vmem:[%s15646_s4 + $0x7b0] sm:$0xff] }
  0x5b   :  { %8302 = vmatpush3.bf16.msra.mxu1 %v8301_v42  ;;  %v265_v42 = vld [vmem:[%s15646_s4 + $0x6b8] sm:$0xff]  ;;  %v8355_v53 = vpack.c.bf16 %v297_v45, %v296_v43  ;;  %v323_v43 = vld [vmem:[%s15646_s4 + $0x888] sm:$0xff]  ;;  %v354_v45 = vld [vmem:[%s15646_s4 + $0x980] sm:$0xff] }
  0x5c   :  { %8304 = vmatprep.subr.bf16.mxu1 %v8303_v49  ;;  %v8323_v49 = vpack.c.bf16 %v265_v42, %v264_v41  ;;  %v289_v41 = vld [vmem:[%s15646_s4 + $0x778] sm:$0xff]  ;;  %v322_v42 = vld [vmem:[%s15646_s4 + $0x880] sm:$0xff] }
  0x5d   :  { %8274 = vmatpush3.bf16.msra.mxu0 %v8273_v34  ;;  %v266_v34 = vld [vmem:[%s15646_s4 + $0x6c0] sm:$0xff]  ;;  %v8375_v51 = vpack.c.bf16 %v323_v43, %v322_v42 }
  0x5e   :  { %8276 = vmatprep.subr.bf16.mxu0 %v8275_v58  ;;  %v299_v58 = vld [vmem:[%s15646_s4 + $0x7c8] sm:$0xff]  ;;  %v8327_v60 = vpack.c.bf16 %v267_v56, %v266_v34  ;;  %v346_v42 = vld [vmem:[%s15646_s4 + $0x940] sm:$0xff] }
  0x5f   :  { %8306 = vmatpush3.bf16.msra.mxu1 %v8305_v57  ;;  %v298_v57 = vld [vmem:[%s15646_s4 + $0x7c0] sm:$0xff]  ;;  %v339_v56 = vld [vmem:[%s15646_s4 + $0x908] sm:$0xff] }
  0x60   :  { %8308 = vmatprep.subr.bf16.mxu1 %v8307_v61  ;;  %v250_v61 = vld [vmem:[%s15646_s4 + $0x640] sm:$0xff]  ;;  %v8359_v1 = vpack.c.bf16 %v299_v58, %v298_v57  ;;  %v324_v57 = vld [vmem:[%s15646_s4 + $0x890] sm:$0xff]  ;;  %v325_v58 = vld [vmem:[%s15646_s4 + $0x898] sm:$0xff]  ;;  %v8409_v63 = vpack.c.bf16 %v339_v56, %v338_v55 }
  0x61   :  { %8278 = vmatpush3.bf16.msra.mxu0 %v8277_v5  ;;  %v300_v5 = vld [vmem:[%s15646_s4 + $0x7d0] sm:$0xff] }
  0x62   :  { %8312 = vmatprep.subr.bf16.mxu0 %v8311_v7  ;;  %v8329_v7 = vpack.c.bf16 %v251_v62, %v250_v61  ;;  %v316_v55 = vld [vmem:[%s15646_s4 + $0x850] sm:$0xff] }
  0x63   :  { %8310 = vmatpush3.bf16.msra.mxu1 %v8309_v6  ;;  %v301_v6 = vld [vmem:[%s15646_s4 + $0x7d8] sm:$0xff]  ;;  %v348_v56 = vld [vmem:[%s15646_s4 + $0x950] sm:$0xff] }
  0x64   :  { %8344 = vmatprep.subr.bf16.mxu1 %v8343_v11  ;;  %2466 = vmatmul.mubr.f32.vlgmr.msra.gmra.mrb[4].mxu0 %v10196_v44  ;;  %v246_v44 = vld [vmem:[%s15646_s4 + $0x620] sm:$0xff]  ;;  %v253_v11 = vld [vmem:[%s15646_s4 + $0x658] sm:$0xff]  ;;  %v8363_v14 = vpack.c.bf16 %v301_v6, %v300_v5 }
  0x65   :  { %8314 = vmatpush3.bf16.msra.mxu0 %v8313_v20  ;;  %2605 = vmatprep.mubr.f32.mxu0 %v1683_v30  ;;  %v8321_v47 = vpack.c.bf16 %v247_v38, %v246_v44  ;;  %v302_v20 = vld [vmem:[%s15646_s4 + $0x7e0] sm:$0xff]  ;;  %v272_v30 = vld [vmem:[%s15646_s4 + $0x6f0] sm:$0xff]  ;;  %v341_v6 = vld [vmem:[%s15646_s4 + $0x918] sm:$0xff] }
  0x66   :  { %2536 = vmatmul.mubr.f32.vlgmr.msra.gmra.mrb[4].mxu1 %v10217_v54  ;;  %8316 = vmatprep.subr.bf16.mxu0 %v8315_v22  ;;  %v279_v54 = vld [vmem:[%s15646_s4 + $0x728] sm:$0xff]  ;;  %v8333_v22 = vpack.c.bf16 %v253_v11, %v252_v10  ;;  %v8339_v44 = vpack.c.bf16 %v273_v31, %v272_v30  ;;  %v256_v38 = vld [vmem:[%s15646_s4 + $0x670] sm:$0xff]  ;;  %v358_v10 = vld [vmem:[%s15646_s4 + $0x9a0] sm:$0xff]  ;;  %v8413_v15 = vpack.c.bf16 %v341_v6, %v340_v4 }
  0x67   :  { %8346 = vmatpush3.bf16.msra.mxu1 %v8345_v21  ;;  %2675 = vmatprep.mubr.f32.mxu1 %v1684_v33  ;;  %v8353_v48 = vpack.c.bf16 %v279_v54, %v278_v39  ;;  %v303_v21 = vld [vmem:[%s15646_s4 + $0x7e8] sm:$0xff]  ;;  %v305_v33 = vld [vmem:[%s15646_s4 + $0x7f8] sm:$0xff]  ;;  %v344_v31 = vld [vmem:[%s15646_s4 + $0x930] sm:$0xff] }
  0x68   :  { %8348 = vmatprep.subr.bf16.mxu1 %v8347_v26  ;;  %v255_v26 = vld [vmem:[%s15646_s4 + $0x668] sm:$0xff]  ;;  %v8367_v28 = vpack.c.bf16 %v303_v21, %v302_v20  ;;  %v257_v39 = vld [vmem:[%s15646_s4 + $0x678] sm:$0xff]  ;;  %v8371_v54 = vpack.c.bf16 %v305_v33, %v304_v32  ;;  %v342_v20 = vld [vmem:[%s15646_s4 + $0x920] sm:$0xff] }
  0x69   :  { %8318 = vmatpush3.bf16.msra.mxu0 %v8317_v35  ;;  %v8337_v35 = vpack.c.bf16 %v255_v26, %v254_v25  ;;  %v359_v11 = vld [vmem:[%s15646_s4 + $0x9a8] sm:$0xff]  ;;  %v361_v25 = vld [vmem:[%s15646_s4 + $0x9b8] sm:$0xff]  ;;  %v318_v4 = vld [vmem:[%s15646_s4 + $0x860] sm:$0xff] }
  0x6a   :  { %8320 = vmatprep.subr.bf16.mxu0 %v8319_v37  ;;  %v8369_v37 = vpack.c.bf16 %v287_v29, %v286_v27  ;;  %v8415_v21 = vpack.c.bf16 %v359_v11, %v358_v10  ;;  %v312_v29 = vld [vmem:[%s15646_s4 + $0x830] sm:$0xff]  ;;  %v313_v30 = vld [vmem:[%s15646_s4 + $0x838] sm:$0xff]  ;;  %v350_v6 = vld [vmem:[%s15646_s4 + $0x960] sm:$0xff] }
  0x6b   :  { %8350 = vmatpush3.bf16.msra.mxu1 %v8349_v36  ;;  %v30_v36 = vld [vmem:[%s15647_s0 + $0x20] sm:$0xff]  ;;  %v345_v33 = vld [vmem:[%s15646_s4 + $0x938] sm:$0xff]  ;;  %v368_v11 = vld [vmem:[%s15646_s4 + $0x9f0] sm:$0xff] }
  0x6c   :  { %8352 = vmatprep.subr.bf16.mxu1 %v8351_v40  ;;  %v288_v40 = vld [vmem:[%s15646_s4 + $0x770] sm:$0xff]  ;;  %v337_v10 = vld [vmem:[%s15646_s4 + $0x8f8] sm:$0xff] }
  0x6d   :  { %8322 = vmatpush3.bf16.msra.mxu0 %v8321_v47  ;;  %v355_v47 = vld [vmem:[%s15646_s4 + $0x988] sm:$0xff]  ;;  %v8373_v50 = vpack.c.bf16 %v289_v41, %v288_v40 }
  0x6e   :  { %8324 = vmatprep.subr.bf16.mxu0 %v8323_v49  ;;  %v8341_v49 = vpack.c.bf16 %v257_v39, %v256_v38  ;;  %v8407_v34 = vpack.c.bf16 %v355_v47, %v354_v45  ;;  %v8389_v38 = vpack.c.bf16 %v313_v30, %v312_v29  ;;  %v8421_v39 = vpack.c.bf16 %v345_v33, %v344_v31  ;;  %v315_v41 = vld [vmem:[%s15646_s4 + $0x848] sm:$0xff]  ;;  %v332_v47 = vld [vmem:[%s15646_s4 + $0x8d0] sm:$0xff]  ;;  %v370_v31 = vld [vmem:[%s15646_s4 + $0xa00] sm:$0xff] }
  0x6f   :  { %8354 = vmatpush3.bf16.msra.mxu1 %v8353_v48  ;;  %v1685_v48 = vcombine.high %v30_v36, %v30_v36  ;;  %v347_v45 = vld [vmem:[%s15646_s4 + $0x948] sm:$0xff]  ;;  %v402_v33 = vld [vmem:[%s15646_s4 + $0xb00] sm:$0xff] }
  0x70   :  { %8356 = vmatprep.subr.bf16.mxu1 %v8355_v53  ;;  %v307_v53 = vld [vmem:[%s15646_s4 + $0x808] sm:$0xff] }
  0x71   :  { %8326 = vmatpush3.bf16.msra.mxu0 %v8325_v59  ;;  %v10595_v59 = vrot.slane %v30_v36, %v9893_v13  ;;  %v10604_v61 = vrot.slane %v1685_v48, %v9893_v13  ;;  %v8377_v62 = vpack.c.bf16 %v307_v53, %v306_v52  ;;  %v331_v36 = vld [vmem:[%s15646_s4 + $0x8c8] sm:$0xff]  ;;  %v333_v48 = vld [vmem:[%s15646_s4 + $0x8d8] sm:$0xff]  ;;  %v8425_v52 = vpack.c.bf16 %v347_v45, %v346_v42  ;;  %v372_v45 = vld [vmem:[%s15646_s4 + $0xa10] sm:$0xff] }
  0x72   :  { %8328 = vmatprep.subr.bf16.mxu0 %v8327_v60  ;;  %v357_v60 = vld [vmem:[%s15646_s4 + $0x998] sm:$0xff]  ;;  %v8395_v53 = vpack.c.bf16 %v333_v48, %v332_v47  ;;  %v404_v48 = vld [vmem:[%s15646_s4 + $0xb10] sm:$0xff] }
  0x73   :  { %8358 = vmatpush3.bf16.msra.mxu1 %v8357_v46  ;;  %v356_v46 = vld [vmem:[%s15646_s4 + $0x990] sm:$0xff]  ;;  %v1701_v12 = vcombine.high %v10604_v61, %v10604_v61  ;;  %v373_v47 = vld [vmem:[%s15646_s4 + $0xa18] sm:$0xff] }
  0x74   :  { %8360 = vmatprep.subr.bf16.mxu1 %v8359_v1  ;;  %v8379_v1 = vpack.c.bf16 %v325_v58, %v324_v57  ;;  %v8411_v5 = vpack.c.bf16 %v357_v60, %v356_v46  ;;  %v349_v58 = vld [vmem:[%s15646_s4 + $0x958] sm:$0xff]  ;;  %v334_v46 = vld [vmem:[%s15646_s4 + $0x8e0] sm:$0xff]  ;;  %v335_v60 = vld [vmem:[%s15646_s4 + $0x8e8] sm:$0xff] }
  0x75   :  { %8330 = vmatpush3.bf16.msra.mxu0 %v8329_v7  ;;  %v326_v7 = vld [vmem:[%s15646_s4 + $0x8a0] sm:$0xff] }
  0x76   :  { %8332 = vmatprep.subr.bf16.mxu0 %v8331_v9  ;;  %v1700_v9 = vcombine.high %v10595_v59, %v10595_v59 }
  0x77   :  { %8362 = vmatpush3.bf16.msra.mxu1 %v8361_v8  ;;  %v327_v8 = vld [vmem:[%s15646_s4 + $0x8a8] sm:$0xff] }
  0x78   :  { %8364 = vmatprep.subr.bf16.mxu1 %v8363_v14  ;;  %v8381_v14 = vpack.c.bf16 %v309_v3, %v308_v2  ;;  %v8383_v17 = vpack.c.bf16 %v327_v8, %v326_v7  ;;  %v8429_v2 = vpack.c.bf16 %v349_v58, %v348_v56  ;;  %v8399_v3 = vpack.c.bf16 %v335_v60, %v334_v46  ;;  %v351_v8 = vld [vmem:[%s15646_s4 + $0x968] sm:$0xff] }
  0x79   :  { %8334 = vmatpush3.bf16.msra.mxu0 %v8333_v22  ;;  %v328_v22 = vld [vmem:[%s15646_s4 + $0x8b0] sm:$0xff]  ;;  %v375_v60 = vld [vmem:[%s15646_s4 + $0xa28] sm:$0xff] }
  0x7a   :  { %8336 = vmatprep.subr.bf16.mxu0 %v8335_v24  ;;  %v360_v24 = vld [vmem:[%s15646_s4 + $0x9b0] sm:$0xff] }
  0x7b   :  { %8366 = vmatpush3.bf16.msra.mxu1 %v8365_v23  ;;  %v329_v23 = vld [vmem:[%s15646_s4 + $0x8b8] sm:$0xff]  ;;  %v8419_v32 = vpack.c.bf16 %v361_v25, %v360_v24  ;;  %v387_v24 = vld [vmem:[%s15646_s4 + $0xa88] sm:$0xff]  ;;  %v418_v25 = vld [vmem:[%s15646_s4 + $0xb80] sm:$0xff] }
  0x7c   :  { %8368 = vmatprep.subr.bf16.mxu1 %v8367_v28  ;;  %v8387_v28 = vpack.c.bf16 %v329_v23, %v328_v22  ;;  %v353_v22 = vld [vmem:[%s15646_s4 + $0x978] sm:$0xff]  ;;  %v386_v23 = vld [vmem:[%s15646_s4 + $0xa80] sm:$0xff] }
  0x7d   :  { %8338 = vmatpush3.bf16.msra.mxu0 %v8337_v35  ;;  %v330_v35 = vld [vmem:[%s15646_s4 + $0x8c0] sm:$0xff]  ;;  %v8439_v30 = vpack.c.bf16 %v387_v24, %v386_v23 }
  0x7e   :  { %8340 = vmatprep.subr.bf16.mxu0 %v8339_v44  ;;  %v363_v44 = vld [vmem:[%s15646_s4 + $0x9c8] sm:$0xff]  ;;  %v8391_v40 = vpack.c.bf16 %v331_v36, %v330_v35  ;;  %v410_v23 = vld [vmem:[%s15646_s4 + $0xb40] sm:$0xff] }
  0x7f   :  { %8370 = vmatpush3.bf16.msra.mxu1 %v8369_v37  ;;  %v362_v37 = vld [vmem:[%s15646_s4 + $0x9c0] sm:$0xff]  ;;  %v403_v36 = vld [vmem:[%s15646_s4 + $0xb08] sm:$0xff] }
  0x80   :  { %8372 = vmatprep.subr.bf16.mxu1 %v8371_v54  ;;  %v314_v54 = vld [vmem:[%s15646_s4 + $0x840] sm:$0xff]  ;;  %v8423_v43 = vpack.c.bf16 %v363_v44, %v362_v37  ;;  %v388_v37 = vld [vmem:[%s15646_s4 + $0xa90] sm:$0xff]  ;;  %v389_v44 = vld [vmem:[%s15646_s4 + $0xa98] sm:$0xff]  ;;  %v8473_v42 = vpack.c.bf16 %v403_v36, %v402_v33 }
  0x81   :  { %8342 = vmatpush3.bf16.msra.mxu0 %v8341_v49  ;;  %v364_v49 = vld [vmem:[%s15646_s4 + $0x9d0] sm:$0xff] }
  0x82   :  { %8376 = vmatprep.subr.bf16.mxu0 %v8375_v51  ;;  %v8393_v51 = vpack.c.bf16 %v315_v41, %v314_v54  ;;  %v380_v33 = vld [vmem:[%s15646_s4 + $0xa50] sm:$0xff] }
  0x83   :  { %8374 = vmatpush3.bf16.msra.mxu1 %v8373_v50  ;;  %v365_v50 = vld [vmem:[%s15646_s4 + $0x9d8] sm:$0xff]  ;;  %v412_v36 = vld [vmem:[%s15646_s4 + $0xb50] sm:$0xff] }
  0x84   :  { %8408 = vmatprep.subr.bf16.mxu1 %v8407_v34  ;;  %2606 = vmatmul.mubr.f32.vlgmr.msra.gmra.mrb[6].mxu0 %v10388_v16  ;;  %v310_v16 = vld [vmem:[%s15646_s4 + $0x820] sm:$0xff]  ;;  %v317_v34 = vld [vmem:[%s15646_s4 + $0x858] sm:$0xff]  ;;  %v8427_v57 = vpack.c.bf16 %v365_v50, %v364_v49 }
  0x85   :  { %8378 = vmatpush3.bf16.msra.mxu0 %v8377_v62  ;;  %2745 = vmatprep.mubr.f32.mxu0 %v1700_v9  ;;  %v8385_v26 = vpack.c.bf16 %v311_v18, %v310_v16  ;;  %v366_v62 = vld [vmem:[%s15646_s4 + $0x9e0] sm:$0xff]  ;;  %v336_v9 = vld [vmem:[%s15646_s4 + $0x8f0] sm:$0xff]  ;;  %v405_v50 = vld [vmem:[%s15646_s4 + $0xb18] sm:$0xff] }
  0x86   :  { %2676 = vmatmul.mubr.f32.vlgmr.msra.gmra.mrb[6].mxu1 %v10397_v19  ;;  %8380 = vmatprep.subr.bf16.mxu0 %v8379_v1  ;;  %v343_v19 = vld [vmem:[%s15646_s4 + $0x928] sm:$0xff]  ;;  %v8397_v1 = vpack.c.bf16 %v317_v34, %v316_v55  ;;  %v8403_v16 = vpack.c.bf16 %v337_v10, %v336_v9  ;;  %v320_v18 = vld [vmem:[%s15646_s4 + $0x870] sm:$0xff]  ;;  %v422_v55 = vld [vmem:[%s15646_s4 + $0xba0] sm:$0xff]  ;;  %v8477_v58 = vpack.c.bf16 %v405_v50, %v404_v48 }
  0x87   :  { %8410 = vmatpush3.bf16.msra.mxu1 %v8409_v63  ;;  %2815 = vmatprep.mubr.f32.mxu1 %v1701_v12  ;;  %v8417_v27 = vpack.c.bf16 %v343_v19, %v342_v20  ;;  %v367_v63 = vld [vmem:[%s15646_s4 + $0x9e8] sm:$0xff]  ;;  %v369_v12 = vld [vmem:[%s15646_s4 + $0x9f8] sm:$0xff]  ;;  %v408_v10 = vld [vmem:[%s15646_s4 + $0xb30] sm:$0xff] }
  0x88   :  { %8412 = vmatprep.subr.bf16.mxu1 %v8411_v5  ;;  %v319_v5 = vld [vmem:[%s15646_s4 + $0x868] sm:$0xff]  ;;  %v8431_v7 = vpack.c.bf16 %v367_v63, %v366_v62  ;;  %v321_v20 = vld [vmem:[%s15646_s4 + $0x878] sm:$0xff]  ;;  %v8435_v19 = vpack.c.bf16 %v369_v12, %v368_v11  ;;  %v406_v62 = vld [vmem:[%s15646_s4 + $0xb20] sm:$0xff] }
  0x89   :  { %8382 = vmatpush3.bf16.msra.mxu0 %v8381_v14  ;;  %v8401_v14 = vpack.c.bf16 %v319_v5, %v318_v4  ;;  %v423_v34 = vld [vmem:[%s15646_s4 + $0xba8] sm:$0xff]  ;;  %v425_v4 = vld [vmem:[%s15646_s4 + $0xbb8] sm:$0xff]  ;;  %v382_v48 = vld [vmem:[%s15646_s4 + $0xa60] sm:$0xff] }
  0x8a   :  { %8384 = vmatprep.subr.bf16.mxu0 %v8383_v17  ;;  %v8433_v17 = vpack.c.bf16 %v351_v8, %v350_v6  ;;  %v8479_v63 = vpack.c.bf16 %v423_v34, %v422_v55  ;;  %v376_v8 = vld [vmem:[%s15646_s4 + $0xa30] sm:$0xff]  ;;  %v377_v9 = vld [vmem:[%s15646_s4 + $0xa38] sm:$0xff]  ;;  %v414_v50 = vld [vmem:[%s15646_s4 + $0xb60] sm:$0xff] }
  0x8b   :  { %8414 = vmatpush3.bf16.msra.mxu1 %v8413_v15  ;;  %v31_v15 = vld [vmem:[%s15647_s0 + $0x28] sm:$0xff]  ;;  %v409_v12 = vld [vmem:[%s15646_s4 + $0xb38] sm:$0xff]  ;;  %v432_v34 = vld [vmem:[%s15646_s4 + $0xbf0] sm:$0xff] }
  0x8c   :  { %8416 = vmatprep.subr.bf16.mxu1 %v8415_v21  ;;  %v352_v21 = vld [vmem:[%s15646_s4 + $0x970] sm:$0xff]  ;;  %v401_v55 = vld [vmem:[%s15646_s4 + $0xaf8] sm:$0xff] }
  0x8d   :  { %8386 = vmatpush3.bf16.msra.mxu0 %v8385_v26  ;;  %v419_v26 = vld [vmem:[%s15646_s4 + $0xb88] sm:$0xff]  ;;  %v8437_v29 = vpack.c.bf16 %v353_v22, %v352_v21 }
  0x8e   :  { %8388 = vmatprep.subr.bf16.mxu0 %v8387_v28  ;;  %v8405_v28 = vpack.c.bf16 %v321_v20, %v320_v18  ;;  %v8471_v35 = vpack.c.bf16 %v419_v26, %v418_v25  ;;  %v8453_v18 = vpack.c.bf16 %v377_v9, %v376_v8  ;;  %v8485_v20 = vpack.c.bf16 %v409_v12, %v408_v10  ;;  %v379_v22 = vld [vmem:[%s15646_s4 + $0xa48] sm:$0xff]  ;;  %v396_v26 = vld [vmem:[%s15646_s4 + $0xad0] sm:$0xff]  ;;  %v434_v10 = vld [vmem:[%s15646_s4 + $0xc00] sm:$0xff] }
  0x8f   :  { %8418 = vmatpush3.bf16.msra.mxu1 %v8417_v27  ;;  %v1702_v27 = vcombine.high %v31_v15, %v31_v15  ;;  %v411_v25 = vld [vmem:[%s15646_s4 + $0xb48] sm:$0xff]  ;;  %v466_v12 = vld [vmem:[%s15646_s4 + $0xd00] sm:$0xff] }
  0x90   :  { %8420 = vmatprep.subr.bf16.mxu1 %v8419_v32  ;;  %v371_v32 = vld [vmem:[%s15646_s4 + $0xa08] sm:$0xff] }
  0x91   :  { %8390 = vmatpush3.bf16.msra.mxu0 %v8389_v38  ;;  %v10802_v38 = vrot.slane %v31_v15, %v9893_v13  ;;  %v10811_v54 = vrot.slane %v1702_v27, %v9893_v13  ;;  %v8441_v41 = vpack.c.bf16 %v371_v32, %v370_v31  ;;  %v395_v15 = vld [vmem:[%s15646_s4 + $0xac8] sm:$0xff]  ;;  %v397_v27 = vld [vmem:[%s15646_s4 + $0xad8] sm:$0xff]  ;;  %v8489_v31 = vpack.c.bf16 %v411_v25, %v410_v23  ;;  %v436_v25 = vld [vmem:[%s15646_s4 + $0xc10] sm:$0xff] }
  0x92   :  { %8392 = vmatprep.subr.bf16.mxu0 %v8391_v40  ;;  %v421_v40 = vld [vmem:[%s15646_s4 + $0xb98] sm:$0xff]  ;;  %v8459_v32 = vpack.c.bf16 %v397_v27, %v396_v26  ;;  %v468_v27 = vld [vmem:[%s15646_s4 + $0xd10] sm:$0xff] }
  0x93   :  { %8422 = vmatpush3.bf16.msra.mxu1 %v8421_v39  ;;  %v420_v39 = vld [vmem:[%s15646_s4 + $0xb90] sm:$0xff]  ;;  %v1718_v56 = vcombine.high %v10811_v54, %v10811_v54  ;;  %v437_v26 = vld [vmem:[%s15646_s4 + $0xc18] sm:$0xff] }
  0x94   :  { %8424 = vmatprep.subr.bf16.mxu1 %v8423_v43  ;;  %v8443_v43 = vpack.c.bf16 %v389_v44, %v388_v37  ;;  %v8475_v49 = vpack.c.bf16 %v421_v40, %v420_v39  ;;  %v413_v44 = vld [vmem:[%s15646_s4 + $0xb58] sm:$0xff]  ;;  %v398_v39 = vld [vmem:[%s15646_s4 + $0xae0] sm:$0xff]  ;;  %v399_v40 = vld [vmem:[%s15646_s4 + $0xae8] sm:$0xff] }
  0x95   :  { %8394 = vmatpush3.bf16.msra.mxu0 %v8393_v51  ;;  %v390_v51 = vld [vmem:[%s15646_s4 + $0xaa0] sm:$0xff] }
  0x96   :  { %8396 = vmatprep.subr.bf16.mxu0 %v8395_v53  ;;  %v1717_v53 = vcombine.high %v10802_v38, %v10802_v38 }
  0x97   :  { %8426 = vmatpush3.bf16.msra.mxu1 %v8425_v52  ;;  %v391_v52 = vld [vmem:[%s15646_s4 + $0xaa8] sm:$0xff] }
  0x98   :  { %8428 = vmatprep.subr.bf16.mxu1 %v8427_v57  ;;  %v8445_v57 = vpack.c.bf16 %v373_v47, %v372_v45  ;;  %v8447_v46 = vpack.c.bf16 %v391_v52, %v390_v51  ;;  %v8493_v45 = vpack.c.bf16 %v413_v44, %v412_v36  ;;  %v8463_v47 = vpack.c.bf16 %v399_v40, %v398_v39  ;;  %v415_v52 = vld [vmem:[%s15646_s4 + $0xb68] sm:$0xff] }
  0x99   :  { %8398 = vmatpush3.bf16.msra.mxu0 %v8397_v1  ;;  %v392_v1 = vld [vmem:[%s15646_s4 + $0xab0] sm:$0xff]  ;;  %v439_v40 = vld [vmem:[%s15646_s4 + $0xc28] sm:$0xff] }
  0x9a   :  { %8400 = vmatprep.subr.bf16.mxu0 %v8399_v3  ;;  %v424_v3 = vld [vmem:[%s15646_s4 + $0xbb0] sm:$0xff] }
  0x9b   :  { %8430 = vmatpush3.bf16.msra.mxu1 %v8429_v2  ;;  %v393_v2 = vld [vmem:[%s15646_s4 + $0xab8] sm:$0xff]  ;;  %v8483_v11 = vpack.c.bf16 %v425_v4, %v424_v3  ;;  %v451_v3 = vld [vmem:[%s15646_s4 + $0xc88] sm:$0xff]  ;;  %v482_v4 = vld [vmem:[%s15646_s4 + $0xd80] sm:$0xff] }
  0x9c   :  { %8432 = vmatprep.subr.bf16.mxu1 %v8431_v7  ;;  %v8451_v7 = vpack.c.bf16 %v393_v2, %v392_v1  ;;  %v417_v1 = vld [vmem:[%s15646_s4 + $0xb78] sm:$0xff]  ;;  %v450_v2 = vld [vmem:[%s15646_s4 + $0xc80] sm:$0xff] }
  0x9d   :  { %8402 = vmatpush3.bf16.msra.mxu0 %v8401_v14  ;;  %v394_v14 = vld [vmem:[%s15646_s4 + $0xac0] sm:$0xff]  ;;  %v8503_v9 = vpack.c.bf16 %v451_v3, %v450_v2 }
  0x9e   :  { %8404 = vmatprep.subr.bf16.mxu0 %v8403_v16  ;;  %v427_v16 = vld [vmem:[%s15646_s4 + $0xbc8] sm:$0xff]  ;;  %v8455_v21 = vpack.c.bf16 %v395_v15, %v394_v14  ;;  %v474_v2 = vld [vmem:[%s15646_s4 + $0xd40] sm:$0xff] }
  0x9f   :  { %8434 = vmatpush3.bf16.msra.mxu1 %v8433_v17  ;;  %v426_v17 = vld [vmem:[%s15646_s4 + $0xbc0] sm:$0xff]  ;;  %v467_v15 = vld [vmem:[%s15646_s4 + $0xd08] sm:$0xff] }
  0xa0   :  { %8436 = vmatprep.subr.bf16.mxu1 %v8435_v19  ;;  %v378_v19 = vld [vmem:[%s15646_s4 + $0xa40] sm:$0xff]  ;;  %v8487_v24 = vpack.c.bf16 %v427_v16, %v426_v17  ;;  %v452_v17 = vld [vmem:[%s15646_s4 + $0xc90] sm:$0xff]  ;;  %v453_v16 = vld [vmem:[%s15646_s4 + $0xc98] sm:$0xff]  ;;  %v8537_v23 = vpack.c.bf16 %v467_v15, %v466_v12 }
  0xa1   :  { %8406 = vmatpush3.bf16.msra.mxu0 %v8405_v28  ;;  %v428_v28 = vld [vmem:[%s15646_s4 + $0xbd0] sm:$0xff] }
  0xa2   :  { %8440 = vmatprep.subr.bf16.mxu0 %v8439_v30  ;;  %v8457_v30 = vpack.c.bf16 %v379_v22, %v378_v19  ;;  %v444_v12 = vld [vmem:[%s15646_s4 + $0xc50] sm:$0xff] }
  0xa3   :  { %8438 = vmatpush3.bf16.msra.mxu1 %v8437_v29  ;;  %v429_v29 = vld [vmem:[%s15646_s4 + $0xbd8] sm:$0xff]  ;;  %v476_v15 = vld [vmem:[%s15646_s4 + $0xd50] sm:$0xff] }
  0xa4   :  { %8472 = vmatprep.subr.bf16.mxu1 %v8471_v35  ;;  %2746 = vmatmul.mubr.f32.vlgmr.msra.gmra.mrb[8].mxu0 %v10595_v59  ;;  %v374_v59 = vld [vmem:[%s15646_s4 + $0xa20] sm:$0xff]  ;;  %v381_v35 = vld [vmem:[%s15646_s4 + $0xa58] sm:$0xff]  ;;  %v8491_v37 = vpack.c.bf16 %v429_v29, %v428_v28 }
  0xa5   :  { %8442 = vmatpush3.bf16.msra.mxu0 %v8441_v41  ;;  %2885 = vmatprep.mubr.f32.mxu0 %v1717_v53  ;;  %v8449_v5 = vpack.c.bf16 %v375_v60, %v374_v59  ;;  %v430_v41 = vld [vmem:[%s15646_s4 + $0xbe0] sm:$0xff]  ;;  %v400_v53 = vld [vmem:[%s15646_s4 + $0xaf0] sm:$0xff]  ;;  %v469_v29 = vld [vmem:[%s15646_s4 + $0xd18] sm:$0xff] }
  0xa6   :  { %2816 = vmatmul.mubr.f32.vlgmr.msra.gmra.mrb[8].mxu1 %v10604_v61  ;;  %8444 = vmatprep.subr.bf16.mxu0 %v8443_v43  ;;  %v407_v61 = vld [vmem:[%s15646_s4 + $0xb28] sm:$0xff]  ;;  %v8461_v43 = vpack.c.bf16 %v381_v35, %v380_v33  ;;  %v8467_v59 = vpack.c.bf16 %v401_v55, %v400_v53  ;;  %v384_v60 = vld [vmem:[%s15646_s4 + $0xa70] sm:$0xff]  ;;  %v486_v33 = vld [vmem:[%s15646_s4 + $0xda0] sm:$0xff]  ;;  %v8541_v44 = vpack.c.bf16 %v469_v29, %v468_v27 }
  0xa7   :  { %8474 = vmatpush3.bf16.msra.mxu1 %v8473_v42  ;;  %2955 = vmatprep.mubr.f32.mxu1 %v1718_v56  ;;  %v8481_v6 = vpack.c.bf16 %v407_v61, %v406_v62  ;;  %v431_v42 = vld [vmem:[%s15646_s4 + $0xbe8] sm:$0xff]  ;;  %v433_v56 = vld [vmem:[%s15646_s4 + $0xbf8] sm:$0xff]  ;;  %v472_v55 = vld [vmem:[%s15646_s4 + $0xd30] sm:$0xff] }
  0xa8   :  { %8476 = vmatprep.subr.bf16.mxu1 %v8475_v49  ;;  %v383_v49 = vld [vmem:[%s15646_s4 + $0xa68] sm:$0xff]  ;;  %v8495_v51 = vpack.c.bf16 %v431_v42, %v430_v41  ;;  %v385_v62 = vld [vmem:[%s15646_s4 + $0xa78] sm:$0xff]  ;;  %v8499_v61 = vpack.c.bf16 %v433_v56, %v432_v34  ;;  %v470_v41 = vld [vmem:[%s15646_s4 + $0xd20] sm:$0xff] }
  0xa9   :  { %8446 = vmatpush3.bf16.msra.mxu0 %v8445_v57  ;;  %v8465_v57 = vpack.c.bf16 %v383_v49, %v382_v48  ;;  %v487_v35 = vld [vmem:[%s15646_s4 + $0xda8] sm:$0xff]  ;;  %v489_v48 = vld [vmem:[%s15646_s4 + $0xdb8] sm:$0xff]  ;;  %v446_v27 = vld [vmem:[%s15646_s4 + $0xc60] sm:$0xff] }
  0xaa   :  { %8448 = vmatprep.subr.bf16.mxu0 %v8447_v46  ;;  %v8497_v46 = vpack.c.bf16 %v415_v52, %v414_v50  ;;  %v8543_v42 = vpack.c.bf16 %v487_v35, %v486_v33  ;;  %v440_v52 = vld [vmem:[%s15646_s4 + $0xc30] sm:$0xff]  ;;  %v441_v53 = vld [vmem:[%s15646_s4 + $0xc38] sm:$0xff]  ;;  %v478_v29 = vld [vmem:[%s15646_s4 + $0xd60] sm:$0xff] }
  0xab   :  { %8478 = vmatpush3.bf16.msra.mxu1 %v8477_v58  ;;  %v32_v58 = vld [vmem:[%s15647_s0 + $0x30] sm:$0xff]  ;;  %v473_v56 = vld [vmem:[%s15646_s4 + $0xd38] sm:$0xff] }
  0xac   :  { %8480 = vmatprep.subr.bf16.mxu1 %v8479_v63  ;;  %v416_v63 = vld [vmem:[%s15646_s4 + $0xb70] sm:$0xff]  ;;  %v465_v33 = vld [vmem:[%s15646_s4 + $0xcf8] sm:$0xff] }
  0xad   :  { %8450 = vmatpush3.bf16.msra.mxu0 %v8449_v5  ;;  %v483_v5 = vld [vmem:[%s15646_s4 + $0xd88] sm:$0xff]  ;;  %v8501_v8 = vpack.c.bf16 %v417_v1, %v416_v63  ;;  %v496_v35 = vld [vmem:[%s15646_s4 + $0xdf0] sm:$0xff] }
  0xae   :  { %8452 = vmatprep.subr.bf16.mxu0 %v8451_v7  ;;  %v8469_v7 = vpack.c.bf16 %v385_v62, %v384_v60  ;;  %v8535_v14 = vpack.c.bf16 %v483_v5, %v482_v4  ;;  %v8517_v60 = vpack.c.bf16 %v441_v53, %v440_v52  ;;  %v8549_v62 = vpack.c.bf16 %v473_v56, %v472_v55  ;;  %v443_v1 = vld [vmem:[%s15646_s4 + $0xc48] sm:$0xff]  ;;  %v460_v5 = vld [vmem:[%s15646_s4 + $0xcd0] sm:$0xff]  ;;  %v498_v55 = vld [vmem:[%s15646_s4 + $0xe00] sm:$0xff] }
  0xaf   :  { %8482 = vmatpush3.bf16.msra.mxu1 %v8481_v6  ;;  %v1719_v6 = vcombine.high %v32_v58, %v32_v58  ;;  %v475_v4 = vld [vmem:[%s15646_s4 + $0xd48] sm:$0xff]  ;;  %v530_v56 = vld [vmem:[%s15646_s4 + $0xf00] sm:$0xff] }
  0xb0   :  { %8484 = vmatprep.subr.bf16.mxu1 %v8483_v11  ;;  %v435_v11 = vld [vmem:[%s15646_s4 + $0xc08] sm:$0xff] }
  0xb1   :  { %8454 = vmatpush3.bf16.msra.mxu0 %v8453_v18  ;;  %v11009_v18 = vrot.slane %v32_v58, %v9893_v13  ;;  %v11018_v19 = vrot.slane %v1719_v6, %v9893_v13  ;;  %v8505_v22 = vpack.c.bf16 %v435_v11, %v434_v10  ;;  %v459_v58 = vld [vmem:[%s15646_s4 + $0xcc8] sm:$0xff]  ;;  %v461_v6 = vld [vmem:[%s15646_s4 + $0xcd8] sm:$0xff]  ;;  %v8553_v10 = vpack.c.bf16 %v475_v4, %v474_v2  ;;  %v500_v4 = vld [vmem:[%s15646_s4 + $0xe10] sm:$0xff] }
  0xb2   :  { %8456 = vmatprep.subr.bf16.mxu0 %v8455_v21  ;;  %v485_v21 = vld [vmem:[%s15646_s4 + $0xd98] sm:$0xff]  ;;  %v8523_v11 = vpack.c.bf16 %v461_v6, %v460_v5  ;;  %v532_v6 = vld [vmem:[%s15646_s4 + $0xf10] sm:$0xff] }
  0xb3   :  { %8486 = vmatpush3.bf16.msra.mxu1 %v8485_v20  ;;  %v484_v20 = vld [vmem:[%s15646_s4 + $0xd90] sm:$0xff]  ;;  %v1735_v36 = vcombine.high %v11018_v19, %v11018_v19  ;;  %v501_v5 = vld [vmem:[%s15646_s4 + $0xe18] sm:$0xff] }
  0xb4   :  { %8488 = vmatprep.subr.bf16.mxu1 %v8487_v24  ;;  %v8507_v24 = vpack.c.bf16 %v453_v16, %v452_v17  ;;  %v8539_v28 = vpack.c.bf16 %v485_v21, %v484_v20  ;;  %v477_v16 = vld [vmem:[%s15646_s4 + $0xd58] sm:$0xff]  ;;  %v462_v20 = vld [vmem:[%s15646_s4 + $0xce0] sm:$0xff]  ;;  %v463_v21 = vld [vmem:[%s15646_s4 + $0xce8] sm:$0xff] }
  0xb5   :  { %8458 = vmatpush3.bf16.msra.mxu0 %v8457_v30  ;;  %v454_v30 = vld [vmem:[%s15646_s4 + $0xca0] sm:$0xff] }
  0xb6   :  { %8460 = vmatprep.subr.bf16.mxu0 %v8459_v32  ;;  %v1734_v32 = vcombine.high %v11009_v18, %v11009_v18 }
  0xb7   :  { %8490 = vmatpush3.bf16.msra.mxu1 %v8489_v31  ;;  %v455_v31 = vld [vmem:[%s15646_s4 + $0xca8] sm:$0xff] }
  0xb8   :  { %8492 = vmatprep.subr.bf16.mxu1 %v8491_v37  ;;  %v8509_v37 = vpack.c.bf16 %v437_v26, %v436_v25  ;;  %v8511_v39 = vpack.c.bf16 %v455_v31, %v454_v30  ;;  %v8557_v25 = vpack.c.bf16 %v477_v16, %v476_v15  ;;  %v8527_v26 = vpack.c.bf16 %v463_v21, %v462_v20  ;;  %v479_v31 = vld [vmem:[%s15646_s4 + $0xd68] sm:$0xff] }
  0xb9   :  { %8462 = vmatpush3.bf16.msra.mxu0 %v8461_v43  ;;  %v456_v43 = vld [vmem:[%s15646_s4 + $0xcb0] sm:$0xff]  ;;  %v503_v21 = vld [vmem:[%s15646_s4 + $0xe28] sm:$0xff] }
  0xba   :  { %8464 = vmatprep.subr.bf16.mxu0 %v8463_v47  ;;  %v488_v47 = vld [vmem:[%s15646_s4 + $0xdb0] sm:$0xff] }
  0xbb   :  { %8494 = vmatpush3.bf16.msra.mxu1 %v8493_v45  ;;  %v457_v45 = vld [vmem:[%s15646_s4 + $0xcb8] sm:$0xff]  ;;  %v8547_v34 = vpack.c.bf16 %v489_v48, %v488_v47  ;;  %v515_v47 = vld [vmem:[%s15646_s4 + $0xe88] sm:$0xff]  ;;  %v546_v48 = vld [vmem:[%s15646_s4 + $0xf80] sm:$0xff] }
  0xbc   :  { %8496 = vmatprep.subr.bf16.mxu1 %v8495_v51  ;;  %v8515_v51 = vpack.c.bf16 %v457_v45, %v456_v43  ;;  %v481_v43 = vld [vmem:[%s15646_s4 + $0xd78] sm:$0xff]  ;;  %v514_v45 = vld [vmem:[%s15646_s4 + $0xe80] sm:$0xff] }
  0xbd   :  { %8466 = vmatpush3.bf16.msra.mxu0 %v8465_v57  ;;  %v458_v57 = vld [vmem:[%s15646_s4 + $0xcc0] sm:$0xff]  ;;  %v8567_v53 = vpack.c.bf16 %v515_v47, %v514_v45 }
  0xbe   :  { %8468 = vmatprep.subr.bf16.mxu0 %v8467_v59  ;;  %v491_v59 = vld [vmem:[%s15646_s4 + $0xdc8] sm:$0xff]  ;;  %v8519_v63 = vpack.c.bf16 %v459_v58, %v458_v57  ;;  %v538_v45 = vld [vmem:[%s15646_s4 + $0xf40] sm:$0xff] }
  0xbf   :  { %8498 = vmatpush3.bf16.msra.mxu1 %v8497_v46  ;;  %v490_v46 = vld [vmem:[%s15646_s4 + $0xdc0] sm:$0xff]  ;;  %v531_v58 = vld [vmem:[%s15646_s4 + $0xf08] sm:$0xff] }
  0xc0   :  { %8500 = vmatprep.subr.bf16.mxu1 %v8499_v61  ;;  %v442_v61 = vld [vmem:[%s15646_s4 + $0xc40] sm:$0xff]  ;;  %v8551_v3 = vpack.c.bf16 %v491_v59, %v490_v46  ;;  %v516_v46 = vld [vmem:[%s15646_s4 + $0xe90] sm:$0xff]  ;;  %v517_v59 = vld [vmem:[%s15646_s4 + $0xe98] sm:$0xff]  ;;  %v8601_v2 = vpack.c.bf16 %v531_v58, %v530_v56 }
  0xc1   :  { %8470 = vmatpush3.bf16.msra.mxu0 %v8469_v7  ;;  %v492_v7 = vld [vmem:[%s15646_s4 + $0xdd0] sm:$0xff] }
  0xc2   :  { %8504 = vmatprep.subr.bf16.mxu0 %v8503_v9  ;;  %v8521_v9 = vpack.c.bf16 %v443_v1, %v442_v61  ;;  %v508_v56 = vld [vmem:[%s15646_s4 + $0xe50] sm:$0xff] }
  0xc3   :  { %8502 = vmatpush3.bf16.msra.mxu1 %v8501_v8  ;;  %v493_v8 = vld [vmem:[%s15646_s4 + $0xdd8] sm:$0xff]  ;;  %v540_v58 = vld [vmem:[%s15646_s4 + $0xf50] sm:$0xff] }
  0xc4   :  { %8536 = vmatprep.subr.bf16.mxu1 %v8535_v14  ;;  %2886 = vmatmul.mubr.f32.vlgmr.msra.gmra.mrb[10].mxu0 %v10802_v38  ;;  %v438_v38 = vld [vmem:[%s15646_s4 + $0xc20] sm:$0xff]  ;;  %v445_v14 = vld [vmem:[%s15646_s4 + $0xc58] sm:$0xff]  ;;  %v8555_v17 = vpack.c.bf16 %v493_v8, %v492_v7 }
  0xc5   :  { %8506 = vmatpush3.bf16.msra.mxu0 %v8505_v22  ;;  %3025 = vmatprep.mubr.f32.mxu0 %v1734_v32  ;;  %v8513_v49 = vpack.c.bf16 %v439_v40, %v438_v38  ;;  %v494_v22 = vld [vmem:[%s15646_s4 + $0xde0] sm:$0xff]  ;;  %v464_v32 = vld [vmem:[%s15646_s4 + $0xcf0] sm:$0xff]  ;;  %v533_v8 = vld [vmem:[%s15646_s4 + $0xf18] sm:$0xff] }
  0xc6   :  { %2956 = vmatmul.mubr.f32.vlgmr.msra.gmra.mrb[10].mxu1 %v10811_v54  ;;  %8508 = vmatprep.subr.bf16.mxu0 %v8507_v24  ;;  %v471_v54 = vld [vmem:[%s15646_s4 + $0xd28] sm:$0xff]  ;;  %v8525_v24 = vpack.c.bf16 %v445_v14, %v444_v12  ;;  %v8531_v38 = vpack.c.bf16 %v465_v33, %v464_v32  ;;  %v448_v40 = vld [vmem:[%s15646_s4 + $0xc70] sm:$0xff]  ;;  %v550_v12 = vld [vmem:[%s15646_s4 + $0xfa0] sm:$0xff]  ;;  %v8605_v16 = vpack.c.bf16 %v533_v8, %v532_v6 }
  0xc7   :  { %8538 = vmatpush3.bf16.msra.mxu1 %v8537_v23  ;;  %3095 = vmatprep.mubr.f32.mxu1 %v1735_v36  ;;  %v8545_v50 = vpack.c.bf16 %v471_v54, %v470_v41  ;;  %v495_v23 = vld [vmem:[%s15646_s4 + $0xde8] sm:$0xff]  ;;  %v497_v36 = vld [vmem:[%s15646_s4 + $0xdf8] sm:$0xff]  ;;  %v536_v33 = vld [vmem:[%s15646_s4 + $0xf30] sm:$0xff] }
  0xc8   :  { %8540 = vmatprep.subr.bf16.mxu1 %v8539_v28  ;;  %v447_v28 = vld [vmem:[%s15646_s4 + $0xc68] sm:$0xff]  ;;  %v8559_v30 = vpack.c.bf16 %v495_v23, %v494_v22  ;;  %v449_v41 = vld [vmem:[%s15646_s4 + $0xc78] sm:$0xff]  ;;  %v8563_v54 = vpack.c.bf16 %v497_v36, %v496_v35  ;;  %v534_v22 = vld [vmem:[%s15646_s4 + $0xf20] sm:$0xff] }
  0xc9   :  { %8510 = vmatpush3.bf16.msra.mxu0 %v8509_v37  ;;  %v8529_v37 = vpack.c.bf16 %v447_v28, %v446_v27  ;;  %v551_v14 = vld [vmem:[%s15646_s4 + $0xfa8] sm:$0xff]  ;;  %v553_v27 = vld [vmem:[%s15646_s4 + $0xfb8] sm:$0xff]  ;;  %v510_v6 = vld [vmem:[%s15646_s4 + $0xe60] sm:$0xff] }
  0xca   :  { %8512 = vmatprep.subr.bf16.mxu0 %v8511_v39  ;;  %v8561_v39 = vpack.c.bf16 %v479_v31, %v478_v29  ;;  %v8607_v23 = vpack.c.bf16 %v551_v14, %v550_v12  ;;  %v504_v31 = vld [vmem:[%s15646_s4 + $0xe30] sm:$0xff]  ;;  %v505_v32 = vld [vmem:[%s15646_s4 + $0xe38] sm:$0xff]  ;;  %v542_v8 = vld [vmem:[%s15646_s4 + $0xf60] sm:$0xff] }
  0xcb   :  { %8542 = vmatpush3.bf16.msra.mxu1 %v8541_v44  ;;  %v33_v44 = vld [vmem:[%s15647_s0 + $0x38] sm:$0xff]  ;;  %v528_v12 = vld [vmem:[%s15646_s4 + $0xef0] sm:$0xff] }
  0xcc   :  { %8544 = vmatprep.subr.bf16.mxu1 %v8543_v42  ;;  %v480_v42 = vld [vmem:[%s15646_s4 + $0xd70] sm:$0xff]  ;;  %v537_v36 = vld [vmem:[%s15646_s4 + $0xf38] sm:$0xff] }
  0xcd   :  { %8514 = vmatpush3.bf16.msra.mxu0 %v8513_v49  ;;  %v547_v49 = vld [vmem:[%s15646_s4 + $0xf88] sm:$0xff]  ;;  %v8565_v52 = vpack.c.bf16 %v481_v43, %v480_v42  ;;  %v529_v14 = vld [vmem:[%s15646_s4 + $0xef8] sm:$0xff] }
  0xce   :  { %8516 = vmatprep.subr.bf16.mxu0 %v8515_v51  ;;  %v8533_v51 = vpack.c.bf16 %v449_v41, %v448_v40  ;;  %v8599_v57 = vpack.c.bf16 %v547_v49, %v546_v48  ;;  %v8581_v40 = vpack.c.bf16 %v505_v32, %v504_v31  ;;  %v8613_v41 = vpack.c.bf16 %v537_v36, %v536_v33  ;;  %v507_v43 = vld [vmem:[%s15646_s4 + $0xe48] sm:$0xff]  ;;  %v524_v49 = vld [vmem:[%s15646_s4 + $0xed0] sm:$0xff]  ;;  %v545_v32 = vld [vmem:[%s15646_s4 + $0xf78] sm:$0xff] }
  0xcf   :  { %8546 = vmatpush3.bf16.msra.mxu1 %v8545_v50  ;;  %v1736_v50 = vcombine.high %v33_v44, %v33_v44  ;;  %v539_v48 = vld [vmem:[%s15646_s4 + $0xf48] sm:$0xff]  ;;  %v578_v33 = vld [vmem:[%s15646_s4 + $0x1080] sm:$0xff] }
  0xd0   :  { %8548 = vmatprep.subr.bf16.mxu1 %v8547_v34  ;;  %v499_v34 = vld [vmem:[%s15646_s4 + $0xe08] sm:$0xff]  ;;  %v610_v36 = vld [vmem:[%s15646_s4 + $0x1180] sm:$0xff] }
  0xd1   :  { %8518 = vmatpush3.bf16.msra.mxu0 %v8517_v60  ;;  %v11216_v60 = vrot.slane %v33_v44, %v9893_v13  ;;  %v11225_v61 = vrot.slane %v1736_v50, %v9893_v13  ;;  %v8569_v1 = vpack.c.bf16 %v499_v34, %v498_v55  ;;  %v523_v44 = vld [vmem:[%s15646_s4 + $0xec8] sm:$0xff]  ;;  %v525_v50 = vld [vmem:[%s15646_s4 + $0xed8] sm:$0xff]  ;;  %v8617_v55 = vpack.c.bf16 %v539_v48, %v538_v45  ;;  %v580_v48 = vld [vmem:[%s15646_s4 + $0x1090] sm:$0xff] }
  0xd2   :  { %8520 = vmatprep.subr.bf16.mxu0 %v8519_v63  ;;  %v549_v63 = vld [vmem:[%s15646_s4 + $0xf98] sm:$0xff]  ;;  %v8587_v34 = vpack.c.bf16 %v525_v50, %v524_v49 }
  0xd3   :  { %8550 = vmatpush3.bf16.msra.mxu1 %v8549_v62  ;;  %v548_v62 = vld [vmem:[%s15646_s4 + $0xf90] sm:$0xff]  ;;  %v1752_v15 = vcombine.high %v11225_v61, %v11225_v61  ;;  %v581_v49 = vld [vmem:[%s15646_s4 + $0x1098] sm:$0xff] }
  0xd4   :  { %8552 = vmatprep.subr.bf16.mxu1 %v8551_v3  ;;  %v8571_v3 = vpack.c.bf16 %v517_v59, %v516_v46  ;;  %v8603_v7 = vpack.c.bf16 %v549_v63, %v548_v62  ;;  %v541_v59 = vld [vmem:[%s15646_s4 + $0xf58] sm:$0xff]  ;;  %v526_v62 = vld [vmem:[%s15646_s4 + $0xee0] sm:$0xff]  ;;  %v527_v63 = vld [vmem:[%s15646_s4 + $0xee8] sm:$0xff] }
  0xd5   :  { %8522 = vmatpush3.bf16.msra.mxu0 %v8521_v9  ;;  %v518_v9 = vld [vmem:[%s15646_s4 + $0xea0] sm:$0xff] }
  0xd6   :  { %8524 = vmatprep.subr.bf16.mxu0 %v8523_v11  ;;  %v1751_v11 = vcombine.high %v11216_v60, %v11216_v60 }
  0xd7   :  { %8554 = vmatpush3.bf16.msra.mxu1 %v8553_v10  ;;  %v519_v10 = vld [vmem:[%s15646_s4 + $0xea8] sm:$0xff] }
  0xd8   :  { %8556 = vmatprep.subr.bf16.mxu1 %v8555_v17  ;;  %v8573_v17 = vpack.c.bf16 %v501_v5, %v500_v4  ;;  %v8575_v20 = vpack.c.bf16 %v519_v10, %v518_v9  ;;  %v8621_v4 = vpack.c.bf16 %v541_v59, %v540_v58  ;;  %v8591_v5 = vpack.c.bf16 %v527_v63, %v526_v62  ;;  %v565_v58 = vld [vmem:[%s15646_s4 + $0x1018] sm:$0xff]  ;;  %v582_v63 = vld [vmem:[%s15646_s4 + $0x10a0] sm:$0xff] }
  0xd9   :  { %8526 = vmatpush3.bf16.msra.mxu0 %v8525_v24  ;;  %v520_v24 = vld [vmem:[%s15646_s4 + $0xeb0] sm:$0xff]  ;;  %v597_v62 = vld [vmem:[%s15646_s4 + $0x1118] sm:$0xff] }
  0xda   :  { %8528 = vmatprep.subr.bf16.mxu0 %v8527_v26  ;;  %v552_v26 = vld [vmem:[%s15646_s4 + $0xfb0] sm:$0xff] }
  0xdb   :  { %8558 = vmatpush3.bf16.msra.mxu1 %v8557_v25  ;;  %v521_v25 = vld [vmem:[%s15646_s4 + $0xeb8] sm:$0xff]  ;;  %v8611_v35 = vpack.c.bf16 %v553_v27, %v552_v26  ;;  %v8595_v26 = vpack.c.bf16 %v529_v14, %v528_v12  ;;  %v512_v27 = vld [vmem:[%s15646_s4 + $0xe70] sm:$0xff] }
  0xdc   :  { %8560 = vmatprep.subr.bf16.mxu1 %v8559_v30  ;;  %v8579_v30 = vpack.c.bf16 %v521_v25, %v520_v24  ;;  %v584_v12 = vld [vmem:[%s15646_s4 + $0x10b0] sm:$0xff]  ;;  %v585_v14 = vld [vmem:[%s15646_s4 + $0x10b8] sm:$0xff] }
  0xdd   :  { %8530 = vmatpush3.bf16.msra.mxu0 %v8529_v37  ;;  %v522_v37 = vld [vmem:[%s15646_s4 + $0xec0] sm:$0xff] }
  0xde   :  { %8532 = vmatprep.subr.bf16.mxu0 %v8531_v38  ;;  %v555_v38 = vld [vmem:[%s15646_s4 + $0xfc8] sm:$0xff]  ;;  %v8583_v42 = vpack.c.bf16 %v523_v44, %v522_v37 }
  0xdf   :  { %8562 = vmatpush3.bf16.msra.mxu1 %v8561_v39  ;;  %v554_v39 = vld [vmem:[%s15646_s4 + $0xfc0] sm:$0xff]  ;;  %v611_v37 = vld [vmem:[%s15646_s4 + $0x1188] sm:$0xff] }
  0xe0   :  { %8564 = vmatprep.subr.bf16.mxu1 %v8563_v54  ;;  %v506_v54 = vld [vmem:[%s15646_s4 + $0xe40] sm:$0xff]  ;;  %v8615_v47 = vpack.c.bf16 %v555_v38, %v554_v39  ;;  %v8663_v45 = vpack.c.bf16 %v611_v37, %v610_v36  ;;  %v603_v37 = vld [vmem:[%s15646_s4 + $0x1148] sm:$0xff] }
  0xe1   :  { %8534 = vmatpush3.bf16.msra.mxu0 %v8533_v51  ;;  %v556_v51 = vld [vmem:[%s15646_s4 + $0xfd0] sm:$0xff] }
  0xe2   :  { %8568 = vmatprep.subr.bf16.mxu0 %v8567_v53  ;;  %v8585_v53 = vpack.c.bf16 %v507_v43, %v506_v54  ;;  %v563_v54 = vld [vmem:[%s15646_s4 + $0x1008] sm:$0xff]  ;;  %v594_v43 = vld [vmem:[%s15646_s4 + $0x1100] sm:$0xff] }
  0xe3   :  { %8566 = vmatpush3.bf16.msra.mxu1 %v8565_v52  ;;  %v557_v52 = vld [vmem:[%s15646_s4 + $0xfd8] sm:$0xff] }
  0xe4   :  { %8600 = vmatprep.subr.bf16.mxu1 %v8599_v57  ;;  %3026 = vmatmul.mubr.f32.vlgmr.msra.gmra.mrb[12].mxu0 %v11009_v18  ;;  %v502_v18 = vld [vmem:[%s15646_s4 + $0xe20] sm:$0xff]  ;;  %v509_v57 = vld [vmem:[%s15646_s4 + $0xe58] sm:$0xff]  ;;  %v8619_v46 = vpack.c.bf16 %v557_v52, %v556_v51  ;;  %v612_v51 = vld [vmem:[%s15646_s4 + $0x1190] sm:$0xff] }
  0xe5   :  { %8570 = vmatpush3.bf16.msra.mxu0 %v8569_v1  ;;  %3165 = vmatprep.mubr.f32.mxu0 %v1751_v11  ;;  %v8577_v28 = vpack.c.bf16 %v503_v21, %v502_v18  ;;  %v558_v1 = vld [vmem:[%s15646_s4 + $0xfe0] sm:$0xff]  ;;  %v543_v11 = vld [vmem:[%s15646_s4 + $0xf68] sm:$0xff]  ;;  %v561_v18 = vld [vmem:[%s15646_s4 + $0xff8] sm:$0xff] }
  0xe6   :  { %3096 = vmatmul.mubr.f32.vlgmr.msra.gmra.mrb[12].mxu1 %v11018_v19  ;;  %8572 = vmatprep.subr.bf16.mxu0 %v8571_v3  ;;  %v535_v19 = vld [vmem:[%s15646_s4 + $0xf28] sm:$0xff]  ;;  %v8589_v3 = vpack.c.bf16 %v509_v57, %v508_v56  ;;  %v8625_v25 = vpack.c.bf16 %v543_v11, %v542_v8  ;;  %v613_v52 = vld [vmem:[%s15646_s4 + $0x1198] sm:$0xff]  ;;  %v8635_v56 = vpack.c.bf16 %v581_v49, %v580_v48  ;;  %v564_v57 = vld [vmem:[%s15646_s4 + $0x1010] sm:$0xff] }
  0xe7   :  { %8602 = vmatpush3.bf16.msra.mxu1 %v8601_v2  ;;  %3235 = vmatprep.mubr.f32.mxu1 %v1752_v15  ;;  %v8609_v29 = vpack.c.bf16 %v535_v19, %v534_v22  ;;  %v559_v2 = vld [vmem:[%s15646_s4 + $0xfe8] sm:$0xff]  ;;  %v6438_v15 = vld [vmem:[%s15648_s5] ss:$0 sm:$0xff]  ;;  %v8667_v59 = vpack.c.bf16 %v613_v52, %v612_v51  ;;  %v604_v48 = vld [vmem:[%s15646_s4 + $0x1150] sm:$0xff] }
  0xe8   :  { %8604 = vmatprep.subr.bf16.mxu1 %v8603_v7  ;;  %v511_v7 = vld [vmem:[%s15646_s4 + $0xe68] sm:$0xff]  ;;  %v8623_v10 = vpack.c.bf16 %v559_v2, %v558_v1  ;;  %v34_v19 = vld [vmem:[%s15647_s0 + $0x40] sm:$0xff]  ;;  %v605_v51 = vld [vmem:[%s15646_s4 + $0x1158] sm:$0xff] }
  0xe9   :  { %8574 = vmatpush3.bf16.msra.mxu0 %v8573_v17  ;;  %v1753_v44 = vcombine.high %v34_v19, %v34_v19  ;;  %v11428_v50 = vrot.slane %v34_v19, %v9893_v13  ;;  %v583_v1 = vld [vmem:[%s15646_s4 + $0x10a8] sm:$0xff]  ;;  %v590_v52 = vld [vmem:[%s15646_s4 + $0x10e0] sm:$0xff] }
  0xea   :  { %8576 = vmatprep.subr.bf16.mxu0 %v8575_v20  ;;  %v560_v20 = vld [vmem:[%s15646_s4 + $0xff0] sm:$0xff]  ;;  %v8639_v8 = vpack.c.bf16 %v583_v1, %v582_v63  ;;  %v606_v63 = vld [vmem:[%s15646_s4 + $0x1160] sm:$0xff] }
  0xeb   :  { %8606 = vmatpush3.bf16.msra.mxu1 %v8605_v16  ;;  %v8627_v31 = vpack.c.bf16 %v561_v18, %v560_v20  ;;  %v1768_v2 = vcombine.high %v11428_v50, %v11428_v50  ;;  %v8643_v18 = vpack.c.bf16 %v585_v14, %v584_v12 }
  0xec   :  { %8608 = vmatprep.subr.bf16.mxu1 %v8607_v23  ;;  %v8593_v23 = vpack.c.bf16 %v511_v7, %v510_v6  ;;  %v8637_v6 = vpack.c.bf16 %v565_v58, %v564_v57  ;;  %v8685_v58 = vpack.c.bf16 %v605_v51, %v604_v48  ;;  %v660_v48 = vld [vmem:[%s15646_s4 + $0x1310] sm:$0xff]  ;;  %v661_v51 = vld [vmem:[%s15646_s4 + $0x1318] sm:$0xff] }
  0xed   :  { %8578 = vmatpush3.bf16.msra.mxu0 %v8577_v28  ;;  %v513_v28 = vld [vmem:[%s15646_s4 + $0xe78] sm:$0xff] }
  0xee   :  { %8580 = vmatprep.subr.bf16.mxu0 %v8579_v30  ;;  %v8597_v38 = vpack.c.bf16 %v513_v28, %v512_v27  ;;  %v618_v27 = vld [vmem:[%s15646_s4 + $0x11c0] sm:$0xff]  ;;  %v619_v28 = vld [vmem:[%s15646_s4 + $0x11c8] sm:$0xff] }
  0xef   :  { %8610 = vmatpush3.bf16.msra.mxu1 %v8609_v29  ;;  %v544_v29 = vld [vmem:[%s15646_s4 + $0xf70] sm:$0xff]  ;;  %v8679_v36 = vpack.c.bf16 %v619_v28, %v618_v27 }
  0xf0   :  { %8612 = vmatprep.subr.bf16.mxu1 %v8611_v35  ;;  %v579_v35 = vld [vmem:[%s15646_s4 + $0x1088] sm:$0xff] }
  0xf1   :  { %8582 = vmatpush3.bf16.msra.mxu0 %v8581_v40  ;;  %v8629_v40 = vpack.c.bf16 %v545_v32, %v544_v29  ;;  %v570_v32 = vld [vmem:[%s15646_s4 + $0x1040] sm:$0xff] }
  0xf2   :  { %8584 = vmatprep.subr.bf16.mxu0 %v8583_v42  ;;  %v562_v42 = vld [vmem:[%s15646_s4 + $0x1000] sm:$0xff] }
  0xf3   :  { %8614 = vmatpush3.bf16.msra.mxu1 %v8613_v41  ;;  %v8631_v41 = vpack.c.bf16 %v579_v35, %v578_v33  ;;  %v571_v33 = vld [vmem:[%s15646_s4 + $0x1048] sm:$0xff]  ;;  %v602_v35 = vld [vmem:[%s15646_s4 + $0x1140] sm:$0xff] }
  0xf4   :  { %8616 = vmatprep.subr.bf16.mxu1 %v8615_v47  ;;  %v595_v47 = vld [vmem:[%s15646_s4 + $0x1108] sm:$0xff] }
  0xf5   :  { %8586 = vmatpush3.bf16.msra.mxu0 %v8585_v53  ;;  %v11437_v53 = vrot.slane %v1753_v44, %v9893_v13  ;;  %v588_v44 = vld [vmem:[%s15646_s4 + $0x10d0] sm:$0xff] }
  0xf6   :  { %8588 = vmatprep.subr.bf16.mxu0 %v8587_v34  ;;  %v8665_v34 = vpack.c.bf16 %v595_v47, %v594_v43  ;;  %v573_v47 = vld [vmem:[%s15646_s4 + $0x1058] sm:$0xff] }
  0xf7   :  { %8618 = vmatpush3.bf16.msra.mxu1 %v8617_v55  ;;  %v6471_v9 = vpop.f32.mrb[0].mxu0  ;;  %v8633_v55 = vpack.c.bf16 %v563_v54, %v562_v42  ;;  %v8649_v42 = vpack.c.bf16 %v571_v33, %v570_v32  ;;  %v8681_v54 = vpack.c.bf16 %v603_v37, %v602_v35  ;;  %v658_v32 = vld [vmem:[%s15646_s4 + $0x1300] sm:$0xff]  ;;  %v659_v35 = vld [vmem:[%s15646_s4 + $0x1308] sm:$0xff]  ;;  %v645_v37 = vld [vmem:[%s15646_s4 + $0x1298] sm:$0xff] }
  0xf8   :  { %8620 = vmatprep.subr.bf16.mxu1 %v8619_v46  ;;  %v6472_v17 = vpop.f32.mrb[1].mxu0  ;;  %v596_v46 = vld [vmem:[%s15646_s4 + $0x1110] sm:$0xff] }
  0xf9   :  { %v6506_v16 = vpop.f32.mrb[0].mxu1  ;;  %v6473_v21 = vadd.f32 %v6472_v17, %v6471_v9  ;;  %8590 = vmatpush3.bf16.msra.mxu0 %v8589_v3  ;;  %v614_v3 = vld [vmem:[%s15646_s4 + $0x11a0] sm:$0xff]  ;;  %v8669_v7 = vpack.c.bf16 %v597_v62, %v596_v46  ;;  %v567_v9 = vld [vmem:[%s15646_s4 + $0x1028] sm:$0xff]  ;;  %v617_v17 = vld [vmem:[%s15646_s4 + $0x11b8] sm:$0xff] }
  0xfa   :  { %v6507_v22 = vpop.f32.mrb[1].mxu1  ;;  %8592 = vmatprep.subr.bf16.mxu0 %v8591_v5  ;;  %v1769_v5 = vcombine.high %v11437_v53, %v11437_v53  ;;  %v575_v62 = vld [vmem:[%s15646_s4 + $0x1068] sm:$0xff] }
  0xfb   :  { %v6508_v24 = vadd.f32 %v6507_v22, %v6506_v16  ;;  %8622 = vmatpush3.bf16.msra.mxu1 %v8621_v4  ;;  %v2188_v30 = vadd.f32 %v6473_v21, %v6438_v15  ;;  %v615_v4 = vld [vmem:[%s15646_s4 + $0x11a8] sm:$0xff]  ;;  %v616_v15 = vld [vmem:[%s15646_s4 + $0x11b0] sm:$0xff]  ;;  %v569_v22 = vld [vmem:[%s15646_s4 + $0x1038] sm:$0xff] }
  0xfc   :  { %8624 = vmatprep.subr.bf16.mxu1 %v8623_v10  ;;  %v598_v10 = vld [vmem:[%s15646_s4 + $0x1120] sm:$0xff]  ;;  %v8671_v11 = vpack.c.bf16 %v615_v4, %v614_v3  ;;  %v568_v21 = vld [vmem:[%s15646_s4 + $0x1030] sm:$0xff]  ;;  %v8675_v19 = vpack.c.bf16 %v617_v17, %v616_v15  ;;  %v607_v3 = vld [vmem:[%s15646_s4 + $0x1168] sm:$0xff] }
  0xfd   :  { %v11407_v39 = vadd.f32 %v6508_v24, %v2188_v30  ;;  %8594 = vmatpush3.bf16.msra.mxu0 %v8593_v23  ;;  %v600_v23 = vld [vmem:[%s15646_s4 + $0x1130] sm:$0xff]  ;;  %v601_v24 = vld [vmem:[%s15646_s4 + $0x1138] sm:$0xff]  ;;  %v8645_v29 = vpack.c.bf16 %v569_v22, %v568_v21  ;;  %v8689_v14 = vpack.c.bf16 %v607_v3, %v606_v63  ;;  %v631_v63 = vld [vmem:[%s15646_s4 + $0x1228] sm:$0xff] }
  0xfe   :  { %8596 = vmatprep.subr.bf16.mxu0 %v8595_v26  ;;  %v587_v26 = vld [vmem:[%s15646_s4 + $0x10c8] sm:$0xff]  ;;  %v8677_v30 = vpack.c.bf16 %v601_v24, %v600_v23  ;;  %v592_v4 = vld [vmem:[%s15646_s4 + $0x10f0] sm:$0xff]  ;;  %v609_v22 = vld [vmem:[%s15646_s4 + $0x1178] sm:$0xff] }
  0xff   :  { %8626 = vmatpush3.bf16.msra.mxu1 %v8625_v25  ;;  %v586_v25 = vld [vmem:[%s15646_s4 + $0x10c0] sm:$0xff]  ;;  %v576_v17 = vld [vmem:[%s15646_s4 + $0x1070] sm:$0xff] }
 0x100   :  { %8628 = vmatprep.subr.bf16.mxu1 %v8627_v31  ;;  %v8647_v31 = vpack.c.bf16 %v587_v26, %v586_v25  ;;  %v642_v23 = vld [vmem:[%s15646_s4 + $0x1280] sm:$0xff]  ;;  %v648_v3 = vld [vmem:[%s15646_s4 + $0x12b0] sm:$0xff] }
 0x101   :  { %8598 = vmatpush3.bf16.msra.mxu0 %v8597_v38  ;;  %v589_v38 = vld [vmem:[%s15646_s4 + $0x10d8] sm:$0xff]  ;;  %v674_v24 = vld [vmem:[%s15646_s4 + $0x1380] sm:$0xff] }
 0x102   :  { %8632 = vmatprep.subr.bf16.mxu0 %v8631_v41  ;;  %v621_v41 = vld [vmem:[%s15646_s4 + $0x11d8] sm:$0xff]  ;;  %v8651_v43 = vpack.c.bf16 %v589_v38, %v588_v44  ;;  %v676_v38 = vld [vmem:[%s15646_s4 + $0x1390] sm:$0xff] }
 0x103   :  { %8630 = vmatpush3.bf16.msra.mxu1 %v8629_v40  ;;  %v620_v40 = vld [vmem:[%s15646_s4 + $0x11d0] sm:$0xff] }
 0x104   :  { %8664 = vmatprep.subr.bf16.mxu1 %v8663_v45  ;;  %3166 = vmatmul.mubr.f32.vlgmr.msra.gmra.mrb[14].mxu0 %v11216_v60  ;;  %v566_v60 = vld [vmem:[%s15646_s4 + $0x1020] sm:$0xff]  ;;  %v572_v45 = vld [vmem:[%s15646_s4 + $0x1050] sm:$0xff]  ;;  %v8683_v49 = vpack.c.bf16 %v621_v41, %v620_v40  ;;  %v677_v40 = vld [vmem:[%s15646_s4 + $0x1398] sm:$0xff] }
 0x105   :  { %8634 = vmatpush3.bf16.msra.mxu0 %v8633_v55  ;;  %3305 = vmatprep.mubr.f32.mxu0 %v1768_v2  ;;  %v8641_v16 = vpack.c.bf16 %v567_v9, %v566_v60  ;;  %v591_v55 = vld [vmem:[%s15646_s4 + $0x10e8] sm:$0xff]  ;;  %v8653_v57 = vpack.c.bf16 %v573_v47, %v572_v45  ;;  %v625_v60 = vld [vmem:[%s15646_s4 + $0x11f8] sm:$0xff]  ;;  %v628_v45 = vld [vmem:[%s15646_s4 + $0x1210] sm:$0xff] }
 0x106   :  { %3236 = vmatmul.mubr.f32.vlgmr.msra.gmra.mrb[14].mxu1 %v11225_v61  ;;  %8636 = vmatprep.subr.bf16.mxu0 %v8635_v56  ;;  %v599_v61 = vld [vmem:[%s15646_s4 + $0x1128] sm:$0xff]  ;;  %v8655_v46 = vpack.c.bf16 %v591_v55, %v590_v52  ;;  %v629_v47 = vld [vmem:[%s15646_s4 + $0x1218] sm:$0xff]  ;;  %v646_v52 = vld [vmem:[%s15646_s4 + $0x12a0] sm:$0xff] }
 0x107   :  { %8666 = vmatpush3.bf16.msra.mxu1 %v8665_v34  ;;  %3375 = vmatprep.mubr.f32.mxu1 %v1769_v5  ;;  %v8673_v20 = vpack.c.bf16 %v599_v61, %v598_v10  ;;  %v622_v34 = vld [vmem:[%s15646_s4 + $0x11e0] sm:$0xff]  ;;  %v623_v56 = vld [vmem:[%s15646_s4 + $0x11e8] sm:$0xff]  ;;  %v593_v5 = vld [vmem:[%s15646_s4 + $0x10f8] sm:$0xff] }
 0x108   :  { %8668 = vmatprep.subr.bf16.mxu1 %v8667_v59  ;;  %v574_v59 = vld [vmem:[%s15646_s4 + $0x1060] sm:$0xff]  ;;  %v8687_v2 = vpack.c.bf16 %v623_v56, %v622_v34  ;;  %v35_v61 = vld [vmem:[%s15647_s0 + $0x48] sm:$0xff]  ;;  %v8659_v15 = vpack.c.bf16 %v593_v5, %v592_v4  ;;  %v649_v4 = vld [vmem:[%s15646_s4 + $0x12b8] sm:$0xff] }
 0x109   :  { %8638 = vmatpush3.bf16.msra.mxu0 %v8637_v6  ;;  %v1770_v25 = vcombine.high %v35_v61, %v35_v61  ;;  %v11638_v44 = vrot.slane %v35_v61, %v9893_v13  ;;  %v647_v55 = vld [vmem:[%s15646_s4 + $0x12a8] sm:$0xff]  ;;  %v678_v56 = vld [vmem:[%s15646_s4 + $0x13a0] sm:$0xff]  ;;  %v680_v5 = vld [vmem:[%s15646_s4 + $0x13b0] sm:$0xff] }
 0x10a   :  { %8640 = vmatprep.subr.bf16.mxu0 %v8639_v8  ;;  %v624_v8 = vld [vmem:[%s15646_s4 + $0x11f0] sm:$0xff] }
 0x10b   :  { %8670 = vmatpush3.bf16.msra.mxu1 %v8669_v7  ;;  %v8691_v21 = vpack.c.bf16 %v625_v60, %v624_v8  ;;  %v11647_v41 = vrot.slane %v1770_v25, %v9893_v13  ;;  %v1785_v34 = vcombine.high %v11638_v44, %v11638_v44  ;;  %v8707_v60 = vpack.c.bf16 %v649_v4, %v648_v3  ;;  %v652_v25 = vld [vmem:[%s15646_s4 + $0x12d0] sm:$0xff] }
 0x10c   :  { %8672 = vmatprep.subr.bf16.mxu1 %v8671_v11  ;;  %v8657_v11 = vpack.c.bf16 %v575_v62, %v574_v59  ;;  %v8733_v59 = vpack.c.bf16 %v661_v51, %v660_v48  ;;  %v8703_v62 = vpack.c.bf16 %v647_v55, %v646_v52  ;;  %v639_v51 = vld [vmem:[%s15646_s4 + $0x1268] sm:$0xff]  ;;  %v670_v52 = vld [vmem:[%s15646_s4 + $0x1360] sm:$0xff] }
 0x10d   :  { %8642 = vmatpush3.bf16.msra.mxu0 %v8641_v16  ;;  %v577_v16 = vld [vmem:[%s15646_s4 + $0x1078] sm:$0xff] }
 0x10e   :  { %8644 = vmatprep.subr.bf16.mxu0 %v8643_v18  ;;  %v8661_v27 = vpack.c.bf16 %v577_v16, %v576_v17  ;;  %v682_v17 = vld [vmem:[%s15646_s4 + $0x13c0] sm:$0xff]  ;;  %v683_v16 = vld [vmem:[%s15646_s4 + $0x13c8] sm:$0xff] }
 0x10f   :  { %8674 = vmatpush3.bf16.msra.mxu1 %v8673_v20  ;;  %v608_v20 = vld [vmem:[%s15646_s4 + $0x1170] sm:$0xff] }
 0x110   :  { %8676 = vmatprep.subr.bf16.mxu1 %v8675_v19  ;;  %v643_v19 = vld [vmem:[%s15646_s4 + $0x1288] sm:$0xff]  ;;  %v8693_v28 = vpack.c.bf16 %v609_v22, %v608_v20  ;;  %v634_v22 = vld [vmem:[%s15646_s4 + $0x1240] sm:$0xff] }
 0x111   :  { %8646 = vmatpush3.bf16.msra.mxu0 %v8645_v29  ;;  %v8695_v29 = vpack.c.bf16 %v643_v19, %v642_v23  ;;  %v635_v23 = vld [vmem:[%s15646_s4 + $0x1248] sm:$0xff]  ;;  %v666_v19 = vld [vmem:[%s15646_s4 + $0x1340] sm:$0xff] }
 0x112   :  { %8648 = vmatprep.subr.bf16.mxu0 %v8647_v31  ;;  %v627_v31 = vld [vmem:[%s15646_s4 + $0x1208] sm:$0xff] }
 0x113   :  { %8678 = vmatpush3.bf16.msra.mxu1 %v8677_v30  ;;  %v626_v30 = vld [vmem:[%s15646_s4 + $0x1200] sm:$0xff] }
 0x114   :  { %8680 = vmatprep.subr.bf16.mxu1 %v8679_v36  ;;  %v644_v36 = vld [vmem:[%s15646_s4 + $0x1290] sm:$0xff] }
 0x115   :  { %8650 = vmatpush3.bf16.msra.mxu0 %v8649_v42  ;;  %v8697_v42 = vpack.c.bf16 %v627_v31, %v626_v30  ;;  %v8713_v30 = vpack.c.bf16 %v635_v23, %v634_v22  ;;  %v722_v22 = vld [vmem:[%s15646_s4 + $0x1500] sm:$0xff] }
 0x116   :  { %8652 = vmatprep.subr.bf16.mxu0 %v8651_v43  ;;  %v8699_v43 = vpack.c.bf16 %v645_v37, %v644_v36  ;;  %v668_v36 = vld [vmem:[%s15646_s4 + $0x1350] sm:$0xff] }
 0x117   :  { %8682 = vmatpush3.bf16.msra.mxu1 %v8681_v54  ;;  %v6541_v1 = vpop.f32.mrb[2].mxu0  ;;  %v8729_v54 = vpack.c.bf16 %v659_v35, %v658_v32  ;;  %v637_v35 = vld [vmem:[%s15646_s4 + $0x1258] sm:$0xff] }
 0x118   :  { %8684 = vmatprep.subr.bf16.mxu1 %v8683_v49  ;;  %v6542_v6 = vpop.f32.mrb[3].mxu0  ;;  %v8731_v49 = vpack.c.bf16 %v677_v40, %v676_v38  ;;  %v669_v38 = vld [vmem:[%s15646_s4 + $0x1358] sm:$0xff]  ;;  %v654_v40 = vld [vmem:[%s15646_s4 + $0x12e0] sm:$0xff] }
 0x119   :  { %v6576_v7 = vpop.f32.mrb[2].mxu1  ;;  %v6543_v9 = vadd.f32 %v6542_v6, %v6541_v1  ;;  %8654 = vmatpush3.bf16.msra.mxu0 %v8653_v57  ;;  %v679_v57 = vld [vmem:[%s15646_s4 + $0x13a8] sm:$0xff]  ;;  %v662_v1 = vld [vmem:[%s15646_s4 + $0x1320] sm:$0xff]  ;;  %v681_v6 = vld [vmem:[%s15646_s4 + $0x13b8] sm:$0xff] }
 0x11a   :  { %v6577_v10 = vpop.f32.mrb[3].mxu1  ;;  %8656 = vmatprep.subr.bf16.mxu0 %v8655_v46  ;;  %v8701_v46 = vpack.c.bf16 %v629_v47, %v628_v45  ;;  %v8739_v61 = vpack.c.bf16 %v681_v6, %v680_v5  ;;  %v8749_v47 = vpack.c.bf16 %v669_v38, %v668_v36  ;;  %v640_v6 = vld [vmem:[%s15646_s4 + $0x1270] sm:$0xff]  ;;  %v725_v38 = vld [vmem:[%s15646_s4 + $0x1518] sm:$0xff] }
 0x11b   :  { %v6578_v12 = vadd.f32 %v6577_v10, %v6576_v7  ;;  %8686 = vmatpush3.bf16.msra.mxu1 %v8685_v58  ;;  %v2328_v18 = vadd.f32 %v6543_v9, %v11407_v39  ;;  %v675_v39 = vld [vmem:[%s15646_s4 + $0x1388] sm:$0xff]  ;;  %v1786_v58 = vcombine.high %v11647_v41, %v11647_v41  ;;  %v632_v9 = vld [vmem:[%s15646_s4 + $0x1230] sm:$0xff]  ;;  %v633_v10 = vld [vmem:[%s15646_s4 + $0x1238] sm:$0xff] }
 0x11c   :  { %8688 = vmatprep.subr.bf16.mxu1 %v8687_v2  ;;  %v8727_v33 = vpack.c.bf16 %v675_v39, %v674_v24  ;;  %v8735_v2 = vpack.c.bf16 %v679_v57, %v678_v56  ;;  %v8709_v20 = vpack.c.bf16 %v633_v10, %v632_v9  ;;  %v8743_v24 = vpack.c.bf16 %v683_v16, %v682_v17  ;;  %v667_v39 = vld [vmem:[%s15646_s4 + $0x1348] sm:$0xff]  ;;  %v656_v57 = vld [vmem:[%s15646_s4 + $0x12f0] sm:$0xff]  ;;  %v673_v10 = vld [vmem:[%s15646_s4 + $0x1378] sm:$0xff] }
 0x11d   :  { %v11617_v26 = vadd.f32 %v6578_v12, %v2328_v18  ;;  %8658 = vmatpush3.bf16.msra.mxu0 %v8657_v11  ;;  %v664_v11 = vld [vmem:[%s15646_s4 + $0x1330] sm:$0xff]  ;;  %v665_v12 = vld [vmem:[%s15646_s4 + $0x1338] sm:$0xff]  ;;  %v8745_v31 = vpack.c.bf16 %v667_v39, %v666_v19  ;;  %v671_v56 = vld [vmem:[%s15646_s4 + $0x1368] sm:$0xff] }
 0x11e   :  { %8660 = vmatprep.subr.bf16.mxu0 %v8659_v15  ;;  %v651_v15 = vld [vmem:[%s15646_s4 + $0x12c8] sm:$0xff]  ;;  %v8741_v18 = vpack.c.bf16 %v665_v12, %v664_v11  ;;  %v8753_v4 = vpack.c.bf16 %v671_v56, %v670_v52  ;;  %v706_v11 = vld [vmem:[%s15646_s4 + $0x1480] sm:$0xff]  ;;  %v709_v39 = vld [vmem:[%s15646_s4 + $0x1498] sm:$0xff] }
 0x11f   :  { %8690 = vmatpush3.bf16.msra.mxu1 %v8689_v14  ;;  %v650_v14 = vld [vmem:[%s15646_s4 + $0x12c0] sm:$0xff]  ;;  %v723_v19 = vld [vmem:[%s15646_s4 + $0x1508] sm:$0xff]  ;;  %v724_v36 = vld [vmem:[%s15646_s4 + $0x1510] sm:$0xff] }
 0x120   :  { %8692 = vmatprep.subr.bf16.mxu1 %v8691_v21  ;;  %v8711_v21 = vpack.c.bf16 %v651_v15, %v650_v14  ;;  %v738_v12 = vld [vmem:[%s15646_s4 + $0x1580] sm:$0xff]  ;;  %v695_v52 = vld [vmem:[%s15646_s4 + $0x1428] sm:$0xff]  ;;  %v712_v56 = vld [vmem:[%s15646_s4 + $0x14b0] sm:$0xff] }
 0x121   :  { %8662 = vmatpush3.bf16.msra.mxu0 %v8661_v27  ;;  %v653_v27 = vld [vmem:[%s15646_s4 + $0x12d8] sm:$0xff] }
 0x122   :  { %8696 = vmatprep.subr.bf16.mxu0 %v8695_v29  ;;  %v685_v29 = vld [vmem:[%s15646_s4 + $0x13d8] sm:$0xff]  ;;  %v8715_v32 = vpack.c.bf16 %v653_v27, %v652_v25  ;;  %v740_v27 = vld [vmem:[%s15646_s4 + $0x1590] sm:$0xff] }
 0x123   :  { %8694 = vmatpush3.bf16.msra.mxu1 %v8693_v28  ;;  %v684_v28 = vld [vmem:[%s15646_s4 + $0x13d0] sm:$0xff] }
 0x124   :  { %8728 = vmatprep.subr.bf16.mxu1 %v8727_v33  ;;  %3306 = vmatmul.mubr.f32.vlgmr.msra.gmra.mrb[16].mxu0 %v11428_v50  ;;  %v630_v50 = vld [vmem:[%s15646_s4 + $0x1220] sm:$0xff]  ;;  %v636_v33 = vld [vmem:[%s15646_s4 + $0x1250] sm:$0xff]  ;;  %v8747_v37 = vpack.c.bf16 %v685_v29, %v684_v28  ;;  %v741_v28 = vld [vmem:[%s15646_s4 + $0x1598] sm:$0xff] }
 0x125   :  { %8698 = vmatpush3.bf16.msra.mxu0 %v8697_v42  ;;  %3445 = vmatprep.mubr.f32.mxu0 %v1785_v34  ;;  %v8705_v7 = vpack.c.bf16 %v631_v63, %v630_v50  ;;  %v655_v42 = vld [vmem:[%s15646_s4 + $0x12e8] sm:$0xff]  ;;  %v8717_v45 = vpack.c.bf16 %v637_v35, %v636_v33  ;;  %v689_v50 = vld [vmem:[%s15646_s4 + $0x13f8] sm:$0xff]  ;;  %v692_v33 = vld [vmem:[%s15646_s4 + $0x1410] sm:$0xff] }
 0x126   :  { %3376 = vmatmul.mubr.f32.vlgmr.msra.gmra.mrb[16].mxu1 %v11437_v53  ;;  %8700 = vmatprep.subr.bf16.mxu0 %v8699_v43  ;;  %v663_v53 = vld [vmem:[%s15646_s4 + $0x1328] sm:$0xff]  ;;  %v8719_v48 = vpack.c.bf16 %v655_v42, %v654_v40  ;;  %v693_v35 = vld [vmem:[%s15646_s4 + $0x1418] sm:$0xff]  ;;  %v710_v40 = vld [vmem:[%s15646_s4 + $0x14a0] sm:$0xff] }
 0x127   :  { %8730 = vmatpush3.bf16.msra.mxu1 %v8729_v54  ;;  %3515 = vmatprep.mubr.f32.mxu1 %v1786_v58  ;;  %v8737_v8 = vpack.c.bf16 %v663_v53, %v662_v1  ;;  %v686_v54 = vld [vmem:[%s15646_s4 + $0x13e0] sm:$0xff]  ;;  %v687_v43 = vld [vmem:[%s15646_s4 + $0x13e8] sm:$0xff]  ;;  %v657_v58 = vld [vmem:[%s15646_s4 + $0x12f8] sm:$0xff] }
 0x128   :  { %8732 = vmatprep.subr.bf16.mxu1 %v8731_v49  ;;  %v638_v49 = vld [vmem:[%s15646_s4 + $0x1260] sm:$0xff]  ;;  %v8751_v34 = vpack.c.bf16 %v687_v43, %v686_v54  ;;  %v36_v53 = vld [vmem:[%s15647_s0 + $0x50] sm:$0xff]  ;;  %v8723_v5 = vpack.c.bf16 %v657_v58, %v656_v57  ;;  %v711_v42 = vld [vmem:[%s15646_s4 + $0x14a8] sm:$0xff] }
 0x129   :  { %8702 = vmatpush3.bf16.msra.mxu0 %v8701_v46  ;;  %v1787_v14 = vcombine.high %v36_v53, %v36_v53  ;;  %v11848_v25 = vrot.slane %v36_v53, %v9893_v13  ;;  %v742_v43 = vld [vmem:[%s15646_s4 + $0x15a0] sm:$0xff]  ;;  %v713_v57 = vld [vmem:[%s15646_s4 + $0x14b8] sm:$0xff]  ;;  %v744_v58 = vld [vmem:[%s15646_s4 + $0x15b0] sm:$0xff] }
 0x12a   :  { %8704 = vmatprep.subr.bf16.mxu0 %v8703_v62  ;;  %v688_v62 = vld [vmem:[%s15646_s4 + $0x13f0] sm:$0xff] }
 0x12b   :  { %8734 = vmatpush3.bf16.msra.mxu1 %v8733_v59  ;;  %v8755_v9 = vpack.c.bf16 %v689_v50, %v688_v62  ;;  %v11857_v29 = vrot.slane %v1787_v14, %v9893_v13  ;;  %v1802_v54 = vcombine.high %v11848_v25, %v11848_v25  ;;  %v8771_v50 = vpack.c.bf16 %v713_v57, %v712_v56  ;;  %v716_v14 = vld [vmem:[%s15646_s4 + $0x14d0] sm:$0xff] }
 0x12c   :  { %8736 = vmatprep.subr.bf16.mxu1 %v8735_v2  ;;  %v8721_v2 = vpack.c.bf16 %v639_v51, %v638_v49  ;;  %v8797_v49 = vpack.c.bf16 %v725_v38, %v724_v36  ;;  %v8767_v51 = vpack.c.bf16 %v711_v42, %v710_v40  ;;  %v703_v38 = vld [vmem:[%s15646_s4 + $0x1468] sm:$0xff]  ;;  %v734_v40 = vld [vmem:[%s15646_s4 + $0x1560] sm:$0xff] }
 0x12d   :  { %8706 = vmatpush3.bf16.msra.mxu0 %v8705_v7  ;;  %v641_v7 = vld [vmem:[%s15646_s4 + $0x1278] sm:$0xff] }
 0x12e   :  { %8708 = vmatprep.subr.bf16.mxu0 %v8707_v60  ;;  %v8725_v17 = vpack.c.bf16 %v641_v7, %v640_v6  ;;  %v746_v6 = vld [vmem:[%s15646_s4 + $0x15c0] sm:$0xff]  ;;  %v747_v7 = vld [vmem:[%s15646_s4 + $0x15c8] sm:$0xff] }
 0x12f   :  { %8738 = vmatpush3.bf16.msra.mxu1 %v8737_v8  ;;  %v672_v8 = vld [vmem:[%s15646_s4 + $0x1370] sm:$0xff] }
 0x130   :  { %8740 = vmatprep.subr.bf16.mxu1 %v8739_v61  ;;  %v707_v61 = vld [vmem:[%s15646_s4 + $0x1488] sm:$0xff]  ;;  %v8757_v16 = vpack.c.bf16 %v673_v10, %v672_v8  ;;  %v698_v10 = vld [vmem:[%s15646_s4 + $0x1440] sm:$0xff] }
 0x131   :  { %8710 = vmatpush3.bf16.msra.mxu0 %v8709_v20  ;;  %v8759_v20 = vpack.c.bf16 %v707_v61, %v706_v11  ;;  %v699_v11 = vld [vmem:[%s15646_s4 + $0x1448] sm:$0xff]  ;;  %v730_v61 = vld [vmem:[%s15646_s4 + $0x1540] sm:$0xff] }
 0x132   :  { %8712 = vmatprep.subr.bf16.mxu0 %v8711_v21  ;;  %v691_v21 = vld [vmem:[%s15646_s4 + $0x1408] sm:$0xff] }
 0x133   :  { %8742 = vmatpush3.bf16.msra.mxu1 %v8741_v18  ;;  %v690_v18 = vld [vmem:[%s15646_s4 + $0x1400] sm:$0xff] }
 0x134   :  { %8744 = vmatprep.subr.bf16.mxu1 %v8743_v24  ;;  %v708_v24 = vld [vmem:[%s15646_s4 + $0x1490] sm:$0xff] }
 0x135   :  { %8714 = vmatpush3.bf16.msra.mxu0 %v8713_v30  ;;  %v8761_v30 = vpack.c.bf16 %v691_v21, %v690_v18  ;;  %v8777_v18 = vpack.c.bf16 %v699_v11, %v698_v10  ;;  %v786_v10 = vld [vmem:[%s15646_s4 + $0x1700] sm:$0xff] }
 0x136   :  { %8716 = vmatprep.subr.bf16.mxu0 %v8715_v32  ;;  %v8763_v32 = vpack.c.bf16 %v709_v39, %v708_v24  ;;  %v732_v24 = vld [vmem:[%s15646_s4 + $0x1550] sm:$0xff] }
 0x137   :  { %8746 = vmatpush3.bf16.msra.mxu1 %v8745_v31  ;;  %v6611_v55 = vpop.f32.mrb[4].mxu0  ;;  %v8793_v31 = vpack.c.bf16 %v723_v19, %v722_v22  ;;  %v701_v19 = vld [vmem:[%s15646_s4 + $0x1458] sm:$0xff] }
 0x138   :  { %8748 = vmatprep.subr.bf16.mxu1 %v8747_v37  ;;  %v6612_v46 = vpop.f32.mrb[5].mxu0  ;;  %v8795_v37 = vpack.c.bf16 %v741_v28, %v740_v27  ;;  %v733_v27 = vld [vmem:[%s15646_s4 + $0x1558] sm:$0xff]  ;;  %v718_v28 = vld [vmem:[%s15646_s4 + $0x14e0] sm:$0xff] }
 0x139   :  { %v6646_v59 = vpop.f32.mrb[4].mxu1  ;;  %v6613_v63 = vadd.f32 %v6612_v46, %v6611_v55  ;;  %8718 = vmatpush3.bf16.msra.mxu0 %v8717_v45  ;;  %v743_v45 = vld [vmem:[%s15646_s4 + $0x15a8] sm:$0xff]  ;;  %v726_v55 = vld [vmem:[%s15646_s4 + $0x1520] sm:$0xff]  ;;  %v745_v46 = vld [vmem:[%s15646_s4 + $0x15b8] sm:$0xff] }
 0x13a   :  { %v6647_v1 = vpop.f32.mrb[5].mxu1  ;;  %8720 = vmatprep.subr.bf16.mxu0 %v8719_v48  ;;  %v8765_v48 = vpack.c.bf16 %v693_v35, %v692_v33  ;;  %v8803_v53 = vpack.c.bf16 %v745_v46, %v744_v58  ;;  %v8813_v35 = vpack.c.bf16 %v733_v27, %v732_v24  ;;  %v704_v46 = vld [vmem:[%s15646_s4 + $0x1470] sm:$0xff]  ;;  %v789_v27 = vld [vmem:[%s15646_s4 + $0x1718] sm:$0xff] }
 0x13b   :  { %v6648_v3 = vadd.f32 %v6647_v1, %v6646_v59  ;;  %8750 = vmatpush3.bf16.msra.mxu1 %v8749_v47  ;;  %v2468_v60 = vadd.f32 %v6613_v63, %v11617_v26  ;;  %v739_v26 = vld [vmem:[%s15646_s4 + $0x1588] sm:$0xff]  ;;  %v1803_v47 = vcombine.high %v11857_v29, %v11857_v29  ;;  %v696_v63 = vld [vmem:[%s15646_s4 + $0x1430] sm:$0xff]  ;;  %v697_v1 = vld [vmem:[%s15646_s4 + $0x1438] sm:$0xff] }
 0x13c   :  { %8752 = vmatprep.subr.bf16.mxu1 %v8751_v34  ;;  %v8791_v23 = vpack.c.bf16 %v739_v26, %v738_v12  ;;  %v8799_v34 = vpack.c.bf16 %v743_v45, %v742_v43  ;;  %v8773_v8 = vpack.c.bf16 %v697_v1, %v696_v63  ;;  %v8807_v12 = vpack.c.bf16 %v747_v7, %v746_v6  ;;  %v731_v26 = vld [vmem:[%s15646_s4 + $0x1548] sm:$0xff]  ;;  %v720_v45 = vld [vmem:[%s15646_s4 + $0x14f0] sm:$0xff]  ;;  %v737_v1 = vld [vmem:[%s15646_s4 + $0x1578] sm:$0xff] }
 0x13d   :  { %v11827_v15 = vadd.f32 %v6648_v3, %v2468_v60  ;;  %8722 = vmatpush3.bf16.msra.mxu0 %v8721_v2  ;;  %v728_v2 = vld [vmem:[%s15646_s4 + $0x1530] sm:$0xff]  ;;  %v729_v3 = vld [vmem:[%s15646_s4 + $0x1538] sm:$0xff]  ;;  %v8809_v21 = vpack.c.bf16 %v731_v26, %v730_v61  ;;  %v735_v43 = vld [vmem:[%s15646_s4 + $0x1568] sm:$0xff] }
 0x13e   :  { %8724 = vmatprep.subr.bf16.mxu0 %v8723_v5  ;;  %v715_v5 = vld [vmem:[%s15646_s4 + $0x14c8] sm:$0xff]  ;;  %v8805_v60 = vpack.c.bf16 %v729_v3, %v728_v2  ;;  %v8817_v57 = vpack.c.bf16 %v735_v43, %v734_v40  ;;  %v770_v2 = vld [vmem:[%s15646_s4 + $0x1680] sm:$0xff]  ;;  %v773_v26 = vld [vmem:[%s15646_s4 + $0x1698] sm:$0xff] }
 0x13f   :  { %8754 = vmatpush3.bf16.msra.mxu1 %v8753_v4  ;;  %v714_v4 = vld [vmem:[%s15646_s4 + $0x14c0] sm:$0xff]  ;;  %v787_v61 = vld [vmem:[%s15646_s4 + $0x1708] sm:$0xff]  ;;  %v788_v24 = vld [vmem:[%s15646_s4 + $0x1710] sm:$0xff] }
 0x140   :  { %8756 = vmatprep.subr.bf16.mxu1 %v8755_v9  ;;  %v8775_v9 = vpack.c.bf16 %v715_v5, %v714_v4  ;;  %v802_v3 = vld [vmem:[%s15646_s4 + $0x1780] sm:$0xff]  ;;  %v759_v40 = vld [vmem:[%s15646_s4 + $0x1628] sm:$0xff]  ;;  %v776_v43 = vld [vmem:[%s15646_s4 + $0x16b0] sm:$0xff] }
 0x141   :  { %8726 = vmatpush3.bf16.msra.mxu0 %v8725_v17  ;;  %v717_v17 = vld [vmem:[%s15646_s4 + $0x14d8] sm:$0xff] }
 0x142   :  { %8760 = vmatprep.subr.bf16.mxu0 %v8759_v20  ;;  %v749_v20 = vld [vmem:[%s15646_s4 + $0x15d8] sm:$0xff]  ;;  %v8779_v22 = vpack.c.bf16 %v717_v17, %v716_v14  ;;  %v804_v17 = vld [vmem:[%s15646_s4 + $0x1790] sm:$0xff] }
 0x143   :  { %8758 = vmatpush3.bf16.msra.mxu1 %v8757_v16  ;;  %v748_v16 = vld [vmem:[%s15646_s4 + $0x15d0] sm:$0xff] }
 0x144   :  { %8792 = vmatprep.subr.bf16.mxu1 %v8791_v23  ;;  %3446 = vmatmul.mubr.f32.vlgmr.msra.gmra.mrb[18].mxu0 %v11638_v44  ;;  %v694_v44 = vld [vmem:[%s15646_s4 + $0x1420] sm:$0xff]  ;;  %v700_v23 = vld [vmem:[%s15646_s4 + $0x1450] sm:$0xff]  ;;  %v8811_v39 = vpack.c.bf16 %v749_v20, %v748_v16  ;;  %v805_v16 = vld [vmem:[%s15646_s4 + $0x1798] sm:$0xff] }
 0x145   :  { %8762 = vmatpush3.bf16.msra.mxu0 %v8761_v30  ;;  %3585 = vmatprep.mubr.f32.mxu0 %v1802_v54  ;;  %v8769_v59 = vpack.c.bf16 %v695_v52, %v694_v44  ;;  %v719_v30 = vld [vmem:[%s15646_s4 + $0x14e8] sm:$0xff]  ;;  %v8781_v33 = vpack.c.bf16 %v701_v19, %v700_v23  ;;  %v753_v44 = vld [vmem:[%s15646_s4 + $0x15f8] sm:$0xff]  ;;  %v756_v23 = vld [vmem:[%s15646_s4 + $0x1610] sm:$0xff] }
 0x146   :  { %3516 = vmatmul.mubr.f32.vlgmr.msra.gmra.mrb[18].mxu1 %v11647_v41  ;;  %8764 = vmatprep.subr.bf16.mxu0 %v8763_v32  ;;  %v727_v41 = vld [vmem:[%s15646_s4 + $0x1528] sm:$0xff]  ;;  %v8783_v36 = vpack.c.bf16 %v719_v30, %v718_v28  ;;  %v757_v19 = vld [vmem:[%s15646_s4 + $0x1618] sm:$0xff]  ;;  %v774_v28 = vld [vmem:[%s15646_s4 + $0x16a0] sm:$0xff] }
 0x147   :  { %8794 = vmatpush3.bf16.msra.mxu1 %v8793_v31  ;;  %3655 = vmatprep.mubr.f32.mxu1 %v1803_v47  ;;  %v8801_v62 = vpack.c.bf16 %v727_v41, %v726_v55  ;;  %v750_v31 = vld [vmem:[%s15646_s4 + $0x15e0] sm:$0xff]  ;;  %v751_v32 = vld [vmem:[%s15646_s4 + $0x15e8] sm:$0xff]  ;;  %v721_v47 = vld [vmem:[%s15646_s4 + $0x14f8] sm:$0xff] }
 0x148   :  { %8796 = vmatprep.subr.bf16.mxu1 %v8795_v37  ;;  %v702_v37 = vld [vmem:[%s15646_s4 + $0x1460] sm:$0xff]  ;;  %v8815_v54 = vpack.c.bf16 %v751_v32, %v750_v31  ;;  %v37_v41 = vld [vmem:[%s15647_s0 + $0x58] sm:$0xff]  ;;  %v8787_v58 = vpack.c.bf16 %v721_v47, %v720_v45  ;;  %v775_v30 = vld [vmem:[%s15646_s4 + $0x16a8] sm:$0xff] }
 0x149   :  { %8766 = vmatpush3.bf16.msra.mxu0 %v8765_v48  ;;  %v1804_v4 = vcombine.high %v37_v41, %v37_v41  ;;  %v12058_v14 = vrot.slane %v37_v41, %v9893_v13  ;;  %v806_v32 = vld [vmem:[%s15646_s4 + $0x17a0] sm:$0xff]  ;;  %v777_v45 = vld [vmem:[%s15646_s4 + $0x16b8] sm:$0xff]  ;;  %v808_v47 = vld [vmem:[%s15646_s4 + $0x17b0] sm:$0xff] }
 0x14a   :  { %8768 = vmatprep.subr.bf16.mxu0 %v8767_v51  ;;  %v752_v51 = vld [vmem:[%s15646_s4 + $0x15f0] sm:$0xff] }
 0x14b   :  { %8798 = vmatpush3.bf16.msra.mxu1 %v8797_v49  ;;  %v8819_v63 = vpack.c.bf16 %v753_v44, %v752_v51  ;;  %v12067_v20 = vrot.slane %v1804_v4, %v9893_v13  ;;  %v1819_v31 = vcombine.high %v12058_v14, %v12058_v14  ;;  %v8835_v44 = vpack.c.bf16 %v777_v45, %v776_v43  ;;  %v780_v4 = vld [vmem:[%s15646_s4 + $0x16d0] sm:$0xff] }
 0x14c   :  { %8800 = vmatprep.subr.bf16.mxu1 %v8799_v34  ;;  %v8785_v34 = vpack.c.bf16 %v703_v38, %v702_v37  ;;  %v8861_v37 = vpack.c.bf16 %v789_v27, %v788_v24  ;;  %v8831_v38 = vpack.c.bf16 %v775_v30, %v774_v28  ;;  %v767_v27 = vld [vmem:[%s15646_s4 + $0x1668] sm:$0xff]  ;;  %v798_v28 = vld [vmem:[%s15646_s4 + $0x1760] sm:$0xff] }
 0x14d   :  { %8770 = vmatpush3.bf16.msra.mxu0 %v8769_v59  ;;  %v705_v59 = vld [vmem:[%s15646_s4 + $0x1478] sm:$0xff] }
 0x14e   :  { %8772 = vmatprep.subr.bf16.mxu0 %v8771_v50  ;;  %v8789_v6 = vpack.c.bf16 %v705_v59, %v704_v46  ;;  %v810_v46 = vld [vmem:[%s15646_s4 + $0x17c0] sm:$0xff]  ;;  %v811_v59 = vld [vmem:[%s15646_s4 + $0x17c8] sm:$0xff] }
 0x14f   :  { %8802 = vmatpush3.bf16.msra.mxu1 %v8801_v62  ;;  %v736_v62 = vld [vmem:[%s15646_s4 + $0x1570] sm:$0xff] }
 0x150   :  { %8804 = vmatprep.subr.bf16.mxu1 %v8803_v53  ;;  %v771_v53 = vld [vmem:[%s15646_s4 + $0x1688] sm:$0xff]  ;;  %v8821_v7 = vpack.c.bf16 %v737_v1, %v736_v62  ;;  %v762_v1 = vld [vmem:[%s15646_s4 + $0x1640] sm:$0xff] }
 0x151   :  { %8774 = vmatpush3.bf16.msra.mxu0 %v8773_v8  ;;  %v8823_v8 = vpack.c.bf16 %v771_v53, %v770_v2  ;;  %v763_v2 = vld [vmem:[%s15646_s4 + $0x1648] sm:$0xff]  ;;  %v794_v53 = vld [vmem:[%s15646_s4 + $0x1740] sm:$0xff] }
 0x152   :  { %8776 = vmatprep.subr.bf16.mxu0 %v8775_v9  ;;  %v755_v9 = vld [vmem:[%s15646_s4 + $0x1608] sm:$0xff] }
 0x153   :  { %8806 = vmatpush3.bf16.msra.mxu1 %v8805_v60  ;;  %v754_v60 = vld [vmem:[%s15646_s4 + $0x1600] sm:$0xff] }
 0x154   :  { %8808 = vmatprep.subr.bf16.mxu1 %v8807_v12  ;;  %v772_v12 = vld [vmem:[%s15646_s4 + $0x1690] sm:$0xff] }
 0x155   :  { %8778 = vmatpush3.bf16.msra.mxu0 %v8777_v18  ;;  %v8825_v18 = vpack.c.bf16 %v755_v9, %v754_v60  ;;  %v8841_v60 = vpack.c.bf16 %v763_v2, %v762_v1  ;;  %v850_v1 = vld [vmem:[%s15646_s4 + $0x1900] sm:$0xff] }
 0x156   :  { %8780 = vmatprep.subr.bf16.mxu0 %v8779_v22  ;;  %v8827_v22 = vpack.c.bf16 %v773_v26, %v772_v12  ;;  %v796_v12 = vld [vmem:[%s15646_s4 + $0x1750] sm:$0xff] }
 0x157   :  { %8810 = vmatpush3.bf16.msra.mxu1 %v8809_v21  ;;  %v6681_v42 = vpop.f32.mrb[6].mxu0  ;;  %v8857_v21 = vpack.c.bf16 %v787_v61, %v786_v10  ;;  %v765_v61 = vld [vmem:[%s15646_s4 + $0x1658] sm:$0xff] }
 0x158   :  { %8812 = vmatprep.subr.bf16.mxu1 %v8811_v39  ;;  %v6682_v48 = vpop.f32.mrb[7].mxu0  ;;  %v8859_v39 = vpack.c.bf16 %v805_v16, %v804_v17  ;;  %v797_v17 = vld [vmem:[%s15646_s4 + $0x1758] sm:$0xff]  ;;  %v782_v16 = vld [vmem:[%s15646_s4 + $0x16e0] sm:$0xff] }
 0x159   :  { %v6716_v49 = vpop.f32.mrb[6].mxu1  ;;  %v6683_v52 = vadd.f32 %v6682_v48, %v6681_v42  ;;  %8782 = vmatpush3.bf16.msra.mxu0 %v8781_v33  ;;  %v807_v33 = vld [vmem:[%s15646_s4 + $0x17a8] sm:$0xff]  ;;  %v790_v42 = vld [vmem:[%s15646_s4 + $0x1720] sm:$0xff]  ;;  %v809_v48 = vld [vmem:[%s15646_s4 + $0x17b8] sm:$0xff] }
 0x15a   :  { %v6717_v55 = vpop.f32.mrb[7].mxu1  ;;  %8784 = vmatprep.subr.bf16.mxu0 %v8783_v36  ;;  %v8829_v36 = vpack.c.bf16 %v757_v19, %v756_v23  ;;  %v8867_v41 = vpack.c.bf16 %v809_v48, %v808_v47  ;;  %v8877_v19 = vpack.c.bf16 %v797_v17, %v796_v12  ;;  %v768_v48 = vld [vmem:[%s15646_s4 + $0x1670] sm:$0xff]  ;;  %v853_v17 = vld [vmem:[%s15646_s4 + $0x1918] sm:$0xff] }
 0x15b   :  { %v6718_v56 = vadd.f32 %v6717_v55, %v6716_v49  ;;  %8814 = vmatpush3.bf16.msra.mxu1 %v8813_v35  ;;  %v2608_v50 = vadd.f32 %v6683_v52, %v11827_v15  ;;  %v803_v15 = vld [vmem:[%s15646_s4 + $0x1788] sm:$0xff]  ;;  %v1820_v35 = vcombine.high %v12067_v20, %v12067_v20  ;;  %v760_v52 = vld [vmem:[%s15646_s4 + $0x1630] sm:$0xff]  ;;  %v761_v55 = vld [vmem:[%s15646_s4 + $0x1638] sm:$0xff] }
 0x15c   :  { %8816 = vmatprep.subr.bf16.mxu1 %v8815_v54  ;;  %v8855_v11 = vpack.c.bf16 %v803_v15, %v802_v3  ;;  %v8863_v54 = vpack.c.bf16 %v807_v33, %v806_v32  ;;  %v8837_v62 = vpack.c.bf16 %v761_v55, %v760_v52  ;;  %v8871_v3 = vpack.c.bf16 %v811_v59, %v810_v46  ;;  %v795_v15 = vld [vmem:[%s15646_s4 + $0x1748] sm:$0xff]  ;;  %v784_v33 = vld [vmem:[%s15646_s4 + $0x16f0] sm:$0xff]  ;;  %v801_v55 = vld [vmem:[%s15646_s4 + $0x1778] sm:$0xff] }
 0x15d   :  { %v12037_v5 = vadd.f32 %v6718_v56, %v2608_v50  ;;  %8786 = vmatpush3.bf16.msra.mxu0 %v8785_v34  ;;  %v792_v34 = vld [vmem:[%s15646_s4 + $0x1730] sm:$0xff]  ;;  %v793_v56 = vld [vmem:[%s15646_s4 + $0x1738] sm:$0xff]  ;;  %v8873_v9 = vpack.c.bf16 %v795_v15, %v794_v53  ;;  %v799_v32 = vld [vmem:[%s15646_s4 + $0x1768] sm:$0xff] }
 0x15e   :  { %8788 = vmatprep.subr.bf16.mxu0 %v8787_v58  ;;  %v779_v58 = vld [vmem:[%s15646_s4 + $0x16c8] sm:$0xff]  ;;  %v8869_v50 = vpack.c.bf16 %v793_v56, %v792_v34  ;;  %v8881_v45 = vpack.c.bf16 %v799_v32, %v798_v28  ;;  %v834_v34 = vld [vmem:[%s15646_s4 + $0x1880] sm:$0xff]  ;;  %v837_v15 = vld [vmem:[%s15646_s4 + $0x1898] sm:$0xff] }
 0x15f   :  { %8818 = vmatpush3.bf16.msra.mxu1 %v8817_v57  ;;  %v778_v57 = vld [vmem:[%s15646_s4 + $0x16c0] sm:$0xff]  ;;  %v851_v53 = vld [vmem:[%s15646_s4 + $0x1908] sm:$0xff]  ;;  %v852_v12 = vld [vmem:[%s15646_s4 + $0x1910] sm:$0xff] }
 0x160   :  { %8820 = vmatprep.subr.bf16.mxu1 %v8819_v63  ;;  %v8839_v63 = vpack.c.bf16 %v779_v58, %v778_v57  ;;  %v866_v56 = vld [vmem:[%s15646_s4 + $0x1980] sm:$0xff]  ;;  %v823_v28 = vld [vmem:[%s15646_s4 + $0x1828] sm:$0xff]  ;;  %v840_v32 = vld [vmem:[%s15646_s4 + $0x18b0] sm:$0xff] }
 0x161   :  { %8790 = vmatpush3.bf16.msra.mxu0 %v8789_v6  ;;  %v781_v6 = vld [vmem:[%s15646_s4 + $0x16d8] sm:$0xff] }
 0x162   :  { %8824 = vmatprep.subr.bf16.mxu0 %v8823_v8  ;;  %v813_v8 = vld [vmem:[%s15646_s4 + $0x17d8] sm:$0xff]  ;;  %v8843_v10 = vpack.c.bf16 %v781_v6, %v780_v4  ;;  %v868_v6 = vld [vmem:[%s15646_s4 + $0x1990] sm:$0xff] }
 0x163   :  { %8822 = vmatpush3.bf16.msra.mxu1 %v8821_v7  ;;  %v812_v7 = vld [vmem:[%s15646_s4 + $0x17d0] sm:$0xff] }
 0x164   :  { %8856 = vmatprep.subr.bf16.mxu1 %v8855_v11  ;;  %3586 = vmatmul.mubr.f32.vlgmr.msra.gmra.mrb[20].mxu0 %v11848_v25  ;;  %v758_v25 = vld [vmem:[%s15646_s4 + $0x1620] sm:$0xff]  ;;  %v764_v11 = vld [vmem:[%s15646_s4 + $0x1650] sm:$0xff]  ;;  %v8875_v26 = vpack.c.bf16 %v813_v8, %v812_v7  ;;  %v869_v7 = vld [vmem:[%s15646_s4 + $0x1998] sm:$0xff] }
 0x165   :  { %8826 = vmatpush3.bf16.msra.mxu0 %v8825_v18  ;;  %3725 = vmatprep.mubr.f32.mxu0 %v1819_v31  ;;  %v8833_v49 = vpack.c.bf16 %v759_v40, %v758_v25  ;;  %v783_v18 = vld [vmem:[%s15646_s4 + $0x16e8] sm:$0xff]  ;;  %v8845_v23 = vpack.c.bf16 %v765_v61, %v764_v11  ;;  %v817_v25 = vld [vmem:[%s15646_s4 + $0x17f8] sm:$0xff]  ;;  %v820_v11 = vld [vmem:[%s15646_s4 + $0x1810] sm:$0xff] }
 0x166   :  { %3656 = vmatmul.mubr.f32.vlgmr.msra.gmra.mrb[20].mxu1 %v11857_v29  ;;  %8828 = vmatprep.subr.bf16.mxu0 %v8827_v22  ;;  %v791_v29 = vld [vmem:[%s15646_s4 + $0x1728] sm:$0xff]  ;;  %v8847_v24 = vpack.c.bf16 %v783_v18, %v782_v16  ;;  %v821_v61 = vld [vmem:[%s15646_s4 + $0x1818] sm:$0xff]  ;;  %v838_v16 = vld [vmem:[%s15646_s4 + $0x18a0] sm:$0xff] }
 0x167   :  { %8858 = vmatpush3.bf16.msra.mxu1 %v8857_v21  ;;  %3795 = vmatprep.mubr.f32.mxu1 %v1820_v35  ;;  %v8865_v51 = vpack.c.bf16 %v791_v29, %v790_v42  ;;  %v814_v21 = vld [vmem:[%s15646_s4 + $0x17e0] sm:$0xff]  ;;  %v815_v22 = vld [vmem:[%s15646_s4 + $0x17e8] sm:$0xff]  ;;  %v785_v35 = vld [vmem:[%s15646_s4 + $0x16f8] sm:$0xff] }
 0x168   :  { %8860 = vmatprep.subr.bf16.mxu1 %v8859_v39  ;;  %v766_v39 = vld [vmem:[%s15646_s4 + $0x1660] sm:$0xff]  ;;  %v8879_v31 = vpack.c.bf16 %v815_v22, %v814_v21  ;;  %v8851_v47 = vpack.c.bf16 %v785_v35, %v784_v33  ;;  %v839_v18 = vld [vmem:[%s15646_s4 + $0x18a8] sm:$0xff]  ;;  %v841_v33 = vld [vmem:[%s15646_s4 + $0x18b8] sm:$0xff] }
 0x169   :  { %8830 = vmatpush3.bf16.msra.mxu0 %v8829_v36  ;;  %v38_v29 = vld [vmem:[%s15647_s0 + $0x60] sm:$0xff]  ;;  %v872_v35 = vld [vmem:[%s15646_s4 + $0x19b0] sm:$0xff] }
 0x16a   :  { %8832 = vmatprep.subr.bf16.mxu0 %v8831_v38  ;;  %v816_v38 = vld [vmem:[%s15646_s4 + $0x17f0] sm:$0xff]  ;;  %v1821_v57 = vcombine.high %v38_v29, %v38_v29  ;;  %v12268_v4 = vrot.slane %v38_v29, %v9893_v13  ;;  %v870_v22 = vld [vmem:[%s15646_s4 + $0x19a0] sm:$0xff] }
 0x16b   :  { %8862 = vmatpush3.bf16.msra.mxu1 %v8861_v37  ;;  %v8883_v52 = vpack.c.bf16 %v817_v25, %v816_v38  ;;  %v8899_v25 = vpack.c.bf16 %v841_v33, %v840_v32 }
 0x16c   :  { %8864 = vmatprep.subr.bf16.mxu1 %v8863_v54  ;;  %v8849_v54 = vpack.c.bf16 %v767_v27, %v766_v39  ;;  %v12277_v8 = vrot.slane %v1821_v57, %v9893_v13  ;;  %v1836_v21 = vcombine.high %v12268_v4, %v12268_v4  ;;  %v8925_v39 = vpack.c.bf16 %v853_v17, %v852_v12  ;;  %v844_v57 = vld [vmem:[%s15646_s4 + $0x18d0] sm:$0xff]  ;;  %v831_v17 = vld [vmem:[%s15646_s4 + $0x1868] sm:$0xff] }
 0x16d   :  { %8834 = vmatpush3.bf16.msra.mxu0 %v8833_v49  ;;  %v769_v49 = vld [vmem:[%s15646_s4 + $0x1678] sm:$0xff]  ;;  %v8895_v27 = vpack.c.bf16 %v839_v18, %v838_v16  ;;  %v862_v16 = vld [vmem:[%s15646_s4 + $0x1960] sm:$0xff] }
 0x16e   :  { %8836 = vmatprep.subr.bf16.mxu0 %v8835_v44  ;;  %v8853_v46 = vpack.c.bf16 %v769_v49, %v768_v48  ;;  %v874_v48 = vld [vmem:[%s15646_s4 + $0x19c0] sm:$0xff]  ;;  %v875_v49 = vld [vmem:[%s15646_s4 + $0x19c8] sm:$0xff] }
 0x16f   :  { %8866 = vmatpush3.bf16.msra.mxu1 %v8865_v51  ;;  %v800_v51 = vld [vmem:[%s15646_s4 + $0x1770] sm:$0xff] }
 0x170   :  { %8868 = vmatprep.subr.bf16.mxu1 %v8867_v41  ;;  %v835_v41 = vld [vmem:[%s15646_s4 + $0x1888] sm:$0xff]  ;;  %v8885_v59 = vpack.c.bf16 %v801_v55, %v800_v51  ;;  %v826_v55 = vld [vmem:[%s15646_s4 + $0x1840] sm:$0xff] }
 0x171   :  { %8838 = vmatpush3.bf16.msra.mxu0 %v8837_v62  ;;  %v8887_v62 = vpack.c.bf16 %v835_v41, %v834_v34  ;;  %v827_v34 = vld [vmem:[%s15646_s4 + $0x1848] sm:$0xff]  ;;  %v858_v41 = vld [vmem:[%s15646_s4 + $0x1940] sm:$0xff] }
 0x172   :  { %8840 = vmatprep.subr.bf16.mxu0 %v8839_v63  ;;  %v819_v63 = vld [vmem:[%s15646_s4 + $0x1808] sm:$0xff] }
 0x173   :  { %8870 = vmatpush3.bf16.msra.mxu1 %v8869_v50  ;;  %v818_v50 = vld [vmem:[%s15646_s4 + $0x1800] sm:$0xff] }
 0x174   :  { %8872 = vmatprep.subr.bf16.mxu1 %v8871_v3  ;;  %v836_v3 = vld [vmem:[%s15646_s4 + $0x1890] sm:$0xff] }
 0x175   :  { %8842 = vmatpush3.bf16.msra.mxu0 %v8841_v60  ;;  %v8889_v60 = vpack.c.bf16 %v819_v63, %v818_v50  ;;  %v8905_v50 = vpack.c.bf16 %v827_v34, %v826_v55  ;;  %v914_v55 = vld [vmem:[%s15646_s4 + $0x1b00] sm:$0xff] }
 0x176   :  { %8844 = vmatprep.subr.bf16.mxu0 %v8843_v10  ;;  %v8891_v10 = vpack.c.bf16 %v837_v15, %v836_v3  ;;  %v860_v3 = vld [vmem:[%s15646_s4 + $0x1950] sm:$0xff] }
 0x177   :  { %8874 = vmatpush3.bf16.msra.mxu1 %v8873_v9  ;;  %v6751_v30 = vpop.f32.mrb[8].mxu0  ;;  %v8921_v9 = vpack.c.bf16 %v851_v53, %v850_v1  ;;  %v829_v53 = vld [vmem:[%s15646_s4 + $0x1858] sm:$0xff] }
 0x178   :  { %8876 = vmatprep.subr.bf16.mxu1 %v8875_v26  ;;  %v6752_v36 = vpop.f32.mrb[9].mxu0  ;;  %v8923_v26 = vpack.c.bf16 %v869_v7, %v868_v6  ;;  %v861_v6 = vld [vmem:[%s15646_s4 + $0x1958] sm:$0xff]  ;;  %v846_v7 = vld [vmem:[%s15646_s4 + $0x18e0] sm:$0xff] }
 0x179   :  { %v6786_v37 = vpop.f32.mrb[8].mxu1  ;;  %v6753_v40 = vadd.f32 %v6752_v36, %v6751_v30  ;;  %8846 = vmatpush3.bf16.msra.mxu0 %v8845_v23  ;;  %v871_v23 = vld [vmem:[%s15646_s4 + $0x19a8] sm:$0xff]  ;;  %v854_v30 = vld [vmem:[%s15646_s4 + $0x1920] sm:$0xff]  ;;  %v873_v36 = vld [vmem:[%s15646_s4 + $0x19b8] sm:$0xff] }
 0x17a   :  { %v6787_v42 = vpop.f32.mrb[9].mxu1  ;;  %8848 = vmatprep.subr.bf16.mxu0 %v8847_v24  ;;  %v8893_v24 = vpack.c.bf16 %v821_v61, %v820_v11  ;;  %v8931_v29 = vpack.c.bf16 %v873_v36, %v872_v35  ;;  %v8941_v61 = vpack.c.bf16 %v861_v6, %v860_v3  ;;  %v832_v36 = vld [vmem:[%s15646_s4 + $0x1870] sm:$0xff]  ;;  %v917_v6 = vld [vmem:[%s15646_s4 + $0x1b18] sm:$0xff] }
 0x17b   :  { %v6788_v43 = vadd.f32 %v6787_v42, %v6786_v37  ;;  %8878 = vmatpush3.bf16.msra.mxu1 %v8877_v19  ;;  %v2748_v44 = vadd.f32 %v6753_v40, %v12037_v5  ;;  %v867_v5 = vld [vmem:[%s15646_s4 + $0x1988] sm:$0xff]  ;;  %v1837_v19 = vcombine.high %v12277_v8, %v12277_v8  ;;  %v824_v40 = vld [vmem:[%s15646_s4 + $0x1830] sm:$0xff]  ;;  %v825_v42 = vld [vmem:[%s15646_s4 + $0x1838] sm:$0xff] }
 0x17c   :  { %8880 = vmatprep.subr.bf16.mxu1 %v8879_v31  ;;  %v8919_v2 = vpack.c.bf16 %v867_v5, %v866_v56  ;;  %v8927_v31 = vpack.c.bf16 %v871_v23, %v870_v22  ;;  %v8901_v51 = vpack.c.bf16 %v825_v42, %v824_v40  ;;  %v8935_v56 = vpack.c.bf16 %v875_v49, %v874_v48  ;;  %v859_v5 = vld [vmem:[%s15646_s4 + $0x1948] sm:$0xff]  ;;  %v848_v23 = vld [vmem:[%s15646_s4 + $0x18f0] sm:$0xff]  ;;  %v865_v42 = vld [vmem:[%s15646_s4 + $0x1978] sm:$0xff] }
 0x17d   :  { %v12247_v58 = vadd.f32 %v6788_v43, %v2748_v44  ;;  %8850 = vmatpush3.bf16.msra.mxu0 %v8849_v54  ;;  %v856_v54 = vld [vmem:[%s15646_s4 + $0x1930] sm:$0xff]  ;;  %v857_v43 = vld [vmem:[%s15646_s4 + $0x1938] sm:$0xff]  ;;  %v8937_v63 = vpack.c.bf16 %v859_v5, %v858_v41  ;;  %v863_v22 = vld [vmem:[%s15646_s4 + $0x1968] sm:$0xff] }
 0x17e   :  { %8852 = vmatprep.subr.bf16.mxu0 %v8851_v47  ;;  %v843_v47 = vld [vmem:[%s15646_s4 + $0x18c8] sm:$0xff]  ;;  %v8933_v44 = vpack.c.bf16 %v857_v43, %v856_v54  ;;  %v8945_v33 = vpack.c.bf16 %v863_v22, %v862_v16  ;;  %v898_v54 = vld [vmem:[%s15646_s4 + $0x1a80] sm:$0xff]  ;;  %v901_v5 = vld [vmem:[%s15646_s4 + $0x1a98] sm:$0xff] }
 0x17f   :  { %8882 = vmatpush3.bf16.msra.mxu1 %v8881_v45  ;;  %v842_v45 = vld [vmem:[%s15646_s4 + $0x18c0] sm:$0xff]  ;;  %v915_v41 = vld [vmem:[%s15646_s4 + $0x1b08] sm:$0xff]  ;;  %v916_v3 = vld [vmem:[%s15646_s4 + $0x1b10] sm:$0xff] }
 0x180   :  { %8884 = vmatprep.subr.bf16.mxu1 %v8883_v52  ;;  %v8903_v52 = vpack.c.bf16 %v843_v47, %v842_v45  ;;  %v930_v43 = vld [vmem:[%s15646_s4 + $0x1b80] sm:$0xff]  ;;  %v887_v16 = vld [vmem:[%s15646_s4 + $0x1a28] sm:$0xff]  ;;  %v904_v22 = vld [vmem:[%s15646_s4 + $0x1ab0] sm:$0xff] }
 0x181   :  { %8854 = vmatpush3.bf16.msra.mxu0 %v8853_v46  ;;  %v845_v46 = vld [vmem:[%s15646_s4 + $0x18d8] sm:$0xff] }
 0x182   :  { %8888 = vmatprep.subr.bf16.mxu0 %v8887_v62  ;;  %v877_v62 = vld [vmem:[%s15646_s4 + $0x19d8] sm:$0xff]  ;;  %v8907_v1 = vpack.c.bf16 %v845_v46, %v844_v57  ;;  %v932_v46 = vld [vmem:[%s15646_s4 + $0x1b90] sm:$0xff] }
 0x183   :  { %8886 = vmatpush3.bf16.msra.mxu1 %v8885_v59  ;;  %v876_v59 = vld [vmem:[%s15646_s4 + $0x19d0] sm:$0xff] }
 0x184   :  { %8920 = vmatprep.subr.bf16.mxu1 %v8919_v2  ;;  %3726 = vmatmul.mubr.f32.vlgmr.msra.gmra.mrb[22].mxu0 %v12058_v14  ;;  %v822_v14 = vld [vmem:[%s15646_s4 + $0x1820] sm:$0xff]  ;;  %v828_v2 = vld [vmem:[%s15646_s4 + $0x1850] sm:$0xff]  ;;  %v8939_v15 = vpack.c.bf16 %v877_v62, %v876_v59  ;;  %v933_v59 = vld [vmem:[%s15646_s4 + $0x1b98] sm:$0xff] }
 0x185   :  { %8890 = vmatpush3.bf16.msra.mxu0 %v8889_v60  ;;  %3865 = vmatprep.mubr.f32.mxu0 %v1836_v21  ;;  %v8897_v37 = vpack.c.bf16 %v823_v28, %v822_v14  ;;  %v847_v60 = vld [vmem:[%s15646_s4 + $0x18e8] sm:$0xff]  ;;  %v8909_v11 = vpack.c.bf16 %v829_v53, %v828_v2  ;;  %v881_v14 = vld [vmem:[%s15646_s4 + $0x19f8] sm:$0xff]  ;;  %v884_v2 = vld [vmem:[%s15646_s4 + $0x1a10] sm:$0xff] }
 0x186   :  { %3796 = vmatmul.mubr.f32.vlgmr.msra.gmra.mrb[22].mxu1 %v12067_v20  ;;  %8892 = vmatprep.subr.bf16.mxu0 %v8891_v10  ;;  %v855_v20 = vld [vmem:[%s15646_s4 + $0x1928] sm:$0xff]  ;;  %v8911_v12 = vpack.c.bf16 %v847_v60, %v846_v7  ;;  %v885_v53 = vld [vmem:[%s15646_s4 + $0x1a18] sm:$0xff]  ;;  %v902_v7 = vld [vmem:[%s15646_s4 + $0x1aa0] sm:$0xff] }
 0x187   :  { %8922 = vmatpush3.bf16.msra.mxu1 %v8921_v9  ;;  %3935 = vmatprep.mubr.f32.mxu1 %v1837_v19  ;;  %v8929_v38 = vpack.c.bf16 %v855_v20, %v854_v30  ;;  %v878_v9 = vld [vmem:[%s15646_s4 + $0x19e0] sm:$0xff]  ;;  %v879_v10 = vld [vmem:[%s15646_s4 + $0x19e8] sm:$0xff]  ;;  %v849_v19 = vld [vmem:[%s15646_s4 + $0x18f8] sm:$0xff] }
 0x188   :  { %8924 = vmatprep.subr.bf16.mxu1 %v8923_v26  ;;  %v830_v26 = vld [vmem:[%s15646_s4 + $0x1860] sm:$0xff]  ;;  %v8943_v21 = vpack.c.bf16 %v879_v10, %v878_v9  ;;  %v39_v20 = vld [vmem:[%s15647_s0 + $0x68] sm:$0xff]  ;;  %v8915_v35 = vpack.c.bf16 %v849_v19, %v848_v23  ;;  %v905_v23 = vld [vmem:[%s15646_s4 + $0x1ab8] sm:$0xff] }
 0x189   :  { %8894 = vmatpush3.bf16.msra.mxu0 %v8893_v24  ;;  %v1838_v45 = vcombine.high %v39_v20, %v39_v20  ;;  %v12478_v57 = vrot.slane %v39_v20, %v9893_v13  ;;  %v903_v60 = vld [vmem:[%s15646_s4 + $0x1aa8] sm:$0xff]  ;;  %v934_v10 = vld [vmem:[%s15646_s4 + $0x1ba0] sm:$0xff]  ;;  %v936_v19 = vld [vmem:[%s15646_s4 + $0x1bb0] sm:$0xff] }
 0x18a   :  { %8896 = vmatprep.subr.bf16.mxu0 %v8895_v27  ;;  %v880_v27 = vld [vmem:[%s15646_s4 + $0x19f0] sm:$0xff] }
 0x18b   :  { %8926 = vmatpush3.bf16.msra.mxu1 %v8925_v39  ;;  %v8947_v40 = vpack.c.bf16 %v881_v14, %v880_v27  ;;  %v12487_v62 = vrot.slane %v1838_v45, %v9893_v13  ;;  %v1853_v9 = vcombine.high %v12478_v57, %v12478_v57  ;;  %v8963_v14 = vpack.c.bf16 %v905_v23, %v904_v22  ;;  %v908_v45 = vld [vmem:[%s15646_s4 + $0x1ad0] sm:$0xff] }
 0x18c   :  { %8928 = vmatprep.subr.bf16.mxu1 %v8927_v31  ;;  %v8913_v31 = vpack.c.bf16 %v831_v17, %v830_v26  ;;  %v8989_v26 = vpack.c.bf16 %v917_v6, %v916_v3  ;;  %v8959_v17 = vpack.c.bf16 %v903_v60, %v902_v7  ;;  %v895_v6 = vld [vmem:[%s15646_s4 + $0x1a68] sm:$0xff]  ;;  %v926_v7 = vld [vmem:[%s15646_s4 + $0x1b60] sm:$0xff] }
 0x18d   :  { %8898 = vmatpush3.bf16.msra.mxu0 %v8897_v37  ;;  %v833_v37 = vld [vmem:[%s15646_s4 + $0x1878] sm:$0xff] }
 0x18e   :  { %8900 = vmatprep.subr.bf16.mxu0 %v8899_v25  ;;  %v8917_v48 = vpack.c.bf16 %v833_v37, %v832_v36  ;;  %v938_v36 = vld [vmem:[%s15646_s4 + $0x1bc0] sm:$0xff]  ;;  %v939_v37 = vld [vmem:[%s15646_s4 + $0x1bc8] sm:$0xff] }
 0x18f   :  { %8930 = vmatpush3.bf16.msra.mxu1 %v8929_v38  ;;  %v864_v38 = vld [vmem:[%s15646_s4 + $0x1970] sm:$0xff] }
 0x190   :  { %8932 = vmatprep.subr.bf16.mxu1 %v8931_v29  ;;  %v899_v29 = vld [vmem:[%s15646_s4 + $0x1a88] sm:$0xff]  ;;  %v8949_v49 = vpack.c.bf16 %v865_v42, %v864_v38  ;;  %v890_v42 = vld [vmem:[%s15646_s4 + $0x1a40] sm:$0xff] }
 0x191   :  { %8902 = vmatpush3.bf16.msra.mxu0 %v8901_v51  ;;  %v8951_v51 = vpack.c.bf16 %v899_v29, %v898_v54  ;;  %v891_v54 = vld [vmem:[%s15646_s4 + $0x1a48] sm:$0xff]  ;;  %v922_v29 = vld [vmem:[%s15646_s4 + $0x1b40] sm:$0xff] }
 0x192   :  { %8904 = vmatprep.subr.bf16.mxu0 %v8903_v52  ;;  %v883_v52 = vld [vmem:[%s15646_s4 + $0x1a08] sm:$0xff] }
 0x193   :  { %8934 = vmatpush3.bf16.msra.mxu1 %v8933_v44  ;;  %v882_v44 = vld [vmem:[%s15646_s4 + $0x1a00] sm:$0xff] }
 0x194   :  { %8936 = vmatprep.subr.bf16.mxu1 %v8935_v56  ;;  %v900_v56 = vld [vmem:[%s15646_s4 + $0x1a90] sm:$0xff] }
 0x195   :  { %8906 = vmatpush3.bf16.msra.mxu0 %v8905_v50  ;;  %v8953_v50 = vpack.c.bf16 %v883_v52, %v882_v44  ;;  %v8969_v44 = vpack.c.bf16 %v891_v54, %v890_v42  ;;  %v978_v42 = vld [vmem:[%s15646_s4 + $0x1d00] sm:$0xff] }
 0x196   :  { %8908 = vmatprep.subr.bf16.mxu0 %v8907_v1  ;;  %v8955_v1 = vpack.c.bf16 %v901_v5, %v900_v56  ;;  %v924_v56 = vld [vmem:[%s15646_s4 + $0x1b50] sm:$0xff] }
 0x197   :  { %8938 = vmatpush3.bf16.msra.mxu1 %v8937_v63  ;;  %v6821_v18 = vpop.f32.mrb[10].mxu0  ;;  %v8985_v63 = vpack.c.bf16 %v915_v41, %v914_v55  ;;  %v893_v41 = vld [vmem:[%s15646_s4 + $0x1a58] sm:$0xff] }
 0x198   :  { %8940 = vmatprep.subr.bf16.mxu1 %v8939_v15  ;;  %v6822_v24 = vpop.f32.mrb[11].mxu0  ;;  %v8987_v15 = vpack.c.bf16 %v933_v59, %v932_v46  ;;  %v925_v46 = vld [vmem:[%s15646_s4 + $0x1b58] sm:$0xff]  ;;  %v910_v59 = vld [vmem:[%s15646_s4 + $0x1ae0] sm:$0xff] }
 0x199   :  { %v6856_v39 = vpop.f32.mrb[10].mxu1  ;;  %v6823_v28 = vadd.f32 %v6822_v24, %v6821_v18  ;;  %8910 = vmatpush3.bf16.msra.mxu0 %v8909_v11  ;;  %v935_v11 = vld [vmem:[%s15646_s4 + $0x1ba8] sm:$0xff]  ;;  %v918_v18 = vld [vmem:[%s15646_s4 + $0x1b20] sm:$0xff]  ;;  %v937_v24 = vld [vmem:[%s15646_s4 + $0x1bb8] sm:$0xff] }
 0x19a   :  { %v6857_v30 = vpop.f32.mrb[11].mxu1  ;;  %8912 = vmatprep.subr.bf16.mxu0 %v8911_v12  ;;  %v8957_v12 = vpack.c.bf16 %v885_v53, %v884_v2  ;;  %v8995_v20 = vpack.c.bf16 %v937_v24, %v936_v19  ;;  %v9005_v53 = vpack.c.bf16 %v925_v46, %v924_v56  ;;  %v896_v24 = vld [vmem:[%s15646_s4 + $0x1a70] sm:$0xff]  ;;  %v981_v46 = vld [vmem:[%s15646_s4 + $0x1d18] sm:$0xff] }
 0x19b   :  { %v6858_v32 = vadd.f32 %v6857_v30, %v6856_v39  ;;  %8942 = vmatpush3.bf16.msra.mxu1 %v8941_v61  ;;  %v2888_v25 = vadd.f32 %v6823_v28, %v12247_v58  ;;  %v931_v58 = vld [vmem:[%s15646_s4 + $0x1b88] sm:$0xff]  ;;  %v1854_v61 = vcombine.high %v12487_v62, %v12487_v62  ;;  %v888_v28 = vld [vmem:[%s15646_s4 + $0x1a30] sm:$0xff]  ;;  %v889_v30 = vld [vmem:[%s15646_s4 + $0x1a38] sm:$0xff] }
 0x19c   :  { %8944 = vmatprep.subr.bf16.mxu1 %v8943_v21  ;;  %v8983_v34 = vpack.c.bf16 %v931_v58, %v930_v43  ;;  %v8991_v21 = vpack.c.bf16 %v935_v11, %v934_v10  ;;  %v8965_v38 = vpack.c.bf16 %v889_v30, %v888_v28  ;;  %v8999_v43 = vpack.c.bf16 %v939_v37, %v938_v36  ;;  %v923_v58 = vld [vmem:[%s15646_s4 + $0x1b48] sm:$0xff]  ;;  %v912_v11 = vld [vmem:[%s15646_s4 + $0x1af0] sm:$0xff]  ;;  %v929_v30 = vld [vmem:[%s15646_s4 + $0x1b78] sm:$0xff] }
 0x19d   :  { %v12457_v47 = vadd.f32 %v6858_v32, %v2888_v25  ;;  %8914 = vmatpush3.bf16.msra.mxu0 %v8913_v31  ;;  %v920_v31 = vld [vmem:[%s15646_s4 + $0x1b30] sm:$0xff]  ;;  %v921_v32 = vld [vmem:[%s15646_s4 + $0x1b38] sm:$0xff]  ;;  %v9001_v52 = vpack.c.bf16 %v923_v58, %v922_v29  ;;  %v927_v10 = vld [vmem:[%s15646_s4 + $0x1b68] sm:$0xff] }
 0x19e   :  { %8916 = vmatprep.subr.bf16.mxu0 %v8915_v35  ;;  %v907_v35 = vld [vmem:[%s15646_s4 + $0x1ac8] sm:$0xff]  ;;  %v8997_v25 = vpack.c.bf16 %v921_v32, %v920_v31  ;;  %v9009_v23 = vpack.c.bf16 %v927_v10, %v926_v7  ;;  %v962_v31 = vld [vmem:[%s15646_s4 + $0x1c80] sm:$0xff]  ;;  %v965_v58 = vld [vmem:[%s15646_s4 + $0x1c98] sm:$0xff] }
 0x19f   :  { %8946 = vmatpush3.bf16.msra.mxu1 %v8945_v33  ;;  %v906_v33 = vld [vmem:[%s15646_s4 + $0x1ac0] sm:$0xff]  ;;  %v979_v29 = vld [vmem:[%s15646_s4 + $0x1d08] sm:$0xff]  ;;  %v980_v56 = vld [vmem:[%s15646_s4 + $0x1d10] sm:$0xff] }
 0x1a0   :  { %8948 = vmatprep.subr.bf16.mxu1 %v8947_v40  ;;  %v8967_v40 = vpack.c.bf16 %v907_v35, %v906_v33  ;;  %v994_v32 = vld [vmem:[%s15646_s4 + $0x1d80] sm:$0xff]  ;;  %v951_v7 = vld [vmem:[%s15646_s4 + $0x1c28] sm:$0xff]  ;;  %v968_v10 = vld [vmem:[%s15646_s4 + $0x1cb0] sm:$0xff] }
 0x1a1   :  { %8918 = vmatpush3.bf16.msra.mxu0 %v8917_v48  ;;  %v909_v48 = vld [vmem:[%s15646_s4 + $0x1ad8] sm:$0xff] }
 0x1a2   :  { %8952 = vmatprep.subr.bf16.mxu0 %v8951_v51  ;;  %v941_v51 = vld [vmem:[%s15646_s4 + $0x1bd8] sm:$0xff]  ;;  %v8971_v55 = vpack.c.bf16 %v909_v48, %v908_v45  ;;  %v996_v48 = vld [vmem:[%s15646_s4 + $0x1d90] sm:$0xff] }
 0x1a3   :  { %8950 = vmatpush3.bf16.msra.mxu1 %v8949_v49  ;;  %v940_v49 = vld [vmem:[%s15646_s4 + $0x1bd0] sm:$0xff] }
 0x1a4   :  { %8984 = vmatprep.subr.bf16.mxu1 %v8983_v34  ;;  %3866 = vmatmul.mubr.f32.vlgmr.msra.gmra.mrb[24].mxu0 %v12268_v4  ;;  %v886_v4 = vld [vmem:[%s15646_s4 + $0x1a20] sm:$0xff]  ;;  %v892_v34 = vld [vmem:[%s15646_s4 + $0x1a50] sm:$0xff]  ;;  %v9003_v5 = vpack.c.bf16 %v941_v51, %v940_v49  ;;  %v997_v49 = vld [vmem:[%s15646_s4 + $0x1d98] sm:$0xff] }
 0x1a5   :  { %8954 = vmatpush3.bf16.msra.mxu0 %v8953_v50  ;;  %4005 = vmatprep.mubr.f32.mxu0 %v1853_v9  ;;  %v8961_v39 = vpack.c.bf16 %v887_v16, %v886_v4  ;;  %v911_v50 = vld [vmem:[%s15646_s4 + $0x1ae8] sm:$0xff]  ;;  %v8973_v2 = vpack.c.bf16 %v893_v41, %v892_v34  ;;  %v945_v4 = vld [vmem:[%s15646_s4 + $0x1bf8] sm:$0xff]  ;;  %v948_v34 = vld [vmem:[%s15646_s4 + $0x1c10] sm:$0xff] }
 0x1a6   :  { %3936 = vmatmul.mubr.f32.vlgmr.msra.gmra.mrb[24].mxu1 %v12277_v8  ;;  %8956 = vmatprep.subr.bf16.mxu0 %v8955_v1  ;;  %v919_v8 = vld [vmem:[%s15646_s4 + $0x1b28] sm:$0xff]  ;;  %v8975_v3 = vpack.c.bf16 %v911_v50, %v910_v59  ;;  %v949_v41 = vld [vmem:[%s15646_s4 + $0x1c18] sm:$0xff]  ;;  %v966_v59 = vld [vmem:[%s15646_s4 + $0x1ca0] sm:$0xff] }
 0x1a7   :  { %8986 = vmatpush3.bf16.msra.mxu1 %v8985_v63  ;;  %4075 = vmatprep.mubr.f32.mxu1 %v1854_v61  ;;  %v8993_v27 = vpack.c.bf16 %v919_v8, %v918_v18  ;;  %v942_v63 = vld [vmem:[%s15646_s4 + $0x1be0] sm:$0xff]  ;;  %v943_v1 = vld [vmem:[%s15646_s4 + $0x1be8] sm:$0xff]  ;;  %v913_v61 = vld [vmem:[%s15646_s4 + $0x1af8] sm:$0xff] }
 0x1a8   :  { %8988 = vmatprep.subr.bf16.mxu1 %v8987_v15  ;;  %v894_v15 = vld [vmem:[%s15646_s4 + $0x1a60] sm:$0xff]  ;;  %v9007_v9 = vpack.c.bf16 %v943_v1, %v942_v63  ;;  %v40_v8 = vld [vmem:[%s15647_s0 + $0x70] sm:$0xff]  ;;  %v8979_v19 = vpack.c.bf16 %v913_v61, %v912_v11  ;;  %v967_v50 = vld [vmem:[%s15646_s4 + $0x1ca8] sm:$0xff] }
 0x1a9   :  { %8958 = vmatpush3.bf16.msra.mxu0 %v8957_v12  ;;  %v1855_v33 = vcombine.high %v40_v8, %v40_v8  ;;  %v12688_v45 = vrot.slane %v40_v8, %v9893_v13  ;;  %v998_v1 = vld [vmem:[%s15646_s4 + $0x1da0] sm:$0xff]  ;;  %v969_v11 = vld [vmem:[%s15646_s4 + $0x1cb8] sm:$0xff]  ;;  %v1000_v61 = vld [vmem:[%s15646_s4 + $0x1db0] sm:$0xff] }
 0x1aa   :  { %8960 = vmatprep.subr.bf16.mxu0 %v8959_v17  ;;  %v944_v17 = vld [vmem:[%s15646_s4 + $0x1bf0] sm:$0xff] }
 0x1ab   :  { %8990 = vmatpush3.bf16.msra.mxu1 %v8989_v26  ;;  %v9011_v28 = vpack.c.bf16 %v945_v4, %v944_v17  ;;  %v12697_v51 = vrot.slane %v1855_v33, %v9893_v13  ;;  %v1870_v63 = vcombine.high %v12688_v45, %v12688_v45  ;;  %v9027_v4 = vpack.c.bf16 %v969_v11, %v968_v10  ;;  %v972_v33 = vld [vmem:[%s15646_s4 + $0x1cd0] sm:$0xff] }
 0x1ac   :  { %8992 = vmatprep.subr.bf16.mxu1 %v8991_v21  ;;  %v8977_v21 = vpack.c.bf16 %v895_v6, %v894_v15  ;;  %v9053_v15 = vpack.c.bf16 %v981_v46, %v980_v56  ;;  %v9023_v6 = vpack.c.bf16 %v967_v50, %v966_v59  ;;  %v959_v46 = vld [vmem:[%s15646_s4 + $0x1c68] sm:$0xff]  ;;  %v990_v59 = vld [vmem:[%s15646_s4 + $0x1d60] sm:$0xff] }
 0x1ad   :  { %8962 = vmatpush3.bf16.msra.mxu0 %v8961_v39  ;;  %v897_v39 = vld [vmem:[%s15646_s4 + $0x1a78] sm:$0xff] }
 0x1ae   :  { %8964 = vmatprep.subr.bf16.mxu0 %v8963_v14  ;;  %v8981_v36 = vpack.c.bf16 %v897_v39, %v896_v24  ;;  %v1002_v24 = vld [vmem:[%s15646_s4 + $0x1dc0] sm:$0xff]  ;;  %v1003_v39 = vld [vmem:[%s15646_s4 + $0x1dc8] sm:$0xff] }
 0x1af   :  { %8994 = vmatpush3.bf16.msra.mxu1 %v8993_v27  ;;  %v928_v27 = vld [vmem:[%s15646_s4 + $0x1b70] sm:$0xff] }
 0x1b0   :  { %8996 = vmatprep.subr.bf16.mxu1 %v8995_v20  ;;  %v963_v20 = vld [vmem:[%s15646_s4 + $0x1c88] sm:$0xff]  ;;  %v9013_v37 = vpack.c.bf16 %v929_v30, %v928_v27  ;;  %v954_v30 = vld [vmem:[%s15646_s4 + $0x1c40] sm:$0xff] }
 0x1b1   :  { %8966 = vmatpush3.bf16.msra.mxu0 %v8965_v38  ;;  %v9015_v38 = vpack.c.bf16 %v963_v20, %v962_v31  ;;  %v955_v31 = vld [vmem:[%s15646_s4 + $0x1c48] sm:$0xff]  ;;  %v986_v20 = vld [vmem:[%s15646_s4 + $0x1d40] sm:$0xff] }
 0x1b2   :  { %8968 = vmatprep.subr.bf16.mxu0 %v8967_v40  ;;  %v947_v40 = vld [vmem:[%s15646_s4 + $0x1c08] sm:$0xff] }
 0x1b3   :  { %8998 = vmatpush3.bf16.msra.mxu1 %v8997_v25  ;;  %v946_v25 = vld [vmem:[%s15646_s4 + $0x1c00] sm:$0xff] }
 0x1b4   :  { %9000 = vmatprep.subr.bf16.mxu1 %v8999_v43  ;;  %v964_v43 = vld [vmem:[%s15646_s4 + $0x1c90] sm:$0xff] }
 0x1b5   :  { %8970 = vmatpush3.bf16.msra.mxu0 %v8969_v44  ;;  %v9017_v44 = vpack.c.bf16 %v947_v40, %v946_v25  ;;  %v9033_v25 = vpack.c.bf16 %v955_v31, %v954_v30  ;;  %v1042_v30 = vld [vmem:[%s15646_s4 + $0x1f00] sm:$0xff] }
 0x1b6   :  { %8972 = vmatprep.subr.bf16.mxu0 %v8971_v55  ;;  %v9019_v55 = vpack.c.bf16 %v965_v58, %v964_v43  ;;  %v988_v43 = vld [vmem:[%s15646_s4 + $0x1d50] sm:$0xff] }
 0x1b7   :  { %9002 = vmatpush3.bf16.msra.mxu1 %v9001_v52  ;;  %v6891_v60 = vpop.f32.mrb[12].mxu0  ;;  %v9049_v52 = vpack.c.bf16 %v979_v29, %v978_v42  ;;  %v957_v29 = vld [vmem:[%s15646_s4 + $0x1c58] sm:$0xff] }
 0x1b8   :  { %9004 = vmatprep.subr.bf16.mxu1 %v9003_v5  ;;  %v6892_v12 = vpop.f32.mrb[13].mxu0  ;;  %v9051_v5 = vpack.c.bf16 %v997_v49, %v996_v48  ;;  %v989_v48 = vld [vmem:[%s15646_s4 + $0x1d58] sm:$0xff]  ;;  %v974_v49 = vld [vmem:[%s15646_s4 + $0x1ce0] sm:$0xff] }
 0x1b9   :  { %v6926_v26 = vpop.f32.mrb[12].mxu1  ;;  %v6893_v16 = vadd.f32 %v6892_v12, %v6891_v60  ;;  %8974 = vmatpush3.bf16.msra.mxu0 %v8973_v2  ;;  %v999_v2 = vld [vmem:[%s15646_s4 + $0x1da8] sm:$0xff]  ;;  %v982_v60 = vld [vmem:[%s15646_s4 + $0x1d20] sm:$0xff]  ;;  %v1001_v12 = vld [vmem:[%s15646_s4 + $0x1db8] sm:$0xff] }
 0x1ba   :  { %v6927_v18 = vpop.f32.mrb[13].mxu1  ;;  %8976 = vmatprep.subr.bf16.mxu0 %v8975_v3  ;;  %v9021_v3 = vpack.c.bf16 %v949_v41, %v948_v34  ;;  %v9059_v8 = vpack.c.bf16 %v1001_v12, %v1000_v61  ;;  %v9069_v41 = vpack.c.bf16 %v989_v48, %v988_v43  ;;  %v960_v12 = vld [vmem:[%s15646_s4 + $0x1c70] sm:$0xff]  ;;  %v1045_v48 = vld [vmem:[%s15646_s4 + $0x1f18] sm:$0xff] }
 0x1bb   :  { %v6928_v22 = vadd.f32 %v6927_v18, %v6926_v26  ;;  %9006 = vmatpush3.bf16.msra.mxu1 %v9005_v53  ;;  %v3028_v14 = vadd.f32 %v6893_v16, %v12457_v47  ;;  %v995_v47 = vld [vmem:[%s15646_s4 + $0x1d88] sm:$0xff]  ;;  %v1871_v53 = vcombine.high %v12697_v51, %v12697_v51  ;;  %v952_v16 = vld [vmem:[%s15646_s4 + $0x1c30] sm:$0xff]  ;;  %v953_v18 = vld [vmem:[%s15646_s4 + $0x1c38] sm:$0xff] }
 0x1bc   :  { %9008 = vmatprep.subr.bf16.mxu1 %v9007_v9  ;;  %v9047_v54 = vpack.c.bf16 %v995_v47, %v994_v32  ;;  %v9055_v9 = vpack.c.bf16 %v999_v2, %v998_v1  ;;  %v9029_v27 = vpack.c.bf16 %v953_v18, %v952_v16  ;;  %v9063_v32 = vpack.c.bf16 %v1003_v39, %v1002_v24  ;;  %v987_v47 = vld [vmem:[%s15646_s4 + $0x1d48] sm:$0xff]  ;;  %v976_v2 = vld [vmem:[%s15646_s4 + $0x1cf0] sm:$0xff]  ;;  %v993_v18 = vld [vmem:[%s15646_s4 + $0x1d78] sm:$0xff] }
 0x1bd   :  { %v12667_v35 = vadd.f32 %v6928_v22, %v3028_v14  ;;  %8978 = vmatpush3.bf16.msra.mxu0 %v8977_v21  ;;  %v984_v21 = vld [vmem:[%s15646_s4 + $0x1d30] sm:$0xff]  ;;  %v985_v22 = vld [vmem:[%s15646_s4 + $0x1d38] sm:$0xff]  ;;  %v9065_v40 = vpack.c.bf16 %v987_v47, %v986_v20  ;;  %v991_v1 = vld [vmem:[%s15646_s4 + $0x1d68] sm:$0xff] }
 0x1be   :  { %8980 = vmatprep.subr.bf16.mxu0 %v8979_v19  ;;  %v971_v19 = vld [vmem:[%s15646_s4 + $0x1cc8] sm:$0xff]  ;;  %v9061_v14 = vpack.c.bf16 %v985_v22, %v984_v21  ;;  %v9073_v11 = vpack.c.bf16 %v991_v1, %v990_v59  ;;  %v1026_v21 = vld [vmem:[%s15646_s4 + $0x1e80] sm:$0xff]  ;;  %v1029_v47 = vld [vmem:[%s15646_s4 + $0x1e98] sm:$0xff] }
 0x1bf   :  { %9010 = vmatpush3.bf16.msra.mxu1 %v9009_v23  ;;  %v970_v23 = vld [vmem:[%s15646_s4 + $0x1cc0] sm:$0xff]  ;;  %v1043_v20 = vld [vmem:[%s15646_s4 + $0x1f08] sm:$0xff]  ;;  %v1044_v43 = vld [vmem:[%s15646_s4 + $0x1f10] sm:$0xff] }
 0x1c0   :  { %9012 = vmatprep.subr.bf16.mxu1 %v9011_v28  ;;  %v9031_v28 = vpack.c.bf16 %v971_v19, %v970_v23  ;;  %v1058_v22 = vld [vmem:[%s15646_s4 + $0x1f80] sm:$0xff]  ;;  %v1015_v59 = vld [vmem:[%s15646_s4 + $0x1e28] sm:$0xff]  ;;  %v1032_v1 = vld [vmem:[%s15646_s4 + $0x1eb0] sm:$0xff] }
 0x1c1   :  { %8982 = vmatpush3.bf16.msra.mxu0 %v8981_v36  ;;  %v973_v36 = vld [vmem:[%s15646_s4 + $0x1cd8] sm:$0xff] }
 0x1c2   :  { %9016 = vmatprep.subr.bf16.mxu0 %v9015_v38  ;;  %v1005_v38 = vld [vmem:[%s15646_s4 + $0x1dd8] sm:$0xff]  ;;  %v9035_v42 = vpack.c.bf16 %v973_v36, %v972_v33  ;;  %v1060_v36 = vld [vmem:[%s15646_s4 + $0x1f90] sm:$0xff] }
 0x1c3   :  { %9014 = vmatpush3.bf16.msra.mxu1 %v9013_v37  ;;  %v1004_v37 = vld [vmem:[%s15646_s4 + $0x1dd0] sm:$0xff] }
 0x1c4   :  { %9048 = vmatprep.subr.bf16.mxu1 %v9047_v54  ;;  %4006 = vmatmul.mubr.f32.vlgmr.msra.gmra.mrb[26].mxu0 %v12478_v57  ;;  %v950_v57 = vld [vmem:[%s15646_s4 + $0x1c20] sm:$0xff]  ;;  %v956_v54 = vld [vmem:[%s15646_s4 + $0x1c50] sm:$0xff]  ;;  %v9067_v58 = vpack.c.bf16 %v1005_v38, %v1004_v37  ;;  %v1061_v37 = vld [vmem:[%s15646_s4 + $0x1f98] sm:$0xff] }
 0x1c5   :  { %9018 = vmatpush3.bf16.msra.mxu0 %v9017_v44  ;;  %4145 = vmatprep.mubr.f32.mxu0 %v1870_v63  ;;  %v9025_v26 = vpack.c.bf16 %v951_v7, %v950_v57  ;;  %v975_v44 = vld [vmem:[%s15646_s4 + $0x1ce8] sm:$0xff]  ;;  %v9037_v34 = vpack.c.bf16 %v957_v29, %v956_v54  ;;  %v1009_v57 = vld [vmem:[%s15646_s4 + $0x1df8] sm:$0xff]  ;;  %v1012_v54 = vld [vmem:[%s15646_s4 + $0x1e10] sm:$0xff] }
 0x1c6   :  { %4076 = vmatmul.mubr.f32.vlgmr.msra.gmra.mrb[26].mxu1 %v12487_v62  ;;  %9020 = vmatprep.subr.bf16.mxu0 %v9019_v55  ;;  %v983_v62 = vld [vmem:[%s15646_s4 + $0x1d28] sm:$0xff]  ;;  %v9039_v56 = vpack.c.bf16 %v975_v44, %v974_v49  ;;  %v1013_v29 = vld [vmem:[%s15646_s4 + $0x1e18] sm:$0xff]  ;;  %v1030_v49 = vld [vmem:[%s15646_s4 + $0x1ea0] sm:$0xff] }
 0x1c7   :  { %9050 = vmatpush3.bf16.msra.mxu1 %v9049_v52  ;;  %4215 = vmatprep.mubr.f32.mxu1 %v1871_v53  ;;  %v9057_v17 = vpack.c.bf16 %v983_v62, %v982_v60  ;;  %v1006_v52 = vld [vmem:[%s15646_s4 + $0x1de0] sm:$0xff]  ;;  %v1007_v55 = vld [vmem:[%s15646_s4 + $0x1de8] sm:$0xff]  ;;  %v977_v53 = vld [vmem:[%s15646_s4 + $0x1cf8] sm:$0xff] }
 0x1c8   :  { %9052 = vmatprep.subr.bf16.mxu1 %v9051_v5  ;;  %v958_v5 = vld [vmem:[%s15646_s4 + $0x1c60] sm:$0xff]  ;;  %v9071_v63 = vpack.c.bf16 %v1007_v55, %v1006_v52  ;;  %v41_v62 = vld [vmem:[%s15647_s0 + $0x78] sm:$0xff]  ;;  %v9043_v61 = vpack.c.bf16 %v977_v53, %v976_v2  ;;  %v1031_v44 = vld [vmem:[%s15646_s4 + $0x1ea8] sm:$0xff] }
 0x1c9   :  { %9022 = vmatpush3.bf16.msra.mxu0 %v9021_v3  ;;  %v1872_v23 = vcombine.high %v41_v62, %v41_v62  ;;  %v12898_v33 = vrot.slane %v41_v62, %v9893_v13  ;;  %v1062_v55 = vld [vmem:[%s15646_s4 + $0x1fa0] sm:$0xff]  ;;  %v1033_v2 = vld [vmem:[%s15646_s4 + $0x1eb8] sm:$0xff]  ;;  %v1064_v53 = vld [vmem:[%s15646_s4 + $0x1fb0] sm:$0xff] }
 0x1ca   :  { %9024 = vmatprep.subr.bf16.mxu0 %v9023_v6  ;;  %v1008_v6 = vld [vmem:[%s15646_s4 + $0x1df0] sm:$0xff] }
 0x1cb   :  { %9054 = vmatpush3.bf16.msra.mxu1 %v9053_v15  ;;  %v9075_v16 = vpack.c.bf16 %v1009_v57, %v1008_v6  ;;  %v12907_v38 = vrot.slane %v1872_v23, %v9893_v13  ;;  %v1887_v52 = vcombine.high %v12898_v33, %v12898_v33  ;;  %v9091_v57 = vpack.c.bf16 %v1033_v2, %v1032_v1  ;;  %v1036_v23 = vld [vmem:[%s15646_s4 + $0x1ed0] sm:$0xff] }
 0x1cc   :  { %9056 = vmatprep.subr.bf16.mxu1 %v9055_v9  ;;  %v9041_v9 = vpack.c.bf16 %v959_v46, %v958_v5  ;;  %v9117_v5 = vpack.c.bf16 %v1045_v48, %v1044_v43  ;;  %v9087_v46 = vpack.c.bf16 %v1031_v44, %v1030_v49  ;;  %v1023_v48 = vld [vmem:[%s15646_s4 + $0x1e68] sm:$0xff]  ;;  %v1054_v49 = vld [vmem:[%s15646_s4 + $0x1f60] sm:$0xff] }
 0x1cd   :  { %9026 = vmatpush3.bf16.msra.mxu0 %v9025_v26  ;;  %v961_v26 = vld [vmem:[%s15646_s4 + $0x1c78] sm:$0xff] }
 0x1ce   :  { %9028 = vmatprep.subr.bf16.mxu0 %v9027_v4  ;;  %v9045_v24 = vpack.c.bf16 %v961_v26, %v960_v12  ;;  %v1066_v12 = vld [vmem:[%s15646_s4 + $0x1fc0] sm:$0xff]  ;;  %v1067_v26 = vld [vmem:[%s15646_s4 + $0x1fc8] sm:$0xff] }
 0x1cf   :  { %9058 = vmatpush3.bf16.msra.mxu1 %v9057_v17  ;;  %v992_v17 = vld [vmem:[%s15646_s4 + $0x1d70] sm:$0xff] }
 0x1d0   :  { %9060 = vmatprep.subr.bf16.mxu1 %v9059_v8  ;;  %v1027_v8 = vld [vmem:[%s15646_s4 + $0x1e88] sm:$0xff]  ;;  %v9077_v39 = vpack.c.bf16 %v993_v18, %v992_v17  ;;  %v1018_v18 = vld [vmem:[%s15646_s4 + $0x1e40] sm:$0xff] }
 0x1d1   :  { %9030 = vmatpush3.bf16.msra.mxu0 %v9029_v27  ;;  %v9079_v27 = vpack.c.bf16 %v1027_v8, %v1026_v21  ;;  %v1019_v21 = vld [vmem:[%s15646_s4 + $0x1e48] sm:$0xff]  ;;  %v1050_v8 = vld [vmem:[%s15646_s4 + $0x1f40] sm:$0xff] }
 0x1d2   :  { %9032 = vmatprep.subr.bf16.mxu0 %v9031_v28  ;;  %v1011_v28 = vld [vmem:[%s15646_s4 + $0x1e08] sm:$0xff] }
 0x1d3   :  { %9062 = vmatpush3.bf16.msra.mxu1 %v9061_v14  ;;  %v1010_v14 = vld [vmem:[%s15646_s4 + $0x1e00] sm:$0xff] }
 0x1d4   :  { %9064 = vmatprep.subr.bf16.mxu1 %v9063_v32  ;;  %v1028_v32 = vld [vmem:[%s15646_s4 + $0x1e90] sm:$0xff] }
 0x1d5   :  { %9034 = vmatpush3.bf16.msra.mxu0 %v9033_v25  ;;  %v9081_v25 = vpack.c.bf16 %v1011_v28, %v1010_v14  ;;  %v9097_v14 = vpack.c.bf16 %v1019_v21, %v1018_v18  ;;  %v1106_v18 = vld [vmem:[%s15646_s4 + $0x2100] sm:$0xff] }
 0x1d6   :  { %9036 = vmatprep.subr.bf16.mxu0 %v9035_v42  ;;  %v9083_v42 = vpack.c.bf16 %v1029_v47, %v1028_v32  ;;  %v1052_v32 = vld [vmem:[%s15646_s4 + $0x1f50] sm:$0xff] }
 0x1d7   :  { %9066 = vmatpush3.bf16.msra.mxu1 %v9065_v40  ;;  %v6961_v50 = vpop.f32.mrb[14].mxu0  ;;  %v9113_v40 = vpack.c.bf16 %v1043_v20, %v1042_v30  ;;  %v1021_v20 = vld [vmem:[%s15646_s4 + $0x1e58] sm:$0xff] }
 0x1d8   :  { %9068 = vmatprep.subr.bf16.mxu1 %v9067_v58  ;;  %v6962_v3 = vpop.f32.mrb[15].mxu0  ;;  %v9115_v58 = vpack.c.bf16 %v1061_v37, %v1060_v36  ;;  %v1053_v36 = vld [vmem:[%s15646_s4 + $0x1f58] sm:$0xff]  ;;  %v1038_v37 = vld [vmem:[%s15646_s4 + $0x1ee0] sm:$0xff] }
 0x1d9   :  { %v6996_v15 = vpop.f32.mrb[14].mxu1  ;;  %v6963_v7 = vadd.f32 %v6962_v3, %v6961_v50  ;;  %9038 = vmatpush3.bf16.msra.mxu0 %v9037_v34  ;;  %v1063_v34 = vld [vmem:[%s15646_s4 + $0x1fa8] sm:$0xff]  ;;  %v1046_v50 = vld [vmem:[%s15646_s4 + $0x1f20] sm:$0xff]  ;;  %v1065_v3 = vld [vmem:[%s15646_s4 + $0x1fb8] sm:$0xff] }
 0x1da   :  { %v6997_v60 = vpop.f32.mrb[15].mxu1  ;;  %9040 = vmatprep.subr.bf16.mxu0 %v9039_v56  ;;  %v9085_v56 = vpack.c.bf16 %v1013_v29, %v1012_v54  ;;  %v9123_v62 = vpack.c.bf16 %v1065_v3, %v1064_v53  ;;  %v9133_v29 = vpack.c.bf16 %v1053_v36, %v1052_v32  ;;  %v1024_v3 = vld [vmem:[%s15646_s4 + $0x1e70] sm:$0xff]  ;;  %v1109_v36 = vld [vmem:[%s15646_s4 + $0x2118] sm:$0xff] }
 0x1db   :  { %v6998_v10 = vadd.f32 %v6997_v60, %v6996_v15  ;;  %9070 = vmatpush3.bf16.msra.mxu1 %v9069_v41  ;;  %v3168_v4 = vadd.f32 %v6963_v7, %v12667_v35  ;;  %v1059_v35 = vld [vmem:[%s15646_s4 + $0x1f88] sm:$0xff]  ;;  %v1888_v41 = vcombine.high %v12907_v38, %v12907_v38  ;;  %v1016_v7 = vld [vmem:[%s15646_s4 + $0x1e30] sm:$0xff]  ;;  %v1017_v60 = vld [vmem:[%s15646_s4 + $0x1e38] sm:$0xff] }
 0x1dc   :  { %9072 = vmatprep.subr.bf16.mxu1 %v9071_v63  ;;  %v9111_v31 = vpack.c.bf16 %v1059_v35, %v1058_v22  ;;  %v9119_v63 = vpack.c.bf16 %v1063_v34, %v1062_v55  ;;  %v9093_v17 = vpack.c.bf16 %v1017_v60, %v1016_v7  ;;  %v9127_v22 = vpack.c.bf16 %v1067_v26, %v1066_v12  ;;  %v1051_v35 = vld [vmem:[%s15646_s4 + $0x1f48] sm:$0xff]  ;;  %v1040_v34 = vld [vmem:[%s15646_s4 + $0x1ef0] sm:$0xff]  ;;  %v1057_v60 = vld [vmem:[%s15646_s4 + $0x1f78] sm:$0xff] }
 0x1dd   :  { %v12877_v19 = vadd.f32 %v6998_v10, %v3168_v4  ;;  %9042 = vmatpush3.bf16.msra.mxu0 %v9041_v9  ;;  %v1048_v9 = vld [vmem:[%s15646_s4 + $0x1f30] sm:$0xff]  ;;  %v1049_v10 = vld [vmem:[%s15646_s4 + $0x1f38] sm:$0xff]  ;;  %v9129_v28 = vpack.c.bf16 %v1051_v35, %v1050_v8  ;;  %v1055_v55 = vld [vmem:[%s15646_s4 + $0x1f68] sm:$0xff] }
 0x1de   :  { %9044 = vmatprep.subr.bf16.mxu0 %v9043_v61  ;;  %v1035_v61 = vld [vmem:[%s15646_s4 + $0x1ec8] sm:$0xff]  ;;  %v9125_v4 = vpack.c.bf16 %v1049_v10, %v1048_v9  ;;  %v9137_v2 = vpack.c.bf16 %v1055_v55, %v1054_v49  ;;  %v1090_v9 = vld [vmem:[%s15646_s4 + $0x2080] sm:$0xff]  ;;  %v1093_v35 = vld [vmem:[%s15646_s4 + $0x2098] sm:$0xff] }
 0x1df   :  { %9074 = vmatpush3.bf16.msra.mxu1 %v9073_v11  ;;  %v1034_v11 = vld [vmem:[%s15646_s4 + $0x1ec0] sm:$0xff]  ;;  %v1107_v8 = vld [vmem:[%s15646_s4 + $0x2108] sm:$0xff]  ;;  %v1108_v32 = vld [vmem:[%s15646_s4 + $0x2110] sm:$0xff] }
 0x1e0   :  { %9076 = vmatprep.subr.bf16.mxu1 %v9075_v16  ;;  %v9095_v16 = vpack.c.bf16 %v1035_v61, %v1034_v11  ;;  %v1122_v10 = vld [vmem:[%s15646_s4 + $0x2180] sm:$0xff]  ;;  %v1079_v49 = vld [vmem:[%s15646_s4 + $0x2028] sm:$0xff]  ;;  %v1096_v55 = vld [vmem:[%s15646_s4 + $0x20b0] sm:$0xff] }
 0x1e1   :  { %9046 = vmatpush3.bf16.msra.mxu0 %v9045_v24  ;;  %v1037_v24 = vld [vmem:[%s15646_s4 + $0x1ed8] sm:$0xff] }
 0x1e2   :  { %9080 = vmatprep.subr.bf16.mxu0 %v9079_v27  ;;  %v1069_v27 = vld [vmem:[%s15646_s4 + $0x1fd8] sm:$0xff]  ;;  %v9099_v30 = vpack.c.bf16 %v1037_v24, %v1036_v23  ;;  %v1124_v24 = vld [vmem:[%s15646_s4 + $0x2190] sm:$0xff] }
 0x1e3   :  { %9078 = vmatpush3.bf16.msra.mxu1 %v9077_v39  ;;  %v1068_v39 = vld [vmem:[%s15646_s4 + $0x1fd0] sm:$0xff] }
 0x1e4   :  { %9112 = vmatprep.subr.bf16.mxu1 %v9111_v31  ;;  %4146 = vmatmul.mubr.f32.vlgmr.msra.gmra.mrb[28].mxu0 %v12688_v45  ;;  %v1014_v45 = vld [vmem:[%s15646_s4 + $0x1e20] sm:$0xff]  ;;  %v1020_v31 = vld [vmem:[%s15646_s4 + $0x1e50] sm:$0xff]  ;;  %v9131_v47 = vpack.c.bf16 %v1069_v27, %v1068_v39  ;;  %v1125_v39 = vld [vmem:[%s15646_s4 + $0x2198] sm:$0xff] }
 0x1e5   :  { %9082 = vmatpush3.bf16.msra.mxu0 %v9081_v25  ;;  %4285 = vmatprep.mubr.f32.mxu0 %v1887_v52  ;;  %v9089_v15 = vpack.c.bf16 %v1015_v59, %v1014_v45  ;;  %v1039_v25 = vld [vmem:[%s15646_s4 + $0x1ee8] sm:$0xff]  ;;  %v9101_v54 = vpack.c.bf16 %v1021_v20, %v1020_v31  ;;  %v1073_v45 = vld [vmem:[%s15646_s4 + $0x1ff8] sm:$0xff]  ;;  %v1076_v31 = vld [vmem:[%s15646_s4 + $0x2010] sm:$0xff] }
 0x1e6   :  { %4216 = vmatmul.mubr.f32.vlgmr.msra.gmra.mrb[28].mxu1 %v12697_v51  ;;  %9084 = vmatprep.subr.bf16.mxu0 %v9083_v42  ;;  %v1047_v51 = vld [vmem:[%s15646_s4 + $0x1f28] sm:$0xff]  ;;  %v9103_v43 = vpack.c.bf16 %v1039_v25, %v1038_v37  ;;  %v1077_v20 = vld [vmem:[%s15646_s4 + $0x2018] sm:$0xff]  ;;  %v1094_v37 = vld [vmem:[%s15646_s4 + $0x20a0] sm:$0xff] }
 0x1e7   :  { %9114 = vmatpush3.bf16.msra.mxu1 %v9113_v40  ;;  %4355 = vmatprep.mubr.f32.mxu1 %v1888_v41  ;;  %v9121_v6 = vpack.c.bf16 %v1047_v51, %v1046_v50  ;;  %v1070_v40 = vld [vmem:[%s15646_s4 + $0x1fe0] sm:$0xff]  ;;  %v1071_v42 = vld [vmem:[%s15646_s4 + $0x1fe8] sm:$0xff]  ;;  %v1041_v41 = vld [vmem:[%s15646_s4 + $0x1ef8] sm:$0xff] }
 0x1e8   :  { %9116 = vmatprep.subr.bf16.mxu1 %v9115_v58  ;;  %v1022_v58 = vld [vmem:[%s15646_s4 + $0x1e60] sm:$0xff]  ;;  %v9135_v52 = vpack.c.bf16 %v1071_v42, %v1070_v40  ;;  %v9107_v53 = vpack.c.bf16 %v1041_v41, %v1040_v34  ;;  %v1095_v25 = vld [vmem:[%s15646_s4 + $0x20a8] sm:$0xff]  ;;  %v1097_v34 = vld [vmem:[%s15646_s4 + $0x20b8] sm:$0xff] }
 0x1e9   :  { %9086 = vmatpush3.bf16.msra.mxu0 %v9085_v56  ;;  %v42_v51 = vld [vmem:[%s15647_s0 + $0x80] sm:$0xff]  ;;  %v1128_v41 = vld [vmem:[%s15646_s4 + $0x21b0] sm:$0xff] }
 0x1ea   :  { %9088 = vmatprep.subr.bf16.mxu0 %v9087_v46  ;;  %v1072_v46 = vld [vmem:[%s15646_s4 + $0x1ff0] sm:$0xff]  ;;  %v1889_v11 = vcombine.high %v42_v51, %v42_v51  ;;  %v13108_v23 = vrot.slane %v42_v51, %v9893_v13  ;;  %v1126_v42 = vld [vmem:[%s15646_s4 + $0x21a0] sm:$0xff] }
 0x1eb   :  { %9118 = vmatpush3.bf16.msra.mxu1 %v9117_v5  ;;  %v9139_v7 = vpack.c.bf16 %v1073_v45, %v1072_v46  ;;  %v9155_v45 = vpack.c.bf16 %v1097_v34, %v1096_v55 }
 0x1ec   :  { %9120 = vmatprep.subr.bf16.mxu1 %v9119_v63  ;;  %v9105_v63 = vpack.c.bf16 %v1023_v48, %v1022_v58  ;;  %v13117_v27 = vrot.slane %v1889_v11, %v9893_v13  ;;  %v1904_v40 = vcombine.high %v13108_v23, %v13108_v23  ;;  %v9181_v58 = vpack.c.bf16 %v1109_v36, %v1108_v32  ;;  %v1100_v11 = vld [vmem:[%s15646_s4 + $0x20d0] sm:$0xff]  ;;  %v1087_v36 = vld [vmem:[%s15646_s4 + $0x2068] sm:$0xff] }
 0x1ed   :  { %9090 = vmatpush3.bf16.msra.mxu0 %v9089_v15  ;;  %v1025_v15 = vld [vmem:[%s15646_s4 + $0x1e78] sm:$0xff]  ;;  %v9151_v48 = vpack.c.bf16 %v1095_v25, %v1094_v37  ;;  %v1118_v37 = vld [vmem:[%s15646_s4 + $0x2160] sm:$0xff] }
 0x1ee   :  { %9092 = vmatprep.subr.bf16.mxu0 %v9091_v57  ;;  %v9109_v12 = vpack.c.bf16 %v1025_v15, %v1024_v3  ;;  %v1130_v3 = vld [vmem:[%s15646_s4 + $0x21c0] sm:$0xff]  ;;  %v1131_v15 = vld [vmem:[%s15646_s4 + $0x21c8] sm:$0xff] }
 0x1ef   :  { %9122 = vmatpush3.bf16.msra.mxu1 %v9121_v6  ;;  %v1056_v6 = vld [vmem:[%s15646_s4 + $0x1f70] sm:$0xff] }
 0x1f0   :  { %9124 = vmatprep.subr.bf16.mxu1 %v9123_v62  ;;  %v1091_v62 = vld [vmem:[%s15646_s4 + $0x2088] sm:$0xff]  ;;  %v9141_v26 = vpack.c.bf16 %v1057_v60, %v1056_v6  ;;  %v1082_v60 = vld [vmem:[%s15646_s4 + $0x2040] sm:$0xff] }
 0x1f1   :  { %9094 = vmatpush3.bf16.msra.mxu0 %v9093_v17  ;;  %v9143_v17 = vpack.c.bf16 %v1091_v62, %v1090_v9  ;;  %v1083_v9 = vld [vmem:[%s15646_s4 + $0x2048] sm:$0xff]  ;;  %v1114_v62 = vld [vmem:[%s15646_s4 + $0x2140] sm:$0xff] }
 0x1f2   :  { %9096 = vmatprep.subr.bf16.mxu0 %v9095_v16  ;;  %v1075_v16 = vld [vmem:[%s15646_s4 + $0x2008] sm:$0xff] }
 0x1f3   :  { %9126 = vmatpush3.bf16.msra.mxu1 %v9125_v4  ;;  %v1074_v4 = vld [vmem:[%s15646_s4 + $0x2000] sm:$0xff] }
 0x1f4   :  { %9128 = vmatprep.subr.bf16.mxu1 %v9127_v22  ;;  %v1092_v22 = vld [vmem:[%s15646_s4 + $0x2090] sm:$0xff] }
 0x1f5   :  { %9098 = vmatpush3.bf16.msra.mxu0 %v9097_v14  ;;  %v9145_v14 = vpack.c.bf16 %v1075_v16, %v1074_v4  ;;  %v9161_v4 = vpack.c.bf16 %v1083_v9, %v1082_v60  ;;  %v1170_v60 = vld [vmem:[%s15646_s4 + $0x2300] sm:$0xff] }
 0x1f6   :  { %9100 = vmatprep.subr.bf16.mxu0 %v9099_v30  ;;  %v9147_v30 = vpack.c.bf16 %v1093_v35, %v1092_v22  ;;  %v1116_v22 = vld [vmem:[%s15646_s4 + $0x2150] sm:$0xff] }
 0x1f7   :  { %9130 = vmatpush3.bf16.msra.mxu1 %v9129_v28  ;;  %v7031_v44 = vpop.f32.mrb[16].mxu0  ;;  %v9177_v28 = vpack.c.bf16 %v1107_v8, %v1106_v18  ;;  %v1085_v8 = vld [vmem:[%s15646_s4 + $0x2058] sm:$0xff] }
 0x1f8   :  { %9132 = vmatprep.subr.bf16.mxu1 %v9131_v47  ;;  %v7032_v56 = vpop.f32.mrb[17].mxu0  ;;  %v9179_v47 = vpack.c.bf16 %v1125_v39, %v1124_v24  ;;  %v1117_v24 = vld [vmem:[%s15646_s4 + $0x2158] sm:$0xff]  ;;  %v1102_v39 = vld [vmem:[%s15646_s4 + $0x20e0] sm:$0xff] }
 0x1f9   :  { %v7066_v5 = vpop.f32.mrb[16].mxu1  ;;  %v7033_v59 = vadd.f32 %v7032_v56, %v7031_v44  ;;  %9102 = vmatpush3.bf16.msra.mxu0 %v9101_v54  ;;  %v1127_v54 = vld [vmem:[%s15646_s4 + $0x21a8] sm:$0xff]  ;;  %v1110_v44 = vld [vmem:[%s15646_s4 + $0x2120] sm:$0xff]  ;;  %v1129_v56 = vld [vmem:[%s15646_s4 + $0x21b8] sm:$0xff] }
 0x1fa   :  { %v7067_v50 = vpop.f32.mrb[17].mxu1  ;;  %9104 = vmatprep.subr.bf16.mxu0 %v9103_v43  ;;  %v9149_v43 = vpack.c.bf16 %v1077_v20, %v1076_v31  ;;  %v9187_v51 = vpack.c.bf16 %v1129_v56, %v1128_v41  ;;  %v9197_v20 = vpack.c.bf16 %v1117_v24, %v1116_v22  ;;  %v1088_v56 = vld [vmem:[%s15646_s4 + $0x2070] sm:$0xff]  ;;  %v1173_v24 = vld [vmem:[%s15646_s4 + $0x2318] sm:$0xff] }
 0x1fb   :  { %v7068_v1 = vadd.f32 %v7067_v50, %v7066_v5  ;;  %9134 = vmatpush3.bf16.msra.mxu1 %v9133_v29  ;;  %v3308_v57 = vadd.f32 %v7033_v59, %v12877_v19  ;;  %v1123_v19 = vld [vmem:[%s15646_s4 + $0x2188] sm:$0xff]  ;;  %v1905_v29 = vcombine.high %v13117_v27, %v13117_v27  ;;  %v1080_v59 = vld [vmem:[%s15646_s4 + $0x2030] sm:$0xff]  ;;  %v1081_v50 = vld [vmem:[%s15646_s4 + $0x2038] sm:$0xff] }
 0x1fc   :  { %9136 = vmatprep.subr.bf16.mxu1 %v9135_v52  ;;  %v9175_v21 = vpack.c.bf16 %v1123_v19, %v1122_v10  ;;  %v9183_v52 = vpack.c.bf16 %v1127_v54, %v1126_v42  ;;  %v9157_v6 = vpack.c.bf16 %v1081_v50, %v1080_v59  ;;  %v9191_v10 = vpack.c.bf16 %v1131_v15, %v1130_v3  ;;  %v1115_v19 = vld [vmem:[%s15646_s4 + $0x2148] sm:$0xff]  ;;  %v1104_v54 = vld [vmem:[%s15646_s4 + $0x20f0] sm:$0xff]  ;;  %v1121_v50 = vld [vmem:[%s15646_s4 + $0x2178] sm:$0xff] }
 0x1fd   :  { %v13087_v61 = vadd.f32 %v7068_v1, %v3308_v57  ;;  %9106 = vmatpush3.bf16.msra.mxu0 %v9105_v63  ;;  %v1112_v63 = vld [vmem:[%s15646_s4 + $0x2130] sm:$0xff]  ;;  %v1113_v1 = vld [vmem:[%s15646_s4 + $0x2138] sm:$0xff]  ;;  %v9193_v16 = vpack.c.bf16 %v1115_v19, %v1114_v62  ;;  %v1119_v42 = vld [vmem:[%s15646_s4 + $0x2168] sm:$0xff] }
 0x1fe   :  { %9108 = vmatprep.subr.bf16.mxu0 %v9107_v53  ;;  %v1099_v53 = vld [vmem:[%s15646_s4 + $0x20c8] sm:$0xff]  ;;  %v9189_v57 = vpack.c.bf16 %v1113_v1, %v1112_v63  ;;  %v9201_v34 = vpack.c.bf16 %v1119_v42, %v1118_v37  ;;  %v1154_v63 = vld [vmem:[%s15646_s4 + $0x2280] sm:$0xff]  ;;  %v1157_v19 = vld [vmem:[%s15646_s4 + $0x2298] sm:$0xff] }
 0x1ff   :  { %9138 = vmatpush3.bf16.msra.mxu1 %v9137_v2  ;;  %v1098_v2 = vld [vmem:[%s15646_s4 + $0x20c0] sm:$0xff]  ;;  %v1171_v62 = vld [vmem:[%s15646_s4 + $0x2308] sm:$0xff]  ;;  %v1172_v22 = vld [vmem:[%s15646_s4 + $0x2310] sm:$0xff] }
 0x200   :  { %9140 = vmatprep.subr.bf16.mxu1 %v9139_v7  ;;  %v9159_v7 = vpack.c.bf16 %v1099_v53, %v1098_v2  ;;  %v1186_v1 = vld [vmem:[%s15646_s4 + $0x2380] sm:$0xff]  ;;  %v1143_v37 = vld [vmem:[%s15646_s4 + $0x2228] sm:$0xff]  ;;  %v1160_v42 = vld [vmem:[%s15646_s4 + $0x22b0] sm:$0xff] }
 0x201   :  { %9110 = vmatpush3.bf16.msra.mxu0 %v9109_v12  ;;  %v1101_v12 = vld [vmem:[%s15646_s4 + $0x20d8] sm:$0xff] }
 0x202   :  { %9144 = vmatprep.subr.bf16.mxu0 %v9143_v17  ;;  %v1133_v17 = vld [vmem:[%s15646_s4 + $0x21d8] sm:$0xff]  ;;  %v9163_v18 = vpack.c.bf16 %v1101_v12, %v1100_v11  ;;  %v1188_v12 = vld [vmem:[%s15646_s4 + $0x2390] sm:$0xff] }
 0x203   :  { %9142 = vmatpush3.bf16.msra.mxu1 %v9141_v26  ;;  %v1132_v26 = vld [vmem:[%s15646_s4 + $0x21d0] sm:$0xff] }
 0x204   :  { %9176 = vmatprep.subr.bf16.mxu1 %v9175_v21  ;;  %4286 = vmatmul.mubr.f32.vlgmr.msra.gmra.mrb[30].mxu0 %v12898_v33  ;;  %v1078_v33 = vld [vmem:[%s15646_s4 + $0x2020] sm:$0xff]  ;;  %v1084_v21 = vld [vmem:[%s15646_s4 + $0x2050] sm:$0xff]  ;;  %v9195_v35 = vpack.c.bf16 %v1133_v17, %v1132_v26  ;;  %v1189_v26 = vld [vmem:[%s15646_s4 + $0x2398] sm:$0xff] }
 0x205   :  { %9146 = vmatpush3.bf16.msra.mxu0 %v9145_v14  ;;  %4425 = vmatprep.mubr.f32.mxu0 %v1904_v40  ;;  %v9153_v5 = vpack.c.bf16 %v1079_v49, %v1078_v33  ;;  %v1103_v14 = vld [vmem:[%s15646_s4 + $0x20e8] sm:$0xff]  ;;  %v9165_v31 = vpack.c.bf16 %v1085_v8, %v1084_v21  ;;  %v1137_v33 = vld [vmem:[%s15646_s4 + $0x21f8] sm:$0xff]  ;;  %v1140_v21 = vld [vmem:[%s15646_s4 + $0x2210] sm:$0xff] }
 0x206   :  { %4356 = vmatmul.mubr.f32.vlgmr.msra.gmra.mrb[30].mxu1 %v12907_v38  ;;  %9148 = vmatprep.subr.bf16.mxu0 %v9147_v30  ;;  %v1111_v38 = vld [vmem:[%s15646_s4 + $0x2128] sm:$0xff]  ;;  %v9167_v32 = vpack.c.bf16 %v1103_v14, %v1102_v39  ;;  %v1141_v8 = vld [vmem:[%s15646_s4 + $0x2218] sm:$0xff]  ;;  %v1158_v39 = vld [vmem:[%s15646_s4 + $0x22a0] sm:$0xff] }
 0x207   :  { %9178 = vmatpush3.bf16.msra.mxu1 %v9177_v28  ;;  %4495 = vmatprep.mubr.f32.mxu1 %v1905_v29  ;;  %v9185_v46 = vpack.c.bf16 %v1111_v38, %v1110_v44  ;;  %v1134_v28 = vld [vmem:[%s15646_s4 + $0x21e0] sm:$0xff]  ;;  %v1135_v30 = vld [vmem:[%s15646_s4 + $0x21e8] sm:$0xff]  ;;  %v1105_v29 = vld [vmem:[%s15646_s4 + $0x20f8] sm:$0xff] }
 0x208   :  { %9180 = vmatprep.subr.bf16.mxu1 %v9179_v47  ;;  %v1086_v47 = vld [vmem:[%s15646_s4 + $0x2060] sm:$0xff]  ;;  %v9199_v40 = vpack.c.bf16 %v1135_v30, %v1134_v28  ;;  %v43_v38 = vld [vmem:[%s15647_s0 + $0x88] sm:$0xff]  ;;  %v9171_v41 = vpack.c.bf16 %v1105_v29, %v1104_v54  ;;  %v1161_v54 = vld [vmem:[%s15646_s4 + $0x22b8] sm:$0xff] }
 0x209   :  { %9150 = vmatpush3.bf16.msra.mxu0 %v9149_v43  ;;  %v1906_v2 = vcombine.high %v43_v38, %v43_v38  ;;  %v13318_v11 = vrot.slane %v43_v38, %v9893_v13  ;;  %v1159_v14 = vld [vmem:[%s15646_s4 + $0x22a8] sm:$0xff]  ;;  %v1190_v30 = vld [vmem:[%s15646_s4 + $0x23a0] sm:$0xff]  ;;  %v1192_v29 = vld [vmem:[%s15646_s4 + $0x23b0] sm:$0xff] }
 0x20a   :  { %9152 = vmatprep.subr.bf16.mxu0 %v9151_v48  ;;  %v1136_v48 = vld [vmem:[%s15646_s4 + $0x21f0] sm:$0xff] }
 0x20b   :  { %9182 = vmatpush3.bf16.msra.mxu1 %v9181_v58  ;;  %v9203_v59 = vpack.c.bf16 %v1137_v33, %v1136_v48  ;;  %v13327_v17 = vrot.slane %v1906_v2, %v9893_v13  ;;  %v1921_v28 = vcombine.high %v13318_v11, %v13318_v11  ;;  %v9219_v33 = vpack.c.bf16 %v1161_v54, %v1160_v42  ;;  %v1164_v2 = vld [vmem:[%s15646_s4 + $0x22d0] sm:$0xff] }
 0x20c   :  { %9184 = vmatprep.subr.bf16.mxu1 %v9183_v52  ;;  %v9169_v52 = vpack.c.bf16 %v1087_v36, %v1086_v47  ;;  %v9245_v47 = vpack.c.bf16 %v1173_v24, %v1172_v22  ;;  %v9215_v36 = vpack.c.bf16 %v1159_v14, %v1158_v39  ;;  %v1151_v24 = vld [vmem:[%s15646_s4 + $0x2268] sm:$0xff]  ;;  %v1182_v39 = vld [vmem:[%s15646_s4 + $0x2360] sm:$0xff] }
 0x20d   :  { %9154 = vmatpush3.bf16.msra.mxu0 %v9153_v5  ;;  %v1089_v5 = vld [vmem:[%s15646_s4 + $0x2078] sm:$0xff] }
 0x20e   :  { %9156 = vmatprep.subr.bf16.mxu0 %v9155_v45  ;;  %v9173_v3 = vpack.c.bf16 %v1089_v5, %v1088_v56  ;;  %v1194_v56 = vld [vmem:[%s15646_s4 + $0x23c0] sm:$0xff]  ;;  %v1195_v5 = vld [vmem:[%s15646_s4 + $0x23c8] sm:$0xff] }
 0x20f   :  { %9186 = vmatpush3.bf16.msra.mxu1 %v9185_v46  ;;  %v1120_v46 = vld [vmem:[%s15646_s4 + $0x2170] sm:$0xff] }
 0x210   :  { %9188 = vmatprep.subr.bf16.mxu1 %v9187_v51  ;;  %v1155_v51 = vld [vmem:[%s15646_s4 + $0x2288] sm:$0xff]  ;;  %v9205_v15 = vpack.c.bf16 %v1121_v50, %v1120_v46  ;;  %v1146_v50 = vld [vmem:[%s15646_s4 + $0x2240] sm:$0xff] }
 0x211   :  { %9158 = vmatpush3.bf16.msra.mxu0 %v9157_v6  ;;  %v9207_v6 = vpack.c.bf16 %v1155_v51, %v1154_v63  ;;  %v1147_v63 = vld [vmem:[%s15646_s4 + $0x2248] sm:$0xff]  ;;  %v1178_v51 = vld [vmem:[%s15646_s4 + $0x2340] sm:$0xff] }
 0x212   :  { %9160 = vmatprep.subr.bf16.mxu0 %v9159_v7  ;;  %v1139_v7 = vld [vmem:[%s15646_s4 + $0x2208] sm:$0xff] }
 0x213   :  { %9190 = vmatpush3.bf16.msra.mxu1 %v9189_v57  ;;  %v1138_v57 = vld [vmem:[%s15646_s4 + $0x2200] sm:$0xff] }
 0x214   :  { %9192 = vmatprep.subr.bf16.mxu1 %v9191_v10  ;;  %v1156_v10 = vld [vmem:[%s15646_s4 + $0x2290] sm:$0xff] }
 0x215   :  { %9162 = vmatpush3.bf16.msra.mxu0 %v9161_v4  ;;  %v9209_v4 = vpack.c.bf16 %v1139_v7, %v1138_v57  ;;  %v9225_v57 = vpack.c.bf16 %v1147_v63, %v1146_v50  ;;  %v1234_v50 = vld [vmem:[%s15646_s4 + $0x2500] sm:$0xff] }
 0x216   :  { %9164 = vmatprep.subr.bf16.mxu0 %v9163_v18  ;;  %v9211_v18 = vpack.c.bf16 %v1157_v19, %v1156_v10  ;;  %v1180_v10 = vld [vmem:[%s15646_s4 + $0x2350] sm:$0xff] }
 0x217   :  { %9194 = vmatpush3.bf16.msra.mxu1 %v9193_v16  ;;  %v7101_v25 = vpop.f32.mrb[18].mxu0  ;;  %v9241_v16 = vpack.c.bf16 %v1171_v62, %v1170_v60  ;;  %v1149_v62 = vld [vmem:[%s15646_s4 + $0x2258] sm:$0xff] }
 0x218   :  { %9196 = vmatprep.subr.bf16.mxu1 %v9195_v35  ;;  %v7102_v43 = vpop.f32.mrb[19].mxu0  ;;  %v9243_v35 = vpack.c.bf16 %v1189_v26, %v1188_v12  ;;  %v1181_v12 = vld [vmem:[%s15646_s4 + $0x2358] sm:$0xff]  ;;  %v1166_v26 = vld [vmem:[%s15646_s4 + $0x22e0] sm:$0xff] }
 0x219   :  { %v7136_v58 = vpop.f32.mrb[18].mxu1  ;;  %v7103_v49 = vadd.f32 %v7102_v43, %v7101_v25  ;;  %9166 = vmatpush3.bf16.msra.mxu0 %v9165_v31  ;;  %v1191_v31 = vld [vmem:[%s15646_s4 + $0x23a8] sm:$0xff]  ;;  %v1174_v25 = vld [vmem:[%s15646_s4 + $0x2320] sm:$0xff]  ;;  %v1193_v43 = vld [vmem:[%s15646_s4 + $0x23b8] sm:$0xff] }
 0x21a   :  { %v7137_v44 = vpop.f32.mrb[19].mxu1  ;;  %9168 = vmatprep.subr.bf16.mxu0 %v9167_v32  ;;  %v9213_v32 = vpack.c.bf16 %v1141_v8, %v1140_v21  ;;  %v9251_v38 = vpack.c.bf16 %v1193_v43, %v1192_v29  ;;  %v9261_v8 = vpack.c.bf16 %v1181_v12, %v1180_v10  ;;  %v1152_v43 = vld [vmem:[%s15646_s4 + $0x2270] sm:$0xff]  ;;  %v1237_v12 = vld [vmem:[%s15646_s4 + $0x2518] sm:$0xff] }
 0x21b   :  { %v7138_v55 = vadd.f32 %v7137_v44, %v7136_v58  ;;  %9198 = vmatpush3.bf16.msra.mxu1 %v9197_v20  ;;  %v3448_v45 = vadd.f32 %v7103_v49, %v13087_v61  ;;  %v1187_v61 = vld [vmem:[%s15646_s4 + $0x2388] sm:$0xff]  ;;  %v1922_v20 = vcombine.high %v13327_v17, %v13327_v17  ;;  %v1144_v49 = vld [vmem:[%s15646_s4 + $0x2230] sm:$0xff]  ;;  %v1145_v44 = vld [vmem:[%s15646_s4 + $0x2238] sm:$0xff] }
 0x21c   :  { %9200 = vmatprep.subr.bf16.mxu1 %v9199_v40  ;;  %v9239_v9 = vpack.c.bf16 %v1187_v61, %v1186_v1  ;;  %v9247_v40 = vpack.c.bf16 %v1191_v31, %v1190_v30  ;;  %v9221_v46 = vpack.c.bf16 %v1145_v44, %v1144_v49  ;;  %v9255_v1 = vpack.c.bf16 %v1195_v5, %v1194_v56  ;;  %v1179_v61 = vld [vmem:[%s15646_s4 + $0x2348] sm:$0xff]  ;;  %v1168_v31 = vld [vmem:[%s15646_s4 + $0x22f0] sm:$0xff]  ;;  %v1185_v44 = vld [vmem:[%s15646_s4 + $0x2378] sm:$0xff] }
 0x21d   :  { %v13297_v53 = vadd.f32 %v7138_v55, %v3448_v45  ;;  %9170 = vmatpush3.bf16.msra.mxu0 %v9169_v52  ;;  %v1176_v52 = vld [vmem:[%s15646_s4 + $0x2330] sm:$0xff]  ;;  %v1177_v55 = vld [vmem:[%s15646_s4 + $0x2338] sm:$0xff]  ;;  %v9257_v7 = vpack.c.bf16 %v1179_v61, %v1178_v51  ;;  %v1183_v30 = vld [vmem:[%s15646_s4 + $0x2368] sm:$0xff] }
 0x21e   :  { %9172 = vmatprep.subr.bf16.mxu0 %v9171_v41  ;;  %v1163_v41 = vld [vmem:[%s15646_s4 + $0x22c8] sm:$0xff]  ;;  %v9253_v45 = vpack.c.bf16 %v1177_v55, %v1176_v52  ;;  %v9265_v54 = vpack.c.bf16 %v1183_v30, %v1182_v39  ;;  %v1218_v52 = vld [vmem:[%s15646_s4 + $0x2480] sm:$0xff]  ;;  %v1221_v61 = vld [vmem:[%s15646_s4 + $0x2498] sm:$0xff] }
 0x21f   :  { %9202 = vmatpush3.bf16.msra.mxu1 %v9201_v34  ;;  %v1162_v34 = vld [vmem:[%s15646_s4 + $0x22c0] sm:$0xff]  ;;  %v1235_v51 = vld [vmem:[%s15646_s4 + $0x2508] sm:$0xff]  ;;  %v1236_v10 = vld [vmem:[%s15646_s4 + $0x2510] sm:$0xff] }
 0x220   :  { %9204 = vmatprep.subr.bf16.mxu1 %v9203_v59  ;;  %v9223_v59 = vpack.c.bf16 %v1163_v41, %v1162_v34  ;;  %v1250_v55 = vld [vmem:[%s15646_s4 + $0x2580] sm:$0xff]  ;;  %v1207_v39 = vld [vmem:[%s15646_s4 + $0x2428] sm:$0xff]  ;;  %v1224_v30 = vld [vmem:[%s15646_s4 + $0x24b0] sm:$0xff] }
 0x221   :  { %9174 = vmatpush3.bf16.msra.mxu0 %v9173_v3  ;;  %v1165_v3 = vld [vmem:[%s15646_s4 + $0x22d8] sm:$0xff] }
 0x222   :  { %9208 = vmatprep.subr.bf16.mxu0 %v9207_v6  ;;  %v1197_v6 = vld [vmem:[%s15646_s4 + $0x23d8] sm:$0xff]  ;;  %v9227_v60 = vpack.c.bf16 %v1165_v3, %v1164_v2  ;;  %v1252_v3 = vld [vmem:[%s15646_s4 + $0x2590] sm:$0xff] }
 0x223   :  { %9206 = vmatpush3.bf16.msra.mxu1 %v9205_v15  ;;  %v1196_v15 = vld [vmem:[%s15646_s4 + $0x23d0] sm:$0xff] }
 0x224   :  { %9240 = vmatprep.subr.bf16.mxu1 %v9239_v9  ;;  %4426 = vmatmul.mubr.f32.vlgmr.msra.gmra.mrb[32].mxu0 %v13108_v23  ;;  %v1142_v23 = vld [vmem:[%s15646_s4 + $0x2220] sm:$0xff]  ;;  %v1148_v9 = vld [vmem:[%s15646_s4 + $0x2250] sm:$0xff]  ;;  %v9259_v19 = vpack.c.bf16 %v1197_v6, %v1196_v15  ;;  %v1253_v15 = vld [vmem:[%s15646_s4 + $0x2598] sm:$0xff] }
 0x225   :  { %9210 = vmatpush3.bf16.msra.mxu0 %v9209_v4  ;;  %4565 = vmatprep.mubr.f32.mxu0 %v1921_v28  ;;  %v9217_v58 = vpack.c.bf16 %v1143_v37, %v1142_v23  ;;  %v1167_v4 = vld [vmem:[%s15646_s4 + $0x22e8] sm:$0xff]  ;;  %v9229_v21 = vpack.c.bf16 %v1149_v62, %v1148_v9  ;;  %v1201_v23 = vld [vmem:[%s15646_s4 + $0x23f8] sm:$0xff]  ;;  %v1204_v9 = vld [vmem:[%s15646_s4 + $0x2410] sm:$0xff] }
 0x226   :  { %4496 = vmatmul.mubr.f32.vlgmr.msra.gmra.mrb[32].mxu1 %v13117_v27  ;;  %9212 = vmatprep.subr.bf16.mxu0 %v9211_v18  ;;  %v1175_v27 = vld [vmem:[%s15646_s4 + $0x2328] sm:$0xff]  ;;  %v9231_v22 = vpack.c.bf16 %v1167_v4, %v1166_v26  ;;  %v1205_v62 = vld [vmem:[%s15646_s4 + $0x2418] sm:$0xff]  ;;  %v1222_v26 = vld [vmem:[%s15646_s4 + $0x24a0] sm:$0xff] }
 0x227   :  { %9242 = vmatpush3.bf16.msra.mxu1 %v9241_v16  ;;  %4635 = vmatprep.mubr.f32.mxu1 %v1922_v20  ;;  %v9249_v48 = vpack.c.bf16 %v1175_v27, %v1174_v25  ;;  %v1198_v16 = vld [vmem:[%s15646_s4 + $0x23e0] sm:$0xff]  ;;  %v1199_v18 = vld [vmem:[%s15646_s4 + $0x23e8] sm:$0xff]  ;;  %v1169_v20 = vld [vmem:[%s15646_s4 + $0x22f8] sm:$0xff] }
 0x228   :  { %9244 = vmatprep.subr.bf16.mxu1 %v9243_v35  ;;  %v1150_v35 = vld [vmem:[%s15646_s4 + $0x2260] sm:$0xff]  ;;  %v9263_v28 = vpack.c.bf16 %v1199_v18, %v1198_v16  ;;  %v44_v27 = vld [vmem:[%s15647_s0 + $0x90] sm:$0xff]  ;;  %v9235_v29 = vpack.c.bf16 %v1169_v20, %v1168_v31  ;;  %v1223_v4 = vld [vmem:[%s15646_s4 + $0x24a8] sm:$0xff] }
 0x229   :  { %9214 = vmatpush3.bf16.msra.mxu0 %v9213_v32  ;;  %v1923_v34 = vcombine.high %v44_v27, %v44_v27  ;;  %v13528_v2 = vrot.slane %v44_v27, %v9893_v13  ;;  %v1254_v18 = vld [vmem:[%s15646_s4 + $0x25a0] sm:$0xff]  ;;  %v1225_v31 = vld [vmem:[%s15646_s4 + $0x24b8] sm:$0xff]  ;;  %v1256_v20 = vld [vmem:[%s15646_s4 + $0x25b0] sm:$0xff] }
 0x22a   :  { %9216 = vmatprep.subr.bf16.mxu0 %v9215_v36  ;;  %v1200_v36 = vld [vmem:[%s15646_s4 + $0x23f0] sm:$0xff] }
 0x22b   :  { %9246 = vmatpush3.bf16.msra.mxu1 %v9245_v47  ;;  %v9267_v49 = vpack.c.bf16 %v1201_v23, %v1200_v36  ;;  %v13537_v6 = vrot.slane %v1923_v34, %v9893_v13  ;;  %v1938_v16 = vcombine.high %v13528_v2, %v13528_v2  ;;  %v9283_v23 = vpack.c.bf16 %v1225_v31, %v1224_v30  ;;  %v1228_v34 = vld [vmem:[%s15646_s4 + $0x24d0] sm:$0xff] }
 0x22c   :  { %9248 = vmatprep.subr.bf16.mxu1 %v9247_v40  ;;  %v9233_v40 = vpack.c.bf16 %v1151_v24, %v1150_v35  ;;  %v9309_v35 = vpack.c.bf16 %v1237_v12, %v1236_v10  ;;  %v9279_v24 = vpack.c.bf16 %v1223_v4, %v1222_v26  ;;  %v1215_v12 = vld [vmem:[%s15646_s4 + $0x2468] sm:$0xff]  ;;  %v1246_v26 = vld [vmem:[%s15646_s4 + $0x2560] sm:$0xff] }
 0x22d   :  { %9218 = vmatpush3.bf16.msra.mxu0 %v9217_v58  ;;  %v1153_v58 = vld [vmem:[%s15646_s4 + $0x2278] sm:$0xff] }
 0x22e   :  { %9220 = vmatprep.subr.bf16.mxu0 %v9219_v33  ;;  %v9237_v56 = vpack.c.bf16 %v1153_v58, %v1152_v43  ;;  %v1258_v43 = vld [vmem:[%s15646_s4 + $0x25c0] sm:$0xff]  ;;  %v1259_v58 = vld [vmem:[%s15646_s4 + $0x25c8] sm:$0xff] }
 0x22f   :  { %9250 = vmatpush3.bf16.msra.mxu1 %v9249_v48  ;;  %v1184_v48 = vld [vmem:[%s15646_s4 + $0x2370] sm:$0xff] }
 0x230   :  { %9252 = vmatprep.subr.bf16.mxu1 %v9251_v38  ;;  %v1219_v38 = vld [vmem:[%s15646_s4 + $0x2488] sm:$0xff]  ;;  %v9269_v5 = vpack.c.bf16 %v1185_v44, %v1184_v48  ;;  %v1210_v44 = vld [vmem:[%s15646_s4 + $0x2440] sm:$0xff] }
 0x231   :  { %9222 = vmatpush3.bf16.msra.mxu0 %v9221_v46  ;;  %v9271_v46 = vpack.c.bf16 %v1219_v38, %v1218_v52  ;;  %v1211_v52 = vld [vmem:[%s15646_s4 + $0x2448] sm:$0xff]  ;;  %v1242_v38 = vld [vmem:[%s15646_s4 + $0x2540] sm:$0xff] }
 0x232   :  { %9224 = vmatprep.subr.bf16.mxu0 %v9223_v59  ;;  %v1203_v59 = vld [vmem:[%s15646_s4 + $0x2408] sm:$0xff] }
 0x233   :  { %9254 = vmatpush3.bf16.msra.mxu1 %v9253_v45  ;;  %v1202_v45 = vld [vmem:[%s15646_s4 + $0x2400] sm:$0xff] }
 0x234   :  { %9256 = vmatprep.subr.bf16.mxu1 %v9255_v1  ;;  %v1220_v1 = vld [vmem:[%s15646_s4 + $0x2490] sm:$0xff] }
 0x235   :  { %9226 = vmatpush3.bf16.msra.mxu0 %v9225_v57  ;;  %v9273_v57 = vpack.c.bf16 %v1203_v59, %v1202_v45  ;;  %v9289_v45 = vpack.c.bf16 %v1211_v52, %v1210_v44  ;;  %v1298_v44 = vld [vmem:[%s15646_s4 + $0x2700] sm:$0xff] }
 0x236   :  { %9228 = vmatprep.subr.bf16.mxu0 %v9227_v60  ;;  %v9275_v60 = vpack.c.bf16 %v1221_v61, %v1220_v1  ;;  %v1244_v1 = vld [vmem:[%s15646_s4 + $0x2550] sm:$0xff] }
 0x237   :  { %9258 = vmatpush3.bf16.msra.mxu1 %v9257_v7  ;;  %v7171_v14 = vpop.f32.mrb[20].mxu0  ;;  %v9305_v7 = vpack.c.bf16 %v1235_v51, %v1234_v50  ;;  %v1213_v51 = vld [vmem:[%s15646_s4 + $0x2458] sm:$0xff] }
 0x238   :  { %9260 = vmatprep.subr.bf16.mxu1 %v9259_v19  ;;  %v7172_v32 = vpop.f32.mrb[21].mxu0  ;;  %v9307_v19 = vpack.c.bf16 %v1253_v15, %v1252_v3  ;;  %v1245_v3 = vld [vmem:[%s15646_s4 + $0x2558] sm:$0xff]  ;;  %v1230_v15 = vld [vmem:[%s15646_s4 + $0x24e0] sm:$0xff] }
 0x239   :  { %v7206_v47 = vpop.f32.mrb[20].mxu1  ;;  %v7173_v37 = vadd.f32 %v7172_v32, %v7171_v14  ;;  %9230 = vmatpush3.bf16.msra.mxu0 %v9229_v21  ;;  %v1255_v21 = vld [vmem:[%s15646_s4 + $0x25a8] sm:$0xff]  ;;  %v1238_v14 = vld [vmem:[%s15646_s4 + $0x2520] sm:$0xff]  ;;  %v1257_v32 = vld [vmem:[%s15646_s4 + $0x25b8] sm:$0xff] }
 0x23a   :  { %v7207_v25 = vpop.f32.mrb[21].mxu1  ;;  %9232 = vmatprep.subr.bf16.mxu0 %v9231_v22  ;;  %v9277_v22 = vpack.c.bf16 %v1205_v62, %v1204_v9  ;;  %v9315_v27 = vpack.c.bf16 %v1257_v32, %v1256_v20  ;;  %v9325_v62 = vpack.c.bf16 %v1245_v3, %v1244_v1  ;;  %v1216_v32 = vld [vmem:[%s15646_s4 + $0x2470] sm:$0xff]  ;;  %v1301_v3 = vld [vmem:[%s15646_s4 + $0x2718] sm:$0xff] }
 0x23b   :  { %v7208_v42 = vadd.f32 %v7207_v25, %v7206_v47  ;;  %9262 = vmatpush3.bf16.msra.mxu1 %v9261_v8  ;;  %v3588_v33 = vadd.f32 %v7173_v37, %v13297_v53  ;;  %v1251_v53 = vld [vmem:[%s15646_s4 + $0x2588] sm:$0xff]  ;;  %v1939_v8 = vcombine.high %v13537_v6, %v13537_v6  ;;  %v1208_v37 = vld [vmem:[%s15646_s4 + $0x2430] sm:$0xff]  ;;  %v1209_v25 = vld [vmem:[%s15646_s4 + $0x2438] sm:$0xff] }
 0x23c   :  { %9264 = vmatprep.subr.bf16.mxu1 %v9263_v28  ;;  %v9303_v63 = vpack.c.bf16 %v1251_v53, %v1250_v55  ;;  %v9311_v28 = vpack.c.bf16 %v1255_v21, %v1254_v18  ;;  %v9285_v48 = vpack.c.bf16 %v1209_v25, %v1208_v37  ;;  %v9319_v55 = vpack.c.bf16 %v1259_v58, %v1258_v43  ;;  %v1243_v53 = vld [vmem:[%s15646_s4 + $0x2548] sm:$0xff]  ;;  %v1232_v21 = vld [vmem:[%s15646_s4 + $0x24f0] sm:$0xff]  ;;  %v1249_v25 = vld [vmem:[%s15646_s4 + $0x2578] sm:$0xff] }
 0x23d   :  { %v13507_v41 = vadd.f32 %v7208_v42, %v3588_v33  ;;  %9234 = vmatpush3.bf16.msra.mxu0 %v9233_v40  ;;  %v1240_v40 = vld [vmem:[%s15646_s4 + $0x2530] sm:$0xff]  ;;  %v1241_v42 = vld [vmem:[%s15646_s4 + $0x2538] sm:$0xff]  ;;  %v9321_v59 = vpack.c.bf16 %v1243_v53, %v1242_v38  ;;  %v1247_v18 = vld [vmem:[%s15646_s4 + $0x2568] sm:$0xff] }
 0x23e   :  { %9236 = vmatprep.subr.bf16.mxu0 %v9235_v29  ;;  %v1227_v29 = vld [vmem:[%s15646_s4 + $0x24c8] sm:$0xff]  ;;  %v9317_v33 = vpack.c.bf16 %v1241_v42, %v1240_v40  ;;  %v9329_v31 = vpack.c.bf16 %v1247_v18, %v1246_v26  ;;  %v1282_v40 = vld [vmem:[%s15646_s4 + $0x2680] sm:$0xff]  ;;  %v1285_v53 = vld [vmem:[%s15646_s4 + $0x2698] sm:$0xff] }
 0x23f   :  { %9266 = vmatpush3.bf16.msra.mxu1 %v9265_v54  ;;  %v1226_v54 = vld [vmem:[%s15646_s4 + $0x24c0] sm:$0xff]  ;;  %v1299_v38 = vld [vmem:[%s15646_s4 + $0x2708] sm:$0xff]  ;;  %v1300_v1 = vld [vmem:[%s15646_s4 + $0x2710] sm:$0xff] }
 0x240   :  { %9268 = vmatprep.subr.bf16.mxu1 %v9267_v49  ;;  %v9287_v49 = vpack.c.bf16 %v1227_v29, %v1226_v54  ;;  %v1314_v42 = vld [vmem:[%s15646_s4 + $0x2780] sm:$0xff]  ;;  %v1271_v26 = vld [vmem:[%s15646_s4 + $0x2628] sm:$0xff]  ;;  %v1288_v18 = vld [vmem:[%s15646_s4 + $0x26b0] sm:$0xff] }
 0x241   :  { %9238 = vmatpush3.bf16.msra.mxu0 %v9237_v56  ;;  %v1229_v56 = vld [vmem:[%s15646_s4 + $0x24d8] sm:$0xff] }
 0x242   :  { %9272 = vmatprep.subr.bf16.mxu0 %v9271_v46  ;;  %v1261_v46 = vld [vmem:[%s15646_s4 + $0x25d8] sm:$0xff]  ;;  %v9291_v50 = vpack.c.bf16 %v1229_v56, %v1228_v34  ;;  %v1316_v56 = vld [vmem:[%s15646_s4 + $0x2790] sm:$0xff] }
 0x243   :  { %9270 = vmatpush3.bf16.msra.mxu1 %v9269_v5  ;;  %v1260_v5 = vld [vmem:[%s15646_s4 + $0x25d0] sm:$0xff] }
 0x244   :  { %9304 = vmatprep.subr.bf16.mxu1 %v9303_v63  ;;  %4566 = vmatmul.mubr.f32.vlgmr.msra.gmra.mrb[34].mxu0 %v13318_v11  ;;  %v1206_v11 = vld [vmem:[%s15646_s4 + $0x2420] sm:$0xff]  ;;  %v1212_v63 = vld [vmem:[%s15646_s4 + $0x2450] sm:$0xff]  ;;  %v9323_v61 = vpack.c.bf16 %v1261_v46, %v1260_v5  ;;  %v1317_v5 = vld [vmem:[%s15646_s4 + $0x2798] sm:$0xff] }
 0x245   :  { %9274 = vmatpush3.bf16.msra.mxu0 %v9273_v57  ;;  %4705 = vmatprep.mubr.f32.mxu0 %v1938_v16  ;;  %v9281_v47 = vpack.c.bf16 %v1207_v39, %v1206_v11  ;;  %v1231_v57 = vld [vmem:[%s15646_s4 + $0x24e8] sm:$0xff]  ;;  %v9293_v9 = vpack.c.bf16 %v1213_v51, %v1212_v63  ;;  %v1265_v11 = vld [vmem:[%s15646_s4 + $0x25f8] sm:$0xff]  ;;  %v1268_v63 = vld [vmem:[%s15646_s4 + $0x2610] sm:$0xff] }
 0x246   :  { %4636 = vmatmul.mubr.f32.vlgmr.msra.gmra.mrb[34].mxu1 %v13327_v17  ;;  %9276 = vmatprep.subr.bf16.mxu0 %v9275_v60  ;;  %v1239_v17 = vld [vmem:[%s15646_s4 + $0x2528] sm:$0xff]  ;;  %v9295_v10 = vpack.c.bf16 %v1231_v57, %v1230_v15  ;;  %v1269_v51 = vld [vmem:[%s15646_s4 + $0x2618] sm:$0xff]  ;;  %v1286_v15 = vld [vmem:[%s15646_s4 + $0x26a0] sm:$0xff] }
 0x247   :  { %9306 = vmatpush3.bf16.msra.mxu1 %v9305_v7  ;;  %4775 = vmatprep.mubr.f32.mxu1 %v1939_v8  ;;  %v9313_v36 = vpack.c.bf16 %v1239_v17, %v1238_v14  ;;  %v1262_v7 = vld [vmem:[%s15646_s4 + $0x25e0] sm:$0xff]  ;;  %v1263_v60 = vld [vmem:[%s15646_s4 + $0x25e8] sm:$0xff]  ;;  %v1233_v8 = vld [vmem:[%s15646_s4 + $0x24f8] sm:$0xff] }
 0x248   :  { %9308 = vmatprep.subr.bf16.mxu1 %v9307_v19  ;;  %v1214_v19 = vld [vmem:[%s15646_s4 + $0x2460] sm:$0xff]  ;;  %v9327_v16 = vpack.c.bf16 %v1263_v60, %v1262_v7  ;;  %v45_v17 = vld [vmem:[%s15647_s0 + $0x98] sm:$0xff]  ;;  %v9299_v20 = vpack.c.bf16 %v1233_v8, %v1232_v21  ;;  %v1287_v57 = vld [vmem:[%s15646_s4 + $0x26a8] sm:$0xff] }
 0x249   :  { %9278 = vmatpush3.bf16.msra.mxu0 %v9277_v22  ;;  %v1940_v54 = vcombine.high %v45_v17, %v45_v17  ;;  %v13738_v34 = vrot.slane %v45_v17, %v9893_v13  ;;  %v1318_v60 = vld [vmem:[%s15646_s4 + $0x27a0] sm:$0xff]  ;;  %v1289_v21 = vld [vmem:[%s15646_s4 + $0x26b8] sm:$0xff]  ;;  %v1320_v8 = vld [vmem:[%s15646_s4 + $0x27b0] sm:$0xff] }
 0x24a   :  { %9280 = vmatprep.subr.bf16.mxu0 %v9279_v24  ;;  %v1264_v24 = vld [vmem:[%s15646_s4 + $0x25f0] sm:$0xff] }
 0x24b   :  { %9310 = vmatpush3.bf16.msra.mxu1 %v9309_v35  ;;  %v9331_v37 = vpack.c.bf16 %v1265_v11, %v1264_v24  ;;  %v13747_v46 = vrot.slane %v1940_v54, %v9893_v13  ;;  %v1955_v7 = vcombine.high %v13738_v34, %v13738_v34  ;;  %v9347_v11 = vpack.c.bf16 %v1289_v21, %v1288_v18  ;;  %v1292_v54 = vld [vmem:[%s15646_s4 + $0x26d0] sm:$0xff] }
 0x24c   :  { %9312 = vmatprep.subr.bf16.mxu1 %v9311_v28  ;;  %v9297_v28 = vpack.c.bf16 %v1215_v12, %v1214_v19  ;;  %v9373_v19 = vpack.c.bf16 %v1301_v3, %v1300_v1  ;;  %v9343_v12 = vpack.c.bf16 %v1287_v57, %v1286_v15  ;;  %v1279_v3 = vld [vmem:[%s15646_s4 + $0x2668] sm:$0xff]  ;;  %v1310_v15 = vld [vmem:[%s15646_s4 + $0x2760] sm:$0xff] }
 0x24d   :  { %9282 = vmatpush3.bf16.msra.mxu0 %v9281_v47  ;;  %v1217_v47 = vld [vmem:[%s15646_s4 + $0x2478] sm:$0xff] }
 0x24e   :  { %9284 = vmatprep.subr.bf16.mxu0 %v9283_v23  ;;  %v9301_v43 = vpack.c.bf16 %v1217_v47, %v1216_v32  ;;  %v1322_v32 = vld [vmem:[%s15646_s4 + $0x27c0] sm:$0xff]  ;;  %v1323_v47 = vld [vmem:[%s15646_s4 + $0x27c8] sm:$0xff] }
 0x24f   :  { %9314 = vmatpush3.bf16.msra.mxu1 %v9313_v36  ;;  %v1248_v36 = vld [vmem:[%s15646_s4 + $0x2570] sm:$0xff] }
 0x250   :  { %9316 = vmatprep.subr.bf16.mxu1 %v9315_v27  ;;  %v1283_v27 = vld [vmem:[%s15646_s4 + $0x2688] sm:$0xff]  ;;  %v9333_v58 = vpack.c.bf16 %v1249_v25, %v1248_v36  ;;  %v1274_v25 = vld [vmem:[%s15646_s4 + $0x2640] sm:$0xff] }
 0x251   :  { %9286 = vmatpush3.bf16.msra.mxu0 %v9285_v48  ;;  %v9335_v48 = vpack.c.bf16 %v1283_v27, %v1282_v40  ;;  %v1275_v40 = vld [vmem:[%s15646_s4 + $0x2648] sm:$0xff]  ;;  %v1306_v27 = vld [vmem:[%s15646_s4 + $0x2740] sm:$0xff] }
 0x252   :  { %9288 = vmatprep.subr.bf16.mxu0 %v9287_v49  ;;  %v1267_v49 = vld [vmem:[%s15646_s4 + $0x2608] sm:$0xff] }
 0x253   :  { %9318 = vmatpush3.bf16.msra.mxu1 %v9317_v33  ;;  %v1266_v33 = vld [vmem:[%s15646_s4 + $0x2600] sm:$0xff] }
 0x254   :  { %9320 = vmatprep.subr.bf16.mxu1 %v9319_v55  ;;  %v1284_v55 = vld [vmem:[%s15646_s4 + $0x2690] sm:$0xff] }
 0x255   :  { %9290 = vmatpush3.bf16.msra.mxu0 %v9289_v45  ;;  %v9337_v45 = vpack.c.bf16 %v1267_v49, %v1266_v33  ;;  %v9353_v33 = vpack.c.bf16 %v1275_v40, %v1274_v25  ;;  %v1362_v25 = vld [vmem:[%s15646_s4 + $0x2900] sm:$0xff] }
 0x256   :  { %9292 = vmatprep.subr.bf16.mxu0 %v9291_v50  ;;  %v9339_v50 = vpack.c.bf16 %v1285_v53, %v1284_v55  ;;  %v1308_v55 = vld [vmem:[%s15646_s4 + $0x2750] sm:$0xff] }
 0x257   :  { %9322 = vmatpush3.bf16.msra.mxu1 %v9321_v59  ;;  %v7241_v4 = vpop.f32.mrb[22].mxu0  ;;  %v9369_v59 = vpack.c.bf16 %v1299_v38, %v1298_v44  ;;  %v1277_v38 = vld [vmem:[%s15646_s4 + $0x2658] sm:$0xff] }
 0x258   :  { %9324 = vmatprep.subr.bf16.mxu1 %v9323_v61  ;;  %v7242_v22 = vpop.f32.mrb[23].mxu0  ;;  %v9371_v61 = vpack.c.bf16 %v1317_v5, %v1316_v56  ;;  %v1309_v56 = vld [vmem:[%s15646_s4 + $0x2758] sm:$0xff]  ;;  %v1294_v5 = vld [vmem:[%s15646_s4 + $0x26e0] sm:$0xff] }
 0x259   :  { %v7276_v35 = vpop.f32.mrb[22].mxu1  ;;  %v7243_v39 = vadd.f32 %v7242_v22, %v7241_v4  ;;  %9294 = vmatpush3.bf16.msra.mxu0 %v9293_v9  ;;  %v1319_v9 = vld [vmem:[%s15646_s4 + $0x27a8] sm:$0xff]  ;;  %v1302_v4 = vld [vmem:[%s15646_s4 + $0x2720] sm:$0xff]  ;;  %v1321_v22 = vld [vmem:[%s15646_s4 + $0x27b8] sm:$0xff] }
 0x25a   :  { %v7277_v14 = vpop.f32.mrb[23].mxu1  ;;  %9296 = vmatprep.subr.bf16.mxu0 %v9295_v10  ;;  %v9341_v10 = vpack.c.bf16 %v1269_v51, %v1268_v63  ;;  %v9379_v17 = vpack.c.bf16 %v1321_v22, %v1320_v8  ;;  %v9389_v51 = vpack.c.bf16 %v1309_v56, %v1308_v55  ;;  %v1280_v22 = vld [vmem:[%s15646_s4 + $0x2670] sm:$0xff]  ;;  %v1365_v56 = vld [vmem:[%s15646_s4 + $0x2918] sm:$0xff] }
 0x25b   :  { %v7278_v30 = vadd.f32 %v7277_v14, %v7276_v35  ;;  %9326 = vmatpush3.bf16.msra.mxu1 %v9325_v62  ;;  %v3728_v23 = vadd.f32 %v7243_v39, %v13507_v41  ;;  %v1315_v41 = vld [vmem:[%s15646_s4 + $0x2788] sm:$0xff]  ;;  %v1956_v62 = vcombine.high %v13747_v46, %v13747_v46  ;;  %v1272_v39 = vld [vmem:[%s15646_s4 + $0x2630] sm:$0xff]  ;;  %v1273_v14 = vld [vmem:[%s15646_s4 + $0x2638] sm:$0xff] }
 0x25c   :  { %9328 = vmatprep.subr.bf16.mxu1 %v9327_v16  ;;  %v9367_v52 = vpack.c.bf16 %v1315_v41, %v1314_v42  ;;  %v9375_v16 = vpack.c.bf16 %v1319_v9, %v1318_v60  ;;  %v9349_v36 = vpack.c.bf16 %v1273_v14, %v1272_v39  ;;  %v9383_v42 = vpack.c.bf16 %v1323_v47, %v1322_v32  ;;  %v1307_v41 = vld [vmem:[%s15646_s4 + $0x2748] sm:$0xff]  ;;  %v1296_v9 = vld [vmem:[%s15646_s4 + $0x26f0] sm:$0xff]  ;;  %v1313_v14 = vld [vmem:[%s15646_s4 + $0x2778] sm:$0xff] }
 0x25d   :  { %v13717_v29 = vadd.f32 %v7278_v30, %v3728_v23  ;;  %9298 = vmatpush3.bf16.msra.mxu0 %v9297_v28  ;;  %v1304_v28 = vld [vmem:[%s15646_s4 + $0x2730] sm:$0xff]  ;;  %v1305_v30 = vld [vmem:[%s15646_s4 + $0x2738] sm:$0xff]  ;;  %v9385_v49 = vpack.c.bf16 %v1307_v41, %v1306_v27  ;;  %v1311_v60 = vld [vmem:[%s15646_s4 + $0x2768] sm:$0xff] }
 0x25e   :  { %9300 = vmatprep.subr.bf16.mxu0 %v9299_v20  ;;  %v1291_v20 = vld [vmem:[%s15646_s4 + $0x26c8] sm:$0xff]  ;;  %v9381_v23 = vpack.c.bf16 %v1305_v30, %v1304_v28  ;;  %v9393_v21 = vpack.c.bf16 %v1311_v60, %v1310_v15  ;;  %v1346_v28 = vld [vmem:[%s15646_s4 + $0x2880] sm:$0xff]  ;;  %v1349_v41 = vld [vmem:[%s15646_s4 + $0x2898] sm:$0xff] }
 0x25f   :  { %9330 = vmatpush3.bf16.msra.mxu1 %v9329_v31  ;;  %v1290_v31 = vld [vmem:[%s15646_s4 + $0x26c0] sm:$0xff]  ;;  %v1363_v27 = vld [vmem:[%s15646_s4 + $0x2908] sm:$0xff]  ;;  %v1364_v55 = vld [vmem:[%s15646_s4 + $0x2910] sm:$0xff] }
 0x260   :  { %9332 = vmatprep.subr.bf16.mxu1 %v9331_v37  ;;  %v9351_v37 = vpack.c.bf16 %v1291_v20, %v1290_v31  ;;  %v1378_v30 = vld [vmem:[%s15646_s4 + $0x2980] sm:$0xff]  ;;  %v1335_v15 = vld [vmem:[%s15646_s4 + $0x2828] sm:$0xff]  ;;  %v1352_v60 = vld [vmem:[%s15646_s4 + $0x28b0] sm:$0xff] }
 0x261   :  { %9302 = vmatpush3.bf16.msra.mxu0 %v9301_v43  ;;  %v1293_v43 = vld [vmem:[%s15646_s4 + $0x26d8] sm:$0xff] }
 0x262   :  { %9336 = vmatprep.subr.bf16.mxu0 %v9335_v48  ;;  %v1325_v48 = vld [vmem:[%s15646_s4 + $0x27d8] sm:$0xff]  ;;  %v9355_v44 = vpack.c.bf16 %v1293_v43, %v1292_v54  ;;  %v1380_v43 = vld [vmem:[%s15646_s4 + $0x2990] sm:$0xff] }
 0x263   :  { %9334 = vmatpush3.bf16.msra.mxu1 %v9333_v58  ;;  %v1324_v58 = vld [vmem:[%s15646_s4 + $0x27d0] sm:$0xff] }
 0x264   :  { %9368 = vmatprep.subr.bf16.mxu1 %v9367_v52  ;;  %4706 = vmatmul.mubr.f32.vlgmr.msra.gmra.mrb[36].mxu0 %v13528_v2  ;;  %v1270_v2 = vld [vmem:[%s15646_s4 + $0x2620] sm:$0xff]  ;;  %v1276_v52 = vld [vmem:[%s15646_s4 + $0x2650] sm:$0xff]  ;;  %v9387_v53 = vpack.c.bf16 %v1325_v48, %v1324_v58  ;;  %v1381_v58 = vld [vmem:[%s15646_s4 + $0x2998] sm:$0xff] }
 0x265   :  { %9338 = vmatpush3.bf16.msra.mxu0 %v9337_v45  ;;  %4845 = vmatprep.mubr.f32.mxu0 %v1955_v7  ;;  %v9345_v35 = vpack.c.bf16 %v1271_v26, %v1270_v2  ;;  %v1295_v45 = vld [vmem:[%s15646_s4 + $0x26e8] sm:$0xff]  ;;  %v9357_v63 = vpack.c.bf16 %v1277_v38, %v1276_v52  ;;  %v1329_v2 = vld [vmem:[%s15646_s4 + $0x27f8] sm:$0xff]  ;;  %v1332_v52 = vld [vmem:[%s15646_s4 + $0x2810] sm:$0xff] }
 0x266   :  { %4776 = vmatmul.mubr.f32.vlgmr.msra.gmra.mrb[36].mxu1 %v13537_v6  ;;  %9340 = vmatprep.subr.bf16.mxu0 %v9339_v50  ;;  %v1303_v6 = vld [vmem:[%s15646_s4 + $0x2728] sm:$0xff]  ;;  %v9359_v1 = vpack.c.bf16 %v1295_v45, %v1294_v5  ;;  %v1333_v38 = vld [vmem:[%s15646_s4 + $0x2818] sm:$0xff]  ;;  %v1350_v5 = vld [vmem:[%s15646_s4 + $0x28a0] sm:$0xff] }
 0x267   :  { %9370 = vmatpush3.bf16.msra.mxu1 %v9369_v59  ;;  %4915 = vmatprep.mubr.f32.mxu1 %v1956_v62  ;;  %v9377_v24 = vpack.c.bf16 %v1303_v6, %v1302_v4  ;;  %v1326_v59 = vld [vmem:[%s15646_s4 + $0x27e0] sm:$0xff]  ;;  %v1327_v50 = vld [vmem:[%s15646_s4 + $0x27e8] sm:$0xff]  ;;  %v1297_v62 = vld [vmem:[%s15646_s4 + $0x26f8] sm:$0xff] }
 0x268   :  { %9372 = vmatprep.subr.bf16.mxu1 %v9371_v61  ;;  %v1278_v61 = vld [vmem:[%s15646_s4 + $0x2660] sm:$0xff]  ;;  %v9391_v7 = vpack.c.bf16 %v1327_v50, %v1326_v59  ;;  %v9363_v8 = vpack.c.bf16 %v1297_v62, %v1296_v9  ;;  %v1351_v45 = vld [vmem:[%s15646_s4 + $0x28a8] sm:$0xff]  ;;  %v1353_v9 = vld [vmem:[%s15646_s4 + $0x28b8] sm:$0xff] }
 0x269   :  { %9342 = vmatpush3.bf16.msra.mxu0 %v9341_v10  ;;  %v46_v6 = vld [vmem:[%s15647_s0 + $0xa0] sm:$0xff]  ;;  %v1384_v62 = vld [vmem:[%s15646_s4 + $0x29b0] sm:$0xff] }
 0x26a   :  { %9344 = vmatprep.subr.bf16.mxu0 %v9343_v12  ;;  %v1328_v12 = vld [vmem:[%s15646_s4 + $0x27f0] sm:$0xff]  ;;  %v1957_v31 = vcombine.high %v46_v6, %v46_v6  ;;  %v13948_v54 = vrot.slane %v46_v6, %v9893_v13  ;;  %v1382_v50 = vld [vmem:[%s15646_s4 + $0x29a0] sm:$0xff] }
 0x26b   :  { %9374 = vmatpush3.bf16.msra.mxu1 %v9373_v19  ;;  %v9395_v39 = vpack.c.bf16 %v1329_v2, %v1328_v12  ;;  %v9411_v2 = vpack.c.bf16 %v1353_v9, %v1352_v60 }
 0x26c   :  { %9376 = vmatprep.subr.bf16.mxu1 %v9375_v16  ;;  %v9361_v16 = vpack.c.bf16 %v1279_v3, %v1278_v61  ;;  %v13957_v48 = vrot.slane %v1957_v31, %v9893_v13  ;;  %v1972_v59 = vcombine.high %v13948_v54, %v13948_v54  ;;  %v9437_v61 = vpack.c.bf16 %v1365_v56, %v1364_v55  ;;  %v1356_v31 = vld [vmem:[%s15646_s4 + $0x28d0] sm:$0xff]  ;;  %v1343_v56 = vld [vmem:[%s15646_s4 + $0x2868] sm:$0xff] }
 0x26d   :  { %9346 = vmatpush3.bf16.msra.mxu0 %v9345_v35  ;;  %v1281_v35 = vld [vmem:[%s15646_s4 + $0x2678] sm:$0xff]  ;;  %v9407_v3 = vpack.c.bf16 %v1351_v45, %v1350_v5  ;;  %v1374_v5 = vld [vmem:[%s15646_s4 + $0x2960] sm:$0xff] }
 0x26e   :  { %9348 = vmatprep.subr.bf16.mxu0 %v9347_v11  ;;  %v9365_v32 = vpack.c.bf16 %v1281_v35, %v1280_v22  ;;  %v1386_v22 = vld [vmem:[%s15646_s4 + $0x29c0] sm:$0xff]  ;;  %v1387_v35 = vld [vmem:[%s15646_s4 + $0x29c8] sm:$0xff] }
 0x26f   :  { %9378 = vmatpush3.bf16.msra.mxu1 %v9377_v24  ;;  %v1312_v24 = vld [vmem:[%s15646_s4 + $0x2770] sm:$0xff] }
 0x270   :  { %9380 = vmatprep.subr.bf16.mxu1 %v9379_v17  ;;  %v1347_v17 = vld [vmem:[%s15646_s4 + $0x2888] sm:$0xff]  ;;  %v9397_v47 = vpack.c.bf16 %v1313_v14, %v1312_v24  ;;  %v1338_v14 = vld [vmem:[%s15646_s4 + $0x2840] sm:$0xff] }
 0x271   :  { %9350 = vmatpush3.bf16.msra.mxu0 %v9349_v36  ;;  %v9399_v36 = vpack.c.bf16 %v1347_v17, %v1346_v28  ;;  %v1339_v28 = vld [vmem:[%s15646_s4 + $0x2848] sm:$0xff]  ;;  %v1370_v17 = vld [vmem:[%s15646_s4 + $0x2940] sm:$0xff] }
 0x272   :  { %9352 = vmatprep.subr.bf16.mxu0 %v9351_v37  ;;  %v1331_v37 = vld [vmem:[%s15646_s4 + $0x2808] sm:$0xff] }
 0x273   :  { %9382 = vmatpush3.bf16.msra.mxu1 %v9381_v23  ;;  %v1330_v23 = vld [vmem:[%s15646_s4 + $0x2800] sm:$0xff] }
 0x274   :  { %9384 = vmatprep.subr.bf16.mxu1 %v9383_v42  ;;  %v1348_v42 = vld [vmem:[%s15646_s4 + $0x2890] sm:$0xff] }
 0x275   :  { %9354 = vmatpush3.bf16.msra.mxu0 %v9353_v33  ;;  %v9401_v33 = vpack.c.bf16 %v1331_v37, %v1330_v23  ;;  %v9417_v23 = vpack.c.bf16 %v1339_v28, %v1338_v14  ;;  %v1426_v14 = vld [vmem:[%s15646_s4 + $0x2b00] sm:$0xff] }
 0x276   :  { %9356 = vmatprep.subr.bf16.mxu0 %v9355_v44  ;;  %v9403_v44 = vpack.c.bf16 %v1349_v41, %v1348_v42  ;;  %v1372_v42 = vld [vmem:[%s15646_s4 + $0x2950] sm:$0xff] }
 0x277   :  { %9386 = vmatpush3.bf16.msra.mxu1 %v9385_v49  ;;  %v7311_v57 = vpop.f32.mrb[24].mxu0  ;;  %v9433_v49 = vpack.c.bf16 %v1363_v27, %v1362_v25  ;;  %v1341_v27 = vld [vmem:[%s15646_s4 + $0x2858] sm:$0xff] }
 0x278   :  { %9388 = vmatprep.subr.bf16.mxu1 %v9387_v53  ;;  %v7312_v10 = vpop.f32.mrb[25].mxu0  ;;  %v9435_v53 = vpack.c.bf16 %v1381_v58, %v1380_v43  ;;  %v1373_v43 = vld [vmem:[%s15646_s4 + $0x2958] sm:$0xff]  ;;  %v1358_v58 = vld [vmem:[%s15646_s4 + $0x28e0] sm:$0xff] }
 0x279   :  { %v7346_v19 = vpop.f32.mrb[24].mxu1  ;;  %v7313_v26 = vadd.f32 %v7312_v10, %v7311_v57  ;;  %9358 = vmatpush3.bf16.msra.mxu0 %v9357_v63  ;;  %v1383_v63 = vld [vmem:[%s15646_s4 + $0x29a8] sm:$0xff]  ;;  %v1366_v57 = vld [vmem:[%s15646_s4 + $0x2920] sm:$0xff]  ;;  %v1385_v10 = vld [vmem:[%s15646_s4 + $0x29b8] sm:$0xff] }
 0x27a   :  { %v7347_v4 = vpop.f32.mrb[25].mxu1  ;;  %9360 = vmatprep.subr.bf16.mxu0 %v9359_v1  ;;  %v9405_v1 = vpack.c.bf16 %v1333_v38, %v1332_v52  ;;  %v9443_v6 = vpack.c.bf16 %v1385_v10, %v1384_v62  ;;  %v9453_v38 = vpack.c.bf16 %v1373_v43, %v1372_v42  ;;  %v1344_v10 = vld [vmem:[%s15646_s4 + $0x2870] sm:$0xff]  ;;  %v1429_v43 = vld [vmem:[%s15646_s4 + $0x2b18] sm:$0xff] }
 0x27b   :  { %v7348_v18 = vadd.f32 %v7347_v4, %v7346_v19  ;;  %9390 = vmatpush3.bf16.msra.mxu1 %v9389_v51  ;;  %v3868_v11 = vadd.f32 %v7313_v26, %v13717_v29  ;;  %v1379_v29 = vld [vmem:[%s15646_s4 + $0x2988] sm:$0xff]  ;;  %v1973_v51 = vcombine.high %v13957_v48, %v13957_v48  ;;  %v1336_v26 = vld [vmem:[%s15646_s4 + $0x2830] sm:$0xff]  ;;  %v1337_v4 = vld [vmem:[%s15646_s4 + $0x2838] sm:$0xff] }
 0x27c   :  { %9392 = vmatprep.subr.bf16.mxu1 %v9391_v7  ;;  %v9431_v40 = vpack.c.bf16 %v1379_v29, %v1378_v30  ;;  %v9439_v7 = vpack.c.bf16 %v1383_v63, %v1382_v50  ;;  %v9413_v24 = vpack.c.bf16 %v1337_v4, %v1336_v26  ;;  %v9447_v30 = vpack.c.bf16 %v1387_v35, %v1386_v22  ;;  %v1371_v29 = vld [vmem:[%s15646_s4 + $0x2948] sm:$0xff]  ;;  %v1360_v63 = vld [vmem:[%s15646_s4 + $0x28f0] sm:$0xff]  ;;  %v1377_v4 = vld [vmem:[%s15646_s4 + $0x2978] sm:$0xff] }
 0x27d   :  { %v13927_v20 = vadd.f32 %v7348_v18, %v3868_v11  ;;  %9362 = vmatpush3.bf16.msra.mxu0 %v9361_v16  ;;  %v1368_v16 = vld [vmem:[%s15646_s4 + $0x2930] sm:$0xff]  ;;  %v1369_v18 = vld [vmem:[%s15646_s4 + $0x2938] sm:$0xff]  ;;  %v9449_v37 = vpack.c.bf16 %v1371_v29, %v1370_v17  ;;  %v1375_v50 = vld [vmem:[%s15646_s4 + $0x2968] sm:$0xff] }
 0x27e   :  { %9364 = vmatprep.subr.bf16.mxu0 %v9363_v8  ;;  %v1355_v8 = vld [vmem:[%s15646_s4 + $0x28c8] sm:$0xff]  ;;  %v9445_v11 = vpack.c.bf16 %v1369_v18, %v1368_v16  ;;  %v9457_v9 = vpack.c.bf16 %v1375_v50, %v1374_v5  ;;  %v1410_v16 = vld [vmem:[%s15646_s4 + $0x2a80] sm:$0xff]  ;;  %v1413_v29 = vld [vmem:[%s15646_s4 + $0x2a98] sm:$0xff] }
 0x27f   :  { %9394 = vmatpush3.bf16.msra.mxu1 %v9393_v21  ;;  %v1354_v21 = vld [vmem:[%s15646_s4 + $0x28c0] sm:$0xff]  ;;  %v1427_v17 = vld [vmem:[%s15646_s4 + $0x2b08] sm:$0xff]  ;;  %v1428_v42 = vld [vmem:[%s15646_s4 + $0x2b10] sm:$0xff] }
 0x280   :  { %9396 = vmatprep.subr.bf16.mxu1 %v9395_v39  ;;  %v9415_v39 = vpack.c.bf16 %v1355_v8, %v1354_v21  ;;  %v1442_v18 = vld [vmem:[%s15646_s4 + $0x2b80] sm:$0xff]  ;;  %v1399_v5 = vld [vmem:[%s15646_s4 + $0x2a28] sm:$0xff]  ;;  %v1416_v50 = vld [vmem:[%s15646_s4 + $0x2ab0] sm:$0xff] }
 0x281   :  { %9366 = vmatpush3.bf16.msra.mxu0 %v9365_v32  ;;  %v1357_v32 = vld [vmem:[%s15646_s4 + $0x28d8] sm:$0xff] }
 0x282   :  { %9400 = vmatprep.subr.bf16.mxu0 %v9399_v36  ;;  %v1389_v36 = vld [vmem:[%s15646_s4 + $0x29d8] sm:$0xff]  ;;  %v9419_v25 = vpack.c.bf16 %v1357_v32, %v1356_v31  ;;  %v1444_v32 = vld [vmem:[%s15646_s4 + $0x2b90] sm:$0xff] }
 0x283   :  { %9398 = vmatpush3.bf16.msra.mxu1 %v9397_v47  ;;  %v1388_v47 = vld [vmem:[%s15646_s4 + $0x29d0] sm:$0xff] }
 0x284   :  { %9432 = vmatprep.subr.bf16.mxu1 %v9431_v40  ;;  %4846 = vmatmul.mubr.f32.vlgmr.msra.gmra.mrb[38].mxu0 %v13738_v34  ;;  %v1334_v34 = vld [vmem:[%s15646_s4 + $0x2820] sm:$0xff]  ;;  %v1340_v40 = vld [vmem:[%s15646_s4 + $0x2850] sm:$0xff]  ;;  %v9451_v41 = vpack.c.bf16 %v1389_v36, %v1388_v47  ;;  %v1445_v47 = vld [vmem:[%s15646_s4 + $0x2b98] sm:$0xff] }
 0x285   :  { %9402 = vmatpush3.bf16.msra.mxu0 %v9401_v33  ;;  %4985 = vmatprep.mubr.f32.mxu0 %v1972_v59  ;;  %v9409_v19 = vpack.c.bf16 %v1335_v15, %v1334_v34  ;;  %v1359_v33 = vld [vmem:[%s15646_s4 + $0x28e8] sm:$0xff]  ;;  %v9421_v52 = vpack.c.bf16 %v1341_v27, %v1340_v40  ;;  %v1393_v34 = vld [vmem:[%s15646_s4 + $0x29f8] sm:$0xff]  ;;  %v1396_v40 = vld [vmem:[%s15646_s4 + $0x2a10] sm:$0xff] }
 0x286   :  { %4916 = vmatmul.mubr.f32.vlgmr.msra.gmra.mrb[38].mxu1 %v13747_v46  ;;  %9404 = vmatprep.subr.bf16.mxu0 %v9403_v44  ;;  %v1367_v46 = vld [vmem:[%s15646_s4 + $0x2928] sm:$0xff]  ;;  %v9423_v55 = vpack.c.bf16 %v1359_v33, %v1358_v58  ;;  %v1397_v27 = vld [vmem:[%s15646_s4 + $0x2a18] sm:$0xff]  ;;  %v1414_v58 = vld [vmem:[%s15646_s4 + $0x2aa0] sm:$0xff] }
 0x287   :  { %9434 = vmatpush3.bf16.msra.mxu1 %v9433_v49  ;;  %5055 = vmatprep.mubr.f32.mxu1 %v1973_v51  ;;  %v9441_v12 = vpack.c.bf16 %v1367_v46, %v1366_v57  ;;  %v1390_v49 = vld [vmem:[%s15646_s4 + $0x29e0] sm:$0xff]  ;;  %v1391_v44 = vld [vmem:[%s15646_s4 + $0x29e8] sm:$0xff]  ;;  %v1361_v51 = vld [vmem:[%s15646_s4 + $0x28f8] sm:$0xff] }
 0x288   :  { %9436 = vmatprep.subr.bf16.mxu1 %v9435_v53  ;;  %v1342_v53 = vld [vmem:[%s15646_s4 + $0x2860] sm:$0xff]  ;;  %v9455_v59 = vpack.c.bf16 %v1391_v44, %v1390_v49  ;;  %v47_v46 = vld [vmem:[%s15647_s0 + $0xa8] sm:$0xff]  ;;  %v9427_v62 = vpack.c.bf16 %v1361_v51, %v1360_v63  ;;  %v1417_v63 = vld [vmem:[%s15646_s4 + $0x2ab8] sm:$0xff] }
 0x289   :  { %9406 = vmatpush3.bf16.msra.mxu0 %v9405_v1  ;;  %v1974_v21 = vcombine.high %v47_v46, %v47_v46  ;;  %v14158_v31 = vrot.slane %v47_v46, %v9893_v13  ;;  %v1415_v33 = vld [vmem:[%s15646_s4 + $0x2aa8] sm:$0xff]  ;;  %v1446_v44 = vld [vmem:[%s15646_s4 + $0x2ba0] sm:$0xff]  ;;  %v1448_v51 = vld [vmem:[%s15646_s4 + $0x2bb0] sm:$0xff] }
 0x28a   :  { %9408 = vmatprep.subr.bf16.mxu0 %v9407_v3  ;;  %v1392_v3 = vld [vmem:[%s15646_s4 + $0x29f0] sm:$0xff] }
 0x28b   :  { %9438 = vmatpush3.bf16.msra.mxu1 %v9437_v61  ;;  %v9459_v26 = vpack.c.bf16 %v1393_v34, %v1392_v3  ;;  %v14167_v36 = vrot.slane %v1974_v21, %v9893_v13  ;;  %v1989_v49 = vcombine.high %v14158_v31, %v14158_v31  ;;  %v9475_v34 = vpack.c.bf16 %v1417_v63, %v1416_v50  ;;  %v1420_v21 = vld [vmem:[%s15646_s4 + $0x2ad0] sm:$0xff] }
 0x28c   :  { %9440 = vmatprep.subr.bf16.mxu1 %v9439_v7  ;;  %v9425_v7 = vpack.c.bf16 %v1343_v56, %v1342_v53  ;;  %v9501_v53 = vpack.c.bf16 %v1429_v43, %v1428_v42  ;;  %v9471_v56 = vpack.c.bf16 %v1415_v33, %v1414_v58  ;;  %v1407_v43 = vld [vmem:[%s15646_s4 + $0x2a68] sm:$0xff]  ;;  %v1438_v58 = vld [vmem:[%s15646_s4 + $0x2b60] sm:$0xff] }
 0x28d   :  { %9410 = vmatpush3.bf16.msra.mxu0 %v9409_v19  ;;  %v1345_v19 = vld [vmem:[%s15646_s4 + $0x2878] sm:$0xff] }
 0x28e   :  { %9412 = vmatprep.subr.bf16.mxu0 %v9411_v2  ;;  %v9429_v22 = vpack.c.bf16 %v1345_v19, %v1344_v10  ;;  %v1450_v10 = vld [vmem:[%s15646_s4 + $0x2bc0] sm:$0xff]  ;;  %v1451_v19 = vld [vmem:[%s15646_s4 + $0x2bc8] sm:$0xff] }
 0x28f   :  { %9442 = vmatpush3.bf16.msra.mxu1 %v9441_v12  ;;  %v1376_v12 = vld [vmem:[%s15646_s4 + $0x2970] sm:$0xff] }
 0x290   :  { %9444 = vmatprep.subr.bf16.mxu1 %v9443_v6  ;;  %v1411_v6 = vld [vmem:[%s15646_s4 + $0x2a88] sm:$0xff]  ;;  %v9461_v35 = vpack.c.bf16 %v1377_v4, %v1376_v12  ;;  %v1402_v4 = vld [vmem:[%s15646_s4 + $0x2a40] sm:$0xff] }
 0x291   :  { %9414 = vmatpush3.bf16.msra.mxu0 %v9413_v24  ;;  %v9463_v24 = vpack.c.bf16 %v1411_v6, %v1410_v16  ;;  %v1403_v16 = vld [vmem:[%s15646_s4 + $0x2a48] sm:$0xff]  ;;  %v1434_v6 = vld [vmem:[%s15646_s4 + $0x2b40] sm:$0xff] }
 0x292   :  { %9416 = vmatprep.subr.bf16.mxu0 %v9415_v39  ;;  %v1395_v39 = vld [vmem:[%s15646_s4 + $0x2a08] sm:$0xff] }
 0x293   :  { %9446 = vmatpush3.bf16.msra.mxu1 %v9445_v11  ;;  %v1394_v11 = vld [vmem:[%s15646_s4 + $0x2a00] sm:$0xff] }
 0x294   :  { %9448 = vmatprep.subr.bf16.mxu1 %v9447_v30  ;;  %v1412_v30 = vld [vmem:[%s15646_s4 + $0x2a90] sm:$0xff] }
 0x295   :  { %9418 = vmatpush3.bf16.msra.mxu0 %v9417_v23  ;;  %v9465_v23 = vpack.c.bf16 %v1395_v39, %v1394_v11  ;;  %v9481_v11 = vpack.c.bf16 %v1403_v16, %v1402_v4  ;;  %v1490_v4 = vld [vmem:[%s15646_s4 + $0x2d00] sm:$0xff] }
 0x296   :  { %9420 = vmatprep.subr.bf16.mxu0 %v9419_v25  ;;  %v9467_v25 = vpack.c.bf16 %v1413_v29, %v1412_v30  ;;  %v1436_v30 = vld [vmem:[%s15646_s4 + $0x2b50] sm:$0xff] }
 0x297   :  { %9450 = vmatpush3.bf16.msra.mxu1 %v9449_v37  ;;  %v7381_v45 = vpop.f32.mrb[26].mxu0  ;;  %v9497_v37 = vpack.c.bf16 %v1427_v17, %v1426_v14  ;;  %v1405_v17 = vld [vmem:[%s15646_s4 + $0x2a58] sm:$0xff] }
 0x298   :  { %9452 = vmatprep.subr.bf16.mxu1 %v9451_v41  ;;  %v7382_v1 = vpop.f32.mrb[27].mxu0  ;;  %v9499_v41 = vpack.c.bf16 %v1445_v47, %v1444_v32  ;;  %v1437_v32 = vld [vmem:[%s15646_s4 + $0x2b58] sm:$0xff]  ;;  %v1422_v47 = vld [vmem:[%s15646_s4 + $0x2ae0] sm:$0xff] }
 0x299   :  { %v7416_v61 = vpop.f32.mrb[26].mxu1  ;;  %v7383_v15 = vadd.f32 %v7382_v1, %v7381_v45  ;;  %9422 = vmatpush3.bf16.msra.mxu0 %v9421_v52  ;;  %v1447_v52 = vld [vmem:[%s15646_s4 + $0x2ba8] sm:$0xff]  ;;  %v1430_v45 = vld [vmem:[%s15646_s4 + $0x2b20] sm:$0xff]  ;;  %v1449_v1 = vld [vmem:[%s15646_s4 + $0x2bb8] sm:$0xff] }
 0x29a   :  { %v7417_v57 = vpop.f32.mrb[27].mxu1  ;;  %9424 = vmatprep.subr.bf16.mxu0 %v9423_v55  ;;  %v9469_v55 = vpack.c.bf16 %v1397_v27, %v1396_v40  ;;  %v9507_v46 = vpack.c.bf16 %v1449_v1, %v1448_v51  ;;  %v9517_v27 = vpack.c.bf16 %v1437_v32, %v1436_v30  ;;  %v1408_v1 = vld [vmem:[%s15646_s4 + $0x2a70] sm:$0xff]  ;;  %v1493_v32 = vld [vmem:[%s15646_s4 + $0x2d18] sm:$0xff] }
 0x29b   :  { %v7418_v60 = vadd.f32 %v7417_v57, %v7416_v61  ;;  %9454 = vmatpush3.bf16.msra.mxu1 %v9453_v38  ;;  %v4008_v2 = vadd.f32 %v7383_v15, %v13927_v20  ;;  %v1443_v20 = vld [vmem:[%s15646_s4 + $0x2b88] sm:$0xff]  ;;  %v1990_v38 = vcombine.high %v14167_v36, %v14167_v36  ;;  %v1400_v15 = vld [vmem:[%s15646_s4 + $0x2a30] sm:$0xff]  ;;  %v1401_v57 = vld [vmem:[%s15646_s4 + $0x2a38] sm:$0xff] }
 0x29c   :  { %9456 = vmatprep.subr.bf16.mxu1 %v9455_v59  ;;  %v9495_v28 = vpack.c.bf16 %v1443_v20, %v1442_v18  ;;  %v9503_v59 = vpack.c.bf16 %v1447_v52, %v1446_v44  ;;  %v9477_v12 = vpack.c.bf16 %v1401_v57, %v1400_v15  ;;  %v9511_v18 = vpack.c.bf16 %v1451_v19, %v1450_v10  ;;  %v1435_v20 = vld [vmem:[%s15646_s4 + $0x2b48] sm:$0xff]  ;;  %v1424_v52 = vld [vmem:[%s15646_s4 + $0x2af0] sm:$0xff]  ;;  %v1441_v57 = vld [vmem:[%s15646_s4 + $0x2b78] sm:$0xff] }
 0x29d   :  { %v14137_v8 = vadd.f32 %v7418_v60, %v4008_v2  ;;  %9426 = vmatpush3.bf16.msra.mxu0 %v9425_v7  ;;  %v1432_v7 = vld [vmem:[%s15646_s4 + $0x2b30] sm:$0xff]  ;;  %v1433_v60 = vld [vmem:[%s15646_s4 + $0x2b38] sm:$0xff]  ;;  %v9513_v39 = vpack.c.bf16 %v1435_v20, %v1434_v6  ;;  %v1439_v44 = vld [vmem:[%s15646_s4 + $0x2b68] sm:$0xff] }
 0x29e   :  { %9428 = vmatprep.subr.bf16.mxu0 %v9427_v62  ;;  %v1419_v62 = vld [vmem:[%s15646_s4 + $0x2ac8] sm:$0xff]  ;;  %v9509_v2 = vpack.c.bf16 %v1433_v60, %v1432_v7  ;;  %v9521_v63 = vpack.c.bf16 %v1439_v44, %v1438_v58  ;;  %v1474_v7 = vld [vmem:[%s15646_s4 + $0x2c80] sm:$0xff]  ;;  %v1477_v20 = vld [vmem:[%s15646_s4 + $0x2c98] sm:$0xff] }
 0x29f   :  { %9458 = vmatpush3.bf16.msra.mxu1 %v9457_v9  ;;  %v1418_v9 = vld [vmem:[%s15646_s4 + $0x2ac0] sm:$0xff]  ;;  %v1491_v6 = vld [vmem:[%s15646_s4 + $0x2d08] sm:$0xff]  ;;  %v1492_v30 = vld [vmem:[%s15646_s4 + $0x2d10] sm:$0xff] }
 0x2a0   :  { %9460 = vmatprep.subr.bf16.mxu1 %v9459_v26  ;;  %v9479_v26 = vpack.c.bf16 %v1419_v62, %v1418_v9  ;;  %v1506_v60 = vld [vmem:[%s15646_s4 + $0x2d80] sm:$0xff]  ;;  %v1463_v58 = vld [vmem:[%s15646_s4 + $0x2c28] sm:$0xff]  ;;  %v1480_v44 = vld [vmem:[%s15646_s4 + $0x2cb0] sm:$0xff] }
 0x2a1   :  { %9430 = vmatpush3.bf16.msra.mxu0 %v9429_v22  ;;  %v1421_v22 = vld [vmem:[%s15646_s4 + $0x2ad8] sm:$0xff] }
 0x2a2   :  { %9464 = vmatprep.subr.bf16.mxu0 %v9463_v24  ;;  %v1453_v24 = vld [vmem:[%s15646_s4 + $0x2bd8] sm:$0xff]  ;;  %v9483_v14 = vpack.c.bf16 %v1421_v22, %v1420_v21  ;;  %v1508_v22 = vld [vmem:[%s15646_s4 + $0x2d90] sm:$0xff] }
 0x2a3   :  { %9462 = vmatpush3.bf16.msra.mxu1 %v9461_v35  ;;  %v1452_v35 = vld [vmem:[%s15646_s4 + $0x2bd0] sm:$0xff] }
 0x2a4   :  { %9496 = vmatprep.subr.bf16.mxu1 %v9495_v28  ;;  %4986 = vmatmul.mubr.f32.vlgmr.msra.gmra.mrb[40].mxu0 %v13948_v54  ;;  %v1398_v54 = vld [vmem:[%s15646_s4 + $0x2a20] sm:$0xff]  ;;  %v1404_v28 = vld [vmem:[%s15646_s4 + $0x2a50] sm:$0xff]  ;;  %v9515_v29 = vpack.c.bf16 %v1453_v24, %v1452_v35  ;;  %v1509_v35 = vld [vmem:[%s15646_s4 + $0x2d98] sm:$0xff] }
 0x2a5   :  { %9466 = vmatpush3.bf16.msra.mxu0 %v9465_v23  ;;  %5125 = vmatprep.mubr.f32.mxu0 %v1989_v49  ;;  %v9473_v61 = vpack.c.bf16 %v1399_v5, %v1398_v54  ;;  %v1423_v23 = vld [vmem:[%s15646_s4 + $0x2ae8] sm:$0xff]  ;;  %v9485_v40 = vpack.c.bf16 %v1405_v17, %v1404_v28  ;;  %v1457_v54 = vld [vmem:[%s15646_s4 + $0x2bf8] sm:$0xff]  ;;  %v1460_v28 = vld [vmem:[%s15646_s4 + $0x2c10] sm:$0xff] }
 0x2a6   :  { %5056 = vmatmul.mubr.f32.vlgmr.msra.gmra.mrb[40].mxu1 %v13957_v48  ;;  %9468 = vmatprep.subr.bf16.mxu0 %v9467_v25  ;;  %v1431_v48 = vld [vmem:[%s15646_s4 + $0x2b28] sm:$0xff]  ;;  %v9487_v42 = vpack.c.bf16 %v1423_v23, %v1422_v47  ;;  %v1461_v17 = vld [vmem:[%s15646_s4 + $0x2c18] sm:$0xff]  ;;  %v1478_v47 = vld [vmem:[%s15646_s4 + $0x2ca0] sm:$0xff] }
 0x2a7   :  { %9498 = vmatpush3.bf16.msra.mxu1 %v9497_v37  ;;  %5195 = vmatprep.mubr.f32.mxu1 %v1990_v38  ;;  %v9505_v3 = vpack.c.bf16 %v1431_v48, %v1430_v45  ;;  %v1454_v37 = vld [vmem:[%s15646_s4 + $0x2be0] sm:$0xff]  ;;  %v1455_v25 = vld [vmem:[%s15646_s4 + $0x2be8] sm:$0xff]  ;;  %v1425_v38 = vld [vmem:[%s15646_s4 + $0x2af8] sm:$0xff] }
 0x2a8   :  { %9500 = vmatprep.subr.bf16.mxu1 %v9499_v41  ;;  %v1406_v41 = vld [vmem:[%s15646_s4 + $0x2a60] sm:$0xff]  ;;  %v9519_v49 = vpack.c.bf16 %v1455_v25, %v1454_v37  ;;  %v48_v48 = vld [vmem:[%s15647_s0 + $0xb0] sm:$0xff]  ;;  %v9491_v51 = vpack.c.bf16 %v1425_v38, %v1424_v52  ;;  %v1479_v23 = vld [vmem:[%s15646_s4 + $0x2ca8] sm:$0xff] }
 0x2a9   :  { %9470 = vmatpush3.bf16.msra.mxu0 %v9469_v55  ;;  %v1991_v9 = vcombine.high %v48_v48, %v48_v48  ;;  %v14368_v21 = vrot.slane %v48_v48, %v9893_v13  ;;  %v1510_v25 = vld [vmem:[%s15646_s4 + $0x2da0] sm:$0xff]  ;;  %v1481_v52 = vld [vmem:[%s15646_s4 + $0x2cb8] sm:$0xff]  ;;  %v1512_v38 = vld [vmem:[%s15646_s4 + $0x2db0] sm:$0xff] }
 0x2aa   :  { %9472 = vmatprep.subr.bf16.mxu0 %v9471_v56  ;;  %v1456_v56 = vld [vmem:[%s15646_s4 + $0x2bf0] sm:$0xff] }
 0x2ab   :  { %9502 = vmatpush3.bf16.msra.mxu1 %v9501_v53  ;;  %v9523_v15 = vpack.c.bf16 %v1457_v54, %v1456_v56  ;;  %v14377_v24 = vrot.slane %v1991_v9, %v9893_v13  ;;  %v2006_v37 = vcombine.high %v14368_v21, %v14368_v21  ;;  %v9539_v54 = vpack.c.bf16 %v1481_v52, %v1480_v44  ;;  %v1484_v9 = vld [vmem:[%s15646_s4 + $0x2cd0] sm:$0xff] }
 0x2ac   :  { %9504 = vmatprep.subr.bf16.mxu1 %v9503_v59  ;;  %v9489_v59 = vpack.c.bf16 %v1407_v43, %v1406_v41  ;;  %v9565_v41 = vpack.c.bf16 %v1493_v32, %v1492_v30  ;;  %v9535_v43 = vpack.c.bf16 %v1479_v23, %v1478_v47  ;;  %v1471_v32 = vld [vmem:[%s15646_s4 + $0x2c68] sm:$0xff]  ;;  %v1502_v47 = vld [vmem:[%s15646_s4 + $0x2d60] sm:$0xff] }
 0x2ad   :  { %9474 = vmatpush3.bf16.msra.mxu0 %v9473_v61  ;;  %v1409_v61 = vld [vmem:[%s15646_s4 + $0x2a78] sm:$0xff] }
 0x2ae   :  { %9476 = vmatprep.subr.bf16.mxu0 %v9475_v34  ;;  %v9493_v10 = vpack.c.bf16 %v1409_v61, %v1408_v1  ;;  %v1514_v1 = vld [vmem:[%s15646_s4 + $0x2dc0] sm:$0xff]  ;;  %v1515_v61 = vld [vmem:[%s15646_s4 + $0x2dc8] sm:$0xff] }
 0x2af   :  { %9506 = vmatpush3.bf16.msra.mxu1 %v9505_v3  ;;  %v1440_v3 = vld [vmem:[%s15646_s4 + $0x2b70] sm:$0xff] }
 0x2b0   :  { %9508 = vmatprep.subr.bf16.mxu1 %v9507_v46  ;;  %v1475_v46 = vld [vmem:[%s15646_s4 + $0x2c88] sm:$0xff]  ;;  %v9525_v19 = vpack.c.bf16 %v1441_v57, %v1440_v3  ;;  %v1466_v57 = vld [vmem:[%s15646_s4 + $0x2c40] sm:$0xff] }
 0x2b1   :  { %9478 = vmatpush3.bf16.msra.mxu0 %v9477_v12  ;;  %v9527_v12 = vpack.c.bf16 %v1475_v46, %v1474_v7  ;;  %v1467_v7 = vld [vmem:[%s15646_s4 + $0x2c48] sm:$0xff]  ;;  %v1498_v46 = vld [vmem:[%s15646_s4 + $0x2d40] sm:$0xff] }
 0x2b2   :  { %9480 = vmatprep.subr.bf16.mxu0 %v9479_v26  ;;  %v1459_v26 = vld [vmem:[%s15646_s4 + $0x2c08] sm:$0xff] }
 0x2b3   :  { %9510 = vmatpush3.bf16.msra.mxu1 %v9509_v2  ;;  %v1458_v2 = vld [vmem:[%s15646_s4 + $0x2c00] sm:$0xff] }
 0x2b4   :  { %9512 = vmatprep.subr.bf16.mxu1 %v9511_v18  ;;  %v1476_v18 = vld [vmem:[%s15646_s4 + $0x2c90] sm:$0xff] }
 0x2b5   :  { %9482 = vmatpush3.bf16.msra.mxu0 %v9481_v11  ;;  %v9529_v11 = vpack.c.bf16 %v1459_v26, %v1458_v2  ;;  %v9545_v2 = vpack.c.bf16 %v1467_v7, %v1466_v57  ;;  %v1554_v57 = vld [vmem:[%s15646_s4 + $0x2f00] sm:$0xff] }
 0x2b6   :  { %9484 = vmatprep.subr.bf16.mxu0 %v9483_v14  ;;  %v9531_v14 = vpack.c.bf16 %v1477_v20, %v1476_v18  ;;  %v1500_v18 = vld [vmem:[%s15646_s4 + $0x2d50] sm:$0xff] }
 0x2b7   :  { %9514 = vmatpush3.bf16.msra.mxu1 %v9513_v39  ;;  %v7451_v33 = vpop.f32.mrb[28].mxu0  ;;  %v9561_v39 = vpack.c.bf16 %v1491_v6, %v1490_v4  ;;  %v1469_v6 = vld [vmem:[%s15646_s4 + $0x2c58] sm:$0xff] }
 0x2b8   :  { %9516 = vmatprep.subr.bf16.mxu1 %v9515_v29  ;;  %v7452_v55 = vpop.f32.mrb[29].mxu0  ;;  %v9563_v29 = vpack.c.bf16 %v1509_v35, %v1508_v22  ;;  %v1501_v22 = vld [vmem:[%s15646_s4 + $0x2d58] sm:$0xff]  ;;  %v1486_v35 = vld [vmem:[%s15646_s4 + $0x2ce0] sm:$0xff] }
 0x2b9   :  { %v7486_v53 = vpop.f32.mrb[28].mxu1  ;;  %v7453_v5 = vadd.f32 %v7452_v55, %v7451_v33  ;;  %9486 = vmatpush3.bf16.msra.mxu0 %v9485_v40  ;;  %v1511_v40 = vld [vmem:[%s15646_s4 + $0x2da8] sm:$0xff]  ;;  %v1494_v33 = vld [vmem:[%s15646_s4 + $0x2d20] sm:$0xff]  ;;  %v1513_v55 = vld [vmem:[%s15646_s4 + $0x2db8] sm:$0xff] }
 0x2ba   :  { %v7487_v45 = vpop.f32.mrb[29].mxu1  ;;  %9488 = vmatprep.subr.bf16.mxu0 %v9487_v42  ;;  %v9533_v42 = vpack.c.bf16 %v1461_v17, %v1460_v28  ;;  %v9571_v48 = vpack.c.bf16 %v1513_v55, %v1512_v38  ;;  %v9581_v17 = vpack.c.bf16 %v1501_v22, %v1500_v18  ;;  %v1472_v55 = vld [vmem:[%s15646_s4 + $0x2c70] sm:$0xff]  ;;  %v1542_v22 = vld [vmem:[%s15646_s4 + $0x2ea0] sm:$0xff] }
 0x2bb   :  { %v7488_v50 = vadd.f32 %v7487_v45, %v7486_v53  ;;  %9518 = vmatpush3.bf16.msra.mxu1 %v9517_v27  ;;  %v4148_v34 = vadd.f32 %v7453_v5, %v14137_v8  ;;  %v1507_v8 = vld [vmem:[%s15646_s4 + $0x2d88] sm:$0xff]  ;;  %v2007_v27 = vcombine.high %v14377_v24, %v14377_v24  ;;  %v1464_v5 = vld [vmem:[%s15646_s4 + $0x2c30] sm:$0xff]  ;;  %v1465_v45 = vld [vmem:[%s15646_s4 + $0x2c38] sm:$0xff] }
 0x2bc   :  { %9520 = vmatprep.subr.bf16.mxu1 %v9519_v49  ;;  %v9559_v16 = vpack.c.bf16 %v1507_v8, %v1506_v60  ;;  %v9567_v49 = vpack.c.bf16 %v1511_v40, %v1510_v25  ;;  %v9541_v3 = vpack.c.bf16 %v1465_v45, %v1464_v5  ;;  %v9575_v60 = vpack.c.bf16 %v1515_v61, %v1514_v1  ;;  %v1499_v8 = vld [vmem:[%s15646_s4 + $0x2d48] sm:$0xff]  ;;  %v1488_v40 = vld [vmem:[%s15646_s4 + $0x2cf0] sm:$0xff]  ;;  %v1505_v45 = vld [vmem:[%s15646_s4 + $0x2d78] sm:$0xff] }
 0x2bd   :  { %v14347_v62 = vadd.f32 %v7488_v50, %v4148_v34  ;;  %9490 = vmatpush3.bf16.msra.mxu0 %v9489_v59  ;;  %v1496_v59 = vld [vmem:[%s15646_s4 + $0x2d30] sm:$0xff]  ;;  %v1497_v50 = vld [vmem:[%s15646_s4 + $0x2d38] sm:$0xff]  ;;  %v9577_v26 = vpack.c.bf16 %v1499_v8, %v1498_v46  ;;  %v1503_v25 = vld [vmem:[%s15646_s4 + $0x2d68] sm:$0xff] }
 0x2be   :  { %9492 = vmatprep.subr.bf16.mxu0 %v9491_v51  ;;  %v1483_v51 = vld [vmem:[%s15646_s4 + $0x2cc8] sm:$0xff]  ;;  %v9573_v34 = vpack.c.bf16 %v1497_v50, %v1496_v59  ;;  %v9585_v52 = vpack.c.bf16 %v1503_v25, %v1502_v47  ;;  %v1538_v59 = vld [vmem:[%s15646_s4 + $0x2e80] sm:$0xff]  ;;  %v1541_v8 = vld [vmem:[%s15646_s4 + $0x2e98] sm:$0xff] }
 0x2bf   :  { %9522 = vmatpush3.bf16.msra.mxu1 %v9521_v63  ;;  %v1482_v63 = vld [vmem:[%s15646_s4 + $0x2cc0] sm:$0xff]  ;;  %v1555_v46 = vld [vmem:[%s15646_s4 + $0x2f08] sm:$0xff]  ;;  %v1556_v18 = vld [vmem:[%s15646_s4 + $0x2f10] sm:$0xff] }
 0x2c0   :  { %9524 = vmatprep.subr.bf16.mxu1 %v9523_v15  ;;  %v9543_v15 = vpack.c.bf16 %v1483_v51, %v1482_v63  ;;  %v1570_v50 = vld [vmem:[%s15646_s4 + $0x2f80] sm:$0xff]  ;;  %v1545_v25 = vld [vmem:[%s15646_s4 + $0x2eb8] sm:$0xff] }
 0x2c1   :  { %9494 = vmatpush3.bf16.msra.mxu0 %v9493_v10  ;;  %v1485_v10 = vld [vmem:[%s15646_s4 + $0x2cd8] sm:$0xff]  ;;  %v1558_v47 = vld [vmem:[%s15646_s4 + $0x2f20] sm:$0xff] }
 0x2c2   :  { %9528 = vmatprep.subr.bf16.mxu0 %v9527_v12  ;;  %v1517_v12 = vld [vmem:[%s15646_s4 + $0x2dd8] sm:$0xff]  ;;  %v9547_v4 = vpack.c.bf16 %v1485_v10, %v1484_v9  ;;  %v1572_v10 = vld [vmem:[%s15646_s4 + $0x2f90] sm:$0xff] }
 0x2c3   :  { %9526 = vmatpush3.bf16.msra.mxu1 %v9525_v19  ;;  %v1516_v19 = vld [vmem:[%s15646_s4 + $0x2dd0] sm:$0xff] }
 0x2c4   :  { %9560 = vmatprep.subr.bf16.mxu1 %v9559_v16  ;;  %5126 = vmatmul.mubr.f32.vlgmr.msra.gmra.mrb[42].mxu0 %v14158_v31  ;;  %v1462_v31 = vld [vmem:[%s15646_s4 + $0x2c20] sm:$0xff]  ;;  %v1468_v16 = vld [vmem:[%s15646_s4 + $0x2c50] sm:$0xff]  ;;  %v9579_v20 = vpack.c.bf16 %v1517_v12, %v1516_v19  ;;  %v1573_v19 = vld [vmem:[%s15646_s4 + $0x2f98] sm:$0xff] }
 0x2c5   :  { %9530 = vmatpush3.bf16.msra.mxu0 %v9529_v11  ;;  %5265 = vmatprep.mubr.f32.mxu0 %v2006_v37  ;;  %v9537_v53 = vpack.c.bf16 %v1463_v58, %v1462_v31  ;;  %v1487_v11 = vld [vmem:[%s15646_s4 + $0x2ce8] sm:$0xff]  ;;  %v9549_v28 = vpack.c.bf16 %v1469_v6, %v1468_v16  ;;  %v1521_v31 = vld [vmem:[%s15646_s4 + $0x2df8] sm:$0xff]  ;;  %v1524_v16 = vld [vmem:[%s15646_s4 + $0x2e10] sm:$0xff] }
 0x2c6   :  { %5196 = vmatmul.mubr.f32.vlgmr.msra.gmra.mrb[42].mxu1 %v14167_v36  ;;  %9532 = vmatprep.subr.bf16.mxu0 %v9531_v14  ;;  %v1495_v36 = vld [vmem:[%s15646_s4 + $0x2d28] sm:$0xff]  ;;  %v9551_v30 = vpack.c.bf16 %v1487_v11, %v1486_v35  ;;  %v1525_v6 = vld [vmem:[%s15646_s4 + $0x2e18] sm:$0xff] }
 0x2c7   :  { %9562 = vmatpush3.bf16.msra.mxu1 %v9561_v39  ;;  %5335 = vmatprep.mubr.f32.mxu1 %v2007_v27  ;;  %v9569_v56 = vpack.c.bf16 %v1495_v36, %v1494_v33  ;;  %v1518_v39 = vld [vmem:[%s15646_s4 + $0x2de0] sm:$0xff]  ;;  %v1519_v14 = vld [vmem:[%s15646_s4 + $0x2de8] sm:$0xff]  ;;  %v1489_v27 = vld [vmem:[%s15646_s4 + $0x2cf8] sm:$0xff] }
 0x2c8   :  { %9564 = vmatprep.subr.bf16.mxu1 %v9563_v29  ;;  %v1470_v29 = vld [vmem:[%s15646_s4 + $0x2c60] sm:$0xff]  ;;  %v9583_v37 = vpack.c.bf16 %v1519_v14, %v1518_v39  ;;  %v49_v36 = vld [vmem:[%s15647_s0 + $0xb8] sm:$0xff]  ;;  %v9555_v38 = vpack.c.bf16 %v1489_v27, %v1488_v40  ;;  %v1543_v35 = vld [vmem:[%s15646_s4 + $0x2ea8] sm:$0xff] }
 0x2c9   :  { %9534 = vmatpush3.bf16.msra.mxu0 %v9533_v42  ;;  %v2008_v63 = vcombine.high %v49_v36, %v49_v36  ;;  %v14578_v9 = vrot.slane %v49_v36, %v9893_v13  ;;  %v1574_v39 = vld [vmem:[%s15646_s4 + $0x2fa0] sm:$0xff]  ;;  %v1575_v14 = vld [vmem:[%s15646_s4 + $0x2fa8] sm:$0xff]  ;;  %v1576_v40 = vld [vmem:[%s15646_s4 + $0x2fb0] sm:$0xff] }
 0x2ca   :  { %9536 = vmatprep.subr.bf16.mxu0 %v9535_v43  ;;  %v1520_v43 = vld [vmem:[%s15646_s4 + $0x2df0] sm:$0xff]  ;;  %v1577_v27 = vld [vmem:[%s15646_s4 + $0x2fb8] sm:$0xff] }
 0x2cb   :  { %9566 = vmatpush3.bf16.msra.mxu1 %v9565_v41  ;;  %v9587_v5 = vpack.c.bf16 %v1521_v31, %v1520_v43  ;;  %v14587_v12 = vrot.slane %v2008_v63, %v9893_v13  ;;  %v9627_v13 = vpack.c.bf16 %v1573_v19, %v1572_v10  ;;  %v2023_v11 = vcombine.high %v14578_v9, %v14578_v9  ;;  %v1528_v31 = vld [vmem:[%s15646_s4 + $0x2e30] sm:$0xff]  ;;  %v1561_v36 = vld [vmem:[%s15646_s4 + $0x2f38] sm:$0xff]  ;;  %v1550_v10 = vld [vmem:[%s15646_s4 + $0x2ee0] sm:$0xff] }
 0x2cc   :  { %9568 = vmatprep.subr.bf16.mxu1 %v9567_v49  ;;  %v9553_v49 = vpack.c.bf16 %v1471_v32, %v1470_v29  ;;  %v9599_v29 = vpack.c.bf16 %v1543_v35, %v1542_v22  ;;  %v1527_v32 = vld [vmem:[%s15646_s4 + $0x2e28] sm:$0xff]  ;;  %v1549_v63 = vld [vmem:[%s15646_s4 + $0x2ed8] sm:$0xff] }
 0x2cd   :  { %9538 = vmatpush3.bf16.msra.mxu0 %v9537_v53  ;;  %v1473_v53 = vld [vmem:[%s15646_s4 + $0x2c78] sm:$0xff]  ;;  %v1551_v19 = vld [vmem:[%s15646_s4 + $0x2ee8] sm:$0xff] }
 0x2ce   :  { %9540 = vmatprep.subr.bf16.mxu0 %v9539_v54  ;;  %v9557_v1 = vpack.c.bf16 %v1473_v53, %v1472_v55  ;;  %v1579_v55 = vld [vmem:[%s15646_s4 + $0x2fc8] sm:$0xff] }
 0x2cf   :  { %9570 = vmatpush3.bf16.msra.mxu1 %v9569_v56  ;;  %v1504_v56 = vld [vmem:[%s15646_s4 + $0x2d70] sm:$0xff] }
 0x2d0   :  { %9572 = vmatprep.subr.bf16.mxu1 %v9571_v48  ;;  %v1539_v48 = vld [vmem:[%s15646_s4 + $0x2e88] sm:$0xff]  ;;  %v9589_v61 = vpack.c.bf16 %v1505_v45, %v1504_v56 }
 0x2d1   :  { %9542 = vmatpush3.bf16.msra.mxu0 %v9541_v3  ;;  %v9591_v3 = vpack.c.bf16 %v1539_v48, %v1538_v59  ;;  %v1531_v45 = vld [vmem:[%s15646_s4 + $0x2e48] sm:$0xff]  ;;  %v1562_v59 = vld [vmem:[%s15646_s4 + $0x2f40] sm:$0xff] }
 0x2d2   :  { %9544 = vmatprep.subr.bf16.mxu0 %v9543_v15  ;;  %v1523_v15 = vld [vmem:[%s15646_s4 + $0x2e08] sm:$0xff] }
 0x2d3   :  { %9574 = vmatpush3.bf16.msra.mxu1 %v9573_v34  ;;  %v1522_v34 = vld [vmem:[%s15646_s4 + $0x2e00] sm:$0xff] }
 0x2d4   :  { %9576 = vmatprep.subr.bf16.mxu1 %v9575_v60  ;;  %v1540_v60 = vld [vmem:[%s15646_s4 + $0x2e90] sm:$0xff] }
 0x2d5   :  { %9546 = vmatpush3.bf16.msra.mxu0 %v9545_v2  ;;  %v9593_v2 = vpack.c.bf16 %v1523_v15, %v1522_v34 }
 0x2d6   :  { %9548 = vmatprep.subr.bf16.mxu0 %v9547_v4  ;;  %v9595_v4 = vpack.c.bf16 %v1541_v8, %v1540_v60  ;;  %v1565_v8 = vld [vmem:[%s15646_s4 + $0x2f58] sm:$0xff] }
 0x2d7   :  { %9578 = vmatpush3.bf16.msra.mxu1 %v9577_v26  ;;  %v7521_v23 = vpop.f32.mrb[30].mxu0  ;;  %v9625_v26 = vpack.c.bf16 %v1555_v46, %v1554_v57  ;;  %v1532_v57 = vld [vmem:[%s15646_s4 + $0x2e50] sm:$0xff] }
 0x2d8   :  { %9580 = vmatprep.subr.bf16.mxu1 %v9579_v20  ;;  %v7522_v42 = vpop.f32.mrb[31].mxu0  ;;  %v1557_v20 = vld [vmem:[%s15646_s4 + $0x2f18] sm:$0xff]  ;;  %v1564_v46 = vld [vmem:[%s15646_s4 + $0x2f50] sm:$0xff] }
 0x2d9   :  { %v7556_v41 = vpop.f32.mrb[30].mxu1  ;;  %v7523_v58 = vadd.f32 %v7522_v42, %v7521_v23  ;;  %9550 = vmatpush3.bf16.msra.mxu0 %v9549_v28  ;;  %v2024_v28 = vcombine.high %v14587_v12, %v14587_v12  ;;  %v9631_v23 = vpack.c.bf16 %v1575_v14, %v1574_v39  ;;  %v1552_v39 = vld [vmem:[%s15646_s4 + $0x2ef0] sm:$0xff]  ;;  %v1553_v14 = vld [vmem:[%s15646_s4 + $0x2ef8] sm:$0xff] }
 0x2da   :  { %v7557_v33 = vpop.f32.mrb[31].mxu1  ;;  %9552 = vmatprep.subr.bf16.mxu0 %v9551_v30  ;;  %v9629_v30 = vpack.c.bf16 %v1557_v20, %v1556_v18  ;;  %v1534_v18 = vld [vmem:[%s15646_s4 + $0x2e60] sm:$0xff] }
 0x2db   :  { %v7558_v44 = vadd.f32 %v7557_v33, %v7556_v41  ;;  %9582 = vmatpush3.bf16.msra.mxu1 %v9581_v17  ;;  %v4288_v54 = vadd.f32 %v7523_v58, %v14347_v62  ;;  %v1571_v62 = vld [vmem:[%s15646_s4 + $0x2f88] sm:$0xff]  ;;  %v9597_v17 = vpack.c.bf16 %v1525_v6, %v1524_v16  ;;  %v1529_v58 = vld [vmem:[%s15646_s4 + $0x2e38] sm:$0xff]  ;;  %v1560_v33 = vld [vmem:[%s15646_s4 + $0x2f30] sm:$0xff]  ;;  %v9645_v16 = vpack.c.bf16 %v1565_v8, %v1564_v46 }
 0x2dc   :  { %9584 = vmatprep.subr.bf16.mxu1 %v9583_v37  ;;  %v9623_v7 = vpack.c.bf16 %v1571_v62, %v1570_v50  ;;  %v1544_v37 = vld [vmem:[%s15646_s4 + $0x2eb0] sm:$0xff]  ;;  %v9605_v53 = vpack.c.bf16 %v1529_v58, %v1528_v31  ;;  %v9637_v56 = vpack.c.bf16 %v1561_v36, %v1560_v33  ;;  %v1563_v50 = vld [vmem:[%s15646_s4 + $0x2f48] sm:$0xff]  ;;  %v9615_v6 = vpack.c.bf16 %v1551_v19, %v1550_v10  ;;  %v1566_v20 = vld [vmem:[%s15646_s4 + $0x2f60] sm:$0xff] }
 0x2dd   :  { %v14557_v51 = vadd.f32 %v7558_v44, %v4288_v54  ;;  %9554 = vmatpush3.bf16.msra.mxu0 %v9553_v49  ;;  %v9603_v43 = vpack.c.bf16 %v1545_v25, %v1544_v37  ;;  %v9635_v49 = vpack.c.bf16 %v1577_v27, %v1576_v40  ;;  %v1546_v44 = vld [vmem:[%s15646_s4 + $0x2ec0] sm:$0xff]  ;;  %v1548_v62 = vld [vmem:[%s15646_s4 + $0x2ed0] sm:$0xff]  ;;  %v9641_v34 = vpack.c.bf16 %v1563_v50, %v1562_v59  ;;  %v1537_v40 = vld [vmem:[%s15646_s4 + $0x2e78] sm:$0xff] }
 0x2de   :  { %9556 = vmatprep.subr.bf16.mxu0 %v9555_v38  ;;  %v1578_v38 = vld [vmem:[%s15646_s4 + $0x2fc0] sm:$0xff]  ;;  %v9611_v15 = vpack.c.bf16 %v1549_v63, %v1548_v62  ;;  %v9619_v37 = vpack.c.bf16 %v1553_v14, %v1552_v39  ;;  %v1536_v25 = vld [vmem:[%s15646_s4 + $0x2e70] sm:$0xff] }
 0x2df   :  { %9586 = vmatpush3.bf16.msra.mxu1 %v9585_v52  ;;  %v1547_v52 = vld [vmem:[%s15646_s4 + $0x2ec8] sm:$0xff]  ;;  %v9639_v48 = vpack.c.bf16 %v1579_v55, %v1578_v38  ;;  %v9621_v58 = vpack.c.bf16 %v1537_v40, %v1536_v25 }
 0x2e0   :  { %9588 = vmatprep.subr.bf16.mxu1 %v9587_v5  ;;  %v9607_v54 = vpack.c.bf16 %v1547_v52, %v1546_v44  ;;  %v1530_v5 = vld [vmem:[%s15646_s4 + $0x2e40] sm:$0xff] }
 0x2e1   :  { %9558 = vmatpush3.bf16.msra.mxu0 %v9557_v1  ;;  %v1580_v1 = vld [vmem:[%s15646_s4 + $0x2fd0] sm:$0xff] }
 0x2e2   :  { %9592 = vmatprep.subr.bf16.mxu0 %v9591_v3  ;;  %v9609_v3 = vpack.c.bf16 %v1531_v45, %v1530_v5 }
 0x2e3   :  { %9590 = vmatpush3.bf16.msra.mxu1 %v9589_v61  ;;  %v1581_v61 = vld [vmem:[%s15646_s4 + $0x2fd8] sm:$0xff] }
 0x2e4   :  { %9624 = vmatprep.subr.bf16.mxu1 %v9623_v7  ;;  %5266 = vmatmul.mubr.f32.vlgmr.msra.gmra.mrb[44].mxu0 %v14368_v21  ;;  %v1526_v21 = vld [vmem:[%s15646_s4 + $0x2e20] sm:$0xff]  ;;  %v1533_v7 = vld [vmem:[%s15646_s4 + $0x2e58] sm:$0xff]  ;;  %v9643_v60 = vpack.c.bf16 %v1581_v61, %v1580_v1 }
 0x2e5   :  { %9594 = vmatpush3.bf16.msra.mxu0 %v9593_v2  ;;  %5405 = vmatprep.mubr.f32.mxu0 %v2023_v11  ;;  %v9601_v42 = vpack.c.bf16 %v1527_v32, %v1526_v21  ;;  %v1582_v2 = vld [vmem:[%s15646_s4 + $0x2fe0] sm:$0xff]  ;;  %v1567_v11 = vld [vmem:[%s15646_s4 + $0x2f68] sm:$0xff] }
 0x2e6   :  { %5336 = vmatmul.mubr.f32.vlgmr.msra.gmra.mrb[44].mxu1 %v14377_v24  ;;  %9596 = vmatprep.subr.bf16.mxu0 %v9595_v4  ;;  %v1559_v24 = vld [vmem:[%s15646_s4 + $0x2f28] sm:$0xff]  ;;  %v9613_v4 = vpack.c.bf16 %v1533_v7, %v1532_v57 }
 0x2e7   :  { %9626 = vmatpush3.bf16.msra.mxu1 %v9625_v26  ;;  %5475 = vmatprep.mubr.f32.mxu1 %v2024_v28  ;;  %v9633_v41 = vpack.c.bf16 %v1559_v24, %v1558_v47  ;;  %v1583_v26 = vld [vmem:[%s15646_s4 + $0x2fe8] sm:$0xff]  ;;  %v9649_v24 = vpack.c.bf16 %v1567_v11, %v1566_v20 }
 0x2e8   :  { %9628 = vmatprep.subr.bf16.mxu1 %v9627_v13  ;;  %v1535_v13 = vld [vmem:[%s15646_s4 + $0x2e68] sm:$0xff]  ;;  %v9647_v35 = vpack.c.bf16 %v1583_v26, %v1582_v2 }
 0x2e9   :  { %9598 = vmatpush3.bf16.msra.mxu0 %v9597_v17  ;;  %v9617_v47 = vpack.c.bf16 %v1535_v13, %v1534_v18 }
 0x2ea   :  { %9600 = vmatprep.subr.bf16.mxu0 %v9599_v29  ;;  %v1585_v29 = vld [vmem:[%s15646_s4 + $0x2ff8] sm:$0xff] }
 0x2eb   :  { %9630 = vmatpush3.bf16.msra.mxu1 %v9629_v30  ;;  %v1584_v30 = vld [vmem:[%s15646_s4 + $0x2ff0] sm:$0xff] }
 0x2ec   :  { %9632 = vmatprep.subr.bf16.mxu1 %v9631_v23 }
 0x2ed   :  { %9602 = vmatpush3.bf16.msra.mxu0 %v9601_v42  ;;  %v9651_v42 = vpack.c.bf16 %v1585_v29, %v1584_v30 }
 0x2ee   :  { %9604 = vmatprep.subr.bf16.mxu0 %v9603_v43  ;;  %v1569_v43 = vld [vmem:[%s15646_s4 + $0x2f78] sm:$0xff] }
 0x2ef   :  { %9634 = vmatpush3.bf16.msra.mxu1 %v9633_v41  ;;  %v1568_v41 = vld [vmem:[%s15646_s4 + $0x2f70] sm:$0xff] }
 0x2f0   :  { %9636 = vmatprep.subr.bf16.mxu1 %v9635_v49  ;;  %v9653_v33 = vpack.c.bf16 %v1569_v43, %v1568_v41 }
 0x2f1   :  { %9606 = vmatpush3.bf16.msra.mxu0 %v9605_v53 }
 0x2f2   :  { %9608 = vmatprep.subr.bf16.mxu0 %v9607_v54 }
 0x2f3   :  { %9638 = vmatpush3.bf16.msra.mxu1 %v9637_v56 }
 0x2f4   :  { %9640 = vmatprep.subr.bf16.mxu1 %v9639_v48 }
 0x2f5   :  { %9610 = vmatpush3.bf16.msra.mxu0 %v9609_v3 }
 0x2f6   :  { %9612 = vmatprep.subr.bf16.mxu0 %v9611_v15 }
 0x2f7   :  { %9642 = vmatpush3.bf16.msra.mxu1 %v9641_v34  ;;  %v7591_v22 = vpop.f32.mrb[32].mxu0 }
 0x2f8   :  { %9644 = vmatprep.subr.bf16.mxu1 %v9643_v60  ;;  %v7592_v28 = vpop.f32.mrb[33].mxu0 }
 0x2f9   :  { %v7626_v17 = vpop.f32.mrb[32].mxu1  ;;  %v7593_v21 = vadd.f32 %v7592_v28, %v7591_v22  ;;  %9614 = vmatpush3.bf16.msra.mxu0 %v9613_v4 }
 0x2fa   :  { %v7627_v32 = vpop.f32.mrb[33].mxu1  ;;  %9616 = vmatprep.subr.bf16.mxu0 %v9615_v6 }
 0x2fb   :  { %v7628_v23 = vadd.f32 %v7627_v32, %v7626_v17  ;;  %9646 = vmatpush3.bf16.msra.mxu1 %v9645_v16  ;;  %v4428_v27 = vadd.f32 %v7593_v21, %v14557_v51 }
 0x2fc   :  { %9648 = vmatprep.subr.bf16.mxu1 %v9647_v35 }
 0x2fd   :  { %v4498_v31 = vadd.f32 %v7628_v23, %v4428_v27  ;;  %9618 = vmatpush3.bf16.msra.mxu0 %v9617_v47 }
 0x2fe   :  { %9620 = vmatprep.subr.bf16.mxu0 %v9619_v37 }
 0x2ff   :  { %9650 = vmatpush3.bf16.msra.mxu1 %v9649_v24 }
 0x300   :  { %9652 = vmatprep.subr.bf16.mxu1 %v9651_v42 }
 0x301   :  { %9622 = vmatpush3.bf16.msra.mxu0 %v9621_v58 }
 0x303   :  { %9654 = vmatpush3.bf16.msra.mxu1 %v9653_v33  ;;  %v9697_v33 = vmov 2  }
 0x304   :  { %5406 = vmatmul.mubr.f32.vlgmr.msra.gmra.mrb[46].mxu0 %v14578_v9  ;;  %9661 = vset.pattern.permute.xlu0 %v9697_v33  ;;  %v14779_v33 = vsub.s32 0, %v9866_v0  ;;  %v5494_v0 = vld [vmem:[%s15649_s1 + $0x8] sm:$0x77] }
 0x306   :  { %5476 = vmatmul.mubr.f32.vlgmr.msra.gmra.mrb[46].mxu1 %v14587_v12 }
 0x317   :  { %v7661_v51 = vpop.f32.mrb[34].mxu0 }
 0x318   :  { %v7662_v49 = vpop.f32.mrb[35].mxu0 }
 0x319   :  { %v7696_v36 = vpop.f32.mrb[34].mxu1  ;;  %v7663_v44 = vadd.f32 %v7662_v49, %v7661_v51  ;;  %v9698_v51 = vmov 0  }
 0x31a   :  { %v7697_v52 = vpop.f32.mrb[35].mxu1  ;;  %9659 = vset.pattern.permute.xlu1 %v9698_v51 }
 0x31b   :  { %v7698_v38 = vadd.f32 %v7697_v52, %v7696_v36  ;;  %v4568_v55 = vadd.f32 %v7663_v44, %v4498_v31  ;;  %v9699_v52 = vmov 1  }
 0x31d   :  { %v4638_v53 = vadd.f32 %v7698_v38, %v4568_v55  ;;  %v5493_v38 = vld [vmem:[%s15649_s1] sm:$0x77] }
 0x31e   :  { %v5535_v55 = vld [vmem:[%s15650_s2] sm:$0x77] }
 0x337   :  { %v7731_v56 = vpop.f32.mrb[36].mxu0 }
 0x338   :  { %v7732_v54 = vpop.f32.mrb[37].mxu0 }
 0x339   :  { %v7766_v5 = vpop.f32.mrb[36].mxu1  ;;  %v7733_v45 = vadd.f32 %v7732_v54, %v7731_v56  ;;  %v5543_v56 = vsel %vm5501_vm1, %v5535_v55, 0.0  ;;  %v5575_v54 = vld [vmem:[%s15651_s3] sm:$0x77] }
 0x33a   :  { %v7767_v59 = vpop.f32.mrb[37].mxu1 }
 0x33b   :  { %v7768_v48 = vadd.f32 %v7767_v59, %v7766_v5  ;;  %v4708_v50 = vadd.f32 %v7733_v45, %v4638_v53  ;;  %v5502_v53 = vsel %vm5501_vm1, %v5493_v38, 0.0  ;;  %v5583_v5 = vsel %vm5501_vm1, %v5575_v54, 0.0 }
 0x33c   :  { %v5539_v45 = vcombine.high %v5535_v55, %v5535_v55  ;;  %v5503_v59 = vrot.slane %v5502_v53, 4 }
 0x33d   :  { %v4778_v62 = vadd.f32 %v7768_v48, %v4708_v50  ;;  %v5544_v48 = vrot.slane %v5543_v56, 4  ;;  %v5497_v50 = vcombine.high %v5493_v38, %v5493_v38 }
 0x357   :  { %v7801_v63 = vpop.f32.mrb[38].mxu0 }
 0x358   :  { %v7802_v9 = vpop.f32.mrb[39].mxu0 }
 0x359   :  { %v7836_v1 = vpop.f32.mrb[38].mxu1  ;;  %v7803_v12 = vadd.f32 %v7802_v9, %v7801_v63  ;;  %v5550_v63 = vsel %vm5501_vm1, %v5539_v45, 0.0  ;;  %v5504_v9 = vadd.f32 %v5503_v59, %v5502_v53 }
 0x35a   :  { %v7837_v61 = vpop.f32.mrb[39].mxu1 }
 0x35b   :  { %v7838_v3 = vadd.f32 %v7837_v61, %v7836_v1  ;;  %v4848_v34 = vadd.f32 %v7803_v12, %v4778_v62  ;;  %v5584_v62 = vrot.slane %v5583_v5, 4  ;;  %v5545_v1 = vadd.f32 %v5544_v48, %v5543_v56  ;;  %v5576_v48 = vld [vmem:[%s15651_s3 + $0x8] sm:$0x77] }
 0x35c   :  { %v5579_v12 = vcombine.high %v5575_v54, %v5575_v54  ;;  %v5509_v61 = vsel %vm5501_vm1, %v5497_v50, 0.0 }
 0x35d   :  { %v4918_v15 = vadd.f32 %v7838_v3, %v4848_v34  ;;  %v5585_v3 = vadd.f32 %v5584_v62, %v5583_v5  ;;  %v5551_v34 = vrot.slane %v5550_v63, 4  ;;  %v5516_v5 = vsel %vm5501_vm1, %v5494_v0, 0.0 }
 0x35e   :  { %v5517_v62 = vrot.slane %v5516_v5, 4 }
 0x377   :  { %v7871_v57 = vpop.f32.mrb[40].mxu0 }
 0x378   :  { %v7872_v7 = vpop.f32.mrb[41].mxu0 }
 0x379   :  { %v7906_v46 = vpop.f32.mrb[40].mxu1  ;;  %v7873_v60 = vadd.f32 %v7872_v7, %v7871_v57  ;;  %v5510_v57 = vrot.slane %v5509_v61, 4  ;;  %v5546_v7 = vrot.slane %v5545_v1, 2 }
 0x37a   :  { %v7907_v8 = vpop.f32.mrb[41].mxu1 }
 0x37b   :  { %v7908_v10 = vadd.f32 %v7907_v8, %v7906_v46  ;;  %v4988_v19 = vadd.f32 %v7873_v60, %v4918_v15  ;;  %v5505_v15 = vrot.slane %v5504_v9, 2  ;;  %v5590_v46 = vsel %vm5501_vm1, %v5579_v12, 0.0 }
 0x37c   :  { %v5586_v60 = vrot.slane %v5585_v3, 2  ;;  %v5552_v8 = vadd.f32 %v5551_v34, %v5550_v63  ;;  %v5597_v63 = vsel %vm5501_vm1, %v5576_v48, 0.0 }
 0x37d   :  { %v5058_v2 = vadd.f32 %v7908_v10, %v4988_v19  ;;  %v5591_v10 = vrot.slane %v5590_v46, 4  ;;  %v5506_v19 = vadd.f32 %v5505_v15, %v5504_v9  ;;  %v5598_v12 = vrot.slane %v5597_v63, 4 }
 0x37f   :  { %v5599_v15 = vadd.f32 %v5598_v12, %v5597_v63  ;;  %v5923_v12 = vld [vmem:[%s15652_s6 + $0x8] sm:$0xff] }
 0x397   :  { %v7941_v26 = vpop.f32.mrb[42].mxu0 }
 0x398   :  { %v7942_v4 = vpop.f32.mrb[43].mxu0 }
 0x399   :  { %v7976_v16 = vpop.f32.mrb[42].mxu1  ;;  %v7943_v6 = vadd.f32 %v7942_v4, %v7941_v26  ;;  %v5547_v26 = vadd.f32 %v5546_v7, %v5545_v1  ;;  %v5587_v4 = vadd.f32 %v5586_v60, %v5585_v3 }
 0x39a   :  { %v7977_v18 = vpop.f32.mrb[43].mxu1 }
 0x39b   :  { %v7978_v13 = vadd.f32 %v7977_v18, %v7976_v16  ;;  %v5128_v20 = vadd.f32 %v7943_v6, %v5058_v2  ;;  %v5511_v2 = vadd.f32 %v5510_v57, %v5509_v61  ;;  %v5553_v16 = vrot.slane %v5552_v8, 2 }
 0x39c   :  { %v5592_v6 = vadd.f32 %v5591_v10, %v5590_v46  ;;  %v5507_v18 = vrot.slane %v5506_v19, 1  ;;  %v5518_v61 = vadd.f32 %v5517_v62, %v5516_v5  ;;  %v5600_v46 = vrot.slane %v5599_v15, 2 }
 0x39d   :  { %v5198_v22 = vadd.f32 %v7978_v13, %v5128_v20  ;;  %v5512_v13 = vrot.slane %v5511_v2, 2  ;;  %v5548_v20 = vrot.slane %v5547_v26, 1 }
 0x39e   :  { %v5519_v57 = vrot.slane %v5518_v61, 2  ;;  %v5601_v10 = vadd.f32 %v5600_v46, %v5599_v15  ;;  %v5949_v15 = vld [vmem:[%s15652_s6 + $0xd8] sm:$0xff]  ;;  %v5924_v46 = vld [vmem:[%s15652_s6 + $0x10] sm:$0xff] }
 0x3a0   :  { %v5520_v60 = vadd.f32 %v5519_v57, %v5518_v61 }
 0x3b7   :  { %v8011_v35 = vpop.f32.mrb[44].mxu0 }
 0x3b8   :  { %v8012_v11 = vpop.f32.mrb[45].mxu0 }
 0x3b9   :  { %v8046_v39 = vpop.f32.mrb[44].mxu1  ;;  %v8013_v14 = vadd.f32 %v8012_v11, %v8011_v35  ;;  %v5554_v35 = vadd.f32 %v5553_v16, %v5552_v8  ;;  %v5593_v11 = vrot.slane %v5592_v6, 2 }
 0x3ba   :  { %v8047_v28 = vpop.f32.mrb[45].mxu1 }
 0x3bb   :  { %v8048_v17 = vadd.f32 %v8047_v28, %v8046_v39  ;;  %v5268_v30 = vadd.f32 %v8013_v14, %v5198_v22  ;;  %v5588_v22 = vrot.slane %v5587_v4, 1  ;;  %v5508_v39 = vadd.f32 %v5507_v18, %v5506_v19 }
 0x3bc   :  { %v5513_v14 = vadd.f32 %v5512_v13, %v5511_v2  ;;  %v5549_v28 = vadd.f32 %v5548_v20, %v5547_v26  ;;  %v5521_v19 = vrot.slane %v5520_v60, 1  ;;  %v5602_v26 = vrot.slane %v5601_v10, 1 }
 0x3bd   :  { %v5338_v29 = vadd.f32 %v8048_v17, %v5268_v30  ;;  %v5589_v17 = vadd.f32 %v5588_v22, %v5587_v4 }
 0x3be   :  { %v5522_v4 = vadd.f32 %v5521_v19, %v5520_v60  ;;  %v5603_v13 = vadd.f32 %v5602_v26, %v5601_v10  ;;  %v5925_v60 = vld [vmem:[%s15652_s6 + $0x18] sm:$0xff]  ;;  %v6077_v10 = vmul.f32 0.02, %v5949_v15  ;;  %v6052_v26 = vmul.f32 0.02, %v5924_v46 }
 0x3c0   :  { %v5533_v20 = vmul.f32 0.33333334, %v5522_v4  ;;  %v6053_v4 = vmul.f32 0.02, %v5925_v60 }
 0x3d7   :  { %v8081_v21 = vpop.f32.mrb[46].mxu0 }
 0x3d8   :  { %v8082_v32 = vpop.f32.mrb[47].mxu0 }
 0x3d9   :  { %v8116_v47 = vpop.f32.mrb[46].mxu1  ;;  %v8083_v23 = vadd.f32 %v8082_v32, %v8081_v21  ;;  %v5594_v21 = vadd.f32 %v5593_v11, %v5592_v6  ;;  %v5514_v32 = vrot.slane %v5513_v14, 1 }
 0x3da   :  { %v8117_v24 = vpop.f32.mrb[47].mxu1 }
 0x3db   :  { %v8118_v37 = vadd.f32 %v8117_v24, %v8116_v47  ;;  %v5408_v25 = vadd.f32 %v8083_v23, %v5338_v29  ;;  %v5555_v29 = vrot.slane %v5554_v35, 1  ;;  %v5531_v47 = vmul.f32 0.33333334, %v5508_v39 }
 0x3dc   :  { %v5571_v23 = vmul.f32 0.33333334, %v5549_v28  ;;  %v5611_v24 = vmul.f32 0.33333334, %v5589_v17 }
 0x3dd   :  { %v5478_v40 = vadd.f32 %v8118_v37, %v5408_v25  ;;  %v5556_v37 = vadd.f32 %v5555_v29, %v5554_v35  ;;  %v5498_v35 = vcombine.high %v5494_v0, %v5494_v0  ;;  %v5580_v29 = vcombine.high %v5576_v48, %v5576_v48 }
 0x3df   :  { %v5482_v27 = vsel %vm5481_vm0, %v5478_v40, -inf }
 0x3e0   :  { %5483 = vmax.xlane.f32.xlu0 %v5482_v27  ;;  %v5595_v27 = vrot.slane %v5594_v21, 1 }
 0x46d   :  { %v5484_v42 = vpop.xlane.xlu0 %5483 }
 0x46e   :  { %v5485_v41 = vsub.f32 %v5478_v40, %v5484_v42  ;;  %v5515_v42 = vadd.f32 %v5514_v32, %v5513_v14  ;;  %v5613_v14 = vmul.f32 0.33333334, %v5603_v13 }
 0x470   :  { %v5486_v43 = vmul.f32 1.442695, %v5485_v41 }
 0x472   :  { %9692 = vpow2.f32 %v5486_v43 }
 0x47c   :  { %v9693_v31 = vpop.eup %9692 }
 0x47d   :  { %v5488_v58 = vsel %vm5481_vm0, %v9693_v31, 0.0 }
 0x47e   :  { %5489 = vadd.xlane.f32.xlu0 %v5488_v58  ;;  %v5572_v58 = vmul.f32 0.33333334, %v5556_v37 }
 0x50b   :  { %v5490_v49 = vpop.xlane.xlu0 %5489 }
 0x50c   :  { %9694 = vrcp.f32 %v5490_v49  ;;  %v5596_v49 = vadd.f32 %v5595_v27, %v5594_v21  ;;  %v5523_v21 = vsel %vm5501_vm1, %v5498_v35, 0.0  ;;  %v5926_v35 = vld [vmem:[%s15652_s6 + $0x20] sm:$0xff] }
 0x50e   :  { %v5612_v56 = vmul.f32 0.33333334, %v5596_v49 }
 0x516   :  { %v9695_v36 = vpop.eup %9694 }
 0x517   :  { %v5492_v44 = vmul.f32 %v9695_v36, %v9693_v31  ;;  %v5532_v36 = vmul.f32 0.33333334, %v5515_v42 }
 0x519   :  { %5641 = vperm.xlu0 %9661, %v5492_v44   ;;  %5617 = vperm.xlu1 %9659, %v5492_v44  }
 0x51d   :  { %9660 = vset.pattern.permute.xlu1 %v9699_v52  ;;  %v5536_v52 = vld [vmem:[%s15650_s2 + $0x8] sm:$0x77] }
 0x51e   :  { %5627 = vperm.xlu1 %9660, %v5492_v44   ;;  %v5557_v53 = vsel %vm5501_vm1, %v5536_v52, 0.0  ;;  %v5540_v18 = vcombine.high %v5536_v52, %v5536_v52 }
 0x51f   :  { %v5558_v45 = vrot.slane %v5557_v53, 4 }
 0x520   :  { %v5564_v39 = vsel %vm5501_vm1, %v5540_v18, 0.0 }
 0x521   :  { %v5559_v9 = vadd.f32 %v5558_v45, %v5557_v53 }
 0x523   :  { %v5560_v3 = vrot.slane %v5559_v9, 2 }
 0x525   :  { %v5561_v7 = vadd.f32 %v5560_v3, %v5559_v9  ;;  %v5945_v9 = vld [vmem:[%s15652_s6 + $0xb8] sm:$0xff] }
 0x526   :  { %v6073_v3 = vmul.f32 0.02, %v5945_v9 }
 0x527   :  { %v5562_v8 = vrot.slane %v5561_v7, 1 }
 0x529   :  { %v5563_v2 = vadd.f32 %v5562_v8, %v5561_v7  ;;  %v6051_v7 = vmul.f32 0.02, %v5923_v12 }
 0x52b   :  { %v5573_v16 = vmul.f32 0.33333334, %v5563_v2 }
 0x598   :  { %v14769_v30 = vpop.permute.xlu1 %5617  ;;  %v14771_v25 = vpop.permute.xlu0 %5641 }
 0x599   :  { %v5622_v41 = vmul.f32 %v14769_v30, %v5531_v47  ;;  %v5646_v31 = vmul.f32 %v14771_v25, %v5611_v24  ;;  %v5623_v54 = vmul.f32 %v14769_v30, %v5532_v36  ;;  %v5647_v50 = vmul.f32 %v14771_v25, %v5612_v56 }
 0x59a   :  { %v5619_v22 = vrot.slane %v14769_v30, 1  ;;  %v5643_v28 = vrot.slane %v14771_v25, 1  ;;  %v5565_v30 = vrot.slane %v5564_v39, 4  ;;  %v5604_v24 = vsel %vm5501_vm1, %v5580_v29, 0.0 }
 0x59b   :  { %v6054_v29 = vmul.f32 0.02, %v5926_v35 }
 0x59c   :  { %v5624_v17 = vmul.f32 %v5619_v22, %v5533_v20  ;;  %v5648_v47 = vmul.f32 %v5643_v28, %v5613_v14  ;;  %v5566_v37 = vadd.f32 %v5565_v30, %v5564_v39 }
 0x59d   :  { %v14773_v40 = vpop.permute.xlu1 %5627 }
 0x59e   :  { %v5632_v43 = vmul.f32 %v14773_v40, %v5571_v23  ;;  %v5633_v38 = vmul.f32 %v14773_v40, %v5572_v58  ;;  %v5629_v6 = vrot.slane %v14773_v40, 1  ;;  %v5524_v23 = vrot.slane %v5523_v21, 4 }
 0x59f   :  { %v5605_v40 = vrot.slane %v5604_v24, 4  ;;  %v5567_v42 = vrot.slane %v5566_v37, 2 }
 0x5a0   :  { %v5636_v51 = vadd.f32 %v5632_v43, %v5622_v41  ;;  %v5637_v59 = vadd.f32 %v5633_v38, %v5623_v54  ;;  %v5634_v11 = vmul.f32 %v5629_v6, %v5573_v16  ;;  %v5525_v27 = vadd.f32 %v5524_v23, %v5523_v21  ;;  %v5952_v16 = vld [vmem:[%s15652_s6 + $0xf0] sm:$0xff] }
 0x5a1   :  { %v5606_v43 = vadd.f32 %v5605_v40, %v5604_v24  ;;  %v5568_v58 = vadd.f32 %v5567_v42, %v5566_v37  ;;  %v6080_v39 = vmul.f32 0.02, %v5952_v16 }
 0x5a2   :  { %v5650_v44 = vadd.f32 %v5646_v31, %v5636_v51  ;;  %v5651_v1 = vadd.f32 %v5647_v50, %v5637_v59  ;;  %v5638_v32 = vadd.f32 %v5634_v11, %v5624_v17  ;;  %v5526_v31 = vrot.slane %v5525_v27, 2  ;;  %v5927_v11 = vld [vmem:[%s15652_s6 + $0x28] sm:$0xff] }
 0x5a3   :  { %v5607_v51 = vrot.slane %v5606_v43, 2  ;;  %v5569_v36 = vrot.slane %v5568_v58, 1  ;;  %v6055_v21 = vmul.f32 0.02, %v5927_v11 }
 0x5a4   :  { %v14786_v55 = vrot.slane %v5650_v44, %v14779_v33  ;;  %v14806_v34 = vrot.slane %v5651_v1, %v14779_v33  ;;  %v5652_v25 = vadd.f32 %v5648_v47, %v5638_v32  ;;  %v5527_v49 = vadd.f32 %v5526_v31, %v5525_v27  ;;  %v5922_v1 = vld [vmem:[%s15652_s6] sm:$0xff] }
 0x5a5   :  { %v5608_v44 = vadd.f32 %v5607_v51, %v5606_v43  ;;  %v5570_v38 = vadd.f32 %v5569_v36, %v5568_v58  ;;  %v6050_v57 = vmul.f32 0.02, %v5922_v1 }
 0x5a6   :  { %5703 = vbcast.lane.b32.xlu0 %v14786_v55, 344  ;;  %5659 = vbcast.lane.b32.xlu1 %v14786_v55, 256  ;;  %v14831_v41 = vrot.slane %v5652_v25, %v14779_v33  ;;  %v5528_v52 = vrot.slane %v5527_v49, 1 }
 0x5a7   :  { %v5609_v53 = vrot.slane %v5608_v44, 1  ;;  %v5574_v0 = vmul.f32 0.33333334, %v5570_v38 }
 0x5a8   :  { %v5529_v56 = vadd.f32 %v5528_v52, %v5527_v49 }
 0x5a9   :  { %v5610_v54 = vadd.f32 %v5609_v53, %v5608_v44 }
 0x5aa   :  { %5711 = vbcast.lane.b32.xlu0 %v14786_v55, 360  ;;  %5663 = vbcast.lane.b32.xlu1 %v14786_v55, 264  ;;  %v5534_v5 = vmul.f32 0.33333334, %v5529_v56 }
 0x5ab   :  { %v5614_v45 = vmul.f32 0.33333334, %v5610_v54 }
 0x5ac   :  { %v5625_v59 = vmul.f32 %v5619_v22, %v5534_v5 }
 0x5ad   :  { %v5649_v50 = vmul.f32 %v5643_v28, %v5614_v45 }
 0x5ae   :  { %5719 = vbcast.lane.b32.xlu0 %v14786_v55, 376  ;;  %5667 = vbcast.lane.b32.xlu1 %v14786_v55, 272 }
 0x5b2   :  { %5730 = vbcast.lane.b32.xlu0 %v14806_v34, 264  ;;  %5671 = vbcast.lane.b32.xlu1 %v14786_v55, 280 }
 0x5b6   :  { %5738 = vbcast.lane.b32.xlu0 %v14806_v34, 280  ;;  %5675 = vbcast.lane.b32.xlu1 %v14786_v55, 288 }
 0x5ba   :  { %5746 = vbcast.lane.b32.xlu0 %v14806_v34, 296  ;;  %5679 = vbcast.lane.b32.xlu1 %v14786_v55, 296 }
 0x5be   :  { %5754 = vbcast.lane.b32.xlu0 %v14806_v34, 312  ;;  %5683 = vbcast.lane.b32.xlu1 %v14786_v55, 304 }
 0x5c2   :  { %5762 = vbcast.lane.b32.xlu0 %v14806_v34, 328  ;;  %5687 = vbcast.lane.b32.xlu1 %v14786_v55, 312 }
 0x5c6   :  { %5770 = vbcast.lane.b32.xlu0 %v14806_v34, 344  ;;  %5691 = vbcast.lane.b32.xlu1 %v14786_v55, 320 }
 0x5ca   :  { %5778 = vbcast.lane.b32.xlu0 %v14806_v34, 360  ;;  %5695 = vbcast.lane.b32.xlu1 %v14786_v55, 328 }
 0x5ce   :  { %5786 = vbcast.lane.b32.xlu0 %v14806_v34, 376  ;;  %5699 = vbcast.lane.b32.xlu1 %v14786_v55, 336 }
 0x5d2   :  { %5707 = vbcast.lane.b32.xlu1 %v14786_v55, 352  ;;  %5797 = vbcast.lane.b32.xlu0 %v14831_v41, 264 }
 0x5d6   :  { %5715 = vbcast.lane.b32.xlu1 %v14786_v55, 368  ;;  %5805 = vbcast.lane.b32.xlu0 %v14831_v41, 280  ;;  %v5635_v55 = vmul.f32 %v5629_v6, %v5574_v0  ;;  %v5953_v6 = vld [vmem:[%s15652_s6 + $0xf8] sm:$0xff] }
 0x5d7   :  { %v6081_v14 = vmul.f32 0.02, %v5953_v6 }
 0x5d8   :  { %v5639_v48 = vadd.f32 %v5635_v55, %v5625_v59 }
 0x5da   :  { %5726 = vbcast.lane.b32.xlu1 %v14806_v34, 256  ;;  %5813 = vbcast.lane.b32.xlu0 %v14831_v41, 296  ;;  %v5653_v62 = vadd.f32 %v5649_v50, %v5639_v48 }
 0x5dc   :  { %v14850_v63 = vrot.slane %v5653_v62, %v14779_v33  ;;  %v5944_v33 = vld [vmem:[%s15652_s6 + $0xb0] sm:$0xff] }
 0x5dd   :  { %v6072_v61 = vmul.f32 0.02, %v5944_v33 }
 0x5de   :  { %5734 = vbcast.lane.b32.xlu1 %v14806_v34, 272  ;;  %5821 = vbcast.lane.b32.xlu0 %v14831_v41, 312 }
 0x5e2   :  { %5742 = vbcast.lane.b32.xlu1 %v14806_v34, 288  ;;  %5829 = vbcast.lane.b32.xlu0 %v14831_v41, 328 }
 0x5e6   :  { %5750 = vbcast.lane.b32.xlu1 %v14806_v34, 304  ;;  %5837 = vbcast.lane.b32.xlu0 %v14831_v41, 344 }
 0x5ea   :  { %5758 = vbcast.lane.b32.xlu1 %v14806_v34, 320  ;;  %5845 = vbcast.lane.b32.xlu0 %v14831_v41, 360 }
 0x5ee   :  { %5766 = vbcast.lane.b32.xlu1 %v14806_v34, 336  ;;  %5853 = vbcast.lane.b32.xlu0 %v14831_v41, 376 }
 0x5f2   :  { %5774 = vbcast.lane.b32.xlu1 %v14806_v34, 352  ;;  %5864 = vbcast.lane.b32.xlu0 %v14850_v63, 264 }
 0x5f6   :  { %5782 = vbcast.lane.b32.xlu1 %v14806_v34, 368  ;;  %5872 = vbcast.lane.b32.xlu0 %v14850_v63, 280  ;;  %v5948_v34 = vld [vmem:[%s15652_s6 + $0xd0] sm:$0xff] }
 0x5f7   :  { %v6076_v8 = vmul.f32 0.02, %v5948_v34 }
 0x5fa   :  { %5880 = vbcast.lane.b32.xlu0 %v14850_v63, 296  ;;  %5793 = vbcast.lane.b32.xlu1 %v14831_v41, 256 }
 0x5fe   :  { %5888 = vbcast.lane.b32.xlu0 %v14850_v63, 312  ;;  %5801 = vbcast.lane.b32.xlu1 %v14831_v41, 272 }
 0x602   :  { %5896 = vbcast.lane.b32.xlu0 %v14850_v63, 328  ;;  %5809 = vbcast.lane.b32.xlu1 %v14831_v41, 288 }
 0x606   :  { %5904 = vbcast.lane.b32.xlu0 %v14850_v63, 344  ;;  %5817 = vbcast.lane.b32.xlu1 %v14831_v41, 304 }
 0x60a   :  { %5912 = vbcast.lane.b32.xlu0 %v14850_v63, 360  ;;  %5825 = vbcast.lane.b32.xlu1 %v14831_v41, 320 }
 0x60e   :  { %5920 = vbcast.lane.b32.xlu0 %v14850_v63, 376  ;;  %5833 = vbcast.lane.b32.xlu1 %v14831_v41, 336 }
 0x612   :  { %5841 = vbcast.lane.b32.xlu1 %v14831_v41, 352 }
 0x616   :  { %5849 = vbcast.lane.b32.xlu1 %v14831_v41, 368 }
 0x618   :  { %v5704_v19 = vpop.permute.xlu0 %5703  ;;  %v5660_v2 = vpop.permute.xlu1 %5659 }
 0x619   :  { %v6200_v18 = vadd.f32 %v6072_v61, %v5704_v19  ;;  %v6201_v13 = vadd.f32 %v6073_v3, %v5704_v19  ;;  %v6178_v20 = vadd.f32 %v6050_v57, %v5660_v2  ;;  %v6179_v22 = vadd.f32 %v6051_v7, %v5660_v2 }
 0x61a   :  { %5860 = vbcast.lane.b32.xlu1 %v14850_v63, 256 }
 0x61b   :  { %6328 = vst [vmem:[%s15653_s7 + $0xb0] sm:$0xff] %v6200_v18  ;;  %6329 = vst [vmem:[%s15653_s7 + $0xb8] sm:$0xff] %v6201_v13 }
 0x61c   :  { %6306 = vst [vmem:[%s15653_s7] sm:$0xff] %v6178_v20  ;;  %6307 = vst [vmem:[%s15653_s7 + $0x8] sm:$0xff] %v6179_v22  ;;  %v5712_v28 = vpop.permute.xlu0 %5711  ;;  %v5664_v17 = vpop.permute.xlu1 %5663 }
 0x61d   :  { %v6204_v47 = vadd.f32 %v6076_v8, %v5712_v28  ;;  %v6205_v23 = vadd.f32 %v6077_v10, %v5712_v28  ;;  %v6180_v24 = vadd.f32 %v6052_v26, %v5664_v17  ;;  %v6181_v37 = vadd.f32 %v6053_v4, %v5664_v17 }
 0x61e   :  { %5868 = vbcast.lane.b32.xlu1 %v14850_v63, 272 }
 0x620   :  { %v5720_v41 = vpop.permute.xlu0 %5719  ;;  %v5668_v43 = vpop.permute.xlu1 %5667 }
 0x621   :  { %v6208_v36 = vadd.f32 %v6080_v39, %v5720_v41  ;;  %v6209_v44 = vadd.f32 %v6081_v14, %v5720_v41  ;;  %v6182_v52 = vadd.f32 %v6054_v29, %v5668_v43  ;;  %v6183_v38 = vadd.f32 %v6055_v21, %v5668_v43 }
 0x622   :  { %5876 = vbcast.lane.b32.xlu1 %v14850_v63, 288 }
 0x623   :  { %v5956_v30 = vld [vmem:[%s15652_s6 + $0x110] sm:$0xff]  ;;  %v5957_v32 = vld [vmem:[%s15652_s6 + $0x118] sm:$0xff] }
 0x624   :  { %v5928_v25 = vld [vmem:[%s15652_s6 + $0x30] sm:$0xff]  ;;  %v5929_v40 = vld [vmem:[%s15652_s6 + $0x38] sm:$0xff]  ;;  %v6084_v27 = vmul.f32 0.02, %v5956_v30  ;;  %v6085_v42 = vmul.f32 0.02, %v5957_v32  ;;  %v5731_v5 = vpop.permute.xlu0 %5730  ;;  %v5672_v55 = vpop.permute.xlu1 %5671 }
 0x625   :  { %6332 = vst [vmem:[%s15653_s7 + $0xd0] sm:$0xff] %v6204_v47  ;;  %6333 = vst [vmem:[%s15653_s7 + $0xd8] sm:$0xff] %v6205_v23  ;;  %v6056_v31 = vmul.f32 0.02, %v5928_v25  ;;  %v6057_v58 = vmul.f32 0.02, %v5929_v40 }
 0x626   :  { %6308 = vst [vmem:[%s15653_s7 + $0x10] sm:$0xff] %v6180_v24  ;;  %6309 = vst [vmem:[%s15653_s7 + $0x18] sm:$0xff] %v6181_v37  ;;  %v6212_v62 = vadd.f32 %v6084_v27, %v5731_v5  ;;  %v6213_v33 = vadd.f32 %v6085_v42, %v5731_v5  ;;  %5884 = vbcast.lane.b32.xlu1 %v14850_v63, 304 }
 0x627   :  { %v6184_v9 = vadd.f32 %v6056_v31, %v5672_v55  ;;  %v6185_v1 = vadd.f32 %v6057_v58, %v5672_v55 }
 0x628   :  { %v5739_v15 = vpop.permute.xlu0 %5738  ;;  %v5676_v57 = vpop.permute.xlu1 %5675 }
 0x62a   :  { %5892 = vbcast.lane.b32.xlu1 %v14850_v63, 320 }
 0x62c   :  { %v5747_v13 = vpop.permute.xlu0 %5746  ;;  %v5680_v20 = vpop.permute.xlu1 %5679 }
 0x62d   :  { %v5960_v51 = vld [vmem:[%s15652_s6 + $0x130] sm:$0xff]  ;;  %v5961_v49 = vld [vmem:[%s15652_s6 + $0x138] sm:$0xff]  ;;  %v5930_v53 = vld [vmem:[%s15652_s6 + $0x40] sm:$0xff] }
 0x62e   :  { %v5931_v56 = vld [vmem:[%s15652_s6 + $0x48] sm:$0xff]  ;;  %v6088_v0 = vmul.f32 0.02, %v5960_v51  ;;  %v6089_v54 = vmul.f32 0.02, %v5961_v49  ;;  %5900 = vbcast.lane.b32.xlu1 %v14850_v63, 336 }
 0x62f   :  { %6336 = vst [vmem:[%s15653_s7 + $0xf0] sm:$0xff] %v6208_v36  ;;  %6337 = vst [vmem:[%s15653_s7 + $0xf8] sm:$0xff] %v6209_v44  ;;  %v6058_v45 = vmul.f32 0.02, %v5930_v53  ;;  %v6059_v59 = vmul.f32 0.02, %v5931_v56 }
 0x630   :  { %6310 = vst [vmem:[%s15653_s7 + $0x20] sm:$0xff] %v6182_v52  ;;  %6311 = vst [vmem:[%s15653_s7 + $0x28] sm:$0xff] %v6183_v38  ;;  %v6216_v10 = vadd.f32 %v6088_v0, %v5739_v15  ;;  %v6217_v19 = vadd.f32 %v6089_v54, %v5739_v15  ;;  %v5755_v23 = vpop.permute.xlu0 %5754  ;;  %v5684_v24 = vpop.permute.xlu1 %5683 }
 0x631   :  { %v6186_v2 = vadd.f32 %v6058_v45, %v5676_v57  ;;  %v6187_v26 = vadd.f32 %v6059_v59, %v5676_v57 }
 0x632   :  { %5908 = vbcast.lane.b32.xlu1 %v14850_v63, 352 }
 0x634   :  { %v5763_v44 = vpop.permute.xlu0 %5762  ;;  %v5688_v52 = vpop.permute.xlu1 %5687 }
 0x636   :  { %5916 = vbcast.lane.b32.xlu1 %v14850_v63, 368 }
 0x637   :  { %v5964_v48 = vld [vmem:[%s15652_s6 + $0x150] sm:$0xff]  ;;  %v5965_v50 = vld [vmem:[%s15652_s6 + $0x158] sm:$0xff] }
 0x638   :  { %v5932_v12 = vld [vmem:[%s15652_s6 + $0x50] sm:$0xff]  ;;  %v5933_v61 = vld [vmem:[%s15652_s6 + $0x58] sm:$0xff]  ;;  %v6092_v3 = vmul.f32 0.02, %v5964_v48  ;;  %v6093_v34 = vmul.f32 0.02, %v5965_v50  ;;  %v5692_v63 = vpop.permute.xlu1 %5691 }
 0x639   :  { %6340 = vst [vmem:[%s15653_s7 + $0x110] sm:$0xff] %v6212_v62  ;;  %6341 = vst [vmem:[%s15653_s7 + $0x118] sm:$0xff] %v6213_v33  ;;  %v6060_v7 = vmul.f32 0.02, %v5932_v12  ;;  %v6061_v46 = vmul.f32 0.02, %v5933_v61  ;;  %v5771_v33 = vpop.permute.xlu0 %5770 }
 0x63a   :  { %6312 = vst [vmem:[%s15653_s7 + $0x30] sm:$0xff] %v6184_v9  ;;  %6313 = vst [vmem:[%s15653_s7 + $0x38] sm:$0xff] %v6185_v1  ;;  %v6220_v14 = vadd.f32 %v6092_v3, %v5747_v13  ;;  %v6221_v28 = vadd.f32 %v6093_v34, %v5747_v13 }
 0x63b   :  { %v6188_v17 = vadd.f32 %v6060_v7, %v5680_v20  ;;  %v6189_v29 = vadd.f32 %v6061_v46, %v5680_v20 }
 0x641   :  { %v5968_v60 = vld [vmem:[%s15652_s6 + $0x170] sm:$0xff]  ;;  %v5969_v8 = vld [vmem:[%s15652_s6 + $0x178] sm:$0xff]  ;;  %v5934_v4 = vld [vmem:[%s15652_s6 + $0x60] sm:$0xff] }
 0x642   :  { %v5935_v16 = vld [vmem:[%s15652_s6 + $0x68] sm:$0xff]  ;;  %v6096_v6 = vmul.f32 0.02, %v5968_v60  ;;  %v6097_v18 = vmul.f32 0.02, %v5969_v8 }
 0x643   :  { %6344 = vst [vmem:[%s15653_s7 + $0x130] sm:$0xff] %v6216_v10  ;;  %6345 = vst [vmem:[%s15653_s7 + $0x138] sm:$0xff] %v6217_v19  ;;  %v6062_v22 = vmul.f32 0.02, %v5934_v4  ;;  %v6063_v35 = vmul.f32 0.02, %v5935_v16  ;;  %v5779_v10 = vpop.permute.xlu0 %5778  ;;  %v5696_v19 = vpop.permute.xlu1 %5695 }
 0x644   :  { %6314 = vst [vmem:[%s15653_s7 + $0x40] sm:$0xff] %v6186_v2  ;;  %6315 = vst [vmem:[%s15653_s7 + $0x48] sm:$0xff] %v6187_v26  ;;  %v6224_v42 = vadd.f32 %v6096_v6, %v5755_v23  ;;  %v6225_v41 = vadd.f32 %v6097_v18, %v5755_v23 }
 0x645   :  { %v6190_v43 = vadd.f32 %v6062_v22, %v5684_v24  ;;  %v6191_v31 = vadd.f32 %v6063_v35, %v5684_v24 }
 0x64b   :  { %v5972_v11 = vld [vmem:[%s15652_s6 + $0x190] sm:$0xff]  ;;  %v5973_v39 = vld [vmem:[%s15652_s6 + $0x198] sm:$0xff] }
 0x64c   :  { %v5936_v21 = vld [vmem:[%s15652_s6 + $0x70] sm:$0xff]  ;;  %v5937_v30 = vld [vmem:[%s15652_s6 + $0x78] sm:$0xff]  ;;  %v6100_v32 = vmul.f32 0.02, %v5972_v11  ;;  %v6101_v47 = vmul.f32 0.02, %v5973_v39 }
 0x64d   :  { %6348 = vst [vmem:[%s15653_s7 + $0x150] sm:$0xff] %v6220_v14  ;;  %6349 = vst [vmem:[%s15653_s7 + $0x158] sm:$0xff] %v6221_v28  ;;  %v6064_v37 = vmul.f32 0.02, %v5936_v21  ;;  %v6065_v25 = vmul.f32 0.02, %v5937_v30  ;;  %v5787_v14 = vpop.permute.xlu0 %5786  ;;  %v5700_v28 = vpop.permute.xlu1 %5699 }
 0x64e   :  { %6316 = vst [vmem:[%s15653_s7 + $0x50] sm:$0xff] %v6188_v17  ;;  %6317 = vst [vmem:[%s15653_s7 + $0x58] sm:$0xff] %v6189_v29  ;;  %v6228_v54 = vadd.f32 %v6100_v32, %v5763_v44  ;;  %v6229_v5 = vadd.f32 %v6101_v47, %v5763_v44 }
 0x64f   :  { %v6192_v55 = vadd.f32 %v6064_v37, %v5688_v52  ;;  %v6193_v45 = vadd.f32 %v6065_v25, %v5688_v52 }
 0x655   :  { %v5976_v40 = vld [vmem:[%s15652_s6 + $0x1b0] sm:$0xff]  ;;  %v5977_v27 = vld [vmem:[%s15652_s6 + $0x1b8] sm:$0xff]  ;;  %v5938_v58 = vld [vmem:[%s15652_s6 + $0x80] sm:$0xff] }
 0x656   :  { %v5939_v51 = vld [vmem:[%s15652_s6 + $0x88] sm:$0xff]  ;;  %v6104_v49 = vmul.f32 0.02, %v5976_v40  ;;  %v6105_v36 = vmul.f32 0.02, %v5977_v27 }
 0x657   :  { %6352 = vst [vmem:[%s15653_s7 + $0x170] sm:$0xff] %v6224_v42  ;;  %6353 = vst [vmem:[%s15653_s7 + $0x178] sm:$0xff] %v6225_v41  ;;  %v6066_v38 = vmul.f32 0.02, %v5938_v58  ;;  %v6067_v53 = vmul.f32 0.02, %v5939_v51  ;;  %v5708_v42 = vpop.permute.xlu1 %5707  ;;  %v5798_v41 = vpop.permute.xlu0 %5797 }
 0x658   :  { %6318 = vst [vmem:[%s15653_s7 + $0x60] sm:$0xff] %v6190_v43  ;;  %6319 = vst [vmem:[%s15653_s7 + $0x68] sm:$0xff] %v6191_v31  ;;  %v6232_v3 = vadd.f32 %v6104_v49, %v5771_v33  ;;  %v6233_v34 = vadd.f32 %v6105_v36, %v5771_v33 }
 0x659   :  { %v6194_v15 = vadd.f32 %v6066_v38, %v5692_v63  ;;  %v6195_v57 = vadd.f32 %v6067_v53, %v5692_v63 }
 0x65f   :  { %v5980_v56 = vld [vmem:[%s15652_s6 + $0x1d0] sm:$0xff]  ;;  %v5981_v0 = vld [vmem:[%s15652_s6 + $0x1d8] sm:$0xff] }
 0x660   :  { %v5940_v59 = vld [vmem:[%s15652_s6 + $0x90] sm:$0xff]  ;;  %v5941_v48 = vld [vmem:[%s15652_s6 + $0x98] sm:$0xff]  ;;  %v6108_v50 = vmul.f32 0.02, %v5980_v56  ;;  %v6109_v62 = vmul.f32 0.02, %v5981_v0 }
 0x661   :  { %6356 = vst [vmem:[%s15653_s7 + $0x190] sm:$0xff] %v6228_v54  ;;  %6357 = vst [vmem:[%s15653_s7 + $0x198] sm:$0xff] %v6229_v5  ;;  %v6068_v9 = vmul.f32 0.02, %v5940_v59  ;;  %v6069_v1 = vmul.f32 0.02, %v5941_v48  ;;  %v5716_v54 = vpop.permute.xlu1 %5715  ;;  %v5806_v5 = vpop.permute.xlu0 %5805 }
 0x662   :  { %6320 = vst [vmem:[%s15653_s7 + $0x70] sm:$0xff] %v6192_v55  ;;  %6321 = vst [vmem:[%s15653_s7 + $0x78] sm:$0xff] %v6193_v45  ;;  %v6236_v6 = vadd.f32 %v6108_v50, %v5779_v10  ;;  %v6237_v18 = vadd.f32 %v6109_v62, %v5779_v10 }
 0x663   :  { %v6196_v13 = vadd.f32 %v6068_v9, %v5696_v19  ;;  %v6197_v20 = vadd.f32 %v6069_v1, %v5696_v19 }
 0x669   :  { %v5984_v12 = vld [vmem:[%s15652_s6 + $0x1f0] sm:$0xff]  ;;  %v5985_v61 = vld [vmem:[%s15652_s6 + $0x1f8] sm:$0xff]  ;;  %v5942_v7 = vld [vmem:[%s15652_s6 + $0xa0] sm:$0xff] }
 0x66a   :  { %v5943_v46 = vld [vmem:[%s15652_s6 + $0xa8] sm:$0xff]  ;;  %v6112_v60 = vmul.f32 0.02, %v5984_v12  ;;  %v6113_v8 = vmul.f32 0.02, %v5985_v61 }
 0x66b   :  { %6360 = vst [vmem:[%s15653_s7 + $0x1b0] sm:$0xff] %v6232_v3  ;;  %6361 = vst [vmem:[%s15653_s7 + $0x1b8] sm:$0xff] %v6233_v34  ;;  %v6070_v2 = vmul.f32 0.02, %v5942_v7  ;;  %v6071_v26 = vmul.f32 0.02, %v5943_v46  ;;  %v5727_v3 = vpop.permute.xlu1 %5726  ;;  %v5814_v34 = vpop.permute.xlu0 %5813 }
 0x66c   :  { %6322 = vst [vmem:[%s15653_s7 + $0x80] sm:$0xff] %v6194_v15  ;;  %6323 = vst [vmem:[%s15653_s7 + $0x88] sm:$0xff] %v6195_v57  ;;  %v6240_v32 = vadd.f32 %v6112_v60, %v5787_v14  ;;  %v6241_v47 = vadd.f32 %v6113_v8, %v5787_v14 }
 0x66d   :  { %v6198_v23 = vadd.f32 %v6070_v2, %v5700_v28  ;;  %v6199_v24 = vadd.f32 %v6071_v26, %v5700_v28 }
 0x673   :  { %v5946_v4 = vld [vmem:[%s15652_s6 + $0xc0] sm:$0xff]  ;;  %v5947_v16 = vld [vmem:[%s15652_s6 + $0xc8] sm:$0xff]  ;;  %v5988_v22 = vld [vmem:[%s15652_s6 + $0x210] sm:$0xff] }
 0x674   :  { %v5989_v35 = vld [vmem:[%s15652_s6 + $0x218] sm:$0xff]  ;;  %v6074_v11 = vmul.f32 0.02, %v5946_v4  ;;  %v6075_v39 = vmul.f32 0.02, %v5947_v16 }
 0x675   :  { %6364 = vst [vmem:[%s15653_s7 + $0x1d0] sm:$0xff] %v6236_v6  ;;  %6365 = vst [vmem:[%s15653_s7 + $0x1d8] sm:$0xff] %v6237_v18  ;;  %v6116_v17 = vmul.f32 0.02, %v5988_v22  ;;  %v6117_v29 = vmul.f32 0.02, %v5989_v35  ;;  %v5735_v6 = vpop.permute.xlu1 %5734  ;;  %v5822_v18 = vpop.permute.xlu0 %5821 }
 0x676   :  { %6324 = vst [vmem:[%s15653_s7 + $0x90] sm:$0xff] %v6196_v13  ;;  %6325 = vst [vmem:[%s15653_s7 + $0x98] sm:$0xff] %v6197_v20  ;;  %v6202_v49 = vadd.f32 %v6074_v11, %v5708_v42  ;;  %v6203_v36 = vadd.f32 %v6075_v39, %v5708_v42 }
 0x677   :  { %v6244_v44 = vadd.f32 %v6116_v17, %v5798_v41  ;;  %v6245_v52 = vadd.f32 %v6117_v29, %v5798_v41 }
 0x67d   :  { %v5950_v21 = vld [vmem:[%s15652_s6 + $0xe0] sm:$0xff]  ;;  %v5951_v30 = vld [vmem:[%s15652_s6 + $0xe8] sm:$0xff]  ;;  %v5992_v37 = vld [vmem:[%s15652_s6 + $0x230] sm:$0xff] }
 0x67e   :  { %v5993_v25 = vld [vmem:[%s15652_s6 + $0x238] sm:$0xff]  ;;  %v6078_v40 = vmul.f32 0.02, %v5950_v21  ;;  %v6079_v27 = vmul.f32 0.02, %v5951_v30 }
 0x67f   :  { %6368 = vst [vmem:[%s15653_s7 + $0x1f0] sm:$0xff] %v6240_v32  ;;  %6369 = vst [vmem:[%s15653_s7 + $0x1f8] sm:$0xff] %v6241_v47  ;;  %v6120_v43 = vmul.f32 0.02, %v5992_v37  ;;  %v6121_v31 = vmul.f32 0.02, %v5993_v25  ;;  %v5743_v32 = vpop.permute.xlu1 %5742  ;;  %v5830_v47 = vpop.permute.xlu0 %5829 }
 0x680   :  { %6326 = vst [vmem:[%s15653_s7 + $0xa0] sm:$0xff] %v6198_v23  ;;  %6327 = vst [vmem:[%s15653_s7 + $0xa8] sm:$0xff] %v6199_v24  ;;  %v6206_v50 = vadd.f32 %v6078_v40, %v5716_v54  ;;  %v6207_v62 = vadd.f32 %v6079_v27, %v5716_v54 }
 0x681   :  { %v6248_v33 = vadd.f32 %v6120_v43, %v5806_v5  ;;  %v6249_v63 = vadd.f32 %v6121_v31, %v5806_v5 }
 0x687   :  { %v5954_v58 = vld [vmem:[%s15652_s6 + $0x100] sm:$0xff]  ;;  %v5955_v51 = vld [vmem:[%s15652_s6 + $0x108] sm:$0xff]  ;;  %v5996_v38 = vld [vmem:[%s15652_s6 + $0x250] sm:$0xff] }
 0x688   :  { %v5997_v53 = vld [vmem:[%s15652_s6 + $0x258] sm:$0xff]  ;;  %v6082_v56 = vmul.f32 0.02, %v5954_v58  ;;  %v6083_v0 = vmul.f32 0.02, %v5955_v51 }
 0x689   :  { %6330 = vst [vmem:[%s15653_s7 + $0xc0] sm:$0xff] %v6202_v49  ;;  %6331 = vst [vmem:[%s15653_s7 + $0xc8] sm:$0xff] %v6203_v36  ;;  %v6124_v55 = vmul.f32 0.02, %v5996_v38  ;;  %v6125_v45 = vmul.f32 0.02, %v5997_v53  ;;  %v5751_v49 = vpop.permute.xlu1 %5750  ;;  %v5838_v36 = vpop.permute.xlu0 %5837 }
 0x68a   :  { %6372 = vst [vmem:[%s15653_s7 + $0x210] sm:$0xff] %v6244_v44  ;;  %6373 = vst [vmem:[%s15653_s7 + $0x218] sm:$0xff] %v6245_v52  ;;  %v6210_v60 = vadd.f32 %v6082_v56, %v5727_v3  ;;  %v6211_v8 = vadd.f32 %v6083_v0, %v5727_v3 }
 0x68b   :  { %v6252_v10 = vadd.f32 %v6124_v55, %v5814_v34  ;;  %v6253_v19 = vadd.f32 %v6125_v45, %v5814_v34 }
 0x691   :  { %v5958_v59 = vld [vmem:[%s15652_s6 + $0x120] sm:$0xff]  ;;  %v5959_v48 = vld [vmem:[%s15652_s6 + $0x128] sm:$0xff]  ;;  %v6000_v9 = vld [vmem:[%s15652_s6 + $0x270] sm:$0xff] }
 0x692   :  { %v6001_v1 = vld [vmem:[%s15652_s6 + $0x278] sm:$0xff]  ;;  %v6086_v12 = vmul.f32 0.02, %v5958_v59  ;;  %v6087_v61 = vmul.f32 0.02, %v5959_v48 }
 0x693   :  { %6334 = vst [vmem:[%s15653_s7 + $0xe0] sm:$0xff] %v6206_v50  ;;  %6335 = vst [vmem:[%s15653_s7 + $0xe8] sm:$0xff] %v6207_v62  ;;  %v6128_v15 = vmul.f32 0.02, %v6000_v9  ;;  %v6129_v57 = vmul.f32 0.02, %v6001_v1  ;;  %v5759_v50 = vpop.permute.xlu1 %5758  ;;  %v5846_v62 = vpop.permute.xlu0 %5845 }
 0x694   :  { %6376 = vst [vmem:[%s15653_s7 + $0x230] sm:$0xff] %v6248_v33  ;;  %6377 = vst [vmem:[%s15653_s7 + $0x238] sm:$0xff] %v6249_v63  ;;  %v6214_v11 = vadd.f32 %v6086_v12, %v5735_v6  ;;  %v6215_v39 = vadd.f32 %v6087_v61, %v5735_v6 }
 0x695   :  { %v6256_v14 = vadd.f32 %v6128_v15, %v5822_v18  ;;  %v6257_v28 = vadd.f32 %v6129_v57, %v5822_v18 }
 0x69b   :  { %v5962_v7 = vld [vmem:[%s15652_s6 + $0x140] sm:$0xff]  ;;  %v5963_v46 = vld [vmem:[%s15652_s6 + $0x148] sm:$0xff]  ;;  %v6004_v2 = vld [vmem:[%s15652_s6 + $0x290] sm:$0xff] }
 0x69c   :  { %v6005_v26 = vld [vmem:[%s15652_s6 + $0x298] sm:$0xff]  ;;  %v6090_v4 = vmul.f32 0.02, %v5962_v7  ;;  %v6091_v16 = vmul.f32 0.02, %v5963_v46 }
 0x69d   :  { %6338 = vst [vmem:[%s15653_s7 + $0x100] sm:$0xff] %v6210_v60  ;;  %6339 = vst [vmem:[%s15653_s7 + $0x108] sm:$0xff] %v6211_v8  ;;  %v6132_v13 = vmul.f32 0.02, %v6004_v2  ;;  %v6133_v20 = vmul.f32 0.02, %v6005_v26  ;;  %v5767_v60 = vpop.permute.xlu1 %5766  ;;  %v5854_v8 = vpop.permute.xlu0 %5853 }
 0x69e   :  { %6380 = vst [vmem:[%s15653_s7 + $0x250] sm:$0xff] %v6252_v10  ;;  %6381 = vst [vmem:[%s15653_s7 + $0x258] sm:$0xff] %v6253_v19  ;;  %v6218_v40 = vadd.f32 %v6090_v4, %v5743_v32  ;;  %v6219_v27 = vadd.f32 %v6091_v16, %v5743_v32 }
 0x69f   :  { %v6260_v42 = vadd.f32 %v6132_v13, %v5830_v47  ;;  %v6261_v41 = vadd.f32 %v6133_v20, %v5830_v47 }
 0x6a5   :  { %v5966_v22 = vld [vmem:[%s15652_s6 + $0x160] sm:$0xff]  ;;  %v5967_v35 = vld [vmem:[%s15652_s6 + $0x168] sm:$0xff]  ;;  %v6008_v17 = vld [vmem:[%s15652_s6 + $0x2b0] sm:$0xff] }
 0x6a6   :  { %v6009_v29 = vld [vmem:[%s15652_s6 + $0x2b8] sm:$0xff]  ;;  %v6094_v21 = vmul.f32 0.02, %v5966_v22  ;;  %v6095_v30 = vmul.f32 0.02, %v5967_v35 }
 0x6a7   :  { %6342 = vst [vmem:[%s15653_s7 + $0x120] sm:$0xff] %v6214_v11  ;;  %6343 = vst [vmem:[%s15653_s7 + $0x128] sm:$0xff] %v6215_v39  ;;  %v6136_v23 = vmul.f32 0.02, %v6008_v17  ;;  %v6137_v24 = vmul.f32 0.02, %v6009_v29  ;;  %v5775_v11 = vpop.permute.xlu1 %5774  ;;  %v5865_v39 = vpop.permute.xlu0 %5864 }
 0x6a8   :  { %6384 = vst [vmem:[%s15653_s7 + $0x270] sm:$0xff] %v6256_v14  ;;  %6385 = vst [vmem:[%s15653_s7 + $0x278] sm:$0xff] %v6257_v28  ;;  %v6222_v56 = vadd.f32 %v6094_v21, %v5751_v49  ;;  %v6223_v0 = vadd.f32 %v6095_v30, %v5751_v49 }
 0x6a9   :  { %v6264_v54 = vadd.f32 %v6136_v23, %v5838_v36  ;;  %v6265_v5 = vadd.f32 %v6137_v24, %v5838_v36 }
 0x6af   :  { %v5970_v37 = vld [vmem:[%s15652_s6 + $0x180] sm:$0xff]  ;;  %v5971_v25 = vld [vmem:[%s15652_s6 + $0x188] sm:$0xff]  ;;  %v6012_v43 = vld [vmem:[%s15652_s6 + $0x2d0] sm:$0xff] }
 0x6b0   :  { %v6013_v31 = vld [vmem:[%s15652_s6 + $0x2d8] sm:$0xff]  ;;  %v6098_v58 = vmul.f32 0.02, %v5970_v37  ;;  %v6099_v51 = vmul.f32 0.02, %v5971_v25 }
 0x6b1   :  { %6346 = vst [vmem:[%s15653_s7 + $0x140] sm:$0xff] %v6218_v40  ;;  %6347 = vst [vmem:[%s15653_s7 + $0x148] sm:$0xff] %v6219_v27  ;;  %v6140_v44 = vmul.f32 0.02, %v6012_v43  ;;  %v6141_v52 = vmul.f32 0.02, %v6013_v31  ;;  %v5783_v40 = vpop.permute.xlu1 %5782  ;;  %v5873_v27 = vpop.permute.xlu0 %5872 }
 0x6b2   :  { %6388 = vst [vmem:[%s15653_s7 + $0x290] sm:$0xff] %v6260_v42  ;;  %6389 = vst [vmem:[%s15653_s7 + $0x298] sm:$0xff] %v6261_v41  ;;  %v6226_v12 = vadd.f32 %v6098_v58, %v5759_v50  ;;  %v6227_v61 = vadd.f32 %v6099_v51, %v5759_v50 }
 0x6b3   :  { %v6268_v3 = vadd.f32 %v6140_v44, %v5846_v62  ;;  %v6269_v34 = vadd.f32 %v6141_v52, %v5846_v62 }
 0x6b9   :  { %v5974_v38 = vld [vmem:[%s15652_s6 + $0x1a0] sm:$0xff]  ;;  %v5975_v53 = vld [vmem:[%s15652_s6 + $0x1a8] sm:$0xff]  ;;  %v6016_v55 = vld [vmem:[%s15652_s6 + $0x2f0] sm:$0xff] }
 0x6ba   :  { %v6017_v45 = vld [vmem:[%s15652_s6 + $0x2f8] sm:$0xff]  ;;  %v6102_v59 = vmul.f32 0.02, %v5974_v38  ;;  %v6103_v48 = vmul.f32 0.02, %v5975_v53 }
 0x6bb   :  { %6350 = vst [vmem:[%s15653_s7 + $0x160] sm:$0xff] %v6222_v56  ;;  %6351 = vst [vmem:[%s15653_s7 + $0x168] sm:$0xff] %v6223_v0  ;;  %v6144_v33 = vmul.f32 0.02, %v6016_v55  ;;  %v6145_v63 = vmul.f32 0.02, %v6017_v45  ;;  %v5881_v56 = vpop.permute.xlu0 %5880  ;;  %v5794_v0 = vpop.permute.xlu1 %5793 }
 0x6bc   :  { %6392 = vst [vmem:[%s15653_s7 + $0x2b0] sm:$0xff] %v6264_v54  ;;  %6393 = vst [vmem:[%s15653_s7 + $0x2b8] sm:$0xff] %v6265_v5  ;;  %v6230_v4 = vadd.f32 %v6102_v59, %v5767_v60  ;;  %v6231_v16 = vadd.f32 %v6103_v48, %v5767_v60 }
 0x6bd   :  { %v6272_v6 = vadd.f32 %v6144_v33, %v5854_v8  ;;  %v6273_v18 = vadd.f32 %v6145_v63, %v5854_v8 }
 0x6c3   :  { %v5978_v9 = vld [vmem:[%s15652_s6 + $0x1c0] sm:$0xff]  ;;  %v5979_v1 = vld [vmem:[%s15652_s6 + $0x1c8] sm:$0xff]  ;;  %v6020_v15 = vld [vmem:[%s15652_s6 + $0x310] sm:$0xff] }
 0x6c4   :  { %v6021_v57 = vld [vmem:[%s15652_s6 + $0x318] sm:$0xff]  ;;  %v6106_v7 = vmul.f32 0.02, %v5978_v9  ;;  %v6107_v46 = vmul.f32 0.02, %v5979_v1 }
 0x6c5   :  { %6354 = vst [vmem:[%s15653_s7 + $0x180] sm:$0xff] %v6226_v12  ;;  %6355 = vst [vmem:[%s15653_s7 + $0x188] sm:$0xff] %v6227_v61  ;;  %v6148_v10 = vmul.f32 0.02, %v6020_v15  ;;  %v6149_v19 = vmul.f32 0.02, %v6021_v57  ;;  %v5889_v12 = vpop.permute.xlu0 %5888  ;;  %v5802_v61 = vpop.permute.xlu1 %5801 }
 0x6c6   :  { %6396 = vst [vmem:[%s15653_s7 + $0x2d0] sm:$0xff] %v6268_v3  ;;  %6397 = vst [vmem:[%s15653_s7 + $0x2d8] sm:$0xff] %v6269_v34  ;;  %v6234_v21 = vadd.f32 %v6106_v7, %v5775_v11  ;;  %v6235_v30 = vadd.f32 %v6107_v46, %v5775_v11 }
 0x6c7   :  { %v6276_v32 = vadd.f32 %v6148_v10, %v5865_v39  ;;  %v6277_v47 = vadd.f32 %v6149_v19, %v5865_v39 }
 0x6cd   :  { %v5982_v2 = vld [vmem:[%s15652_s6 + $0x1e0] sm:$0xff]  ;;  %v5983_v26 = vld [vmem:[%s15652_s6 + $0x1e8] sm:$0xff]  ;;  %v6024_v13 = vld [vmem:[%s15652_s6 + $0x330] sm:$0xff] }
 0x6ce   :  { %v6025_v20 = vld [vmem:[%s15652_s6 + $0x338] sm:$0xff]  ;;  %v6110_v22 = vmul.f32 0.02, %v5982_v2  ;;  %v6111_v35 = vmul.f32 0.02, %v5983_v26 }
 0x6cf   :  { %6358 = vst [vmem:[%s15653_s7 + $0x1a0] sm:$0xff] %v6230_v4  ;;  %6359 = vst [vmem:[%s15653_s7 + $0x1a8] sm:$0xff] %v6231_v16  ;;  %v6152_v14 = vmul.f32 0.02, %v6024_v13  ;;  %v6153_v28 = vmul.f32 0.02, %v6025_v20  ;;  %v5897_v4 = vpop.permute.xlu0 %5896  ;;  %v5810_v16 = vpop.permute.xlu1 %5809 }
 0x6d0   :  { %6400 = vst [vmem:[%s15653_s7 + $0x2f0] sm:$0xff] %v6272_v6  ;;  %6401 = vst [vmem:[%s15653_s7 + $0x2f8] sm:$0xff] %v6273_v18  ;;  %v6238_v58 = vadd.f32 %v6110_v22, %v5783_v40  ;;  %v6239_v51 = vadd.f32 %v6111_v35, %v5783_v40 }
 0x6d1   :  { %v6280_v49 = vadd.f32 %v6152_v14, %v5873_v27  ;;  %v6281_v36 = vadd.f32 %v6153_v28, %v5873_v27 }
 0x6d7   :  { %v6028_v17 = vld [vmem:[%s15652_s6 + $0x350] sm:$0xff]  ;;  %v6029_v29 = vld [vmem:[%s15652_s6 + $0x358] sm:$0xff]  ;;  %v5986_v23 = vld [vmem:[%s15652_s6 + $0x200] sm:$0xff] }
 0x6d8   :  { %v5987_v24 = vld [vmem:[%s15652_s6 + $0x208] sm:$0xff]  ;;  %v6156_v37 = vmul.f32 0.02, %v6028_v17  ;;  %v6157_v25 = vmul.f32 0.02, %v6029_v29 }
 0x6d9   :  { %6362 = vst [vmem:[%s15653_s7 + $0x1c0] sm:$0xff] %v6234_v21  ;;  %6363 = vst [vmem:[%s15653_s7 + $0x1c8] sm:$0xff] %v6235_v30  ;;  %v6114_v42 = vmul.f32 0.02, %v5986_v23  ;;  %v6115_v41 = vmul.f32 0.02, %v5987_v24  ;;  %v5905_v21 = vpop.permute.xlu0 %5904  ;;  %v5818_v30 = vpop.permute.xlu1 %5817 }
 0x6da   :  { %6404 = vst [vmem:[%s15653_s7 + $0x310] sm:$0xff] %v6276_v32  ;;  %6405 = vst [vmem:[%s15653_s7 + $0x318] sm:$0xff] %v6277_v47  ;;  %v6284_v59 = vadd.f32 %v6156_v37, %v5881_v56  ;;  %v6285_v48 = vadd.f32 %v6157_v25, %v5881_v56 }
 0x6db   :  { %v6242_v50 = vadd.f32 %v6114_v42, %v5794_v0  ;;  %v6243_v62 = vadd.f32 %v6115_v41, %v5794_v0 }
 0x6e1   :  { %v6032_v43 = vld [vmem:[%s15652_s6 + $0x370] sm:$0xff]  ;;  %v6033_v31 = vld [vmem:[%s15652_s6 + $0x378] sm:$0xff]  ;;  %v5990_v44 = vld [vmem:[%s15652_s6 + $0x220] sm:$0xff] }
 0x6e2   :  { %v5991_v52 = vld [vmem:[%s15652_s6 + $0x228] sm:$0xff]  ;;  %v6160_v38 = vmul.f32 0.02, %v6032_v43  ;;  %v6161_v53 = vmul.f32 0.02, %v6033_v31  ;;  %v5913_v31 = vpop.permute.xlu0 %5912 }
 0x6e3   :  { %6366 = vst [vmem:[%s15653_s7 + $0x1e0] sm:$0xff] %v6238_v58  ;;  %6367 = vst [vmem:[%s15653_s7 + $0x1e8] sm:$0xff] %v6239_v51  ;;  %v6118_v54 = vmul.f32 0.02, %v5990_v44  ;;  %v6119_v5 = vmul.f32 0.02, %v5991_v52  ;;  %v5826_v58 = vpop.permute.xlu1 %5825 }
 0x6e4   :  { %6408 = vst [vmem:[%s15653_s7 + $0x330] sm:$0xff] %v6280_v49  ;;  %6409 = vst [vmem:[%s15653_s7 + $0x338] sm:$0xff] %v6281_v36  ;;  %v6288_v7 = vadd.f32 %v6160_v38, %v5889_v12  ;;  %v6289_v46 = vadd.f32 %v6161_v53, %v5889_v12 }
 0x6e5   :  { %v6246_v60 = vadd.f32 %v6118_v54, %v5802_v61  ;;  %v6247_v8 = vadd.f32 %v6119_v5, %v5802_v61 }
 0x6e6   :  { %v5921_v54 = vpop.permute.xlu0 %5920 }
 0x6e7   :  { %v5834_v5 = vpop.permute.xlu1 %5833 }
 0x6eb   :  { %v6036_v55 = vld [vmem:[%s15652_s6 + $0x390] sm:$0xff]  ;;  %v6037_v45 = vld [vmem:[%s15652_s6 + $0x398] sm:$0xff]  ;;  %v5994_v33 = vld [vmem:[%s15652_s6 + $0x240] sm:$0xff] }
 0x6ec   :  { %v5995_v63 = vld [vmem:[%s15652_s6 + $0x248] sm:$0xff]  ;;  %v6164_v9 = vmul.f32 0.02, %v6036_v55  ;;  %v6165_v1 = vmul.f32 0.02, %v6037_v45 }
 0x6ed   :  { %6412 = vst [vmem:[%s15653_s7 + $0x350] sm:$0xff] %v6284_v59  ;;  %6413 = vst [vmem:[%s15653_s7 + $0x358] sm:$0xff] %v6285_v48  ;;  %v6122_v3 = vmul.f32 0.02, %v5994_v33  ;;  %v6123_v34 = vmul.f32 0.02, %v5995_v63 }
 0x6ee   :  { %6370 = vst [vmem:[%s15653_s7 + $0x200] sm:$0xff] %v6242_v50  ;;  %6371 = vst [vmem:[%s15653_s7 + $0x208] sm:$0xff] %v6243_v62  ;;  %v6292_v22 = vadd.f32 %v6164_v9, %v5897_v4  ;;  %v6293_v35 = vadd.f32 %v6165_v1, %v5897_v4  ;;  %v5842_v9 = vpop.permute.xlu1 %5841 }
 0x6ef   :  { %v6250_v11 = vadd.f32 %v6122_v3, %v5810_v16  ;;  %v6251_v39 = vadd.f32 %v6123_v34, %v5810_v16 }
 0x6f5   :  { %v6040_v15 = vld [vmem:[%s15652_s6 + $0x3b0] sm:$0xff]  ;;  %v6041_v57 = vld [vmem:[%s15652_s6 + $0x3b8] sm:$0xff]  ;;  %v5998_v10 = vld [vmem:[%s15652_s6 + $0x260] sm:$0xff] }
 0x6f6   :  { %v5999_v19 = vld [vmem:[%s15652_s6 + $0x268] sm:$0xff]  ;;  %v6168_v2 = vmul.f32 0.02, %v6040_v15  ;;  %v6169_v26 = vmul.f32 0.02, %v6041_v57  ;;  %v5850_v57 = vpop.permute.xlu1 %5849 }
 0x6f7   :  { %6416 = vst [vmem:[%s15653_s7 + $0x370] sm:$0xff] %v6288_v7  ;;  %6417 = vst [vmem:[%s15653_s7 + $0x378] sm:$0xff] %v6289_v46  ;;  %v6126_v6 = vmul.f32 0.02, %v5998_v10  ;;  %v6127_v18 = vmul.f32 0.02, %v5999_v19 }
 0x6f8   :  { %6374 = vst [vmem:[%s15653_s7 + $0x220] sm:$0xff] %v6246_v60  ;;  %6375 = vst [vmem:[%s15653_s7 + $0x228] sm:$0xff] %v6247_v8  ;;  %v6296_v24 = vadd.f32 %v6168_v2, %v5905_v21  ;;  %v6297_v37 = vadd.f32 %v6169_v26, %v5905_v21 }
 0x6f9   :  { %v6254_v25 = vadd.f32 %v6126_v6, %v5818_v30  ;;  %v6255_v40 = vadd.f32 %v6127_v18, %v5818_v30 }
 0x6fa   :  { %v5861_v2 = vpop.permute.xlu1 %5860 }
 0x6ff   :  { %v6044_v13 = vld [vmem:[%s15652_s6 + $0x3d0] sm:$0xff]  ;;  %v6045_v20 = vld [vmem:[%s15652_s6 + $0x3d8] sm:$0xff]  ;;  %v6002_v14 = vld [vmem:[%s15652_s6 + $0x280] sm:$0xff] }
 0x700   :  { %v6003_v28 = vld [vmem:[%s15652_s6 + $0x288] sm:$0xff]  ;;  %v6172_v17 = vmul.f32 0.02, %v6044_v13  ;;  %v6173_v29 = vmul.f32 0.02, %v6045_v20  ;;  %v5869_v20 = vpop.permute.xlu1 %5868 }
 0x701   :  { %6420 = vst [vmem:[%s15653_s7 + $0x390] sm:$0xff] %v6292_v22  ;;  %6421 = vst [vmem:[%s15653_s7 + $0x398] sm:$0xff] %v6293_v35  ;;  %v6130_v32 = vmul.f32 0.02, %v6002_v14  ;;  %v6131_v47 = vmul.f32 0.02, %v6003_v28 }
 0x702   :  { %6378 = vst [vmem:[%s15653_s7 + $0x240] sm:$0xff] %v6250_v11  ;;  %6379 = vst [vmem:[%s15653_s7 + $0x248] sm:$0xff] %v6251_v39  ;;  %v6300_v44 = vadd.f32 %v6172_v17, %v5913_v31  ;;  %v6301_v52 = vadd.f32 %v6173_v29, %v5913_v31 }
 0x703   :  { %v6258_v38 = vadd.f32 %v6130_v32, %v5826_v58  ;;  %v6259_v53 = vadd.f32 %v6131_v47, %v5826_v58 }
 0x704   :  { %v5877_v17 = vpop.permute.xlu1 %5876 }
 0x709   :  { %v6048_v23 = vld [vmem:[%s15652_s6 + $0x3f0] sm:$0xff]  ;;  %v6049_v27 = vld [vmem:[%s15652_s6 + $0x3f8] sm:$0xff]  ;;  %v6006_v42 = vld [vmem:[%s15652_s6 + $0x2a0] sm:$0xff] }
 0x70a   :  { %v6007_v41 = vld [vmem:[%s15652_s6 + $0x2a8] sm:$0xff]  ;;  %v6176_v43 = vmul.f32 0.02, %v6048_v23  ;;  %v6177_v51 = vmul.f32 0.02, %v6049_v27 }
 0x70b   :  { %6424 = vst [vmem:[%s15653_s7 + $0x3b0] sm:$0xff] %v6296_v24  ;;  %6425 = vst [vmem:[%s15653_s7 + $0x3b8] sm:$0xff] %v6297_v37  ;;  %v6134_v49 = vmul.f32 0.02, %v6006_v42  ;;  %v6135_v36 = vmul.f32 0.02, %v6007_v41  ;;  %v5885_v24 = vpop.permute.xlu1 %5884 }
 0x70c   :  { %6382 = vst [vmem:[%s15653_s7 + $0x260] sm:$0xff] %v6254_v25  ;;  %6383 = vst [vmem:[%s15653_s7 + $0x268] sm:$0xff] %v6255_v40  ;;  %v6304_v59 = vadd.f32 %v6176_v43, %v5921_v54  ;;  %v6305_v48 = vadd.f32 %v6177_v51, %v5921_v54 }
 0x70d   :  { %v6262_v50 = vadd.f32 %v6134_v49, %v5834_v5  ;;  %v6263_v62 = vadd.f32 %v6135_v36, %v5834_v5 }
 0x70f   :  { %v5893_v43 = vpop.permute.xlu1 %5892 }
 0x713   :  { %v6010_v56 = vld [vmem:[%s15652_s6 + $0x2c0] sm:$0xff]  ;;  %v6011_v0 = vld [vmem:[%s15652_s6 + $0x2c8] sm:$0xff] }
 0x714   :  { %6428 = vst [vmem:[%s15653_s7 + $0x3d0] sm:$0xff] %v6300_v44  ;;  %6429 = vst [vmem:[%s15653_s7 + $0x3d8] sm:$0xff] %v6301_v52  ;;  %v6138_v55 = vmul.f32 0.02, %v6010_v56  ;;  %v6139_v45 = vmul.f32 0.02, %v6011_v0  ;;  %v5901_v52 = vpop.permute.xlu1 %5900 }
 0x715   :  { %6386 = vst [vmem:[%s15653_s7 + $0x280] sm:$0xff] %v6258_v38  ;;  %6387 = vst [vmem:[%s15653_s7 + $0x288] sm:$0xff] %v6259_v53 }
 0x716   :  { %v6266_v1 = vadd.f32 %v6138_v55, %v5842_v9  ;;  %v6267_v12 = vadd.f32 %v6139_v45, %v5842_v9 }
 0x718   :  { %v5909_v55 = vpop.permute.xlu1 %5908 }
 0x71c   :  { %v6014_v33 = vld [vmem:[%s15652_s6 + $0x2e0] sm:$0xff]  ;;  %v6015_v63 = vld [vmem:[%s15652_s6 + $0x2e8] sm:$0xff] }
 0x71d   :  { %6432 = vst [vmem:[%s15653_s7 + $0x3f0] sm:$0xff] %v6304_v59  ;;  %6433 = vst [vmem:[%s15653_s7 + $0x3f8] sm:$0xff] %v6305_v48  ;;  %v6142_v61 = vmul.f32 0.02, %v6014_v33  ;;  %v6143_v3 = vmul.f32 0.02, %v6015_v63 }
 0x71e   :  { %6390 = vst [vmem:[%s15653_s7 + $0x2a0] sm:$0xff] %v6262_v50  ;;  %6391 = vst [vmem:[%s15653_s7 + $0x2a8] sm:$0xff] %v6263_v62  ;;  %v5917_v62 = vpop.permute.xlu1 %5916 }
 0x71f   :  { %v6270_v7 = vadd.f32 %v6142_v61, %v5850_v57  ;;  %v6271_v46 = vadd.f32 %v6143_v3, %v5850_v57 }
 0x725   :  { %v6018_v34 = vld [vmem:[%s15652_s6 + $0x300] sm:$0xff]  ;;  %v6019_v15 = vld [vmem:[%s15652_s6 + $0x308] sm:$0xff] }
 0x726   :  { %6394 = vst [vmem:[%s15653_s7 + $0x2c0] sm:$0xff] %v6266_v1  ;;  %6395 = vst [vmem:[%s15653_s7 + $0x2c8] sm:$0xff] %v6267_v12  ;;  %v6146_v60 = vmul.f32 0.02, %v6018_v34  ;;  %v6147_v8 = vmul.f32 0.02, %v6019_v15 }
 0x728   :  { %v6274_v26 = vadd.f32 %v6146_v60, %v5861_v2  ;;  %v6275_v4 = vadd.f32 %v6147_v8, %v5861_v2 }
 0x72d   :  { %v6022_v10 = vld [vmem:[%s15652_s6 + $0x320] sm:$0xff]  ;;  %v6023_v19 = vld [vmem:[%s15652_s6 + $0x328] sm:$0xff] }
 0x72e   :  { %6398 = vst [vmem:[%s15653_s7 + $0x2e0] sm:$0xff] %v6270_v7  ;;  %6399 = vst [vmem:[%s15653_s7 + $0x2e8] sm:$0xff] %v6271_v46  ;;  %v6150_v16 = vmul.f32 0.02, %v6022_v10  ;;  %v6151_v6 = vmul.f32 0.02, %v6023_v19 }
 0x730   :  { %v6278_v22 = vadd.f32 %v6150_v16, %v5869_v20  ;;  %v6279_v35 = vadd.f32 %v6151_v6, %v5869_v20 }
 0x735   :  { %v6026_v18 = vld [vmem:[%s15652_s6 + $0x340] sm:$0xff]  ;;  %v6027_v13 = vld [vmem:[%s15652_s6 + $0x348] sm:$0xff] }
 0x736   :  { %6402 = vst [vmem:[%s15653_s7 + $0x300] sm:$0xff] %v6274_v26  ;;  %6403 = vst [vmem:[%s15653_s7 + $0x308] sm:$0xff] %v6275_v4  ;;  %v6154_v11 = vmul.f32 0.02, %v6026_v18  ;;  %v6155_v39 = vmul.f32 0.02, %v6027_v13 }
 0x738   :  { %v6282_v29 = vadd.f32 %v6154_v11, %v5877_v17  ;;  %v6283_v21 = vadd.f32 %v6155_v39, %v5877_v17 }
 0x73d   :  { %v6030_v14 = vld [vmem:[%s15652_s6 + $0x360] sm:$0xff]  ;;  %v6031_v28 = vld [vmem:[%s15652_s6 + $0x368] sm:$0xff] }
 0x73e   :  { %6406 = vst [vmem:[%s15653_s7 + $0x320] sm:$0xff] %v6278_v22  ;;  %6407 = vst [vmem:[%s15653_s7 + $0x328] sm:$0xff] %v6279_v35  ;;  %v6158_v30 = vmul.f32 0.02, %v6030_v14  ;;  %v6159_v32 = vmul.f32 0.02, %v6031_v28 }
 0x740   :  { %v6286_v37 = vadd.f32 %v6158_v30, %v5885_v24  ;;  %v6287_v25 = vadd.f32 %v6159_v32, %v5885_v24 }
 0x745   :  { %v6034_v47 = vld [vmem:[%s15652_s6 + $0x380] sm:$0xff]  ;;  %v6035_v23 = vld [vmem:[%s15652_s6 + $0x388] sm:$0xff] }
 0x746   :  { %6410 = vst [vmem:[%s15653_s7 + $0x340] sm:$0xff] %v6282_v29  ;;  %6411 = vst [vmem:[%s15653_s7 + $0x348] sm:$0xff] %v6283_v21  ;;  %v6162_v40 = vmul.f32 0.02, %v6034_v47  ;;  %v6163_v27 = vmul.f32 0.02, %v6035_v23 }
 0x748   :  { %v6290_v31 = vadd.f32 %v6162_v40, %v5893_v43  ;;  %v6291_v58 = vadd.f32 %v6163_v27, %v5893_v43 }
 0x74d   :  { %v6038_v42 = vld [vmem:[%s15652_s6 + $0x3a0] sm:$0xff]  ;;  %v6039_v41 = vld [vmem:[%s15652_s6 + $0x3a8] sm:$0xff] }
 0x74e   :  { %6414 = vst [vmem:[%s15653_s7 + $0x360] sm:$0xff] %v6286_v37  ;;  %6415 = vst [vmem:[%s15653_s7 + $0x368] sm:$0xff] %v6287_v25  ;;  %v6166_v51 = vmul.f32 0.02, %v6038_v42  ;;  %v6167_v49 = vmul.f32 0.02, %v6039_v41 }
 0x750   :  { %v6294_v38 = vadd.f32 %v6166_v51, %v5901_v52  ;;  %v6295_v53 = vadd.f32 %v6167_v49, %v5901_v52 }
 0x755   :  { %v6042_v36 = vld [vmem:[%s15652_s6 + $0x3c0] sm:$0xff]  ;;  %v6043_v44 = vld [vmem:[%s15652_s6 + $0x3c8] sm:$0xff] }
 0x756   :  { %6418 = vst [vmem:[%s15653_s7 + $0x380] sm:$0xff] %v6290_v31  ;;  %6419 = vst [vmem:[%s15653_s7 + $0x388] sm:$0xff] %v6291_v58  ;;  %v6170_v56 = vmul.f32 0.02, %v6042_v36  ;;  %v6171_v0 = vmul.f32 0.02, %v6043_v44 }
 0x758   :  { %v6298_v45 = vadd.f32 %v6170_v56, %v5909_v55  ;;  %v6299_v59 = vadd.f32 %v6171_v0, %v5909_v55 }
 0x75d   :  { %v6046_v54 = vld [vmem:[%s15652_s6 + $0x3e0] sm:$0xff]  ;;  %v6047_v5 = vld [vmem:[%s15652_s6 + $0x3e8] sm:$0xff] }
 0x75e   :  { %6422 = vst [vmem:[%s15653_s7 + $0x3a0] sm:$0xff] %v6294_v38  ;;  %6423 = vst [vmem:[%s15653_s7 + $0x3a8] sm:$0xff] %v6295_v53  ;;  %v6174_v48 = vmul.f32 0.02, %v6046_v54  ;;  %v6175_v50 = vmul.f32 0.02, %v6047_v5 }
 0x75f   :  { %6426 = vst [vmem:[%s15653_s7 + $0x3c0] sm:$0xff] %v6298_v45  ;;  %6427 = vst [vmem:[%s15653_s7 + $0x3c8] sm:$0xff] %v6299_v59 }
 0x760   :  { %v6302_v33 = vadd.f32 %v6174_v48, %v5917_v62  ;;  %v6303_v63 = vadd.f32 %v6175_v50, %v5917_v62 }
 0x762   :  { %6430 = vst [vmem:[%s15653_s7 + $0x3e0] sm:$0xff] %v6302_v33  ;;  %6431 = vst [vmem:[%s15653_s7 + $0x3e8] sm:$0xff] %v6303_v63 }

</bundles_post_ra>
